<compile_context>
chip_gen: v7x
topology: tpu7x:2x2x1
jax: 0.10.0
libtpu: 0.0.40
codegen_flags: <defaults>
</compile_context>

<pallas_src>
import jax
import jax.numpy as jnp
from jax.experimental import pallas as pl
from jax.experimental.pallas import tpu as pltpu

# --- model hyper-parameters (mirror SigmaNet.__init__) --------------------
DIM_IN = 32
DIM_OUT = 8
DIM_HIDDEN = 64
NUM_LAYERS = 8
SKIPS = (4,)                    # SigmaNet.skips = [4]

# --- kernel tiling / packing ------------------------------------------------
GROUPS = 4                      # lane-packing factor; 4 fills the 256-wide
                                # v6e/v7x MXU. Use 2 on v5e (128-wide MXU).
K_PAD = DIM_HIDDEN              # per-group K for every packed weight (= 64)
LANES = GROUPS * DIM_HIDDEN     # packed lane width (= 256)
TM = 512                        # packed-row tile -> GROUPS*TM original rows/step
N_WSLOTS = NUM_LAYERS + 2       # 8 hidden layers (layer 5 split in 2) + sigma = 10
N_BROWS = NUM_LAYERS + 1        # 9 biases

assert DIM_IN <= K_PAD and DIM_OUT <= DIM_HIDDEN


# ----------------------------- kernel -------------------------------------
def sigma_net_kernel(x_ref, w_ref, b_ref, h_out_ref, sig_out_ref):
    # x_ref      : (TM, LANES) bf16 — 4 original rows per packed row; within
    #              each 64-lane group, lanes >= DIM_IN are zero.
    # w_ref      : (N_WSLOTS, LANES, LANES) bf16 block-diagonal packed weights
    # b_ref      : (N_BROWS, LANES) f32 biases (tiled 4x along lanes)
    # h_out_ref  : (TM, LANES) f32 — final hidden feature h (packed layout)
    # sig_out_ref: (TM, LANES) f32 — sigma in lanes [g*64, g*64+8) per group
    x_bf = x_ref[...]                       # (TM, 256) bf16
    b_all = b_ref[...]                      # (9, 256) f32

    def dense(h_bf, slot):                  # bf16 x bf16 -> f32 on the MXU
        return jnp.dot(h_bf, w_ref[slot], preferred_element_type=jnp.float32)

    def bias(i):                            # (1, 256) f32 row, broadcasts over TM
        return b_all[i:i + 1, :]

    # layer 0: dim_in -> dim_hidden (weight rows >= DIM_IN are zero)
    h = jnp.maximum(dense(x_bf, 0) + bias(0), 0.0)

    # layers 1..4: dim_hidden -> dim_hidden
    for i in range(1, 5):
        h = jnp.maximum(dense(h.astype(jnp.bfloat16), i) + bias(i), 0.0)

    # layer 5: reference computes Linear(cat([x, h])); implemented as a split
    # dual matmul accumulating into the same f32 tile (slot 5 = x-part,
    # slot 6 = h-part).  No 96-lane concat / relayout.
    acc = dense(x_bf, 5) + dense(h.astype(jnp.bfloat16), 6)
    h = jnp.maximum(acc + bias(5), 0.0)

    # layers 6, 7
    h = jnp.maximum(dense(h.astype(jnp.bfloat16), 7) + bias(6), 0.0)
    h = jnp.maximum(dense(h.astype(jnp.bfloat16), 8) + bias(7), 0.0)

    # sigma head (no activation); weight cols >= DIM_OUT (per group) are zero,
    # so the unused lanes of each sigma group are exactly the (zero) padding.
    sigma = dense(h.astype(jnp.bfloat16), 9) + bias(8)

    # two lane-dense 256-wide unmasked stores
    h_out_ref[...] = h.astype(h_out_ref.dtype)
    sig_out_ref[...] = sigma.astype(sig_out_ref.dtype)


# --------------------------- param helpers ---------------------------------
def make_params(key):
    """Deterministic synthetic init; weights stored pre-transposed [in, out]."""
    in_dims = [DIM_IN] + [
        DIM_IN + DIM_HIDDEN if (j - 1) in SKIPS else DIM_HIDDEN
        for j in range(1, NUM_LAYERS)
    ]
    params = []
    for d_in in in_dims:
        key, kw, kb = jax.random.split(key, 3)
        w = jax.random.normal(kw, (d_in, DIM_HIDDEN), jnp.float32) * (2.0 / d_in) ** 0.5
        b = jax.random.normal(kb, (DIM_HIDDEN,), jnp.float32) * 0.01
        params += [w, b]
    key, kw, kb = jax.random.split(key, 3)
    w_s = jax.random.normal(kw, (DIM_HIDDEN, DIM_OUT), jnp.float32) * (1.0 / DIM_HIDDEN) ** 0.5
    b_s = jax.random.normal(kb, (DIM_OUT,), jnp.float32) * 0.01
    params += [w_s, b_s]
    return params


def pack_params(params):
    """Pack the 9 Linear layers into one block-diagonal bf16 weight slab
    (N_WSLOTS, LANES, LANES) and one f32 bias slab (N_BROWS, LANES)."""
    ws = params[0::2]                 # 9 weights [in, out]
    bs = params[1::2]                 # 9 biases

    def pad_w(w):                     # zero-pad to the common (K_PAD, DIM_HIDDEN)
        kin, kout = w.shape
        return jnp.pad(w, ((0, K_PAD - kin), (0, DIM_HIDDEN - kout)))

    def bdiag(w):                     # (64, 64) -> (256, 256) block-diagonal
        return jnp.kron(jnp.eye(GROUPS, dtype=w.dtype), w)

    w5 = ws[5]                        # (DIM_IN + DIM_HIDDEN, DIM_HIDDEN)
    slots = [
        pad_w(ws[0]),                 # 0 : layer 0   (32 -> 64, zero-padded K)
        pad_w(ws[1]), pad_w(ws[2]), pad_w(ws[3]), pad_w(ws[4]),   # 1..4
        pad_w(w5[:DIM_IN, :]),        # 5 : layer 5, x-part of the skip concat
        pad_w(w5[DIM_IN:, :]),        # 6 : layer 5, h-part
        pad_w(ws[6]), pad_w(ws[7]),   # 7, 8 : layers 6, 7
        pad_w(ws[8]),                 # 9 : sigma head (out zero-padded 8 -> 64)
    ]
    w_slab = jnp.stack([bdiag(s) for s in slots]).astype(jnp.bfloat16)   # (10,256,256)
    b_rows = [jnp.tile(jnp.pad(b, (0, DIM_HIDDEN - b.shape[0])), GROUPS) for b in bs]
    b_slab = jnp.stack(b_rows).astype(jnp.float32)                       # (9, 256)
    return w_slab, b_slab


# ------------------------------ wrapper ------------------------------------
@jax.jit
def sigma_net_pallas(x, *params):
    n, d_in = x.shape
    assert d_in == DIM_IN
    w_slab, b_slab = pack_params(list(params))

    rows_per_step = GROUPS * TM
    n_pad = ((n + rows_per_step - 1) // rows_per_step) * rows_per_step
    # zero-pad features to K_PAD lanes and tail rows to a tile multiple,
    # then lane-pack GROUPS consecutive rows per packed row (free reshape).
    x_p = jnp.pad(x, ((0, n_pad - n), (0, K_PAD - DIM_IN))).astype(jnp.bfloat16)
    x_r = x_p.reshape(n_pad // GROUPS, LANES)
    grid = (n_pad // rows_per_step,)

    h_out, sig_out = pl.pallas_call(
        sigma_net_kernel,
        out_shape=(
            jax.ShapeDtypeStruct((n_pad // GROUPS, LANES), jnp.float32),
            jax.ShapeDtypeStruct((n_pad // GROUPS, LANES), jnp.float32),
        ),
        grid_spec=pltpu.PrefetchScalarGridSpec(
            num_scalar_prefetch=0,
            grid=grid,
            in_specs=[
                pl.BlockSpec((TM, LANES), lambda i: (i, 0)),
                pl.BlockSpec((N_WSLOTS, LANES, LANES), lambda i: (0, 0, 0)),
                pl.BlockSpec((N_BROWS, LANES), lambda i: (0, 0)),
            ],
            out_specs=[
                pl.BlockSpec((TM, LANES), lambda i: (i, 0)),
                pl.BlockSpec((TM, LANES), lambda i: (i, 0)),
            ],
        ),
        compiler_params=pltpu.CompilerParams(
            dimension_semantics=("parallel",)),
    )(x_r, w_slab, b_slab)

    # un-pack (free reshapes) + final slices
    h = h_out.reshape(n_pad, DIM_HIDDEN)[:n]
    sigma = sig_out.reshape(n_pad, DIM_HIDDEN)[:n, :DIM_OUT]
    return sigma, h


# ---------------------------- references -----------------------------------
def sigma_net_ref(x, params):
    """Pure f32 reference reproducing the PyTorch forward exactly (with concat)."""
    h = x
    for i in range(NUM_LAYERS):
        w, b = params[2 * i], params[2 * i + 1]
        h = jnp.maximum(h @ w + b, 0.0)
        if i in SKIPS:
            h = jnp.concatenate([x, h], axis=-1)
    sigma = h @ params[-2] + params[-1]
    return sigma, h


def sigma_net_ref_bf16_math(x, params):
    """Mirror of the kernel math (bf16 MXU inputs, f32 accum, split skip)."""
    bf = lambda a: a.astype(jnp.bfloat16)
    dot = lambda a, b: jnp.dot(bf(a), bf(b), preferred_element_type=jnp.float32)
    ws, bs = params[0::2], params[1::2]
    h = jnp.maximum(dot(x, ws[0]) + bs[0], 0.0)
    for i in range(1, 5):
        h = jnp.maximum(dot(h, ws[i]) + bs[i], 0.0)
    acc = dot(x, ws[5][:DIM_IN, :]) + dot(h, ws[5][DIM_IN:, :])
    h = jnp.maximum(acc + bs[5], 0.0)
    h = jnp.maximum(dot(h, ws[6]) + bs[6], 0.0)
    h = jnp.maximum(dot(h, ws[7]) + bs[7], 0.0)
    sigma = dot(h, ws[8]) + bs[8]
    return sigma, h


# ------------------------------- main --------------------------------------
if __name__ == "__main__":
    key = jax.random.PRNGKey(0)
    key, kx = jax.random.split(key)
    n = 1000                                   # non-multiple of the tile: exercises tail
    x = jax.random.normal(kx, (n, DIM_IN), jnp.float32)
    params = make_params(key)

    sigma, h = sigma_net_pallas(x, *params)
    jax.block_until_ready((sigma, h))

    assert sigma.shape == (n, DIM_OUT) and h.shape == (n, DIM_HIDDEN)

    # Tight check against a reference that mirrors the kernel's bf16 math.
    sig_m, h_m = sigma_net_ref_bf16_math(x, params)
    assert float(jnp.max(jnp.abs(sigma - sig_m))) < 1e-2
    assert float(jnp.max(jnp.abs(h - h_m))) < 1e-2

    # Loose check against the pure-f32 PyTorch-semantics reference
    # (tolerance loosened because the kernel runs its matmuls in bf16).
    sig_f, h_f = sigma_net_ref(x, params)
    assert bool(jnp.allclose(sigma, sig_f, atol=0.1, rtol=0.1))
    assert bool(jnp.allclose(h, h_f, atol=0.1, rtol=0.1))

    print("KERNEL_OK")
</pallas_src>

<mosaic_0001>
module attributes {stable_mosaic.version = 11 : i64} {
  func.func @sigma_net_kernel(%arg0: i32, %arg1: memref<512x256xbf16, #tpu.memory_space<vmem>>, %arg2: memref<10x256x256xbf16, #tpu.memory_space<vmem>>, %arg3: memref<9x256xf32, #tpu.memory_space<vmem>>, %arg4: memref<512x256xf32, #tpu.memory_space<vmem>>, %arg5: memref<512x256xf32, #tpu.memory_space<vmem>>) attributes {dimension_semantics = [#tpu.dimension_semantics<parallel>], iteration_bounds = array<i64: 1>, scalar_prefetch = 0 : i64, scratch_operands = 0 : i64, tpu.core_type = #tpu.core_type<tc>, window_params = [{transform_indices = @transform_0, window_bounds = array<i64: 512, 256>}, {pipeline_mode = #tpu.pipeline_mode<synchronous>, transform_indices = @transform_1, window_bounds = array<i64: 10, 256, 256>}, {pipeline_mode = #tpu.pipeline_mode<synchronous>, transform_indices = @transform_2, window_bounds = array<i64: 9, 256>}, {transform_indices = @transform_3, window_bounds = array<i64: 512, 256>}, {transform_indices = @transform_4, window_bounds = array<i64: 512, 256>}]} {
    %c0 = arith.constant 0 : index
    %c0_0 = arith.constant 0 : index
    %0 = vector.load %arg1[%c0, %c0_0] : memref<512x256xbf16, #tpu.memory_space<vmem>>, vector<512x256xbf16>
    %c0_1 = arith.constant 0 : index
    %c0_2 = arith.constant 0 : index
    %1 = vector.load %arg3[%c0_1, %c0_2] : memref<9x256xf32, #tpu.memory_space<vmem>>, vector<9x256xf32>
    %c0_3 = arith.constant 0 : index
    %c0_4 = arith.constant 0 : index
    %c0_5 = arith.constant 0 : index
    %2 = vector.load %arg2[%c0_3, %c0_4, %c0_5] : memref<10x256x256xbf16, #tpu.memory_space<vmem>>, vector<1x256x256xbf16>
    %3 = vector.shape_cast %2 : vector<1x256x256xbf16> to vector<256x256xbf16>
    %cst = arith.constant dense<0.000000e+00> : vector<512x256xf32>
    %4 = tpu.matmul %0, %3, %cst {dimension_numbers = #tpu.dot_dimension_numbers<[1], [0], [0], [1], [0, 0, 1, 1], [], []>} : vector<512x256xbf16>, vector<256x256xbf16>, vector<512x256xf32> -> vector<512x256xf32>
    %5 = vector.extract_strided_slice %1 {offsets = [0, 0], sizes = [1, 256], strides = [1, 1]} : vector<9x256xf32> to vector<1x256xf32>
    %6 = vector.broadcast %5 : vector<1x256xf32> to vector<512x256xf32>
    %7 = arith.addf %4, %6 : vector<512x256xf32>
    %cst_6 = arith.constant 0.000000e+00 : f32
    %8 = vector.broadcast %cst_6 : f32 to vector<512x256xf32>
    %9 = arith.maximumf %7, %8 : vector<512x256xf32>
    %10 = arith.truncf %9 : vector<512x256xf32> to vector<512x256xbf16>
    %c1 = arith.constant 1 : index
    %c0_7 = arith.constant 0 : index
    %c0_8 = arith.constant 0 : index
    %11 = vector.load %arg2[%c1, %c0_7, %c0_8] : memref<10x256x256xbf16, #tpu.memory_space<vmem>>, vector<1x256x256xbf16>
    %12 = vector.shape_cast %11 : vector<1x256x256xbf16> to vector<256x256xbf16>
    %cst_9 = arith.constant dense<0.000000e+00> : vector<512x256xf32>
    %13 = tpu.matmul %10, %12, %cst_9 {dimension_numbers = #tpu.dot_dimension_numbers<[1], [0], [0], [1], [0, 0, 1, 1], [], []>} : vector<512x256xbf16>, vector<256x256xbf16>, vector<512x256xf32> -> vector<512x256xf32>
    %14 = vector.extract_strided_slice %1 {offsets = [1, 0], sizes = [1, 256], strides = [1, 1]} : vector<9x256xf32> to vector<1x256xf32>
    %15 = vector.broadcast %14 : vector<1x256xf32> to vector<512x256xf32>
    %16 = arith.addf %13, %15 : vector<512x256xf32>
    %cst_10 = arith.constant 0.000000e+00 : f32
    %17 = vector.broadcast %cst_10 : f32 to vector<512x256xf32>
    %18 = arith.maximumf %16, %17 : vector<512x256xf32>
    %19 = arith.truncf %18 : vector<512x256xf32> to vector<512x256xbf16>
    %c2 = arith.constant 2 : index
    %c0_11 = arith.constant 0 : index
    %c0_12 = arith.constant 0 : index
    %20 = vector.load %arg2[%c2, %c0_11, %c0_12] : memref<10x256x256xbf16, #tpu.memory_space<vmem>>, vector<1x256x256xbf16>
    %21 = vector.shape_cast %20 : vector<1x256x256xbf16> to vector<256x256xbf16>
    %cst_13 = arith.constant dense<0.000000e+00> : vector<512x256xf32>
    %22 = tpu.matmul %19, %21, %cst_13 {dimension_numbers = #tpu.dot_dimension_numbers<[1], [0], [0], [1], [0, 0, 1, 1], [], []>} : vector<512x256xbf16>, vector<256x256xbf16>, vector<512x256xf32> -> vector<512x256xf32>
    %23 = vector.extract_strided_slice %1 {offsets = [2, 0], sizes = [1, 256], strides = [1, 1]} : vector<9x256xf32> to vector<1x256xf32>
    %24 = vector.broadcast %23 : vector<1x256xf32> to vector<512x256xf32>
    %25 = arith.addf %22, %24 : vector<512x256xf32>
    %cst_14 = arith.constant 0.000000e+00 : f32
    %26 = vector.broadcast %cst_14 : f32 to vector<512x256xf32>
    %27 = arith.maximumf %25, %26 : vector<512x256xf32>
    %28 = arith.truncf %27 : vector<512x256xf32> to vector<512x256xbf16>
    %c3 = arith.constant 3 : index
    %c0_15 = arith.constant 0 : index
    %c0_16 = arith.constant 0 : index
    %29 = vector.load %arg2[%c3, %c0_15, %c0_16] : memref<10x256x256xbf16, #tpu.memory_space<vmem>>, vector<1x256x256xbf16>
    %30 = vector.shape_cast %29 : vector<1x256x256xbf16> to vector<256x256xbf16>
    %cst_17 = arith.constant dense<0.000000e+00> : vector<512x256xf32>
    %31 = tpu.matmul %28, %30, %cst_17 {dimension_numbers = #tpu.dot_dimension_numbers<[1], [0], [0], [1], [0, 0, 1, 1], [], []>} : vector<512x256xbf16>, vector<256x256xbf16>, vector<512x256xf32> -> vector<512x256xf32>
    %32 = vector.extract_strided_slice %1 {offsets = [3, 0], sizes = [1, 256], strides = [1, 1]} : vector<9x256xf32> to vector<1x256xf32>
    %33 = vector.broadcast %32 : vector<1x256xf32> to vector<512x256xf32>
    %34 = arith.addf %31, %33 : vector<512x256xf32>
    %cst_18 = arith.constant 0.000000e+00 : f32
    %35 = vector.broadcast %cst_18 : f32 to vector<512x256xf32>
    %36 = arith.maximumf %34, %35 : vector<512x256xf32>
    %37 = arith.truncf %36 : vector<512x256xf32> to vector<512x256xbf16>
    %c4 = arith.constant 4 : index
    %c0_19 = arith.constant 0 : index
    %c0_20 = arith.constant 0 : index
    %38 = vector.load %arg2[%c4, %c0_19, %c0_20] : memref<10x256x256xbf16, #tpu.memory_space<vmem>>, vector<1x256x256xbf16>
    %39 = vector.shape_cast %38 : vector<1x256x256xbf16> to vector<256x256xbf16>
    %cst_21 = arith.constant dense<0.000000e+00> : vector<512x256xf32>
    %40 = tpu.matmul %37, %39, %cst_21 {dimension_numbers = #tpu.dot_dimension_numbers<[1], [0], [0], [1], [0, 0, 1, 1], [], []>} : vector<512x256xbf16>, vector<256x256xbf16>, vector<512x256xf32> -> vector<512x256xf32>
    %41 = vector.extract_strided_slice %1 {offsets = [4, 0], sizes = [1, 256], strides = [1, 1]} : vector<9x256xf32> to vector<1x256xf32>
    %42 = vector.broadcast %41 : vector<1x256xf32> to vector<512x256xf32>
    %43 = arith.addf %40, %42 : vector<512x256xf32>
    %cst_22 = arith.constant 0.000000e+00 : f32
    %44 = vector.broadcast %cst_22 : f32 to vector<512x256xf32>
    %45 = arith.maximumf %43, %44 : vector<512x256xf32>
    %c5 = arith.constant 5 : index
    %c0_23 = arith.constant 0 : index
    %c0_24 = arith.constant 0 : index
    %46 = vector.load %arg2[%c5, %c0_23, %c0_24] : memref<10x256x256xbf16, #tpu.memory_space<vmem>>, vector<1x256x256xbf16>
    %47 = vector.shape_cast %46 : vector<1x256x256xbf16> to vector<256x256xbf16>
    %cst_25 = arith.constant dense<0.000000e+00> : vector<512x256xf32>
    %48 = tpu.matmul %0, %47, %cst_25 {dimension_numbers = #tpu.dot_dimension_numbers<[1], [0], [0], [1], [0, 0, 1, 1], [], []>} : vector<512x256xbf16>, vector<256x256xbf16>, vector<512x256xf32> -> vector<512x256xf32>
    %49 = arith.truncf %45 : vector<512x256xf32> to vector<512x256xbf16>
    %c6 = arith.constant 6 : index
    %c0_26 = arith.constant 0 : index
    %c0_27 = arith.constant 0 : index
    %50 = vector.load %arg2[%c6, %c0_26, %c0_27] : memref<10x256x256xbf16, #tpu.memory_space<vmem>>, vector<1x256x256xbf16>
    %51 = vector.shape_cast %50 : vector<1x256x256xbf16> to vector<256x256xbf16>
    %cst_28 = arith.constant dense<0.000000e+00> : vector<512x256xf32>
    %52 = tpu.matmul %49, %51, %cst_28 {dimension_numbers = #tpu.dot_dimension_numbers<[1], [0], [0], [1], [0, 0, 1, 1], [], []>} : vector<512x256xbf16>, vector<256x256xbf16>, vector<512x256xf32> -> vector<512x256xf32>
    %53 = arith.addf %48, %52 : vector<512x256xf32>
    %54 = vector.extract_strided_slice %1 {offsets = [5, 0], sizes = [1, 256], strides = [1, 1]} : vector<9x256xf32> to vector<1x256xf32>
    %55 = vector.broadcast %54 : vector<1x256xf32> to vector<512x256xf32>
    %56 = arith.addf %53, %55 : vector<512x256xf32>
    %cst_29 = arith.constant 0.000000e+00 : f32
    %57 = vector.broadcast %cst_29 : f32 to vector<512x256xf32>
    %58 = arith.maximumf %56, %57 : vector<512x256xf32>
    %59 = arith.truncf %58 : vector<512x256xf32> to vector<512x256xbf16>
    %c7 = arith.constant 7 : index
    %c0_30 = arith.constant 0 : index
    %c0_31 = arith.constant 0 : index
    %60 = vector.load %arg2[%c7, %c0_30, %c0_31] : memref<10x256x256xbf16, #tpu.memory_space<vmem>>, vector<1x256x256xbf16>
    %61 = vector.shape_cast %60 : vector<1x256x256xbf16> to vector<256x256xbf16>
    %cst_32 = arith.constant dense<0.000000e+00> : vector<512x256xf32>
    %62 = tpu.matmul %59, %61, %cst_32 {dimension_numbers = #tpu.dot_dimension_numbers<[1], [0], [0], [1], [0, 0, 1, 1], [], []>} : vector<512x256xbf16>, vector<256x256xbf16>, vector<512x256xf32> -> vector<512x256xf32>
    %63 = vector.extract_strided_slice %1 {offsets = [6, 0], sizes = [1, 256], strides = [1, 1]} : vector<9x256xf32> to vector<1x256xf32>
    %64 = vector.broadcast %63 : vector<1x256xf32> to vector<512x256xf32>
    %65 = arith.addf %62, %64 : vector<512x256xf32>
    %cst_33 = arith.constant 0.000000e+00 : f32
    %66 = vector.broadcast %cst_33 : f32 to vector<512x256xf32>
    %67 = arith.maximumf %65, %66 : vector<512x256xf32>
    %68 = arith.truncf %67 : vector<512x256xf32> to vector<512x256xbf16>
    %c8 = arith.constant 8 : index
    %c0_34 = arith.constant 0 : index
    %c0_35 = arith.constant 0 : index
    %69 = vector.load %arg2[%c8, %c0_34, %c0_35] : memref<10x256x256xbf16, #tpu.memory_space<vmem>>, vector<1x256x256xbf16>
    %70 = vector.shape_cast %69 : vector<1x256x256xbf16> to vector<256x256xbf16>
    %cst_36 = arith.constant dense<0.000000e+00> : vector<512x256xf32>
    %71 = tpu.matmul %68, %70, %cst_36 {dimension_numbers = #tpu.dot_dimension_numbers<[1], [0], [0], [1], [0, 0, 1, 1], [], []>} : vector<512x256xbf16>, vector<256x256xbf16>, vector<512x256xf32> -> vector<512x256xf32>
    %72 = vector.extract_strided_slice %1 {offsets = [7, 0], sizes = [1, 256], strides = [1, 1]} : vector<9x256xf32> to vector<1x256xf32>
    %73 = vector.broadcast %72 : vector<1x256xf32> to vector<512x256xf32>
    %74 = arith.addf %71, %73 : vector<512x256xf32>
    %cst_37 = arith.constant 0.000000e+00 : f32
    %75 = vector.broadcast %cst_37 : f32 to vector<512x256xf32>
    %76 = arith.maximumf %74, %75 : vector<512x256xf32>
    %77 = arith.truncf %76 : vector<512x256xf32> to vector<512x256xbf16>
    %c9 = arith.constant 9 : index
    %c0_38 = arith.constant 0 : index
    %c0_39 = arith.constant 0 : index
    %78 = vector.load %arg2[%c9, %c0_38, %c0_39] : memref<10x256x256xbf16, #tpu.memory_space<vmem>>, vector<1x256x256xbf16>
    %79 = vector.shape_cast %78 : vector<1x256x256xbf16> to vector<256x256xbf16>
    %cst_40 = arith.constant dense<0.000000e+00> : vector<512x256xf32>
    %80 = tpu.matmul %77, %79, %cst_40 {dimension_numbers = #tpu.dot_dimension_numbers<[1], [0], [0], [1], [0, 0, 1, 1], [], []>} : vector<512x256xbf16>, vector<256x256xbf16>, vector<512x256xf32> -> vector<512x256xf32>
    %81 = vector.extract_strided_slice %1 {offsets = [8, 0], sizes = [1, 256], strides = [1, 1]} : vector<9x256xf32> to vector<1x256xf32>
    %82 = vector.broadcast %81 : vector<1x256xf32> to vector<512x256xf32>
    %83 = arith.addf %80, %82 : vector<512x256xf32>
    %c0_41 = arith.constant 0 : index
    %c0_42 = arith.constant 0 : index
    %84 = vector.load %arg4[%c0_41, %c0_42] : memref<512x256xf32, #tpu.memory_space<vmem>>, vector<512x256xf32>
    tpu.vector_store %arg4[%c0_41, %c0_42], %76 {strides = array<i32>} : memref<512x256xf32, #tpu.memory_space<vmem>>, vector<512x256xf32>,
    %c0_43 = arith.constant 0 : index
    %c0_44 = arith.constant 0 : index
    %85 = vector.load %arg5[%c0_43, %c0_44] : memref<512x256xf32, #tpu.memory_space<vmem>>, vector<512x256xf32>
    tpu.vector_store %arg5[%c0_43, %c0_44], %83 {strides = array<i32>} : memref<512x256xf32, #tpu.memory_space<vmem>>, vector<512x256xf32>,
    return
  }
  func.func @transform_0(%arg0: i32) -> (i32, i32) {
    %c0_i32 = arith.constant 0 : i32
    %c0_i32_0 = arith.constant 0 : i32
    return %arg0, %c0_i32 : i32, i32
  }
  func.func @transform_1(%arg0: i32) -> (i32, i32, i32) {
    %c0_i32 = arith.constant 0 : i32
    %c0_i32_0 = arith.constant 0 : i32
    %c0_i32_1 = arith.constant 0 : i32
    %c0_i32_2 = arith.constant 0 : i32
    return %c0_i32, %c0_i32_0, %c0_i32_1 : i32, i32, i32
  }
  func.func @transform_2(%arg0: i32) -> (i32, i32) {
    %c0_i32 = arith.constant 0 : i32
    %c0_i32_0 = arith.constant 0 : i32
    %c0_i32_1 = arith.constant 0 : i32
    return %c0_i32, %c0_i32_0 : i32, i32
  }
  func.func @transform_3(%arg0: i32) -> (i32, i32) {
    %c0_i32 = arith.constant 0 : i32
    %c0_i32_0 = arith.constant 0 : i32
    return %arg0, %c0_i32 : i32, i32
  }
  func.func @transform_4(%arg0: i32) -> (i32, i32) {
    %c0_i32 = arith.constant 0 : i32
    %c0_i32_0 = arith.constant 0 : i32
    return %arg0, %c0_i32 : i32, i32
  }
}

</mosaic_0001>

<bundles_post_ra>
// kernel: tile.80
= control target key start
LH: loop header
LB: loop body
LE: loop exit
PB: predicated region body
PF: predicated region fallthrough
CT: control target
= control target key end

     0   :  { %s22_s0 = inlined_call_operand.vmem [shape: f32[64], index: 0, kind: input, shape index: {}]   ;;  %s23_s1 = inlined_call_operand.vmem [shape: f32[4,64], index: 1, kind: output, shape index: {}]  }
   0x1   :  { %v4_v0 = vld [vmem:[%s22_s0] ss:$0 sm:$0xff] }
   0x2   :  { %5 = vst [vmem:[%s23_s1] sm:$0xf] %v4_v0 }

// kernel: tile.48
= control target key start
LH: loop header
LB: loop body
LE: loop exit
PB: predicated region body
PF: predicated region fallthrough
CT: control target
= control target key end

     0   :  { %2 = vsyncpa [#allocation1], 0  ;;  %s44_s6 = smov [#allocation0]   ;;  %s70_s0 = inlined_call_operand.hbm [shape: f32[64], index: 0, kind: input, shape index: {}]   ;;  %s71_s1 = inlined_call_operand.vmem [shape: f32[4,64], index: 1, kind: output, shape index: {}]  }
   0x1   :  { %s9_s7 = sshll.u32 %s44_s6, 4  ;;  %s20_s10 = scalar_lea.hbm %s70_s0, 16  ;;  %s10_s7 = int_to_ptr.vmem [resolvable:$true] %s9_s7 }
   0x2   :  { %p21_p0 = scmp.ne.s32.totalorder %s70_s0, %s20_s10  ;;  %p24_p1 = scmp.lt.u32.totalorder %s20_s10, %s70_s0 }
   0x4   :  { %p26_p2 = pnand %p24_p1, %p21_p0 }
   0x6   :  { %29 = shalt.err (!%p26_p2)
}
   0x7   :  { %s30_s15 = scalar_lea.vmem %s10_s7, 16  ;;  %s34_s16 = scalar_lea.vmem %s10_s7, 32 }
   0x8   :  { %p31_p3 = scmp.ne.s32.totalorder %s10_s7, %s30_s15  ;;  %p35_p4 = scmp.lt.s32.totalorder %s10_s7, %s10_s7 }
   0x9   :  { %p36_p5 = scmp.lt.s32.totalorder %s34_s16, %s30_s15 }
   0xb   :  { %p37_p6 = por %p36_p5, %p35_p4 }
   0xd   :  { %p38_p7 = pnand %p37_p6, %p31_p3 }
   0xf   :  { %41 = shalt.err (!%p38_p7)
}
  0x10   :  { %12 = dma.hbm_to_vmem [thread:$0]  %s70_s0, 16, %s10_s7, [#allocation1]  }
  0x11   :  { %42 = dma.done.wait [#allocation1], 16  }
  0x12   :  { %43 = vsyncadd [#allocation1], 4294967280  ;;  %v16_v0 = vld [vmem:[#allocation0] ss:$0 sm:$0xff] }
  0x13   :  { %17 = vst [vmem:[%s71_s1] sm:$0xf] %v16_v0 }
  0x14   :  { %18 = vsyncpa [#allocation1], 1 }

// kernel: tile.89
= control target key start
LH: loop header
LB: loop body
LE: loop exit
PB: predicated region body
PF: predicated region fallthrough
CT: control target
= control target key end

     0   :  { %s6_s8 = smov 3  ;;  %vm8_vm0 = vcmask 523264   ;;  %s30_s9 = smov 64   ;;  %vm15_vm1 = vcmask 1048064   ;;  %s50_s0 = inlined_call_operand.vmem [shape: f32[4,64], index: 0, kind: input, shape index: {}]   ;;  %s51_s1 = inlined_call_operand.vmem [shape: f32[1,256], index: 1, kind: output, shape index: {}]  }
   0x1   :  { %v4_v0 = vld [vmem:[%s50_s0] sm:$0xf]  ;;  %s11_s0 = smov 3 }
   0x2   :  { %5 = vst [vmem:[#allocation1] sm:$0xf] %v4_v0 }
   0x9   :  { %v12_v1 = vld [vmem:[#allocation1 + $0x1] ss:$2 sm:%s11_s0]   ;;  %v7_v2 = vld [vmem:[#allocation1] ss:$2 sm:%s6_s8]  }
   0xa   :  { %13 = vrot.lane.b32.xlu0 %v12_v1, %s30_s9  ;;  %9 = vst.msk [vmem:[#allocation0] ss:$8 sm:$0x3] %vm8_vm0, %v7_v2  }
  0x7c   :  { %v14_v3 = vpop.permute.xlu0 %13  }
  0x7d   :  { %16 = vst.msk [vmem:[#allocation0] ss:$8 sm:$0x3] %vm15_vm1, %v14_v3  }
  0x84   :  { %v20_v4 = vld [vmem:[#allocation0] sm:$0x1]  ;;  %v24_v5 = vld [vmem:[#allocation0 + $0x8] sm:$0x1] }
  0x85   :  { %22 = vst [vmem:[%s51_s1] sm:$0x1] %v20_v4  ;;  %28 = vst [vmem:[%s51_s1 + $0x1] sm:$0x1] %v24_v5 }

// kernel: sigma_net_pallas.1
= control target key start
LH: loop header
LB: loop body
LE: loop exit
PB: predicated region body
PF: predicated region fallthrough
CT: control target
= control target key end

     0   :  { %s12867_s1 = inlined_call_operand.vmem [shape: bf16[10,256,256], index: 1, kind: input, shape index: {}]   ;;  %s12868_s0 = inlined_call_operand.vmem [shape: bf16[512,256], index: 0, kind: input, shape index: {}]   ;;  %s12869_s2 = inlined_call_operand.vmem [shape: f32[9,256], index: 2, kind: input, shape index: {}]   ;;  %s12870_s3 = inlined_call_operand.vmem [shape: f32[512,256], index: 3, kind: output, shape index: {0}]   ;;  %s12871_s4 = inlined_call_operand.vmem [shape: f32[512,256], index: 4, kind: output, shape index: {1}]  }
   0x1   :  { %v8665_v0 = vld [vmem:[%s12867_s1 + $0x4] ss:$8 sps:$4 sm:$0xff]   ;;  %v8667_v1 = vld [vmem:[%s12867_s1] ss:$8 sps:$4 sm:$0xff]   ;;  %v8668_v2 = vld [vmem:[%s12867_s1 + $0x14] ss:$8 sps:$4 sm:$0xff]  }
   0x2   :  { %604 = vmatprep.subr.bf16.mxu0 %v8665_v0  ;;  %v8670_v3 = vld [vmem:[%s12867_s1 + $0x10] ss:$8 sps:$4 sm:$0xff]   ;;  %v8671_v4 = vld [vmem:[%s12867_s1 + $0x24] ss:$8 sps:$4 sm:$0xff]   ;;  %v8673_v5 = vld [vmem:[%s12867_s1 + $0x20] ss:$8 sps:$4 sm:$0xff]  }
   0x3   :  { %605 = vmatpush1.bf16.msra.mxu0 %v8667_v1  ;;  %v8674_v6 = vld [vmem:[%s12867_s1 + $0x34] ss:$8 sps:$4 sm:$0xff]   ;;  %v8676_v7 = vld [vmem:[%s12867_s1 + $0x30] ss:$8 sps:$4 sm:$0xff]   ;;  %v8677_v8 = vld [vmem:[%s12867_s1 + $0x44] ss:$8 sps:$4 sm:$0xff]  }
   0x4   :  { %606 = vmatprep.subr.bf16.mxu0 %v8668_v2  ;;  %v8679_v9 = vld [vmem:[%s12867_s1 + $0x40] ss:$8 sps:$4 sm:$0xff]   ;;  %v8680_v10 = vld [vmem:[%s12867_s1 + $0x54] ss:$8 sps:$4 sm:$0xff]   ;;  %v8682_v11 = vld [vmem:[%s12867_s1 + $0x50] ss:$8 sps:$4 sm:$0xff]  }
   0x5   :  { %v8683_v12 = vld [vmem:[%s12867_s1 + $0x64] ss:$8 sps:$4 sm:$0xff]   ;;  %v8685_v14 = vld [vmem:[%s12867_s1 + $0x60] ss:$8 sps:$4 sm:$0xff]   ;;  %v8686_v15 = vld [vmem:[%s12867_s1 + $0x74] ss:$8 sps:$4 sm:$0xff]  }
   0x6   :  { %v8715_v13 = vld [vmem:[%s12868_s0 + $0x4] ss:$8 sps:$4 sm:$0xff]   ;;  %v8688_v16 = vld [vmem:[%s12867_s1 + $0x70] ss:$8 sps:$4 sm:$0xff]   ;;  %v8691_v18 = vld [vmem:[%s12867_s1 + $0x80] ss:$8 sps:$4 sm:$0xff]  }
   0x7   :  { %607 = vmatpush1.bf16.msra.mxu0 %v8670_v3  ;;  %636 = vmatprep.mubr.bf16.mxu0 %v8715_v13  ;;  %v8689_v17 = vld [vmem:[%s12867_s1 + $0x84] ss:$8 sps:$4 sm:$0xff]   ;;  %v8692_v19 = vld [vmem:[%s12867_s1 + $0x94] ss:$8 sps:$4 sm:$0xff]   ;;  %v8694_v20 = vld [vmem:[%s12867_s1 + $0x90] ss:$8 sps:$4 sm:$0xff]  }
   0x8   :  { %608 = vmatprep.subr.bf16.mxu0 %v8671_v4  ;;  %v8695_v21 = vld [vmem:[%s12867_s1 + $0xa4] ss:$8 sps:$4 sm:$0xff]   ;;  %v8697_v22 = vld [vmem:[%s12867_s1 + $0xa0] ss:$8 sps:$4 sm:$0xff]   ;;  %v8698_v23 = vld [vmem:[%s12867_s1 + $0xb4] ss:$8 sps:$4 sm:$0xff]  }
   0x9   :  { %v8700_v24 = vld [vmem:[%s12867_s1 + $0xb0] ss:$8 sps:$4 sm:$0xff]   ;;  %v8701_v25 = vld [vmem:[%s12867_s1 + $0xc4] ss:$8 sps:$4 sm:$0xff]   ;;  %v8703_v26 = vld [vmem:[%s12867_s1 + $0xc0] ss:$8 sps:$4 sm:$0xff]  }
   0xa   :  { %v8704_v27 = vld [vmem:[%s12867_s1 + $0xd4] ss:$8 sps:$4 sm:$0xff]   ;;  %v8706_v28 = vld [vmem:[%s12867_s1 + $0xd0] ss:$8 sps:$4 sm:$0xff]   ;;  %v8707_v29 = vld [vmem:[%s12867_s1 + $0xe4] ss:$8 sps:$4 sm:$0xff]  }
   0xb   :  { %609 = vmatpush1.bf16.msra.mxu0 %v8673_v5  ;;  %v8709_v30 = vld [vmem:[%s12867_s1 + $0xe0] ss:$8 sps:$4 sm:$0xff]   ;;  %v8710_v31 = vld [vmem:[%s12867_s1 + $0xf4] ss:$8 sps:$4 sm:$0xff]   ;;  %v8712_v32 = vld [vmem:[%s12867_s1 + $0xf0] ss:$8 sps:$4 sm:$0xff]  }
   0xc   :  { %610 = vmatprep.subr.bf16.mxu0 %v8674_v6  ;;  %v8713_v33 = vld [vmem:[%s12868_s0] ss:$8 sps:$4 sm:$0xff]   ;;  %v8716_v34 = vld [vmem:[%s12868_s0 + $0x14] ss:$8 sps:$4 sm:$0xff]   ;;  %v8718_v35 = vld [vmem:[%s12868_s0 + $0x10] ss:$8 sps:$4 sm:$0xff]  }
   0xd   :  { %v8719_v36 = vld [vmem:[%s12868_s0 + $0x24] ss:$8 sps:$4 sm:$0xff]   ;;  %v8721_v37 = vld [vmem:[%s12868_s0 + $0x20] ss:$8 sps:$4 sm:$0xff]   ;;  %v8722_v38 = vld [vmem:[%s12868_s0 + $0x34] ss:$8 sps:$4 sm:$0xff]  }
   0xe   :  { %v8724_v39 = vld [vmem:[%s12868_s0 + $0x30] ss:$8 sps:$4 sm:$0xff]   ;;  %v8725_v40 = vld [vmem:[%s12868_s0 + $0x44] ss:$8 sps:$4 sm:$0xff]   ;;  %v8777_v42 = vld [vmem:[%s12867_s1 + $0x100] ss:$8 sps:$4 sm:$0xff]  }
   0xf   :  { %611 = vmatpush1.bf16.msra.mxu0 %v8676_v7  ;;  %v8773_v41 = vld [vmem:[%s12867_s1 + $0x104] ss:$8 sps:$4 sm:$0xff]   ;;  %v8727_v43 = vld [vmem:[%s12868_s0 + $0x40] ss:$8 sps:$4 sm:$0xff]   ;;  %v8728_v44 = vld [vmem:[%s12868_s0 + $0x54] ss:$8 sps:$4 sm:$0xff]  }
  0x10   :  { %612 = vmatprep.subr.bf16.mxu0 %v8677_v8  ;;  %1350 = vmatprep.subr.bf16.mxu1 %v8773_v41  ;;  %v8779_v45 = vld [vmem:[%s12867_s1 + $0x114] ss:$8 sps:$4 sm:$0xff]   ;;  %v8781_v46 = vld [vmem:[%s12867_s1 + $0x110] ss:$8 sps:$4 sm:$0xff]   ;;  %v8782_v47 = vld [vmem:[%s12867_s1 + $0x124] ss:$8 sps:$4 sm:$0xff]  }
  0x11   :  { %1351 = vmatpush1.bf16.msra.mxu1 %v8777_v42  ;;  %v8786_v48 = vld [vmem:[%s12867_s1 + $0x120] ss:$8 sps:$4 sm:$0xff]   ;;  %v8730_v49 = vld [vmem:[%s12868_s0 + $0x50] ss:$8 sps:$4 sm:$0xff]   ;;  %v8731_v50 = vld [vmem:[%s12868_s0 + $0x64] ss:$8 sps:$4 sm:$0xff]  }
  0x12   :  { %1352 = vmatprep.subr.bf16.mxu1 %v8779_v45  ;;  %v8788_v51 = vld [vmem:[%s12867_s1 + $0x134] ss:$8 sps:$4 sm:$0xff]   ;;  %v8790_v52 = vld [vmem:[%s12867_s1 + $0x130] ss:$8 sps:$4 sm:$0xff]   ;;  %v8791_v53 = vld [vmem:[%s12867_s1 + $0x144] ss:$8 sps:$4 sm:$0xff]  }
  0x13   :  { %613 = vmatpush1.bf16.msra.mxu0 %v8679_v9  ;;  %v8795_v54 = vld [vmem:[%s12867_s1 + $0x140] ss:$8 sps:$4 sm:$0xff]   ;;  %v8734_v56 = vld [vmem:[%s12868_s0 + $0x74] ss:$8 sps:$4 sm:$0xff]   ;;  %v8799_v58 = vld [vmem:[%s12867_s1 + $0x150] ss:$8 sps:$4 sm:$0xff]  }
  0x14   :  { %614 = vmatprep.subr.bf16.mxu0 %v8680_v10  ;;  %v8733_v55 = vld [vmem:[%s12868_s0 + $0x60] ss:$8 sps:$4 sm:$0xff]   ;;  %v8797_v57 = vld [vmem:[%s12867_s1 + $0x154] ss:$8 sps:$4 sm:$0xff]   ;;  %v8800_v59 = vld [vmem:[%s12867_s1 + $0x164] ss:$8 sps:$4 sm:$0xff]  }
  0x15   :  { %1353 = vmatpush1.bf16.msra.mxu1 %v8781_v46  ;;  %v8804_v60 = vld [vmem:[%s12867_s1 + $0x160] ss:$8 sps:$4 sm:$0xff]   ;;  %v8736_v61 = vld [vmem:[%s12868_s0 + $0x70] ss:$8 sps:$4 sm:$0xff]   ;;  %v8737_v62 = vld [vmem:[%s12868_s0 + $0x84] ss:$8 sps:$4 sm:$0xff]  }
  0x16   :  { %1354 = vmatprep.subr.bf16.mxu1 %v8782_v47  ;;  %v8806_v63 = vld [vmem:[%s12867_s1 + $0x174] ss:$8 sps:$4 sm:$0xff]   ;;  %v8808_v0 = vld [vmem:[%s12867_s1 + $0x170] ss:$8 sps:$4 sm:$0xff]   ;;  %v8809_v1 = vld [vmem:[%s12867_s1 + $0x200] ss:$8 sps:$4 sm:$0xff]  }
  0x17   :  { %615 = vmatpush1.bf16.msra.mxu0 %v8682_v11  ;;  %v8811_v2 = vld [vmem:[%s12867_s1 + $0x204] ss:$8 sps:$4 sm:$0xff]   ;;  %v8739_v4 = vld [vmem:[%s12868_s0 + $0x80] ss:$8 sps:$4 sm:$0xff]   ;;  %v8740_v6 = vld [vmem:[%s12868_s0 + $0x94] ss:$8 sps:$4 sm:$0xff]  }
  0x18   :  { %616 = vmatprep.subr.bf16.mxu0 %v8683_v12  ;;  %v8812_v3 = vld [vmem:[%s12867_s1 + $0x184] ss:$8 sps:$4 sm:$0xff]   ;;  %v8816_v5 = vld [vmem:[%s12867_s1 + $0x180] ss:$8 sps:$4 sm:$0xff]   ;;  %v8818_v7 = vld [vmem:[%s12867_s1 + $0x194] ss:$8 sps:$4 sm:$0xff]  }
  0x19   :  { %1355 = vmatpush1.bf16.msra.mxu1 %v8786_v48  ;;  %v8820_v8 = vld [vmem:[%s12867_s1 + $0x190] ss:$8 sps:$4 sm:$0xff]   ;;  %v8821_v9 = vld [vmem:[%s12867_s1 + $0x1a4] ss:$8 sps:$4 sm:$0xff]   ;;  %v8825_v10 = vld [vmem:[%s12867_s1 + $0x1a0] ss:$8 sps:$4 sm:$0xff]  }
  0x1a   :  { %1356 = vmatprep.subr.bf16.mxu1 %v8788_v51  ;;  %v8742_v11 = vld [vmem:[%s12868_s0 + $0x90] ss:$8 sps:$4 sm:$0xff]   ;;  %v8743_v12 = vld [vmem:[%s12868_s0 + $0xa4] ss:$8 sps:$4 sm:$0xff]   ;;  %v8827_v13 = vld [vmem:[%s12867_s1 + $0x1b4] ss:$8 sps:$4 sm:$0xff]  }
  0x1b   :  { %617 = vmatpush1.bf16.msra.mxu0 %v8685_v14  ;;  %v8829_v14 = vld [vmem:[%s12867_s1 + $0x1b0] ss:$8 sps:$4 sm:$0xff]   ;;  %v8763_v41 = vld [vmem:[%s12868_s0 + $0x100] ss:$8 sps:$4 sm:$0xff]   ;;  %v8764_v42 = vld [vmem:[%s12868_s0 + $0x114] ss:$8 sps:$4 sm:$0xff]  }
  0x1c   :  { %618 = vmatprep.subr.bf16.mxu0 %v8686_v15  ;;  %v8830_v15 = vld [vmem:[%s12867_s1 + $0x210] ss:$8 sps:$4 sm:$0xff]   ;;  %v8767_v46 = vld [vmem:[%s12868_s0 + $0x124] ss:$8 sps:$4 sm:$0xff]   ;;  %v8769_v47 = vld [vmem:[%s12868_s0 + $0x120] ss:$8 sps:$4 sm:$0xff]  }
  0x1d   :  { %1357 = vmatpush1.bf16.msra.mxu1 %v8790_v52  ;;  %v8766_v45 = vld [vmem:[%s12868_s0 + $0x110] ss:$8 sps:$4 sm:$0xff]   ;;  %v8770_v48 = vld [vmem:[%s12868_s0 + $0x134] ss:$8 sps:$4 sm:$0xff]   ;;  %v8775_v52 = vld [vmem:[%s12868_s0 + $0x144] ss:$8 sps:$4 sm:$0xff]  }
  0x1e   :  { %1358 = vmatprep.subr.bf16.mxu1 %v8791_v53  ;;  %v8772_v51 = vld [vmem:[%s12868_s0 + $0x130] ss:$8 sps:$4 sm:$0xff]   ;;  %v8778_v53 = vld [vmem:[%s12868_s0 + $0x140] ss:$8 sps:$4 sm:$0xff]  }
  0x1f   :  { %619 = vmatpush1.bf16.msra.mxu0 %v8688_v16  ;;  %v8832_v16 = vld [vmem:[%s12867_s1 + $0x214] ss:$8 sps:$4 sm:$0xff]  }
  0x20   :  { %620 = vmatprep.subr.bf16.mxu0 %v8689_v17  ;;  %v8833_v17 = vld [vmem:[%s12867_s1 + $0x1c4] ss:$8 sps:$4 sm:$0xff]  }
  0x21   :  { %1359 = vmatpush1.bf16.msra.mxu1 %v8795_v54  ;;  %v8784_v54 = vld [vmem:[%s12868_s0 + $0x154] ss:$8 sps:$4 sm:$0xff]  }
  0x22   :  { %1360 = vmatprep.subr.bf16.mxu1 %v8797_v57  ;;  %v8787_v57 = vld [vmem:[%s12868_s0 + $0x150] ss:$8 sps:$4 sm:$0xff]  }
  0x23   :  { %621 = vmatpush1.bf16.msra.mxu0 %v8691_v18  ;;  %v8745_v18 = vld [vmem:[%s12868_s0 + $0xa0] ss:$8 sps:$4 sm:$0xff]  }
  0x24   :  { %622 = vmatprep.subr.bf16.mxu0 %v8692_v19  ;;  %v8837_v19 = vld [vmem:[%s12867_s1 + $0x1c0] ss:$8 sps:$4 sm:$0xff]  }
  0x25   :  { %1361 = vmatpush1.bf16.msra.mxu1 %v8799_v58  ;;  %v8793_v58 = vld [vmem:[%s12868_s0 + $0x164] ss:$8 sps:$4 sm:$0xff]  }
  0x26   :  { %1362 = vmatprep.subr.bf16.mxu1 %v8800_v59  ;;  %v8796_v59 = vld [vmem:[%s12868_s0 + $0x160] ss:$8 sps:$4 sm:$0xff]  }
  0x27   :  { %623 = vmatpush1.bf16.msra.mxu0 %v8694_v20  ;;  %v8746_v20 = vld [vmem:[%s12868_s0 + $0xb4] ss:$8 sps:$4 sm:$0xff]  }
  0x28   :  { %624 = vmatprep.subr.bf16.mxu0 %v8695_v21  ;;  %v8839_v21 = vld [vmem:[%s12867_s1 + $0x1d4] ss:$8 sps:$4 sm:$0xff]  }
  0x29   :  { %1363 = vmatpush1.bf16.msra.mxu1 %v8804_v60  ;;  %v8802_v60 = vld [vmem:[%s12868_s0 + $0x174] ss:$8 sps:$4 sm:$0xff]  }
  0x2a   :  { %1364 = vmatprep.subr.bf16.mxu1 %v8806_v63  ;;  %v8805_v63 = vld [vmem:[%s12868_s0 + $0x170] ss:$8 sps:$4 sm:$0xff]  }
  0x2b   :  { %625 = vmatpush1.bf16.msra.mxu0 %v8697_v22  ;;  %v8841_v22 = vld [vmem:[%s12867_s1 + $0x1d0] ss:$8 sps:$4 sm:$0xff]  }
  0x2c   :  { %626 = vmatprep.subr.bf16.mxu0 %v8698_v23  ;;  %v8748_v23 = vld [vmem:[%s12868_s0 + $0xb0] ss:$8 sps:$4 sm:$0xff]  }
  0x2d   :  { %1365 = vmatpush1.bf16.msra.mxu1 %v8808_v0  ;;  %v8814_v0 = vld [vmem:[%s12868_s0 + $0x184] ss:$8 sps:$4 sm:$0xff]  }
  0x2e   :  { %1366 = vmatprep.subr.bf16.mxu1 %v8812_v3  ;;  %v8881_v3 = vld [vmem:[%s12867_s1 + $0x280] ss:$8 sps:$4 sm:$0xff]  }
  0x2f   :  { %627 = vmatpush1.bf16.msra.mxu0 %v8700_v24  ;;  %v8842_v24 = vld [vmem:[%s12867_s1 + $0x1e4] ss:$8 sps:$4 sm:$0xff]  }
  0x30   :  { %628 = vmatprep.subr.bf16.mxu0 %v8701_v25  ;;  %v8749_v25 = vld [vmem:[%s12868_s0 + $0xc4] ss:$8 sps:$4 sm:$0xff]  }
  0x31   :  { %1367 = vmatpush1.bf16.msra.mxu1 %v8816_v5  ;;  %v8826_v5 = vld [vmem:[%s12868_s0 + $0x190] ss:$8 sps:$4 sm:$0xff]  }
  0x32   :  { %1368 = vmatprep.subr.bf16.mxu1 %v8818_v7  ;;  %v8835_v7 = vld [vmem:[%s12868_s0 + $0x1a4] ss:$8 sps:$4 sm:$0xff]  }
  0x33   :  { %629 = vmatpush1.bf16.msra.mxu0 %v8703_v26  ;;  %v8846_v26 = vld [vmem:[%s12867_s1 + $0x1e0] ss:$8 sps:$4 sm:$0xff]  }
  0x34   :  { %630 = vmatprep.subr.bf16.mxu0 %v8704_v27  ;;  %v8848_v27 = vld [vmem:[%s12867_s1 + $0x1f4] ss:$8 sps:$4 sm:$0xff]  }
  0x35   :  { %1369 = vmatpush1.bf16.msra.mxu1 %v8820_v8 }
  0x36   :  { %1370 = vmatprep.subr.bf16.mxu1 %v8821_v9  ;;  %v8838_v9 = vld [vmem:[%s12868_s0 + $0x1a0] ss:$8 sps:$4 sm:$0xff]  }
  0x37   :  { %631 = vmatpush1.bf16.msra.mxu0 %v8706_v28  ;;  %v8850_v28 = vld [vmem:[%s12867_s1 + $0x1f0] ss:$8 sps:$4 sm:$0xff]  }
  0x38   :  { %632 = vmatprep.subr.bf16.mxu0 %v8707_v29  ;;  %v8751_v29 = vld [vmem:[%s12868_s0 + $0xc0] ss:$8 sps:$4 sm:$0xff]  }
  0x39   :  { %1371 = vmatpush1.bf16.msra.mxu1 %v8825_v10 }
  0x3a   :  { %1372 = vmatprep.subr.bf16.mxu1 %v8827_v13  ;;  %v81_v13 = vld [vmem:[%s12869_s2 + $0x8] sm:$0xff] }
  0x3b   :  { %633 = vmatpush1.bf16.msra.mxu0 %v8709_v30  ;;  %v8752_v30 = vld [vmem:[%s12868_s0 + $0xd4] ss:$8 sps:$4 sm:$0xff]  }
  0x3c   :  { %634 = vmatprep.subr.bf16.mxu0 %v8710_v31  ;;  %v8851_v31 = vld [vmem:[%s12867_s1 + $0x220] ss:$8 sps:$4 sm:$0xff]  }
  0x3d   :  { %1373 = vmatpush1.bf16.msra.mxu1 %v8829_v14  ;;  %v8884_v14 = vld [vmem:[%s12867_s1 + $0x290] ss:$8 sps:$4 sm:$0xff]  }
  0x3e   :  { %1374 = vmatprep.subr.bf16.mxu1 %v8833_v17 }
  0x3f   :  { %635 = vmatpush1.bf16.msra.mxu0 %v8712_v32  ;;  %v8853_v32 = vld [vmem:[%s12867_s1 + $0x224] ss:$8 sps:$4 sm:$0xff]  }
  0x40   :  { %2096 = vmatprep.subr.bf16.mxu0 %v8811_v2  ;;  %v8823_v2 = vld [vmem:[%s12868_s0 + $0x194] ss:$8 sps:$4 sm:$0xff]  }
  0x41   :  { %1375 = vmatpush1.bf16.msra.mxu1 %v8837_v19 }
  0x42   :  { %637 = vmatmul.mubr.bf16.vlgmr.msra.gmra.mrb[0].mxu0 %v8713_v33  ;;  %1376 = vmatprep.subr.bf16.mxu1 %v8839_v21  ;;  %v8754_v33 = vld [vmem:[%s12868_s0 + $0xd0] ss:$8 sps:$4 sm:$0xff]  }
  0x43   :  { %646 = vmatprep.mubr.bf16.mxu0 %v8716_v34  ;;  %2097 = vmatpush1.bf16.msra.mxu0 %v8809_v1  ;;  %v8755_v34 = vld [vmem:[%s12868_s0 + $0xe4] ss:$8 sps:$4 sm:$0xff]   ;;  %v8817_v1 = vld [vmem:[%s12868_s0 + $0x180] ss:$8 sps:$4 sm:$0xff]   ;;  %v8847_v21 = vld [vmem:[%s12868_s0 + $0x1b0] ss:$8 sps:$4 sm:$0xff]  }
  0x44   :  { %2098 = vmatprep.subr.bf16.mxu0 %v8832_v16 }
  0x45   :  { %1377 = vmatpush1.bf16.msra.mxu1 %v8841_v22 }
  0x46   :  { %1378 = vmatprep.subr.bf16.mxu1 %v8842_v24  ;;  %v8854_v24 = vld [vmem:[%s12868_s0 + $0x1c4] ss:$8 sps:$4 sm:$0xff]  }
  0x47   :  { %2099 = vmatpush1.bf16.msra.mxu0 %v8830_v15  ;;  %v8886_v15 = vld [vmem:[%s12867_s1 + $0x294] ss:$8 sps:$4 sm:$0xff]  }
  0x48   :  { %2100 = vmatprep.subr.bf16.mxu0 %v8853_v32 }
  0x49   :  { %1379 = vmatpush1.bf16.msra.mxu1 %v8846_v26 }
  0x4a   :  { %647 = vmatmul.mubr.bf16.gmra.mrb[4].mxu0 %v8718_v35  ;;  %1380 = vmatprep.subr.bf16.mxu1 %v8848_v27  ;;  %v8757_v35 = vld [vmem:[%s12868_s0 + $0xe0] ss:$8 sps:$4 sm:$0xff]  }
  0x4b   :  { %656 = vmatprep.mubr.bf16.mxu0 %v8719_v36  ;;  %2101 = vmatpush1.bf16.msra.mxu0 %v8851_v31  ;;  %v8758_v36 = vld [vmem:[%s12868_s0 + $0xf4] ss:$8 sps:$4 sm:$0xff]  }
  0x4d   :  { %1381 = vmatpush1.bf16.msra.mxu1 %v8850_v28 }
  0x52   :  { %657 = vmatmul.mubr.bf16.gmra.mrb[8].mxu0 %v8721_v37  ;;  %v8860_v37 = vld [vmem:[%s12867_s1 + $0x230] ss:$8 sps:$4 sm:$0xff]  }
  0x53   :  { %666 = vmatprep.mubr.bf16.mxu0 %v8722_v38  ;;  %v8862_v38 = vld [vmem:[%s12867_s1 + $0x234] ss:$8 sps:$4 sm:$0xff]  }
  0x54   :  { %2102 = vmatprep.subr.bf16.mxu0 %v8862_v38 }
  0x55   :  { %2103 = vmatpush1.bf16.msra.mxu0 %v8860_v37  ;;  %v8856_v37 = vld [vmem:[%s12868_s0 + $0x1c0] ss:$8 sps:$4 sm:$0xff]  }
  0x5a   :  { %667 = vmatmul.mubr.bf16.gmra.mrb[12].mxu0 %v8724_v39  ;;  %v8760_v39 = vld [vmem:[%s12868_s0 + $0xf0] ss:$8 sps:$4 sm:$0xff]  }
  0x5b   :  { %676 = vmatprep.mubr.bf16.mxu0 %v8725_v40  ;;  %v8761_v40 = vld [vmem:[%s12868_s0 + $0x104] ss:$8 sps:$4 sm:$0xff]  }
  0x62   :  { %677 = vmatmul.mubr.bf16.gmra.mrb[16].mxu0 %v8727_v43  ;;  %v8869_v43 = vld [vmem:[%s12867_s1 + $0x240] ss:$8 sps:$4 sm:$0xff]  }
  0x63   :  { %686 = vmatprep.mubr.bf16.mxu0 %v8728_v44  ;;  %v8871_v44 = vld [vmem:[%s12867_s1 + $0x244] ss:$8 sps:$4 sm:$0xff]  }
  0x64   :  { %2104 = vmatprep.subr.bf16.mxu0 %v8871_v44  ;;  %v8889_v44 = vld [vmem:[%s12867_s1 + $0x2a4] ss:$8 sps:$4 sm:$0xff]  }
  0x65   :  { %2105 = vmatpush1.bf16.msra.mxu0 %v8869_v43  ;;  %v8887_v43 = vld [vmem:[%s12867_s1 + $0x2a0] ss:$8 sps:$4 sm:$0xff]  }
  0x6a   :  { %687 = vmatmul.mubr.bf16.gmra.mrb[20].mxu0 %v8730_v49  ;;  %v8872_v49 = vld [vmem:[%s12867_s1 + $0x250] ss:$8 sps:$4 sm:$0xff]  }
  0x6b   :  { %696 = vmatprep.mubr.bf16.mxu0 %v8731_v50  ;;  %v8874_v50 = vld [vmem:[%s12867_s1 + $0x254] ss:$8 sps:$4 sm:$0xff]  }
  0x6c   :  { %2106 = vmatprep.subr.bf16.mxu0 %v8874_v50 }
  0x6d   :  { %2107 = vmatpush1.bf16.msra.mxu0 %v8872_v49 }
  0x72   :  { %697 = vmatmul.mubr.bf16.gmra.mrb[24].mxu0 %v8733_v55  ;;  %v8875_v55 = vld [vmem:[%s12867_s1 + $0x260] ss:$8 sps:$4 sm:$0xff]  }
  0x73   :  { %706 = vmatprep.mubr.bf16.mxu0 %v8734_v56  ;;  %v8877_v56 = vld [vmem:[%s12867_s1 + $0x264] ss:$8 sps:$4 sm:$0xff]  }
  0x74   :  { %2108 = vmatprep.subr.bf16.mxu0 %v8877_v56 }
  0x75   :  { %2109 = vmatpush1.bf16.msra.mxu0 %v8875_v55  ;;  %v8859_v55 = vld [vmem:[%s12868_s0 + $0x1d0] ss:$8 sps:$4 sm:$0xff]  }
  0x7a   :  { %707 = vmatmul.mubr.bf16.gmra.mrb[28].mxu0 %v8736_v61  ;;  %v8878_v61 = vld [vmem:[%s12867_s1 + $0x270] ss:$8 sps:$4 sm:$0xff]  }
  0x7b   :  { %716 = vmatprep.mubr.bf16.mxu0 %v8737_v62  ;;  %v8880_v62 = vld [vmem:[%s12867_s1 + $0x274] ss:$8 sps:$4 sm:$0xff]  }
  0x7c   :  { %2110 = vmatprep.subr.bf16.mxu0 %v8880_v62 }
  0x7d   :  { %2111 = vmatpush1.bf16.msra.mxu0 %v8878_v61 }
  0x82   :  { %717 = vmatmul.mubr.bf16.gmra.mrb[32].mxu0 %v8739_v4  ;;  %v8883_v4 = vld [vmem:[%s12867_s1 + $0x284] ss:$8 sps:$4 sm:$0xff]  }
  0x83   :  { %726 = vmatprep.mubr.bf16.mxu0 %v8740_v6  ;;  %2112 = vmatprep.subr.bf16.mxu0 %v8883_v4  ;;  %v116_v6 = vlaneseq }
  0x84   :  { %2113 = vmatpush1.bf16.msra.mxu0 %v8881_v3 }
  0x85   :  { %v9749_v8 = vshrl.u32 %v116_v6, 7  ;;  %2114 = vmatprep.subr.bf16.mxu0 %v8886_v15  ;;  %v8892_v15 = vld [vmem:[%s12867_s1 + $0x2b4] ss:$8 sps:$4 sm:$0xff]  }
  0x87   :  { %v118_v10 = vsub.s32 0, %v9749_v8 }
  0x88   :  { %2115 = vmatpush1.bf16.msra.mxu0 %v8884_v14  ;;  %v8890_v14 = vld [vmem:[%s12867_s1 + $0x2b0] ss:$8 sps:$4 sm:$0xff]  }
  0x89   :  { %v9772_v17 = vrot.slane %v81_v13, %v118_v10  ;;  %2116 = vmatprep.subr.bf16.mxu0 %v8889_v44 }
  0x8a   :  { %727 = vmatmul.mubr.bf16.gmra.mrb[36].mxu0 %v8742_v11  ;;  %v80_v11 = vld [vmem:[%s12869_s2] sm:$0xff] }
  0x8b   :  { %736 = vmatprep.mubr.bf16.mxu0 %v8743_v12  ;;  %v8844_v12 = vld [vmem:[%s12868_s0 + $0x1b4] ss:$8 sps:$4 sm:$0xff]   ;;  %v9770_v16 = vrot.slane %v80_v11, %v118_v10 }
  0x8c   :  { %2117 = vmatpush1.bf16.msra.mxu0 %v8887_v43  ;;  %v8866_v11 = vld [vmem:[%s12868_s0 + $0x1f4] ss:$8 sps:$4 sm:$0xff]  }
  0x8d   :  { %2118 = vmatprep.subr.bf16.mxu0 %v8892_v15  ;;  %v8898_v15 = vld [vmem:[%s12867_s1 + $0x2d4] ss:$8 sps:$4 sm:$0xff]  }
  0x90   :  { %2119 = vmatpush1.bf16.msra.mxu0 %v8890_v14  ;;  %v8896_v14 = vld [vmem:[%s12867_s1 + $0x2d0] ss:$8 sps:$4 sm:$0xff]  }
  0x92   :  { %737 = vmatmul.mubr.bf16.gmra.mrb[40].mxu0 %v8745_v18 }
  0x93   :  { %746 = vmatprep.mubr.bf16.mxu0 %v8746_v20 }
  0x9a   :  { %747 = vmatmul.mubr.bf16.gmra.mrb[44].mxu0 %v8748_v23 }
  0x9b   :  { %756 = vmatprep.mubr.bf16.mxu0 %v8749_v25 }
  0xa2   :  { %757 = vmatmul.mubr.bf16.gmra.mrb[48].mxu0 %v8751_v29 }
  0xa3   :  { %766 = vmatprep.mubr.bf16.mxu0 %v8752_v30 }
  0xaa   :  { %767 = vmatmul.mubr.bf16.gmra.mrb[52].mxu0 %v8754_v33 }
  0xab   :  { %776 = vmatprep.mubr.bf16.mxu0 %v8755_v34 }
  0xb2   :  { %777 = vmatmul.mubr.bf16.gmra.mrb[56].mxu0 %v8757_v35 }
  0xb3   :  { %786 = vmatprep.mubr.bf16.mxu0 %v8758_v36 }
  0xba   :  { %787 = vmatmul.mubr.bf16.gmra.mrb[60].mxu0 %v8760_v39 }
  0xbb   :  { %796 = vmatprep.mubr.bf16.mxu0 %v8761_v40  ;;  %v8857_v40 = vld [vmem:[%s12868_s0 + $0x1d4] ss:$8 sps:$4 sm:$0xff]  }
  0xc2   :  { %797 = vmatmul.mubr.bf16.gmra.mrb[64].mxu0 %v8763_v41 }
  0xc3   :  { %806 = vmatprep.mubr.bf16.mxu0 %v8764_v42 }
  0xca   :  { %807 = vmatmul.mubr.bf16.gmra.mrb[68].mxu0 %v8766_v45 }
  0xcb   :  { %816 = vmatprep.mubr.bf16.mxu0 %v8767_v46 }
  0xd2   :  { %817 = vmatmul.mubr.bf16.gmra.mrb[72].mxu0 %v8769_v47 }
  0xd3   :  { %826 = vmatprep.mubr.bf16.mxu0 %v8770_v48 }
  0xda   :  { %827 = vmatmul.mubr.bf16.gmra.mrb[76].mxu0 %v8772_v51 }
  0xdb   :  { %836 = vmatprep.mubr.bf16.mxu0 %v8775_v52 }
  0xe2   :  { %837 = vmatmul.mubr.bf16.gmra.mrb[80].mxu0 %v8778_v53 }
  0xe3   :  { %846 = vmatprep.mubr.bf16.mxu0 %v8784_v54 }
  0xea   :  { %847 = vmatmul.mubr.bf16.gmra.mrb[84].mxu0 %v8787_v57 }
  0xeb   :  { %856 = vmatprep.mubr.bf16.mxu0 %v8793_v58  ;;  %v8863_v58 = vld [vmem:[%s12868_s0 + $0x1e4] ss:$8 sps:$4 sm:$0xff]  }
  0xf2   :  { %857 = vmatmul.mubr.bf16.gmra.mrb[88].mxu0 %v8796_v59 }
  0xf3   :  { %866 = vmatprep.mubr.bf16.mxu0 %v8802_v60 }
  0xfa   :  { %867 = vmatmul.mubr.bf16.gmra.mrb[92].mxu0 %v8805_v63 }
  0xfb   :  { %876 = vmatprep.mubr.bf16.mxu0 %v8814_v0 }
 0x102   :  { %877 = vmatmul.mubr.bf16.gmra.mrb[96].mxu0 %v8817_v1 }
 0x103   :  { %886 = vmatprep.mubr.bf16.mxu0 %v8823_v2 }
 0x10a   :  { %887 = vmatmul.mubr.bf16.gmra.mrb[100].mxu0 %v8826_v5 }
 0x10b   :  { %896 = vmatprep.mubr.bf16.mxu0 %v8835_v7  ;;  %v8865_v7 = vld [vmem:[%s12868_s0 + $0x1e0] ss:$8 sps:$4 sm:$0xff]  }
 0x112   :  { %897 = vmatmul.mubr.bf16.gmra.mrb[104].mxu0 %v8838_v9 }
 0x113   :  { %906 = vmatprep.mubr.bf16.mxu0 %v8844_v12 }
 0x115   :  { %v638_v18 = vpop.f32.mrb[0].mxu0 }
 0x116   :  { %v639_v19 = vadd.f32 %v638_v18, %v9770_v16  ;;  %v640_v20 = vpop.f32.mrb[1].mxu0 }
 0x117   :  { %v642_v22 = vpop.f32.mrb[2].mxu0  ;;  %v641_v23 = vadd.f32 %v640_v20, %v9772_v17 }
 0x118   :  { %v643_v25 = vadd.f32 %v642_v22, %v9770_v16  ;;  %v644_v26 = vpop.f32.mrb[3].mxu0  ;;  %v957_v28 = vmax.f32 %v639_v19, 0.0 }
 0x119   :  { %v645_v27 = vadd.f32 %v644_v26, %v9772_v17  ;;  %v958_v30 = vmax.f32 %v641_v23, 0.0 }
 0x11a   :  { %v959_v29 = vmax.f32 %v643_v25, 0.0  ;;  %907 = vmatmul.mubr.bf16.gmra.mrb[108].mxu0 %v8847_v21 }
 0x11b   :  { %v960_v31 = vmax.f32 %v645_v27, 0.0  ;;  %916 = vmatprep.mubr.bf16.mxu0 %v8854_v24 }
 0x11c   :  { %v1085_v32 = vpack.c.bf16 %v959_v29, %v957_v28  ;;  %v8868_v28 = vld [vmem:[%s12868_s0 + $0x1f0] ss:$8 sps:$4 sm:$0xff]  }
 0x11d   :  { %v648_v33 = vpop.f32.mrb[4].mxu0  ;;  %v1086_v34 = vpack.c.bf16 %v960_v31, %v958_v30 }
 0x11e   :  { %v649_v35 = vadd.f32 %v648_v33, %v9770_v16  ;;  %v650_v36 = vpop.f32.mrb[5].mxu0 }
 0x11f   :  { %v651_v38 = vadd.f32 %v650_v36, %v9772_v17  ;;  %v652_v39 = vpop.f32.mrb[6].mxu0  ;;  %1382 = vmatprep.mubr.bf16.mxu1 %v1086_v34 }
 0x120   :  { %v653_v41 = vadd.f32 %v652_v39, %v9770_v16  ;;  %v654_v42 = vpop.f32.mrb[7].mxu0  ;;  %1383 = vmatmul.mubr.bf16.vlgmr.msra.gmra.mrb[0].mxu1 %v1085_v32  ;;  %v961_v46 = vmax.f32 %v649_v35, 0.0 }
 0x121   :  { %v655_v45 = vadd.f32 %v654_v42, %v9772_v17  ;;  %v962_v48 = vmax.f32 %v651_v38, 0.0 }
 0x122   :  { %v963_v47 = vmax.f32 %v653_v41, 0.0  ;;  %917 = vmatmul.mubr.bf16.gmra.mrb[112].mxu0 %v8856_v37 }
 0x123   :  { %v964_v49 = vmax.f32 %v655_v45, 0.0  ;;  %926 = vmatprep.mubr.bf16.mxu0 %v8857_v40 }
 0x124   :  { %v1087_v50 = vpack.c.bf16 %v963_v47, %v961_v46  ;;  %v8893_v47 = vld [vmem:[%s12867_s1 + $0x2c0] ss:$8 sps:$4 sm:$0xff]  }
 0x125   :  { %v658_v51 = vpop.f32.mrb[8].mxu0  ;;  %v1088_v52 = vpack.c.bf16 %v964_v49, %v962_v48  ;;  %v8895_v48 = vld [vmem:[%s12867_s1 + $0x2c4] ss:$8 sps:$4 sm:$0xff]  }
 0x126   :  { %v659_v53 = vadd.f32 %v658_v51, %v9770_v16  ;;  %v660_v54 = vpop.f32.mrb[9].mxu0  ;;  %2120 = vmatprep.subr.bf16.mxu0 %v8895_v48  ;;  %v8902_v48 = vld [vmem:[%s12867_s1 + $0x2e0] ss:$8 sps:$4 sm:$0xff]  }
 0x127   :  { %v661_v56 = vadd.f32 %v660_v54, %v9772_v17  ;;  %v662_v57 = vpop.f32.mrb[10].mxu0  ;;  %1392 = vmatprep.mubr.bf16.mxu1 %v1088_v52  ;;  %2121 = vmatpush1.bf16.msra.mxu0 %v8893_v47 }
 0x128   :  { %v663_v59 = vadd.f32 %v662_v57, %v9770_v16  ;;  %v664_v60 = vpop.f32.mrb[11].mxu0  ;;  %1393 = vmatmul.mubr.bf16.gmra.mrb[4].mxu1 %v1087_v50  ;;  %v965_v62 = vmax.f32 %v659_v53, 0.0  ;;  %2122 = vmatprep.subr.bf16.mxu0 %v8898_v15 }
 0x129   :  { %v665_v61 = vadd.f32 %v664_v60, %v9772_v17  ;;  %v966_v0 = vmax.f32 %v661_v56, 0.0 }
 0x12a   :  { %v967_v63 = vmax.f32 %v663_v59, 0.0  ;;  %927 = vmatmul.mubr.bf16.gmra.mrb[116].mxu0 %v8859_v55 }
 0x12b   :  { %v968_v1 = vmax.f32 %v665_v61, 0.0  ;;  %936 = vmatprep.mubr.bf16.mxu0 %v8863_v58  ;;  %2123 = vmatpush1.bf16.msra.mxu0 %v8896_v14 }
 0x12c   :  { %v1089_v2 = vpack.c.bf16 %v967_v63, %v965_v62 }
 0x12d   :  { %v668_v3 = vpop.f32.mrb[12].mxu0  ;;  %v1090_v4 = vpack.c.bf16 %v968_v1, %v966_v0 }
 0x12e   :  { %v669_v5 = vadd.f32 %v668_v3, %v9770_v16  ;;  %v670_v6 = vpop.f32.mrb[13].mxu0 }
 0x12f   :  { %v671_v9 = vadd.f32 %v670_v6, %v9772_v17  ;;  %v672_v10 = vpop.f32.mrb[14].mxu0  ;;  %1402 = vmatprep.mubr.bf16.mxu1 %v1090_v4 }
 0x130   :  { %v673_v12 = vadd.f32 %v672_v10, %v9770_v16  ;;  %v674_v13 = vpop.f32.mrb[15].mxu0  ;;  %1403 = vmatmul.mubr.bf16.gmra.mrb[8].mxu1 %v1089_v2  ;;  %v969_v19 = vmax.f32 %v669_v5, 0.0 }
 0x131   :  { %v675_v18 = vadd.f32 %v674_v13, %v9772_v17  ;;  %v970_v21 = vmax.f32 %v671_v9, 0.0 }
 0x132   :  { %v971_v20 = vmax.f32 %v673_v12, 0.0  ;;  %937 = vmatmul.mubr.bf16.gmra.mrb[120].mxu0 %v8865_v7 }
 0x133   :  { %v972_v22 = vmax.f32 %v675_v18, 0.0  ;;  %946 = vmatprep.mubr.bf16.mxu0 %v8866_v11 }
 0x134   :  { %v1091_v23 = vpack.c.bf16 %v971_v20, %v969_v19 }
 0x135   :  { %v678_v24 = vpop.f32.mrb[16].mxu0  ;;  %v1092_v25 = vpack.c.bf16 %v972_v22, %v970_v21 }
 0x136   :  { %v679_v26 = vadd.f32 %v678_v24, %v9770_v16  ;;  %v680_v27 = vpop.f32.mrb[17].mxu0 }
 0x137   :  { %v681_v29 = vadd.f32 %v680_v27, %v9772_v17  ;;  %v682_v30 = vpop.f32.mrb[18].mxu0  ;;  %1412 = vmatprep.mubr.bf16.mxu1 %v1092_v25 }
 0x138   :  { %v683_v31 = vadd.f32 %v682_v30, %v9770_v16  ;;  %v684_v32 = vpop.f32.mrb[19].mxu0  ;;  %1413 = vmatmul.mubr.bf16.gmra.mrb[12].mxu1 %v1091_v23  ;;  %v973_v34 = vmax.f32 %v679_v26, 0.0 }
 0x139   :  { %v685_v33 = vadd.f32 %v684_v32, %v9772_v17  ;;  %v974_v36 = vmax.f32 %v681_v29, 0.0 }
 0x13a   :  { %v975_v35 = vmax.f32 %v683_v31, 0.0  ;;  %947 = vmatmul.mubr.bf16.gmra.mrb[124].mxu0 %v8868_v28 }
 0x13b   :  { %v976_v37 = vmax.f32 %v685_v33, 0.0 }
 0x13c   :  { %v1093_v38 = vpack.c.bf16 %v975_v35, %v973_v34 }
 0x13d   :  { %v688_v39 = vpop.f32.mrb[20].mxu0  ;;  %v1094_v40 = vpack.c.bf16 %v976_v37, %v974_v36  ;;  %v8899_v37 = vld [vmem:[%s12867_s1 + $0x300] ss:$8 sps:$4 sm:$0xff]  }
 0x13e   :  { %v689_v41 = vadd.f32 %v688_v39, %v9770_v16  ;;  %v690_v42 = vpop.f32.mrb[21].mxu0 }
 0x13f   :  { %v691_v43 = vadd.f32 %v690_v42, %v9772_v17  ;;  %v692_v44 = vpop.f32.mrb[22].mxu0  ;;  %1422 = vmatprep.mubr.bf16.mxu1 %v1094_v40 }
 0x140   :  { %v693_v45 = vadd.f32 %v692_v44, %v9770_v16  ;;  %v694_v46 = vpop.f32.mrb[23].mxu0  ;;  %1423 = vmatmul.mubr.bf16.gmra.mrb[16].mxu1 %v1093_v38  ;;  %v977_v50 = vmax.f32 %v689_v41, 0.0  ;;  %v8901_v38 = vld [vmem:[%s12867_s1 + $0x304] ss:$8 sps:$4 sm:$0xff]  }
 0x141   :  { %v695_v49 = vadd.f32 %v694_v46, %v9772_v17  ;;  %v978_v52 = vmax.f32 %v691_v43, 0.0  ;;  %2842 = vmatprep.subr.bf16.mxu1 %v8901_v38 }
 0x142   :  { %v979_v51 = vmax.f32 %v693_v45, 0.0  ;;  %2843 = vmatpush1.bf16.msra.mxu1 %v8899_v37 }
 0x143   :  { %v980_v53 = vmax.f32 %v695_v49, 0.0  ;;  %v8904_v49 = vld [vmem:[%s12867_s1 + $0x2e4] ss:$8 sps:$4 sm:$0xff]  }
 0x144   :  { %v1095_v54 = vpack.c.bf16 %v979_v51, %v977_v50  ;;  %2124 = vmatprep.subr.bf16.mxu0 %v8904_v49 }
 0x145   :  { %v698_v55 = vpop.f32.mrb[24].mxu0  ;;  %v1096_v56 = vpack.c.bf16 %v980_v53, %v978_v52  ;;  %2125 = vmatpush1.bf16.msra.mxu0 %v8902_v48 }
 0x146   :  { %v699_v57 = vadd.f32 %v698_v55, %v9770_v16  ;;  %v700_v58 = vpop.f32.mrb[25].mxu0 }
 0x147   :  { %v701_v59 = vadd.f32 %v700_v58, %v9772_v17  ;;  %v702_v60 = vpop.f32.mrb[26].mxu0  ;;  %1432 = vmatprep.mubr.bf16.mxu1 %v1096_v56 }
 0x148   :  { %v703_v61 = vadd.f32 %v702_v60, %v9770_v16  ;;  %v704_v62 = vpop.f32.mrb[27].mxu0  ;;  %1433 = vmatmul.mubr.bf16.gmra.mrb[20].mxu1 %v1095_v54  ;;  %v981_v0 = vmax.f32 %v699_v57, 0.0 }
 0x149   :  { %v705_v63 = vadd.f32 %v704_v62, %v9772_v17  ;;  %v982_v2 = vmax.f32 %v701_v59, 0.0 }
 0x14a   :  { %v983_v1 = vmax.f32 %v703_v61, 0.0 }
 0x14b   :  { %v984_v3 = vmax.f32 %v705_v63, 0.0 }
 0x14c   :  { %v1097_v4 = vpack.c.bf16 %v983_v1, %v981_v0 }
 0x14d   :  { %v708_v5 = vpop.f32.mrb[28].mxu0  ;;  %v1098_v6 = vpack.c.bf16 %v984_v3, %v982_v2 }
 0x14e   :  { %v709_v7 = vadd.f32 %v708_v5, %v9770_v16  ;;  %v710_v9 = vpop.f32.mrb[29].mxu0  ;;  %v8905_v5 = vld [vmem:[%s12867_s1 + $0x310] ss:$8 sps:$4 sm:$0xff]  }
 0x14f   :  { %v711_v10 = vadd.f32 %v710_v9, %v9772_v17  ;;  %v712_v11 = vpop.f32.mrb[30].mxu0  ;;  %1442 = vmatprep.mubr.bf16.mxu1 %v1098_v6  ;;  %v8907_v6 = vld [vmem:[%s12867_s1 + $0x314] ss:$8 sps:$4 sm:$0xff]  }
 0x150   :  { %v713_v12 = vadd.f32 %v712_v11, %v9770_v16  ;;  %v714_v13 = vpop.f32.mrb[31].mxu0  ;;  %1443 = vmatmul.mubr.bf16.gmra.mrb[24].mxu1 %v1097_v4  ;;  %v985_v19 = vmax.f32 %v709_v7, 0.0  ;;  %2844 = vmatprep.subr.bf16.mxu1 %v8907_v6 }
 0x151   :  { %v715_v18 = vadd.f32 %v714_v13, %v9772_v17  ;;  %v986_v21 = vmax.f32 %v711_v10, 0.0  ;;  %2845 = vmatpush1.bf16.msra.mxu1 %v8905_v5 }
 0x152   :  { %v987_v20 = vmax.f32 %v713_v12, 0.0 }
 0x153   :  { %v988_v22 = vmax.f32 %v715_v18, 0.0 }
 0x154   :  { %v1099_v23 = vpack.c.bf16 %v987_v20, %v985_v19  ;;  %v8908_v19 = vld [vmem:[%s12867_s1 + $0x2f0] ss:$8 sps:$4 sm:$0xff]   ;;  %v8910_v20 = vld [vmem:[%s12867_s1 + $0x2f4] ss:$8 sps:$4 sm:$0xff]  }
 0x155   :  { %v718_v24 = vpop.f32.mrb[32].mxu0  ;;  %v1100_v25 = vpack.c.bf16 %v988_v22, %v986_v21  ;;  %2126 = vmatprep.subr.bf16.mxu0 %v8910_v20 }
 0x156   :  { %v719_v26 = vadd.f32 %v718_v24, %v9770_v16  ;;  %v720_v27 = vpop.f32.mrb[33].mxu0  ;;  %2127 = vmatpush1.bf16.msra.mxu0 %v8908_v19 }
 0x157   :  { %v721_v28 = vadd.f32 %v720_v27, %v9772_v17  ;;  %v722_v29 = vpop.f32.mrb[34].mxu0  ;;  %1452 = vmatprep.mubr.bf16.mxu1 %v1100_v25 }
 0x158   :  { %v723_v30 = vadd.f32 %v722_v29, %v9770_v16  ;;  %v724_v31 = vpop.f32.mrb[35].mxu0  ;;  %1453 = vmatmul.mubr.bf16.gmra.mrb[28].mxu1 %v1099_v23  ;;  %v989_v33 = vmax.f32 %v719_v26, 0.0 }
 0x159   :  { %v725_v32 = vadd.f32 %v724_v31, %v9772_v17  ;;  %v990_v35 = vmax.f32 %v721_v28, 0.0 }
 0x15a   :  { %v991_v34 = vmax.f32 %v723_v30, 0.0 }
 0x15b   :  { %v992_v36 = vmax.f32 %v725_v32, 0.0 }
 0x15c   :  { %v1101_v39 = vpack.c.bf16 %v991_v34, %v989_v33 }
 0x15d   :  { %v728_v40 = vpop.f32.mrb[36].mxu0  ;;  %v1102_v41 = vpack.c.bf16 %v992_v36, %v990_v35 }
 0x15e   :  { %v729_v42 = vadd.f32 %v728_v40, %v9770_v16  ;;  %v730_v43 = vpop.f32.mrb[37].mxu0 }
 0x15f   :  { %v731_v44 = vadd.f32 %v730_v43, %v9772_v17  ;;  %v732_v45 = vpop.f32.mrb[38].mxu0  ;;  %1462 = vmatprep.mubr.bf16.mxu1 %v1102_v41  ;;  %v8911_v41 = vld [vmem:[%s12867_s1 + $0x320] ss:$8 sps:$4 sm:$0xff]  }
 0x160   :  { %v733_v46 = vadd.f32 %v732_v45, %v9770_v16  ;;  %v734_v47 = vpop.f32.mrb[39].mxu0  ;;  %1463 = vmatmul.mubr.bf16.gmra.mrb[32].mxu1 %v1101_v39  ;;  %v993_v51 = vmax.f32 %v729_v42, 0.0  ;;  %v8913_v42 = vld [vmem:[%s12867_s1 + $0x324] ss:$8 sps:$4 sm:$0xff]  }
 0x161   :  { %v735_v50 = vadd.f32 %v734_v47, %v9772_v17  ;;  %v994_v53 = vmax.f32 %v731_v44, 0.0  ;;  %2846 = vmatprep.subr.bf16.mxu1 %v8913_v42 }
 0x162   :  { %v995_v52 = vmax.f32 %v733_v46, 0.0  ;;  %2847 = vmatpush1.bf16.msra.mxu1 %v8911_v41  ;;  %v8919_v41 = vld [vmem:[%s12867_s1 + $0x344] ss:$8 sps:$4 sm:$0xff]  }
 0x163   :  { %v996_v54 = vmax.f32 %v735_v50, 0.0 }
 0x164   :  { %v1103_v55 = vpack.c.bf16 %v995_v52, %v993_v51 }
 0x165   :  { %v738_v56 = vpop.f32.mrb[40].mxu0  ;;  %v1104_v57 = vpack.c.bf16 %v996_v54, %v994_v53 }
 0x166   :  { %v739_v58 = vadd.f32 %v738_v56, %v9770_v16  ;;  %v740_v59 = vpop.f32.mrb[41].mxu0 }
 0x167   :  { %v741_v60 = vadd.f32 %v740_v59, %v9772_v17  ;;  %v742_v61 = vpop.f32.mrb[42].mxu0  ;;  %1472 = vmatprep.mubr.bf16.mxu1 %v1104_v57 }
 0x168   :  { %v743_v62 = vadd.f32 %v742_v61, %v9770_v16  ;;  %v744_v63 = vpop.f32.mrb[43].mxu0  ;;  %1473 = vmatmul.mubr.bf16.gmra.mrb[36].mxu1 %v1103_v55  ;;  %v997_v1 = vmax.f32 %v739_v58, 0.0 }
 0x169   :  { %v745_v0 = vadd.f32 %v744_v63, %v9772_v17  ;;  %v998_v3 = vmax.f32 %v741_v60, 0.0 }
 0x16a   :  { %v999_v2 = vmax.f32 %v743_v62, 0.0 }
 0x16b   :  { %v1000_v4 = vmax.f32 %v745_v0, 0.0 }
 0x16c   :  { %v1105_v7 = vpack.c.bf16 %v999_v2, %v997_v1 }
 0x16d   :  { %v748_v9 = vpop.f32.mrb[44].mxu0  ;;  %v1106_v10 = vpack.c.bf16 %v1000_v4, %v998_v3 }
 0x16e   :  { %v749_v11 = vadd.f32 %v748_v9, %v9770_v16  ;;  %v750_v12 = vpop.f32.mrb[45].mxu0  ;;  %v8916_v9 = vld [vmem:[%s12867_s1 + $0x334] ss:$8 sps:$4 sm:$0xff]  }
 0x16f   :  { %v751_v13 = vadd.f32 %v750_v12, %v9772_v17  ;;  %v752_v14 = vpop.f32.mrb[46].mxu0  ;;  %1482 = vmatprep.mubr.bf16.mxu1 %v1106_v10  ;;  %2848 = vmatprep.subr.bf16.mxu1 %v8916_v9 }
 0x170   :  { %v753_v15 = vadd.f32 %v752_v14, %v9770_v16  ;;  %v754_v18 = vpop.f32.mrb[47].mxu0  ;;  %1483 = vmatmul.mubr.bf16.gmra.mrb[40].mxu1 %v1105_v7  ;;  %v1001_v22 = vmax.f32 %v749_v11, 0.0  ;;  %v8914_v7 = vld [vmem:[%s12867_s1 + $0x330] ss:$8 sps:$4 sm:$0xff]  }
 0x171   :  { %v755_v21 = vadd.f32 %v754_v18, %v9772_v17  ;;  %v1002_v24 = vmax.f32 %v751_v13, 0.0  ;;  %2849 = vmatpush1.bf16.msra.mxu1 %v8914_v7  ;;  %v8922_v7 = vld [vmem:[%s12867_s1 + $0x354] ss:$8 sps:$4 sm:$0xff]  }
 0x172   :  { %v1003_v23 = vmax.f32 %v753_v15, 0.0  ;;  %2850 = vmatprep.subr.bf16.mxu1 %v8919_v41 }
 0x173   :  { %v1004_v25 = vmax.f32 %v755_v21, 0.0 }
 0x174   :  { %v1107_v26 = vpack.c.bf16 %v1003_v23, %v1001_v22 }
 0x175   :  { %v758_v27 = vpop.f32.mrb[48].mxu0  ;;  %v1108_v28 = vpack.c.bf16 %v1004_v25, %v1002_v24 }
 0x176   :  { %v759_v29 = vadd.f32 %v758_v27, %v9770_v16  ;;  %v760_v30 = vpop.f32.mrb[49].mxu0 }
 0x177   :  { %v761_v31 = vadd.f32 %v760_v30, %v9772_v17  ;;  %v762_v32 = vpop.f32.mrb[50].mxu0  ;;  %1492 = vmatprep.mubr.bf16.mxu1 %v1108_v28 }
 0x178   :  { %v763_v33 = vadd.f32 %v762_v32, %v9770_v16  ;;  %v764_v34 = vpop.f32.mrb[51].mxu0  ;;  %1493 = vmatmul.mubr.bf16.gmra.mrb[44].mxu1 %v1107_v26  ;;  %v1005_v36 = vmax.f32 %v759_v29, 0.0 }
 0x179   :  { %v765_v35 = vadd.f32 %v764_v34, %v9772_v17  ;;  %v1006_v38 = vmax.f32 %v761_v31, 0.0 }
 0x17a   :  { %v1007_v37 = vmax.f32 %v763_v33, 0.0 }
 0x17b   :  { %v1008_v39 = vmax.f32 %v765_v35, 0.0 }
 0x17c   :  { %v1109_v40 = vpack.c.bf16 %v1007_v37, %v1005_v36 }
 0x17d   :  { %v768_v43 = vpop.f32.mrb[52].mxu0  ;;  %v1110_v44 = vpack.c.bf16 %v1008_v39, %v1006_v38 }
 0x17e   :  { %v769_v45 = vadd.f32 %v768_v43, %v9770_v16  ;;  %v770_v46 = vpop.f32.mrb[53].mxu0 }
 0x17f   :  { %v771_v47 = vadd.f32 %v770_v46, %v9772_v17  ;;  %v772_v48 = vpop.f32.mrb[54].mxu0  ;;  %1502 = vmatprep.mubr.bf16.mxu1 %v1110_v44 }
 0x180   :  { %v773_v49 = vadd.f32 %v772_v48, %v9770_v16  ;;  %v774_v50 = vpop.f32.mrb[55].mxu0  ;;  %1503 = vmatmul.mubr.bf16.gmra.mrb[48].mxu1 %v1109_v40  ;;  %v1009_v52 = vmax.f32 %v769_v45, 0.0  ;;  %v8917_v40 = vld [vmem:[%s12867_s1 + $0x340] ss:$8 sps:$4 sm:$0xff]  }
 0x181   :  { %v775_v51 = vadd.f32 %v774_v50, %v9772_v17  ;;  %v1010_v54 = vmax.f32 %v771_v47, 0.0  ;;  %2851 = vmatpush1.bf16.msra.mxu1 %v8917_v40  ;;  %v8925_v40 = vld [vmem:[%s12867_s1 + $0x364] ss:$8 sps:$4 sm:$0xff]  }
 0x182   :  { %v1011_v53 = vmax.f32 %v773_v49, 0.0  ;;  %2852 = vmatprep.subr.bf16.mxu1 %v8922_v7 }
 0x183   :  { %v1012_v55 = vmax.f32 %v775_v51, 0.0 }
 0x184   :  { %v1111_v56 = vpack.c.bf16 %v1011_v53, %v1009_v52 }
 0x185   :  { %v778_v57 = vpop.f32.mrb[56].mxu0  ;;  %v1112_v58 = vpack.c.bf16 %v1012_v55, %v1010_v54 }
 0x186   :  { %v779_v59 = vadd.f32 %v778_v57, %v9770_v16  ;;  %v780_v60 = vpop.f32.mrb[57].mxu0 }
 0x187   :  { %v781_v61 = vadd.f32 %v780_v60, %v9772_v17  ;;  %v782_v62 = vpop.f32.mrb[58].mxu0  ;;  %1512 = vmatprep.mubr.bf16.mxu1 %v1112_v58 }
 0x188   :  { %v783_v63 = vadd.f32 %v782_v62, %v9770_v16  ;;  %v784_v0 = vpop.f32.mrb[59].mxu0  ;;  %1513 = vmatmul.mubr.bf16.gmra.mrb[52].mxu1 %v1111_v56  ;;  %v1013_v2 = vmax.f32 %v779_v59, 0.0 }
 0x189   :  { %v785_v1 = vadd.f32 %v784_v0, %v9772_v17  ;;  %v1014_v4 = vmax.f32 %v781_v61, 0.0 }
 0x18a   :  { %v1015_v3 = vmax.f32 %v783_v63, 0.0 }
 0x18b   :  { %v1016_v5 = vmax.f32 %v785_v1, 0.0 }
 0x18c   :  { %v1113_v6 = vpack.c.bf16 %v1015_v3, %v1013_v2 }
 0x18d   :  { %v788_v10 = vpop.f32.mrb[60].mxu0  ;;  %v1114_v11 = vpack.c.bf16 %v1016_v5, %v1014_v4 }
 0x18e   :  { %v789_v12 = vadd.f32 %v788_v10, %v9770_v16  ;;  %v790_v13 = vpop.f32.mrb[61].mxu0 }
 0x18f   :  { %v791_v14 = vadd.f32 %v790_v13, %v9772_v17  ;;  %v792_v15 = vpop.f32.mrb[62].mxu0  ;;  %1522 = vmatprep.mubr.bf16.mxu1 %v1114_v11 }
 0x190   :  { %v793_v18 = vadd.f32 %v792_v15, %v9770_v16  ;;  %v794_v19 = vpop.f32.mrb[63].mxu0  ;;  %1523 = vmatmul.mubr.bf16.gmra.mrb[56].mxu1 %v1113_v6  ;;  %v1017_v21 = vmax.f32 %v789_v12, 0.0  ;;  %v8920_v6 = vld [vmem:[%s12867_s1 + $0x350] ss:$8 sps:$4 sm:$0xff]  }
 0x191   :  { %v795_v20 = vadd.f32 %v794_v19, %v9772_v17  ;;  %v1018_v23 = vmax.f32 %v791_v14, 0.0  ;;  %2853 = vmatpush1.bf16.msra.mxu1 %v8920_v6  ;;  %v8928_v6 = vld [vmem:[%s12867_s1 + $0x374] ss:$8 sps:$4 sm:$0xff]  }
 0x192   :  { %v1019_v22 = vmax.f32 %v793_v18, 0.0  ;;  %2854 = vmatprep.subr.bf16.mxu1 %v8925_v40 }
 0x193   :  { %v1020_v24 = vmax.f32 %v795_v20, 0.0 }
 0x194   :  { %v1115_v25 = vpack.c.bf16 %v1019_v22, %v1017_v21 }
 0x195   :  { %v798_v26 = vpop.f32.mrb[64].mxu0  ;;  %v1116_v27 = vpack.c.bf16 %v1020_v24, %v1018_v23 }
 0x196   :  { %v799_v28 = vadd.f32 %v798_v26, %v9770_v16  ;;  %v800_v29 = vpop.f32.mrb[65].mxu0 }
 0x197   :  { %v801_v30 = vadd.f32 %v800_v29, %v9772_v17  ;;  %v802_v31 = vpop.f32.mrb[66].mxu0  ;;  %1532 = vmatprep.mubr.bf16.mxu1 %v1116_v27 }
 0x198   :  { %v803_v32 = vadd.f32 %v802_v31, %v9770_v16  ;;  %v804_v33 = vpop.f32.mrb[67].mxu0  ;;  %1533 = vmatmul.mubr.bf16.gmra.mrb[60].mxu1 %v1115_v25  ;;  %v1021_v35 = vmax.f32 %v799_v28, 0.0 }
 0x199   :  { %v805_v34 = vadd.f32 %v804_v33, %v9772_v17  ;;  %v1022_v37 = vmax.f32 %v801_v30, 0.0 }
 0x19a   :  { %v1023_v36 = vmax.f32 %v803_v32, 0.0 }
 0x19b   :  { %v1024_v38 = vmax.f32 %v805_v34, 0.0 }
 0x19c   :  { %v1117_v39 = vpack.c.bf16 %v1023_v36, %v1021_v35 }
 0x19d   :  { %v808_v42 = vpop.f32.mrb[68].mxu0  ;;  %v1118_v43 = vpack.c.bf16 %v1024_v38, %v1022_v37 }
 0x19e   :  { %v809_v44 = vadd.f32 %v808_v42, %v9770_v16  ;;  %v810_v45 = vpop.f32.mrb[69].mxu0 }
 0x19f   :  { %v811_v46 = vadd.f32 %v810_v45, %v9772_v17  ;;  %v812_v47 = vpop.f32.mrb[70].mxu0  ;;  %1542 = vmatprep.mubr.bf16.mxu1 %v1118_v43 }
 0x1a0   :  { %v813_v48 = vadd.f32 %v812_v47, %v9770_v16  ;;  %v814_v49 = vpop.f32.mrb[71].mxu0  ;;  %1543 = vmatmul.mubr.bf16.gmra.mrb[64].mxu1 %v1117_v39  ;;  %v1025_v51 = vmax.f32 %v809_v44, 0.0  ;;  %v8923_v39 = vld [vmem:[%s12867_s1 + $0x360] ss:$8 sps:$4 sm:$0xff]  }
 0x1a1   :  { %v815_v50 = vadd.f32 %v814_v49, %v9772_v17  ;;  %v1026_v53 = vmax.f32 %v811_v46, 0.0  ;;  %2855 = vmatpush1.bf16.msra.mxu1 %v8923_v39  ;;  %v8931_v39 = vld [vmem:[%s12867_s1 + $0x384] ss:$8 sps:$4 sm:$0xff]  }
 0x1a2   :  { %v1027_v52 = vmax.f32 %v813_v48, 0.0  ;;  %2856 = vmatprep.subr.bf16.mxu1 %v8928_v6  ;;  %v8934_v6 = vld [vmem:[%s12867_s1 + $0x394] ss:$8 sps:$4 sm:$0xff]  }
 0x1a3   :  { %v1028_v54 = vmax.f32 %v815_v50, 0.0 }
 0x1a4   :  { %v1119_v55 = vpack.c.bf16 %v1027_v52, %v1025_v51 }
 0x1a5   :  { %v818_v56 = vpop.f32.mrb[72].mxu0  ;;  %v1120_v57 = vpack.c.bf16 %v1028_v54, %v1026_v53 }
 0x1a6   :  { %v819_v58 = vadd.f32 %v818_v56, %v9770_v16  ;;  %v820_v59 = vpop.f32.mrb[73].mxu0 }
 0x1a7   :  { %v821_v60 = vadd.f32 %v820_v59, %v9772_v17  ;;  %v822_v61 = vpop.f32.mrb[74].mxu0  ;;  %1552 = vmatprep.mubr.bf16.mxu1 %v1120_v57 }
 0x1a8   :  { %v823_v62 = vadd.f32 %v822_v61, %v9770_v16  ;;  %v824_v63 = vpop.f32.mrb[75].mxu0  ;;  %1553 = vmatmul.mubr.bf16.gmra.mrb[68].mxu1 %v1119_v55  ;;  %v1029_v1 = vmax.f32 %v819_v58, 0.0 }
 0x1a9   :  { %v825_v0 = vadd.f32 %v824_v63, %v9772_v17  ;;  %v1030_v3 = vmax.f32 %v821_v60, 0.0 }
 0x1aa   :  { %v1031_v2 = vmax.f32 %v823_v62, 0.0 }
 0x1ab   :  { %v1032_v4 = vmax.f32 %v825_v0, 0.0 }
 0x1ac   :  { %v1121_v5 = vpack.c.bf16 %v1031_v2, %v1029_v1 }
 0x1ad   :  { %v828_v9 = vpop.f32.mrb[76].mxu0  ;;  %v1122_v10 = vpack.c.bf16 %v1032_v4, %v1030_v3 }
 0x1ae   :  { %v829_v11 = vadd.f32 %v828_v9, %v9770_v16  ;;  %v830_v12 = vpop.f32.mrb[77].mxu0 }
 0x1af   :  { %v831_v13 = vadd.f32 %v830_v12, %v9772_v17  ;;  %v832_v14 = vpop.f32.mrb[78].mxu0  ;;  %1562 = vmatprep.mubr.bf16.mxu1 %v1122_v10 }
 0x1b0   :  { %v833_v15 = vadd.f32 %v832_v14, %v9770_v16  ;;  %v834_v18 = vpop.f32.mrb[79].mxu0  ;;  %1563 = vmatmul.mubr.bf16.gmra.mrb[72].mxu1 %v1121_v5  ;;  %v1033_v20 = vmax.f32 %v829_v11, 0.0  ;;  %v8926_v5 = vld [vmem:[%s12867_s1 + $0x370] ss:$8 sps:$4 sm:$0xff]  }
 0x1b1   :  { %v835_v19 = vadd.f32 %v834_v18, %v9772_v17  ;;  %v1034_v22 = vmax.f32 %v831_v13, 0.0  ;;  %2857 = vmatpush1.bf16.msra.mxu1 %v8926_v5  ;;  %v8932_v5 = vld [vmem:[%s12867_s1 + $0x390] ss:$8 sps:$4 sm:$0xff]  }
 0x1b2   :  { %v1035_v21 = vmax.f32 %v833_v15, 0.0  ;;  %2858 = vmatprep.subr.bf16.mxu1 %v8931_v39 }
 0x1b3   :  { %v1036_v23 = vmax.f32 %v835_v19, 0.0 }
 0x1b4   :  { %v1123_v24 = vpack.c.bf16 %v1035_v21, %v1033_v20 }
 0x1b5   :  { %v838_v25 = vpop.f32.mrb[80].mxu0  ;;  %v1124_v26 = vpack.c.bf16 %v1036_v23, %v1034_v22 }
 0x1b6   :  { %v839_v27 = vadd.f32 %v838_v25, %v9770_v16  ;;  %v840_v28 = vpop.f32.mrb[81].mxu0 }
 0x1b7   :  { %v841_v29 = vadd.f32 %v840_v28, %v9772_v17  ;;  %v842_v30 = vpop.f32.mrb[82].mxu0  ;;  %1572 = vmatprep.mubr.bf16.mxu1 %v1124_v26 }
 0x1b8   :  { %v843_v31 = vadd.f32 %v842_v30, %v9770_v16  ;;  %v844_v32 = vpop.f32.mrb[83].mxu0  ;;  %1573 = vmatmul.mubr.bf16.gmra.mrb[76].mxu1 %v1123_v24  ;;  %v1037_v34 = vmax.f32 %v839_v27, 0.0 }
 0x1b9   :  { %v845_v33 = vadd.f32 %v844_v32, %v9772_v17  ;;  %v1038_v36 = vmax.f32 %v841_v29, 0.0 }
 0x1ba   :  { %v1039_v35 = vmax.f32 %v843_v31, 0.0 }
 0x1bb   :  { %v1040_v37 = vmax.f32 %v845_v33, 0.0 }
 0x1bc   :  { %v1125_v38 = vpack.c.bf16 %v1039_v35, %v1037_v34 }
 0x1bd   :  { %v848_v41 = vpop.f32.mrb[84].mxu0  ;;  %v1126_v42 = vpack.c.bf16 %v1040_v37, %v1038_v36 }
 0x1be   :  { %v849_v43 = vadd.f32 %v848_v41, %v9770_v16  ;;  %v850_v44 = vpop.f32.mrb[85].mxu0 }
 0x1bf   :  { %v851_v45 = vadd.f32 %v850_v44, %v9772_v17  ;;  %v852_v46 = vpop.f32.mrb[86].mxu0  ;;  %1582 = vmatprep.mubr.bf16.mxu1 %v1126_v42 }
 0x1c0   :  { %v853_v47 = vadd.f32 %v852_v46, %v9770_v16  ;;  %v854_v48 = vpop.f32.mrb[87].mxu0  ;;  %1583 = vmatmul.mubr.bf16.gmra.mrb[80].mxu1 %v1125_v38  ;;  %v1041_v50 = vmax.f32 %v849_v43, 0.0  ;;  %v8929_v38 = vld [vmem:[%s12867_s1 + $0x380] ss:$8 sps:$4 sm:$0xff]  }
 0x1c1   :  { %v855_v49 = vadd.f32 %v854_v48, %v9772_v17  ;;  %v1042_v52 = vmax.f32 %v851_v45, 0.0  ;;  %2859 = vmatpush1.bf16.msra.mxu1 %v8929_v38 }
 0x1c2   :  { %v1043_v51 = vmax.f32 %v853_v47, 0.0  ;;  %2860 = vmatprep.subr.bf16.mxu1 %v8934_v6 }
 0x1c3   :  { %v1044_v53 = vmax.f32 %v855_v49, 0.0 }
 0x1c4   :  { %v1127_v54 = vpack.c.bf16 %v1043_v51, %v1041_v50 }
 0x1c5   :  { %v858_v55 = vpop.f32.mrb[88].mxu0  ;;  %v1128_v56 = vpack.c.bf16 %v1044_v53, %v1042_v52  ;;  %2861 = vmatpush1.bf16.msra.mxu1 %v8932_v5 }
 0x1c6   :  { %v859_v57 = vadd.f32 %v858_v55, %v9770_v16  ;;  %v860_v58 = vpop.f32.mrb[89].mxu0 }
 0x1c7   :  { %v861_v59 = vadd.f32 %v860_v58, %v9772_v17  ;;  %v862_v60 = vpop.f32.mrb[90].mxu0  ;;  %1592 = vmatprep.mubr.bf16.mxu1 %v1128_v56 }
 0x1c8   :  { %v863_v61 = vadd.f32 %v862_v60, %v9770_v16  ;;  %v864_v62 = vpop.f32.mrb[91].mxu0  ;;  %1593 = vmatmul.mubr.bf16.gmra.mrb[84].mxu1 %v1127_v54  ;;  %v1045_v0 = vmax.f32 %v859_v57, 0.0 }
 0x1c9   :  { %v865_v63 = vadd.f32 %v864_v62, %v9772_v17  ;;  %v1046_v2 = vmax.f32 %v861_v59, 0.0 }
 0x1ca   :  { %v1047_v1 = vmax.f32 %v863_v61, 0.0 }
 0x1cb   :  { %v1048_v3 = vmax.f32 %v865_v63, 0.0 }
 0x1cc   :  { %v1129_v4 = vpack.c.bf16 %v1047_v1, %v1045_v0 }
 0x1cd   :  { %v868_v7 = vpop.f32.mrb[92].mxu0  ;;  %v1130_v9 = vpack.c.bf16 %v1048_v3, %v1046_v2 }
 0x1ce   :  { %v869_v10 = vadd.f32 %v868_v7, %v9770_v16  ;;  %v870_v11 = vpop.f32.mrb[93].mxu0 }
 0x1cf   :  { %v871_v12 = vadd.f32 %v870_v11, %v9772_v17  ;;  %v872_v13 = vpop.f32.mrb[94].mxu0  ;;  %1602 = vmatprep.mubr.bf16.mxu1 %v1130_v9 }
 0x1d0   :  { %v873_v14 = vadd.f32 %v872_v13, %v9770_v16  ;;  %v874_v15 = vpop.f32.mrb[95].mxu0  ;;  %1603 = vmatmul.mubr.bf16.gmra.mrb[88].mxu1 %v1129_v4  ;;  %v1049_v19 = vmax.f32 %v869_v10, 0.0  ;;  %v1184_v4 = vsub.s32 1, %v9749_v8 }
 0x1d1   :  { %v875_v18 = vadd.f32 %v874_v15, %v9772_v17  ;;  %v1050_v21 = vmax.f32 %v871_v12, 0.0 }
 0x1d2   :  { %v1051_v20 = vmax.f32 %v873_v14, 0.0 }
 0x1d3   :  { %v1052_v22 = vmax.f32 %v875_v18, 0.0  ;;  %v9241_v18 = vld [vmem:[%s12869_s2] sm:$0xff] }
 0x1d4   :  { %v1131_v23 = vpack.c.bf16 %v1051_v20, %v1049_v19  ;;  %v10012_v19 = vrot.slane %v9241_v18, %v1184_v4 }
 0x1d5   :  { %v878_v24 = vpop.f32.mrb[96].mxu0  ;;  %v1132_v25 = vpack.c.bf16 %v1052_v22, %v1050_v21  ;;  %v9242_v21 = vld [vmem:[%s12869_s2 + $0x8] sm:$0xff] }
 0x1d6   :  { %v879_v26 = vadd.f32 %v878_v24, %v9770_v16  ;;  %v880_v27 = vpop.f32.mrb[97].mxu0  ;;  %v10018_v22 = vrot.slane %v9242_v21, %v1184_v4 }
 0x1d7   :  { %v881_v28 = vadd.f32 %v880_v27, %v9772_v17  ;;  %v882_v29 = vpop.f32.mrb[98].mxu0  ;;  %1612 = vmatprep.mubr.bf16.mxu1 %v1132_v25 }
 0x1d8   :  { %v883_v30 = vadd.f32 %v882_v29, %v9770_v16  ;;  %v884_v31 = vpop.f32.mrb[99].mxu0  ;;  %1613 = vmatmul.mubr.bf16.gmra.mrb[92].mxu1 %v1131_v23  ;;  %v1053_v33 = vmax.f32 %v879_v26, 0.0 }
 0x1d9   :  { %v885_v32 = vadd.f32 %v884_v31, %v9772_v17  ;;  %v1054_v35 = vmax.f32 %v881_v28, 0.0 }
 0x1da   :  { %v1055_v34 = vmax.f32 %v883_v30, 0.0 }
 0x1db   :  { %v1056_v36 = vmax.f32 %v885_v32, 0.0 }
 0x1dc   :  { %v1133_v37 = vpack.c.bf16 %v1055_v34, %v1053_v33 }
 0x1dd   :  { %v888_v40 = vpop.f32.mrb[100].mxu0  ;;  %v1134_v41 = vpack.c.bf16 %v1056_v36, %v1054_v35 }
 0x1de   :  { %v889_v42 = vadd.f32 %v888_v40, %v9770_v16  ;;  %v890_v43 = vpop.f32.mrb[101].mxu0 }
 0x1df   :  { %v891_v44 = vadd.f32 %v890_v43, %v9772_v17  ;;  %v892_v45 = vpop.f32.mrb[102].mxu0  ;;  %1622 = vmatprep.mubr.bf16.mxu1 %v1134_v41 }
 0x1e0   :  { %v893_v46 = vadd.f32 %v892_v45, %v9770_v16  ;;  %v894_v47 = vpop.f32.mrb[103].mxu0  ;;  %1623 = vmatmul.mubr.bf16.gmra.mrb[96].mxu1 %v1133_v37  ;;  %v1057_v49 = vmax.f32 %v889_v42, 0.0 }
 0x1e1   :  { %v895_v48 = vadd.f32 %v894_v47, %v9772_v17  ;;  %v1058_v51 = vmax.f32 %v891_v44, 0.0 }
 0x1e2   :  { %v1059_v50 = vmax.f32 %v893_v46, 0.0 }
 0x1e3   :  { %v1060_v52 = vmax.f32 %v895_v48, 0.0 }
 0x1e4   :  { %v1135_v53 = vpack.c.bf16 %v1059_v50, %v1057_v49 }
 0x1e5   :  { %v898_v54 = vpop.f32.mrb[104].mxu0  ;;  %v1136_v55 = vpack.c.bf16 %v1060_v52, %v1058_v51 }
 0x1e6   :  { %v899_v56 = vadd.f32 %v898_v54, %v9770_v16  ;;  %v900_v57 = vpop.f32.mrb[105].mxu0 }
 0x1e7   :  { %v901_v58 = vadd.f32 %v900_v57, %v9772_v17  ;;  %v902_v59 = vpop.f32.mrb[106].mxu0  ;;  %1632 = vmatprep.mubr.bf16.mxu1 %v1136_v55 }
 0x1e8   :  { %v903_v60 = vadd.f32 %v902_v59, %v9770_v16  ;;  %v904_v61 = vpop.f32.mrb[107].mxu0  ;;  %1633 = vmatmul.mubr.bf16.gmra.mrb[100].mxu1 %v1135_v53  ;;  %v1061_v63 = vmax.f32 %v899_v56, 0.0  ;;  %v8935_v59 = vld [vmem:[%s12867_s1 + $0x3a0] ss:$8 sps:$4 sm:$0xff]  }
 0x1e9   :  { %v905_v62 = vadd.f32 %v904_v61, %v9772_v17  ;;  %v1062_v1 = vmax.f32 %v901_v58, 0.0 }
 0x1ea   :  { %v1063_v0 = vmax.f32 %v903_v60, 0.0  ;;  %v8937_v60 = vld [vmem:[%s12867_s1 + $0x3a4] ss:$8 sps:$4 sm:$0xff]  }
 0x1eb   :  { %v1064_v2 = vmax.f32 %v905_v62, 0.0  ;;  %2862 = vmatprep.subr.bf16.mxu1 %v8937_v60 }
 0x1ec   :  { %v1137_v3 = vpack.c.bf16 %v1063_v0, %v1061_v63  ;;  %2863 = vmatpush1.bf16.msra.mxu1 %v8935_v59  ;;  %v8940_v59 = vld [vmem:[%s12867_s1 + $0x3b4] ss:$8 sps:$4 sm:$0xff]  }
 0x1ed   :  { %v908_v7 = vpop.f32.mrb[108].mxu0  ;;  %v1138_v9 = vpack.c.bf16 %v1064_v2, %v1062_v1  ;;  %2864 = vmatprep.subr.bf16.mxu1 %v8940_v59 }
 0x1ee   :  { %v909_v10 = vadd.f32 %v908_v7, %v9770_v16  ;;  %v910_v11 = vpop.f32.mrb[109].mxu0 }
 0x1ef   :  { %v911_v12 = vadd.f32 %v910_v11, %v9772_v17  ;;  %v912_v13 = vpop.f32.mrb[110].mxu0  ;;  %1642 = vmatprep.mubr.bf16.mxu1 %v1138_v9 }
 0x1f0   :  { %v913_v14 = vadd.f32 %v912_v13, %v9770_v16  ;;  %v914_v15 = vpop.f32.mrb[111].mxu0  ;;  %1643 = vmatmul.mubr.bf16.gmra.mrb[104].mxu1 %v1137_v3  ;;  %v1065_v23 = vmax.f32 %v909_v10, 0.0 }
 0x1f1   :  { %v915_v20 = vadd.f32 %v914_v15, %v9772_v17  ;;  %v1066_v25 = vmax.f32 %v911_v12, 0.0 }
 0x1f2   :  { %v1067_v24 = vmax.f32 %v913_v14, 0.0 }
 0x1f3   :  { %v1068_v26 = vmax.f32 %v915_v20, 0.0  ;;  %v1384_v27 = vpop.f32.mrb[0].mxu1 }
 0x1f4   :  { %v1385_v28 = vadd.f32 %v1384_v27, %v10012_v19  ;;  %v1386_v29 = vpop.f32.mrb[1].mxu1  ;;  %v1139_v30 = vpack.c.bf16 %v1067_v24, %v1065_v23 }
 0x1f5   :  { %v1387_v31 = vadd.f32 %v1386_v29, %v10018_v22  ;;  %v918_v32 = vpop.f32.mrb[112].mxu0  ;;  %v1388_v33 = vpop.f32.mrb[2].mxu1  ;;  %v1140_v34 = vpack.c.bf16 %v1068_v26, %v1066_v25 }
 0x1f6   :  { %v919_v35 = vadd.f32 %v918_v32, %v9770_v16  ;;  %v1389_v36 = vadd.f32 %v1388_v33, %v10012_v19  ;;  %v920_v37 = vpop.f32.mrb[113].mxu0  ;;  %v1390_v38 = vpop.f32.mrb[3].mxu1  ;;  %v1703_v42 = vmax.f32 %v1385_v28, 0.0 }
 0x1f7   :  { %v921_v39 = vadd.f32 %v920_v37, %v9772_v17  ;;  %v1391_v40 = vadd.f32 %v1390_v38, %v10018_v22  ;;  %v922_v41 = vpop.f32.mrb[114].mxu0  ;;  %1652 = vmatprep.mubr.bf16.mxu1 %v1140_v34  ;;  %v1704_v47 = vmax.f32 %v1387_v31, 0.0 }
 0x1f8   :  { %v1705_v43 = vmax.f32 %v1389_v36, 0.0  ;;  %v923_v44 = vadd.f32 %v922_v41, %v9770_v16  ;;  %v924_v45 = vpop.f32.mrb[115].mxu0  ;;  %1653 = vmatmul.mubr.bf16.gmra.mrb[108].mxu1 %v1139_v30  ;;  %v1069_v49 = vmax.f32 %v919_v35, 0.0 }
 0x1f9   :  { %v925_v46 = vadd.f32 %v924_v45, %v9772_v17  ;;  %v1706_v48 = vmax.f32 %v1391_v40, 0.0  ;;  %v1070_v52 = vmax.f32 %v921_v39, 0.0 }
 0x1fa   :  { %v1831_v50 = vpack.c.bf16 %v1705_v43, %v1703_v42  ;;  %v1071_v51 = vmax.f32 %v923_v44, 0.0 }
 0x1fb   :  { %v1072_v53 = vmax.f32 %v925_v46, 0.0  ;;  %v1394_v54 = vpop.f32.mrb[4].mxu1  ;;  %v1832_v55 = vpack.c.bf16 %v1706_v48, %v1704_v47 }
 0x1fc   :  { %v1395_v56 = vadd.f32 %v1394_v54, %v10012_v19  ;;  %v1396_v57 = vpop.f32.mrb[5].mxu1  ;;  %v1141_v58 = vpack.c.bf16 %v1071_v51, %v1069_v49 }
 0x1fd   :  { %v1397_v61 = vadd.f32 %v1396_v57, %v10018_v22  ;;  %v928_v62 = vpop.f32.mrb[116].mxu0  ;;  %v1398_v63 = vpop.f32.mrb[6].mxu1  ;;  %2128 = vmatprep.mubr.bf16.mxu0 %v1832_v55  ;;  %v1142_v0 = vpack.c.bf16 %v1072_v53, %v1070_v52 }
 0x1fe   :  { %v929_v1 = vadd.f32 %v928_v62, %v9770_v16  ;;  %v1399_v2 = vadd.f32 %v1398_v63, %v10012_v19  ;;  %v930_v3 = vpop.f32.mrb[117].mxu0  ;;  %v1400_v4 = vpop.f32.mrb[7].mxu1  ;;  %2129 = vmatmul.mubr.bf16.vlgmr.msra.gmra.mrb[128].mxu0 %v1831_v50  ;;  %v1707_v11 = vmax.f32 %v1395_v56, 0.0 }
 0x1ff   :  { %v931_v5 = vadd.f32 %v930_v3, %v9772_v17  ;;  %v1401_v6 = vadd.f32 %v1400_v4, %v10018_v22  ;;  %v932_v7 = vpop.f32.mrb[118].mxu0  ;;  %1662 = vmatprep.mubr.bf16.mxu1 %v1142_v0  ;;  %v1708_v14 = vmax.f32 %v1397_v61, 0.0 }
 0x200   :  { %v933_v9 = vadd.f32 %v932_v7, %v9770_v16  ;;  %v934_v10 = vpop.f32.mrb[119].mxu0  ;;  %1663 = vmatmul.mubr.bf16.gmra.mrb[112].mxu1 %v1141_v58  ;;  %v1709_v12 = vmax.f32 %v1399_v2, 0.0  ;;  %v1073_v18 = vmax.f32 %v929_v1, 0.0  ;;  %v8938_v58 = vld [vmem:[%s12867_s1 + $0x3b0] ss:$8 sps:$4 sm:$0xff]  }
 0x201   :  { %v935_v13 = vadd.f32 %v934_v10, %v9772_v17  ;;  %v1710_v15 = vmax.f32 %v1401_v6, 0.0  ;;  %v1074_v23 = vmax.f32 %v931_v5, 0.0  ;;  %2865 = vmatpush1.bf16.msra.mxu1 %v8938_v58 }
 0x202   :  { %v1075_v20 = vmax.f32 %v933_v9, 0.0  ;;  %v1833_v21 = vpack.c.bf16 %v1709_v12, %v1707_v11 }
 0x203   :  { %v1076_v24 = vmax.f32 %v935_v13, 0.0  ;;  %v1404_v25 = vpop.f32.mrb[8].mxu1  ;;  %v1834_v26 = vpack.c.bf16 %v1710_v15, %v1708_v14 }
 0x204   :  { %v1405_v27 = vadd.f32 %v1404_v25, %v10012_v19  ;;  %v1406_v28 = vpop.f32.mrb[9].mxu1  ;;  %v1143_v29 = vpack.c.bf16 %v1075_v20, %v1073_v18 }
 0x205   :  { %v1407_v30 = vadd.f32 %v1406_v28, %v10018_v22  ;;  %v938_v31 = vpop.f32.mrb[120].mxu0  ;;  %v1408_v32 = vpop.f32.mrb[10].mxu1  ;;  %2138 = vmatprep.mubr.bf16.mxu0 %v1834_v26  ;;  %v1144_v33 = vpack.c.bf16 %v1076_v24, %v1074_v23 }
 0x206   :  { %v939_v34 = vadd.f32 %v938_v31, %v9770_v16  ;;  %v1409_v35 = vadd.f32 %v1408_v32, %v10012_v19  ;;  %v940_v36 = vpop.f32.mrb[121].mxu0  ;;  %v1410_v37 = vpop.f32.mrb[11].mxu1  ;;  %2139 = vmatmul.mubr.bf16.gmra.mrb[132].mxu0 %v1833_v21  ;;  %v1711_v43 = vmax.f32 %v1405_v27, 0.0 }
 0x207   :  { %v941_v38 = vadd.f32 %v940_v36, %v9772_v17  ;;  %v1411_v39 = vadd.f32 %v1410_v37, %v10018_v22  ;;  %v942_v40 = vpop.f32.mrb[122].mxu0  ;;  %1672 = vmatprep.mubr.bf16.mxu1 %v1144_v33  ;;  %v1712_v46 = vmax.f32 %v1407_v30, 0.0 }
 0x208   :  { %v943_v41 = vadd.f32 %v942_v40, %v9770_v16  ;;  %v944_v42 = vpop.f32.mrb[123].mxu0  ;;  %1673 = vmatmul.mubr.bf16.gmra.mrb[116].mxu1 %v1143_v29  ;;  %v1713_v44 = vmax.f32 %v1409_v35, 0.0  ;;  %v1077_v48 = vmax.f32 %v939_v34, 0.0 }
 0x209   :  { %v945_v45 = vadd.f32 %v944_v42, %v9772_v17  ;;  %v1714_v47 = vmax.f32 %v1411_v39, 0.0  ;;  %v1078_v51 = vmax.f32 %v941_v38, 0.0  ;;  %v8941_v42 = vld [vmem:[%s12867_s1 + $0x3c0] ss:$8 sps:$4 sm:$0xff]  }
 0x20a   :  { %v1079_v49 = vmax.f32 %v943_v41, 0.0  ;;  %v1835_v50 = vpack.c.bf16 %v1713_v44, %v1711_v43  ;;  %v8943_v43 = vld [vmem:[%s12867_s1 + $0x3c4] ss:$8 sps:$4 sm:$0xff]  }
 0x20b   :  { %v1080_v52 = vmax.f32 %v945_v45, 0.0  ;;  %v1414_v53 = vpop.f32.mrb[12].mxu1  ;;  %v1836_v54 = vpack.c.bf16 %v1714_v47, %v1712_v46  ;;  %2866 = vmatprep.subr.bf16.mxu1 %v8943_v43  ;;  %v8950_v43 = vld [vmem:[%s12867_s1 + $0x3e0] ss:$8 sps:$4 sm:$0xff]  }
 0x20c   :  { %v1415_v55 = vadd.f32 %v1414_v53, %v10012_v19  ;;  %v1416_v56 = vpop.f32.mrb[13].mxu1  ;;  %v1145_v57 = vpack.c.bf16 %v1079_v49, %v1077_v48  ;;  %2867 = vmatpush1.bf16.msra.mxu1 %v8941_v42 }
 0x20d   :  { %v1417_v60 = vadd.f32 %v1416_v56, %v10018_v22  ;;  %v948_v61 = vpop.f32.mrb[124].mxu0  ;;  %v1418_v62 = vpop.f32.mrb[14].mxu1  ;;  %2148 = vmatprep.mubr.bf16.mxu0 %v1836_v54  ;;  %v1146_v63 = vpack.c.bf16 %v1080_v52, %v1078_v51 }
 0x20e   :  { %v949_v0 = vadd.f32 %v948_v61, %v9770_v16  ;;  %v1419_v1 = vadd.f32 %v1418_v62, %v10012_v19  ;;  %v950_v2 = vpop.f32.mrb[125].mxu0  ;;  %v1420_v3 = vpop.f32.mrb[15].mxu1  ;;  %2149 = vmatmul.mubr.bf16.gmra.mrb[136].mxu0 %v1835_v50  ;;  %v1715_v10 = vmax.f32 %v1415_v55, 0.0 }
 0x20f   :  { %v951_v4 = vadd.f32 %v950_v2, %v9772_v17  ;;  %v1421_v5 = vadd.f32 %v1420_v3, %v10018_v22  ;;  %v952_v6 = vpop.f32.mrb[126].mxu0  ;;  %1682 = vmatprep.mubr.bf16.mxu1 %v1146_v63  ;;  %v1716_v13 = vmax.f32 %v1417_v60, 0.0 }
 0x210   :  { %v953_v7 = vadd.f32 %v952_v6, %v9770_v16  ;;  %v954_v9 = vpop.f32.mrb[127].mxu0  ;;  %1683 = vmatmul.mubr.bf16.gmra.mrb[120].mxu1 %v1145_v57  ;;  %v1717_v11 = vmax.f32 %v1419_v1, 0.0  ;;  %v1081_v15 = vmax.f32 %v949_v0, 0.0 }
 0x211   :  { %v955_v12 = vadd.f32 %v954_v9, %v9772_v17  ;;  %v1718_v14 = vmax.f32 %v1421_v5, 0.0  ;;  %v1082_v21 = vmax.f32 %v951_v4, 0.0  ;;  %v8944_v9 = vld [vmem:[%s12867_s1 + $0x3d0] ss:$8 sps:$4 sm:$0xff]  }
 0x212   :  { %v1083_v18 = vmax.f32 %v953_v7, 0.0  ;;  %v1837_v20 = vpack.c.bf16 %v1717_v11, %v1715_v10  ;;  %v8946_v10 = vld [vmem:[%s12867_s1 + $0x3d4] ss:$8 sps:$4 sm:$0xff]  }
 0x213   :  { %v1084_v23 = vmax.f32 %v955_v12, 0.0  ;;  %v1424_v24 = vpop.f32.mrb[16].mxu1  ;;  %v1838_v25 = vpack.c.bf16 %v1718_v14, %v1716_v13  ;;  %2868 = vmatprep.subr.bf16.mxu1 %v8946_v10 }
 0x214   :  { %v1425_v26 = vadd.f32 %v1424_v24, %v10012_v19  ;;  %v1426_v27 = vpop.f32.mrb[17].mxu1  ;;  %v1147_v28 = vpack.c.bf16 %v1083_v18, %v1081_v15  ;;  %2869 = vmatpush1.bf16.msra.mxu1 %v8944_v9 }
 0x215   :  { %v1427_v16 = vadd.f32 %v1426_v27, %v10018_v22  ;;  %v1428_v29 = vpop.f32.mrb[18].mxu1  ;;  %2158 = vmatprep.mubr.bf16.mxu0 %v1838_v25  ;;  %v1148_v30 = vpack.c.bf16 %v1084_v23, %v1082_v21 }
 0x216   :  { %v1429_v17 = vadd.f32 %v1428_v29, %v10012_v19  ;;  %v1430_v31 = vpop.f32.mrb[19].mxu1  ;;  %2159 = vmatmul.mubr.bf16.gmra.mrb[140].mxu0 %v1837_v20  ;;  %v1719_v33 = vmax.f32 %v1425_v26, 0.0 }
 0x217   :  { %v1431_v32 = vadd.f32 %v1430_v31, %v10018_v22  ;;  %1692 = vmatprep.mubr.bf16.mxu1 %v1148_v30  ;;  %v1720_v35 = vmax.f32 %v1427_v16, 0.0 }
 0x218   :  { %1693 = vmatmul.mubr.bf16.gmra.mrb[124].mxu1 %v1147_v28  ;;  %v1721_v34 = vmax.f32 %v1429_v17, 0.0 }
 0x219   :  { %v1722_v36 = vmax.f32 %v1431_v32, 0.0  ;;  %v8947_v32 = vld [vmem:[%s12867_s1 + $0x400] ss:$8 sps:$4 sm:$0xff]  }
 0x21a   :  { %v1839_v37 = vpack.c.bf16 %v1721_v34, %v1719_v33  ;;  %v8949_v33 = vld [vmem:[%s12867_s1 + $0x404] ss:$8 sps:$4 sm:$0xff]  }
 0x21b   :  { %v1434_v38 = vpop.f32.mrb[20].mxu1  ;;  %v1840_v39 = vpack.c.bf16 %v1722_v36, %v1720_v35  ;;  %3588 = vmatprep.subr.bf16.mxu0 %v8949_v33 }
 0x21c   :  { %v1435_v40 = vadd.f32 %v1434_v38, %v10012_v19  ;;  %v1436_v41 = vpop.f32.mrb[21].mxu1  ;;  %3589 = vmatpush1.bf16.msra.mxu0 %v8947_v32 }
 0x21d   :  { %v1437_v44 = vadd.f32 %v1436_v41, %v10018_v22  ;;  %v1438_v45 = vpop.f32.mrb[22].mxu1  ;;  %2168 = vmatprep.mubr.bf16.mxu0 %v1840_v39 }
 0x21e   :  { %v1439_v46 = vadd.f32 %v1438_v45, %v10012_v19  ;;  %v1440_v47 = vpop.f32.mrb[23].mxu1  ;;  %2169 = vmatmul.mubr.bf16.gmra.mrb[144].mxu0 %v1839_v37  ;;  %v1723_v49 = vmax.f32 %v1435_v40, 0.0 }
 0x21f   :  { %v1441_v48 = vadd.f32 %v1440_v47, %v10018_v22  ;;  %v1724_v51 = vmax.f32 %v1437_v44, 0.0  ;;  %v8952_v44 = vld [vmem:[%s12867_s1 + $0x3e4] ss:$8 sps:$4 sm:$0xff]  }
 0x220   :  { %v1725_v50 = vmax.f32 %v1439_v46, 0.0  ;;  %2870 = vmatprep.subr.bf16.mxu1 %v8952_v44  ;;  %v8959_v44 = vld [vmem:[%s12867_s1 + $0x420] ss:$8 sps:$4 sm:$0xff]  }
 0x221   :  { %v1726_v52 = vmax.f32 %v1441_v48, 0.0  ;;  %2871 = vmatpush1.bf16.msra.mxu1 %v8950_v43 }
 0x222   :  { %v1841_v53 = vpack.c.bf16 %v1725_v50, %v1723_v49 }
 0x223   :  { %v1444_v54 = vpop.f32.mrb[24].mxu1  ;;  %v1842_v55 = vpack.c.bf16 %v1726_v52, %v1724_v51 }
 0x224   :  { %v1445_v56 = vadd.f32 %v1444_v54, %v10012_v19  ;;  %v1446_v57 = vpop.f32.mrb[25].mxu1 }
 0x225   :  { %v1447_v58 = vadd.f32 %v1446_v57, %v10018_v22  ;;  %v1448_v59 = vpop.f32.mrb[26].mxu1  ;;  %2178 = vmatprep.mubr.bf16.mxu0 %v1842_v55 }
 0x226   :  { %v1449_v60 = vadd.f32 %v1448_v59, %v10012_v19  ;;  %v1450_v61 = vpop.f32.mrb[27].mxu1  ;;  %2179 = vmatmul.mubr.bf16.gmra.mrb[148].mxu0 %v1841_v53  ;;  %v1727_v63 = vmax.f32 %v1445_v56, 0.0 }
 0x227   :  { %v1451_v62 = vadd.f32 %v1450_v61, %v10018_v22  ;;  %v1728_v1 = vmax.f32 %v1447_v58, 0.0 }
 0x228   :  { %v1729_v0 = vmax.f32 %v1449_v60, 0.0 }
 0x229   :  { %v1730_v2 = vmax.f32 %v1451_v62, 0.0 }
 0x22a   :  { %v1843_v3 = vpack.c.bf16 %v1729_v0, %v1727_v63  ;;  %v8953_v0 = vld [vmem:[%s12867_s1 + $0x410] ss:$8 sps:$4 sm:$0xff]  }
 0x22b   :  { %v1454_v4 = vpop.f32.mrb[28].mxu1  ;;  %v1844_v5 = vpack.c.bf16 %v1730_v2, %v1728_v1  ;;  %v8955_v1 = vld [vmem:[%s12867_s1 + $0x414] ss:$8 sps:$4 sm:$0xff]  }
 0x22c   :  { %v1455_v6 = vadd.f32 %v1454_v4, %v10012_v19  ;;  %v1456_v7 = vpop.f32.mrb[29].mxu1  ;;  %3590 = vmatprep.subr.bf16.mxu0 %v8955_v1 }
 0x22d   :  { %v1457_v11 = vadd.f32 %v1456_v7, %v10018_v22  ;;  %v1458_v12 = vpop.f32.mrb[30].mxu1  ;;  %2188 = vmatprep.mubr.bf16.mxu0 %v1844_v5  ;;  %3591 = vmatpush1.bf16.msra.mxu0 %v8953_v0 }
 0x22e   :  { %v1459_v13 = vadd.f32 %v1458_v12, %v10012_v19  ;;  %v1460_v14 = vpop.f32.mrb[31].mxu1  ;;  %2189 = vmatmul.mubr.bf16.gmra.mrb[152].mxu0 %v1843_v3  ;;  %v1731_v18 = vmax.f32 %v1455_v6, 0.0  ;;  %v8956_v12 = vld [vmem:[%s12867_s1 + $0x3f0] ss:$8 sps:$4 sm:$0xff]  }
 0x22f   :  { %v1461_v15 = vadd.f32 %v1460_v14, %v10018_v22  ;;  %v1732_v21 = vmax.f32 %v1457_v11, 0.0 }
 0x230   :  { %v1733_v20 = vmax.f32 %v1459_v13, 0.0  ;;  %v8958_v13 = vld [vmem:[%s12867_s1 + $0x3f4] ss:$8 sps:$4 sm:$0xff]  }
 0x231   :  { %v1734_v23 = vmax.f32 %v1461_v15, 0.0  ;;  %2872 = vmatprep.subr.bf16.mxu1 %v8958_v13 }
 0x232   :  { %v1845_v24 = vpack.c.bf16 %v1733_v20, %v1731_v18  ;;  %2873 = vmatpush1.bf16.msra.mxu1 %v8956_v12  ;;  %v8964_v12 = vld [vmem:[%s12867_s1 + $0x434] ss:$8 sps:$4 sm:$0xff]  }
 0x233   :  { %v1464_v25 = vpop.f32.mrb[32].mxu1  ;;  %v1846_v26 = vpack.c.bf16 %v1734_v23, %v1732_v21 }
 0x234   :  { %v1465_v27 = vadd.f32 %v1464_v25, %v10012_v19  ;;  %v1466_v28 = vpop.f32.mrb[33].mxu1 }
 0x235   :  { %v1467_v16 = vadd.f32 %v1466_v28, %v10018_v22  ;;  %v1468_v29 = vpop.f32.mrb[34].mxu1  ;;  %2198 = vmatprep.mubr.bf16.mxu0 %v1846_v26 }
 0x236   :  { %v1469_v30 = vadd.f32 %v1468_v29, %v10012_v19  ;;  %v1470_v17 = vpop.f32.mrb[35].mxu1  ;;  %2199 = vmatmul.mubr.bf16.gmra.mrb[156].mxu0 %v1845_v24  ;;  %v1735_v34 = vmax.f32 %v1465_v27, 0.0 }
 0x237   :  { %v1471_v31 = vadd.f32 %v1470_v17, %v10018_v22  ;;  %v1736_v36 = vmax.f32 %v1467_v16, 0.0 }
 0x238   :  { %v1737_v35 = vmax.f32 %v1469_v30, 0.0 }
 0x239   :  { %v1738_v37 = vmax.f32 %v1471_v31, 0.0 }
 0x23a   :  { %v1847_v38 = vpack.c.bf16 %v1737_v35, %v1735_v34 }
 0x23b   :  { %v1474_v39 = vpop.f32.mrb[36].mxu1  ;;  %v1848_v40 = vpack.c.bf16 %v1738_v37, %v1736_v36 }
 0x23c   :  { %v1475_v41 = vadd.f32 %v1474_v39, %v10012_v19  ;;  %v1476_v42 = vpop.f32.mrb[37].mxu1 }
 0x23d   :  { %v1477_v45 = vadd.f32 %v1476_v42, %v10018_v22  ;;  %v1478_v46 = vpop.f32.mrb[38].mxu1  ;;  %2208 = vmatprep.mubr.bf16.mxu0 %v1848_v40 }
 0x23e   :  { %v1479_v47 = vadd.f32 %v1478_v46, %v10012_v19  ;;  %v1480_v48 = vpop.f32.mrb[39].mxu1  ;;  %2209 = vmatmul.mubr.bf16.gmra.mrb[160].mxu0 %v1847_v38  ;;  %v1739_v50 = vmax.f32 %v1475_v41, 0.0 }
 0x23f   :  { %v1481_v49 = vadd.f32 %v1480_v48, %v10018_v22  ;;  %v1740_v52 = vmax.f32 %v1477_v45, 0.0  ;;  %v8961_v45 = vld [vmem:[%s12867_s1 + $0x424] ss:$8 sps:$4 sm:$0xff]  }
 0x240   :  { %v1741_v51 = vmax.f32 %v1479_v47, 0.0  ;;  %3592 = vmatprep.subr.bf16.mxu0 %v8961_v45 }
 0x241   :  { %v1742_v53 = vmax.f32 %v1481_v49, 0.0  ;;  %3593 = vmatpush1.bf16.msra.mxu0 %v8959_v44  ;;  %v8967_v44 = vld [vmem:[%s12867_s1 + $0x444] ss:$8 sps:$4 sm:$0xff]  }
 0x242   :  { %v1849_v54 = vpack.c.bf16 %v1741_v51, %v1739_v50  ;;  %3594 = vmatprep.subr.bf16.mxu0 %v8964_v12 }
 0x243   :  { %v1484_v55 = vpop.f32.mrb[40].mxu1  ;;  %v1850_v56 = vpack.c.bf16 %v1742_v53, %v1740_v52 }
 0x244   :  { %v1485_v57 = vadd.f32 %v1484_v55, %v10012_v19  ;;  %v1486_v58 = vpop.f32.mrb[41].mxu1 }
 0x245   :  { %v1487_v59 = vadd.f32 %v1486_v58, %v10018_v22  ;;  %v1488_v60 = vpop.f32.mrb[42].mxu1  ;;  %2218 = vmatprep.mubr.bf16.mxu0 %v1850_v56 }
 0x246   :  { %v1489_v61 = vadd.f32 %v1488_v60, %v10012_v19  ;;  %v1490_v62 = vpop.f32.mrb[43].mxu1  ;;  %2219 = vmatmul.mubr.bf16.gmra.mrb[164].mxu0 %v1849_v54  ;;  %v1743_v2 = vmax.f32 %v1485_v57, 0.0 }
 0x247   :  { %v1491_v63 = vadd.f32 %v1490_v62, %v10018_v22  ;;  %v1744_v4 = vmax.f32 %v1487_v59, 0.0 }
 0x248   :  { %v1745_v3 = vmax.f32 %v1489_v61, 0.0 }
 0x249   :  { %v1746_v5 = vmax.f32 %v1491_v63, 0.0 }
 0x24a   :  { %v1851_v6 = vpack.c.bf16 %v1745_v3, %v1743_v2 }
 0x24b   :  { %v1494_v7 = vpop.f32.mrb[44].mxu1  ;;  %v1852_v9 = vpack.c.bf16 %v1746_v5, %v1744_v4 }
 0x24c   :  { %v1495_v10 = vadd.f32 %v1494_v7, %v10012_v19  ;;  %v1496_v11 = vpop.f32.mrb[45].mxu1 }
 0x24d   :  { %v1497_v14 = vadd.f32 %v1496_v11, %v10018_v22  ;;  %v1498_v15 = vpop.f32.mrb[46].mxu1  ;;  %2228 = vmatprep.mubr.bf16.mxu0 %v1852_v9  ;;  %v8962_v11 = vld [vmem:[%s12867_s1 + $0x430] ss:$8 sps:$4 sm:$0xff]  }
 0x24e   :  { %v1499_v18 = vadd.f32 %v1498_v15, %v10012_v19  ;;  %v1500_v20 = vpop.f32.mrb[47].mxu1  ;;  %2229 = vmatmul.mubr.bf16.gmra.mrb[168].mxu0 %v1851_v6  ;;  %v1747_v23 = vmax.f32 %v1495_v10, 0.0 }
 0x24f   :  { %v1501_v21 = vadd.f32 %v1500_v20, %v10018_v22  ;;  %v1748_v25 = vmax.f32 %v1497_v14, 0.0  ;;  %3595 = vmatpush1.bf16.msra.mxu0 %v8962_v11  ;;  %v8970_v11 = vld [vmem:[%s12867_s1 + $0x454] ss:$8 sps:$4 sm:$0xff]  }
 0x250   :  { %v1749_v24 = vmax.f32 %v1499_v18, 0.0  ;;  %3596 = vmatprep.subr.bf16.mxu0 %v8967_v44 }
 0x251   :  { %v1750_v26 = vmax.f32 %v1501_v21, 0.0 }
 0x252   :  { %v1853_v27 = vpack.c.bf16 %v1749_v24, %v1747_v23 }
 0x253   :  { %v1504_v28 = vpop.f32.mrb[48].mxu1  ;;  %v1854_v16 = vpack.c.bf16 %v1750_v26, %v1748_v25 }
 0x254   :  { %v1505_v29 = vadd.f32 %v1504_v28, %v10012_v19  ;;  %v1506_v30 = vpop.f32.mrb[49].mxu1 }
 0x255   :  { %v1507_v17 = vadd.f32 %v1506_v30, %v10018_v22  ;;  %v1508_v31 = vpop.f32.mrb[50].mxu1  ;;  %2238 = vmatprep.mubr.bf16.mxu0 %v1854_v16 }
 0x256   :  { %v1509_v32 = vadd.f32 %v1508_v31, %v10012_v19  ;;  %v1510_v33 = vpop.f32.mrb[51].mxu1  ;;  %2239 = vmatmul.mubr.bf16.gmra.mrb[172].mxu0 %v1853_v27  ;;  %v1751_v35 = vmax.f32 %v1505_v29, 0.0 }
 0x257   :  { %v1511_v34 = vadd.f32 %v1510_v33, %v10018_v22  ;;  %v1752_v37 = vmax.f32 %v1507_v17, 0.0 }
 0x258   :  { %v1753_v36 = vmax.f32 %v1509_v32, 0.0 }
 0x259   :  { %v1754_v38 = vmax.f32 %v1511_v34, 0.0 }
 0x25a   :  { %v1855_v39 = vpack.c.bf16 %v1753_v36, %v1751_v35 }
 0x25b   :  { %v1514_v40 = vpop.f32.mrb[52].mxu1  ;;  %v1856_v41 = vpack.c.bf16 %v1754_v38, %v1752_v37 }
 0x25c   :  { %v1515_v42 = vadd.f32 %v1514_v40, %v10012_v19  ;;  %v1516_v43 = vpop.f32.mrb[53].mxu1 }
 0x25d   :  { %v1517_v46 = vadd.f32 %v1516_v43, %v10018_v22  ;;  %v1518_v47 = vpop.f32.mrb[54].mxu1  ;;  %2248 = vmatprep.mubr.bf16.mxu0 %v1856_v41  ;;  %v8965_v43 = vld [vmem:[%s12867_s1 + $0x440] ss:$8 sps:$4 sm:$0xff]  }
 0x25e   :  { %v1519_v48 = vadd.f32 %v1518_v47, %v10012_v19  ;;  %v1520_v49 = vpop.f32.mrb[55].mxu1  ;;  %2249 = vmatmul.mubr.bf16.gmra.mrb[176].mxu0 %v1855_v39  ;;  %v1755_v51 = vmax.f32 %v1515_v42, 0.0 }
 0x25f   :  { %v1521_v50 = vadd.f32 %v1520_v49, %v10018_v22  ;;  %v1756_v53 = vmax.f32 %v1517_v46, 0.0  ;;  %3597 = vmatpush1.bf16.msra.mxu0 %v8965_v43  ;;  %v8973_v43 = vld [vmem:[%s12867_s1 + $0x464] ss:$8 sps:$4 sm:$0xff]  }
 0x260   :  { %v1757_v52 = vmax.f32 %v1519_v48, 0.0  ;;  %3598 = vmatprep.subr.bf16.mxu0 %v8970_v11 }
 0x261   :  { %v1758_v54 = vmax.f32 %v1521_v50, 0.0 }
 0x262   :  { %v1857_v55 = vpack.c.bf16 %v1757_v52, %v1755_v51 }
 0x263   :  { %v1524_v56 = vpop.f32.mrb[56].mxu1  ;;  %v1858_v57 = vpack.c.bf16 %v1758_v54, %v1756_v53 }
 0x264   :  { %v1525_v58 = vadd.f32 %v1524_v56, %v10012_v19  ;;  %v1526_v59 = vpop.f32.mrb[57].mxu1 }
 0x265   :  { %v1527_v60 = vadd.f32 %v1526_v59, %v10018_v22  ;;  %v1528_v61 = vpop.f32.mrb[58].mxu1  ;;  %2258 = vmatprep.mubr.bf16.mxu0 %v1858_v57 }
 0x266   :  { %v1529_v62 = vadd.f32 %v1528_v61, %v10012_v19  ;;  %v1530_v63 = vpop.f32.mrb[59].mxu1  ;;  %2259 = vmatmul.mubr.bf16.gmra.mrb[180].mxu0 %v1857_v55  ;;  %v1759_v1 = vmax.f32 %v1525_v58, 0.0 }
 0x267   :  { %v1531_v0 = vadd.f32 %v1530_v63, %v10018_v22  ;;  %v1760_v3 = vmax.f32 %v1527_v60, 0.0 }
 0x268   :  { %v1761_v2 = vmax.f32 %v1529_v62, 0.0 }
 0x269   :  { %v1762_v4 = vmax.f32 %v1531_v0, 0.0 }
 0x26a   :  { %v1859_v5 = vpack.c.bf16 %v1761_v2, %v1759_v1 }
 0x26b   :  { %v1534_v6 = vpop.f32.mrb[60].mxu1  ;;  %v1860_v7 = vpack.c.bf16 %v1762_v4, %v1760_v3 }
 0x26c   :  { %v1535_v9 = vadd.f32 %v1534_v6, %v10012_v19  ;;  %v1536_v10 = vpop.f32.mrb[61].mxu1 }
 0x26d   :  { %v1537_v13 = vadd.f32 %v1536_v10, %v10018_v22  ;;  %v1538_v14 = vpop.f32.mrb[62].mxu1  ;;  %2268 = vmatprep.mubr.bf16.mxu0 %v1860_v7  ;;  %v8968_v10 = vld [vmem:[%s12867_s1 + $0x450] ss:$8 sps:$4 sm:$0xff]  }
 0x26e   :  { %v1539_v15 = vadd.f32 %v1538_v14, %v10012_v19  ;;  %v1540_v18 = vpop.f32.mrb[63].mxu1  ;;  %2269 = vmatmul.mubr.bf16.gmra.mrb[184].mxu0 %v1859_v5  ;;  %v1763_v21 = vmax.f32 %v1535_v9, 0.0 }
 0x26f   :  { %v1541_v20 = vadd.f32 %v1540_v18, %v10018_v22  ;;  %v1764_v24 = vmax.f32 %v1537_v13, 0.0  ;;  %3599 = vmatpush1.bf16.msra.mxu0 %v8968_v10  ;;  %v8976_v10 = vld [vmem:[%s12867_s1 + $0x474] ss:$8 sps:$4 sm:$0xff]  }
 0x270   :  { %v1765_v23 = vmax.f32 %v1539_v15, 0.0  ;;  %3600 = vmatprep.subr.bf16.mxu0 %v8973_v43 }
 0x271   :  { %v1766_v25 = vmax.f32 %v1541_v20, 0.0 }
 0x272   :  { %v1861_v26 = vpack.c.bf16 %v1765_v23, %v1763_v21 }
 0x273   :  { %v1544_v27 = vpop.f32.mrb[64].mxu1  ;;  %v1862_v28 = vpack.c.bf16 %v1766_v25, %v1764_v24 }
 0x274   :  { %v1545_v16 = vadd.f32 %v1544_v27, %v10012_v19  ;;  %v1546_v29 = vpop.f32.mrb[65].mxu1 }
 0x275   :  { %v1547_v30 = vadd.f32 %v1546_v29, %v10018_v22  ;;  %v1548_v17 = vpop.f32.mrb[66].mxu1  ;;  %2278 = vmatprep.mubr.bf16.mxu0 %v1862_v28 }
 0x276   :  { %v1549_v31 = vadd.f32 %v1548_v17, %v10012_v19  ;;  %v1550_v32 = vpop.f32.mrb[67].mxu1  ;;  %2279 = vmatmul.mubr.bf16.gmra.mrb[188].mxu0 %v1861_v26  ;;  %v1767_v34 = vmax.f32 %v1545_v16, 0.0 }
 0x277   :  { %v1551_v33 = vadd.f32 %v1550_v32, %v10018_v22  ;;  %v1768_v36 = vmax.f32 %v1547_v30, 0.0 }
 0x278   :  { %v1769_v35 = vmax.f32 %v1549_v31, 0.0 }
 0x279   :  { %v1770_v37 = vmax.f32 %v1551_v33, 0.0 }
 0x27a   :  { %v1863_v38 = vpack.c.bf16 %v1769_v35, %v1767_v34 }
 0x27b   :  { %v1554_v39 = vpop.f32.mrb[68].mxu1  ;;  %v1864_v40 = vpack.c.bf16 %v1770_v37, %v1768_v36 }
 0x27c   :  { %v1555_v41 = vadd.f32 %v1554_v39, %v10012_v19  ;;  %v1556_v42 = vpop.f32.mrb[69].mxu1 }
 0x27d   :  { %v1557_v45 = vadd.f32 %v1556_v42, %v10018_v22  ;;  %v1558_v46 = vpop.f32.mrb[70].mxu1  ;;  %2288 = vmatprep.mubr.bf16.mxu0 %v1864_v40  ;;  %v8971_v42 = vld [vmem:[%s12867_s1 + $0x460] ss:$8 sps:$4 sm:$0xff]  }
 0x27e   :  { %v1559_v47 = vadd.f32 %v1558_v46, %v10012_v19  ;;  %v1560_v48 = vpop.f32.mrb[71].mxu1  ;;  %2289 = vmatmul.mubr.bf16.gmra.mrb[192].mxu0 %v1863_v38  ;;  %v1771_v50 = vmax.f32 %v1555_v41, 0.0 }
 0x27f   :  { %v1561_v49 = vadd.f32 %v1560_v48, %v10018_v22  ;;  %v1772_v52 = vmax.f32 %v1557_v45, 0.0  ;;  %3601 = vmatpush1.bf16.msra.mxu0 %v8971_v42  ;;  %v8979_v42 = vld [vmem:[%s12867_s1 + $0x484] ss:$8 sps:$4 sm:$0xff]  }
 0x280   :  { %v1773_v51 = vmax.f32 %v1559_v47, 0.0  ;;  %3602 = vmatprep.subr.bf16.mxu0 %v8976_v10  ;;  %v8982_v10 = vld [vmem:[%s12867_s1 + $0x494] ss:$8 sps:$4 sm:$0xff]  }
 0x281   :  { %v1774_v53 = vmax.f32 %v1561_v49, 0.0 }
 0x282   :  { %v1865_v54 = vpack.c.bf16 %v1773_v51, %v1771_v50 }
 0x283   :  { %v1564_v55 = vpop.f32.mrb[72].mxu1  ;;  %v1866_v56 = vpack.c.bf16 %v1774_v53, %v1772_v52 }
 0x284   :  { %v1565_v57 = vadd.f32 %v1564_v55, %v10012_v19  ;;  %v1566_v58 = vpop.f32.mrb[73].mxu1 }
 0x285   :  { %v1567_v59 = vadd.f32 %v1566_v58, %v10018_v22  ;;  %v1568_v60 = vpop.f32.mrb[74].mxu1  ;;  %2298 = vmatprep.mubr.bf16.mxu0 %v1866_v56 }
 0x286   :  { %v1569_v61 = vadd.f32 %v1568_v60, %v10012_v19  ;;  %v1570_v62 = vpop.f32.mrb[75].mxu1  ;;  %2299 = vmatmul.mubr.bf16.gmra.mrb[196].mxu0 %v1865_v54  ;;  %v1775_v0 = vmax.f32 %v1565_v57, 0.0 }
 0x287   :  { %v1571_v63 = vadd.f32 %v1570_v62, %v10018_v22  ;;  %v1776_v2 = vmax.f32 %v1567_v59, 0.0 }
 0x288   :  { %v1777_v1 = vmax.f32 %v1569_v61, 0.0 }
 0x289   :  { %v1778_v3 = vmax.f32 %v1571_v63, 0.0 }
 0x28a   :  { %v1867_v4 = vpack.c.bf16 %v1777_v1, %v1775_v0 }
 0x28b   :  { %v1574_v5 = vpop.f32.mrb[76].mxu1  ;;  %v1868_v6 = vpack.c.bf16 %v1778_v3, %v1776_v2 }
 0x28c   :  { %v1575_v7 = vadd.f32 %v1574_v5, %v10012_v19  ;;  %v1576_v9 = vpop.f32.mrb[77].mxu1 }
 0x28d   :  { %v1577_v12 = vadd.f32 %v1576_v9, %v10018_v22  ;;  %v1578_v13 = vpop.f32.mrb[78].mxu1  ;;  %2308 = vmatprep.mubr.bf16.mxu0 %v1868_v6  ;;  %v8974_v9 = vld [vmem:[%s12867_s1 + $0x470] ss:$8 sps:$4 sm:$0xff]  }
 0x28e   :  { %v1579_v14 = vadd.f32 %v1578_v13, %v10012_v19  ;;  %v1580_v15 = vpop.f32.mrb[79].mxu1  ;;  %2309 = vmatmul.mubr.bf16.gmra.mrb[200].mxu0 %v1867_v4  ;;  %v1779_v20 = vmax.f32 %v1575_v7, 0.0 }
 0x28f   :  { %v1581_v18 = vadd.f32 %v1580_v15, %v10018_v22  ;;  %v1780_v23 = vmax.f32 %v1577_v12, 0.0  ;;  %3603 = vmatpush1.bf16.msra.mxu0 %v8974_v9  ;;  %v8980_v9 = vld [vmem:[%s12867_s1 + $0x490] ss:$8 sps:$4 sm:$0xff]  }
 0x290   :  { %v1781_v21 = vmax.f32 %v1579_v14, 0.0  ;;  %3604 = vmatprep.subr.bf16.mxu0 %v8979_v42 }
 0x291   :  { %v1782_v24 = vmax.f32 %v1581_v18, 0.0 }
 0x292   :  { %v1869_v25 = vpack.c.bf16 %v1781_v21, %v1779_v20 }
 0x293   :  { %v1584_v26 = vpop.f32.mrb[80].mxu1  ;;  %v1870_v27 = vpack.c.bf16 %v1782_v24, %v1780_v23 }
 0x294   :  { %v1585_v28 = vadd.f32 %v1584_v26, %v10012_v19  ;;  %v1586_v16 = vpop.f32.mrb[81].mxu1 }
 0x295   :  { %v1587_v29 = vadd.f32 %v1586_v16, %v10018_v22  ;;  %v1588_v30 = vpop.f32.mrb[82].mxu1  ;;  %2318 = vmatprep.mubr.bf16.mxu0 %v1870_v27 }
 0x296   :  { %v1589_v17 = vadd.f32 %v1588_v30, %v10012_v19  ;;  %v1590_v31 = vpop.f32.mrb[83].mxu1  ;;  %2319 = vmatmul.mubr.bf16.gmra.mrb[204].mxu0 %v1869_v25  ;;  %v1783_v33 = vmax.f32 %v1585_v28, 0.0 }
 0x297   :  { %v1591_v32 = vadd.f32 %v1590_v31, %v10018_v22  ;;  %v1784_v35 = vmax.f32 %v1587_v29, 0.0 }
 0x298   :  { %v1785_v34 = vmax.f32 %v1589_v17, 0.0 }
 0x299   :  { %v1786_v36 = vmax.f32 %v1591_v32, 0.0 }
 0x29a   :  { %v1871_v37 = vpack.c.bf16 %v1785_v34, %v1783_v33 }
 0x29b   :  { %v1594_v38 = vpop.f32.mrb[84].mxu1  ;;  %v1872_v39 = vpack.c.bf16 %v1786_v36, %v1784_v35 }
 0x29c   :  { %v1595_v40 = vadd.f32 %v1594_v38, %v10012_v19  ;;  %v1596_v41 = vpop.f32.mrb[85].mxu1 }
 0x29d   :  { %v1597_v44 = vadd.f32 %v1596_v41, %v10018_v22  ;;  %v1598_v45 = vpop.f32.mrb[86].mxu1  ;;  %2328 = vmatprep.mubr.bf16.mxu0 %v1872_v39  ;;  %v8977_v41 = vld [vmem:[%s12867_s1 + $0x480] ss:$8 sps:$4 sm:$0xff]  }
 0x29e   :  { %v1599_v46 = vadd.f32 %v1598_v45, %v10012_v19  ;;  %v1600_v47 = vpop.f32.mrb[87].mxu1  ;;  %2329 = vmatmul.mubr.bf16.gmra.mrb[208].mxu0 %v1871_v37  ;;  %v1787_v49 = vmax.f32 %v1595_v40, 0.0 }
 0x29f   :  { %v1601_v48 = vadd.f32 %v1600_v47, %v10018_v22  ;;  %v1788_v51 = vmax.f32 %v1597_v44, 0.0  ;;  %3605 = vmatpush1.bf16.msra.mxu0 %v8977_v41 }
 0x2a0   :  { %v1789_v50 = vmax.f32 %v1599_v46, 0.0  ;;  %3606 = vmatprep.subr.bf16.mxu0 %v8982_v10 }
 0x2a1   :  { %v1790_v52 = vmax.f32 %v1601_v48, 0.0 }
 0x2a2   :  { %v1873_v53 = vpack.c.bf16 %v1789_v50, %v1787_v49 }
 0x2a3   :  { %v1604_v54 = vpop.f32.mrb[88].mxu1  ;;  %v1874_v55 = vpack.c.bf16 %v1790_v52, %v1788_v51  ;;  %3607 = vmatpush1.bf16.msra.mxu0 %v8980_v9 }
 0x2a4   :  { %v1605_v56 = vadd.f32 %v1604_v54, %v10012_v19  ;;  %v1606_v57 = vpop.f32.mrb[89].mxu1 }
 0x2a5   :  { %v1607_v58 = vadd.f32 %v1606_v57, %v10018_v22  ;;  %v1608_v59 = vpop.f32.mrb[90].mxu1  ;;  %2338 = vmatprep.mubr.bf16.mxu0 %v1874_v55 }
 0x2a6   :  { %v1609_v60 = vadd.f32 %v1608_v59, %v10012_v19  ;;  %v1610_v61 = vpop.f32.mrb[91].mxu1  ;;  %2339 = vmatmul.mubr.bf16.gmra.mrb[212].mxu0 %v1873_v53  ;;  %v1791_v63 = vmax.f32 %v1605_v56, 0.0 }
 0x2a7   :  { %v1611_v62 = vadd.f32 %v1610_v61, %v10018_v22  ;;  %v1792_v1 = vmax.f32 %v1607_v58, 0.0 }
 0x2a8   :  { %v1793_v0 = vmax.f32 %v1609_v60, 0.0 }
 0x2a9   :  { %v1794_v2 = vmax.f32 %v1611_v62, 0.0 }
 0x2aa   :  { %v1875_v3 = vpack.c.bf16 %v1793_v0, %v1791_v63 }
 0x2ab   :  { %v1614_v4 = vpop.f32.mrb[92].mxu1  ;;  %v1876_v5 = vpack.c.bf16 %v1794_v2, %v1792_v1 }
 0x2ac   :  { %v1615_v6 = vadd.f32 %v1614_v4, %v10012_v19  ;;  %v1616_v7 = vpop.f32.mrb[93].mxu1 }
 0x2ad   :  { %v1617_v11 = vadd.f32 %v1616_v7, %v10018_v22  ;;  %v1618_v12 = vpop.f32.mrb[94].mxu1  ;;  %2348 = vmatprep.mubr.bf16.mxu0 %v1876_v5 }
 0x2ae   :  { %v1619_v13 = vadd.f32 %v1618_v12, %v10012_v19  ;;  %v1620_v14 = vpop.f32.mrb[95].mxu1  ;;  %2349 = vmatmul.mubr.bf16.gmra.mrb[216].mxu0 %v1875_v3  ;;  %v1795_v18 = vmax.f32 %v1615_v6, 0.0  ;;  %v1930_v3 = vsub.s32 2, %v9749_v8 }
 0x2af   :  { %v1621_v15 = vadd.f32 %v1620_v14, %v10018_v22  ;;  %v1796_v21 = vmax.f32 %v1617_v11, 0.0 }
 0x2b0   :  { %v1797_v20 = vmax.f32 %v1619_v13, 0.0 }
 0x2b1   :  { %v1798_v23 = vmax.f32 %v1621_v15, 0.0  ;;  %v9243_v15 = vld [vmem:[%s12869_s2] sm:$0xff] }
 0x2b2   :  { %v1877_v24 = vpack.c.bf16 %v1797_v20, %v1795_v18  ;;  %v10247_v18 = vrot.slane %v9243_v15, %v1930_v3 }
 0x2b3   :  { %v1624_v25 = vpop.f32.mrb[96].mxu1  ;;  %v1878_v26 = vpack.c.bf16 %v1798_v23, %v1796_v21  ;;  %v9244_v21 = vld [vmem:[%s12869_s2 + $0x8] sm:$0xff] }
 0x2b4   :  { %v1625_v27 = vadd.f32 %v1624_v25, %v10012_v19  ;;  %v1626_v28 = vpop.f32.mrb[97].mxu1  ;;  %v10253_v23 = vrot.slane %v9244_v21, %v1930_v3 }
 0x2b5   :  { %v1627_v16 = vadd.f32 %v1626_v28, %v10018_v22  ;;  %v1628_v29 = vpop.f32.mrb[98].mxu1  ;;  %2358 = vmatprep.mubr.bf16.mxu0 %v1878_v26 }
 0x2b6   :  { %v1629_v30 = vadd.f32 %v1628_v29, %v10012_v19  ;;  %v1630_v17 = vpop.f32.mrb[99].mxu1  ;;  %2359 = vmatmul.mubr.bf16.gmra.mrb[220].mxu0 %v1877_v24  ;;  %v1799_v32 = vmax.f32 %v1625_v27, 0.0 }
 0x2b7   :  { %v1631_v31 = vadd.f32 %v1630_v17, %v10018_v22  ;;  %v1800_v34 = vmax.f32 %v1627_v16, 0.0 }
 0x2b8   :  { %v1801_v33 = vmax.f32 %v1629_v30, 0.0 }
 0x2b9   :  { %v1802_v35 = vmax.f32 %v1631_v31, 0.0 }
 0x2ba   :  { %v1879_v36 = vpack.c.bf16 %v1801_v33, %v1799_v32 }
 0x2bb   :  { %v1634_v37 = vpop.f32.mrb[100].mxu1  ;;  %v1880_v38 = vpack.c.bf16 %v1802_v35, %v1800_v34 }
 0x2bc   :  { %v1635_v39 = vadd.f32 %v1634_v37, %v10012_v19  ;;  %v1636_v40 = vpop.f32.mrb[101].mxu1 }
 0x2bd   :  { %v1637_v43 = vadd.f32 %v1636_v40, %v10018_v22  ;;  %v1638_v44 = vpop.f32.mrb[102].mxu1  ;;  %2368 = vmatprep.mubr.bf16.mxu0 %v1880_v38 }
 0x2be   :  { %v1639_v45 = vadd.f32 %v1638_v44, %v10012_v19  ;;  %v1640_v46 = vpop.f32.mrb[103].mxu1  ;;  %2369 = vmatmul.mubr.bf16.gmra.mrb[224].mxu0 %v1879_v36  ;;  %v1803_v48 = vmax.f32 %v1635_v39, 0.0 }
 0x2bf   :  { %v1641_v47 = vadd.f32 %v1640_v46, %v10018_v22  ;;  %v1804_v50 = vmax.f32 %v1637_v43, 0.0 }
 0x2c0   :  { %v1805_v49 = vmax.f32 %v1639_v45, 0.0 }
 0x2c1   :  { %v1806_v51 = vmax.f32 %v1641_v47, 0.0 }
 0x2c2   :  { %v1881_v52 = vpack.c.bf16 %v1805_v49, %v1803_v48 }
 0x2c3   :  { %v1644_v53 = vpop.f32.mrb[104].mxu1  ;;  %v1882_v54 = vpack.c.bf16 %v1806_v51, %v1804_v50 }
 0x2c4   :  { %v1645_v55 = vadd.f32 %v1644_v53, %v10012_v19  ;;  %v1646_v56 = vpop.f32.mrb[105].mxu1 }
 0x2c5   :  { %v1647_v57 = vadd.f32 %v1646_v56, %v10018_v22  ;;  %v1648_v58 = vpop.f32.mrb[106].mxu1  ;;  %2378 = vmatprep.mubr.bf16.mxu0 %v1882_v54 }
 0x2c6   :  { %v1649_v59 = vadd.f32 %v1648_v58, %v10012_v19  ;;  %v1650_v60 = vpop.f32.mrb[107].mxu1  ;;  %2379 = vmatmul.mubr.bf16.gmra.mrb[228].mxu0 %v1881_v52  ;;  %v1807_v62 = vmax.f32 %v1645_v55, 0.0 }
 0x2c7   :  { %v1651_v61 = vadd.f32 %v1650_v60, %v10018_v22  ;;  %v1808_v0 = vmax.f32 %v1647_v57, 0.0 }
 0x2c8   :  { %v1809_v63 = vmax.f32 %v1649_v59, 0.0 }
 0x2c9   :  { %v1810_v1 = vmax.f32 %v1651_v61, 0.0 }
 0x2ca   :  { %v1883_v2 = vpack.c.bf16 %v1809_v63, %v1807_v62 }
 0x2cb   :  { %v1654_v4 = vpop.f32.mrb[108].mxu1  ;;  %v1884_v5 = vpack.c.bf16 %v1810_v1, %v1808_v0 }
 0x2cc   :  { %v1655_v6 = vadd.f32 %v1654_v4, %v10012_v19  ;;  %v1656_v7 = vpop.f32.mrb[109].mxu1 }
 0x2cd   :  { %v1657_v11 = vadd.f32 %v1656_v7, %v10018_v22  ;;  %v1658_v12 = vpop.f32.mrb[110].mxu1  ;;  %2388 = vmatprep.mubr.bf16.mxu0 %v1884_v5 }
 0x2ce   :  { %v1659_v13 = vadd.f32 %v1658_v12, %v10012_v19  ;;  %v1660_v14 = vpop.f32.mrb[111].mxu1  ;;  %2389 = vmatmul.mubr.bf16.gmra.mrb[232].mxu0 %v1883_v2  ;;  %v1811_v24 = vmax.f32 %v1655_v6, 0.0  ;;  %v8983_v2 = vld [vmem:[%s12867_s1 + $0x4a0] ss:$8 sps:$4 sm:$0xff]   ;;  %v8985_v6 = vld [vmem:[%s12867_s1 + $0x4a4] ss:$8 sps:$4 sm:$0xff]  }
 0x2cf   :  { %v1661_v20 = vadd.f32 %v1660_v14, %v10018_v22  ;;  %v1812_v27 = vmax.f32 %v1657_v11, 0.0  ;;  %3608 = vmatprep.subr.bf16.mxu0 %v8985_v6 }
 0x2d0   :  { %v1813_v25 = vmax.f32 %v1659_v13, 0.0  ;;  %3609 = vmatpush1.bf16.msra.mxu0 %v8983_v2 }
 0x2d1   :  { %v2130_v26 = vpop.f32.mrb[128].mxu0  ;;  %v1814_v28 = vmax.f32 %v1661_v20, 0.0 }
 0x2d2   :  { %v2131_v16 = vadd.f32 %v2130_v26, %v10247_v18  ;;  %v2132_v29 = vpop.f32.mrb[129].mxu0  ;;  %v1885_v30 = vpack.c.bf16 %v1813_v25, %v1811_v24 }
 0x2d3   :  { %v2133_v17 = vadd.f32 %v2132_v29, %v10253_v23  ;;  %v1664_v31 = vpop.f32.mrb[112].mxu1  ;;  %v2134_v32 = vpop.f32.mrb[130].mxu0  ;;  %v1886_v33 = vpack.c.bf16 %v1814_v28, %v1812_v27 }
 0x2d4   :  { %v1665_v34 = vadd.f32 %v1664_v31, %v10012_v19  ;;  %v2135_v35 = vadd.f32 %v2134_v32, %v10247_v18  ;;  %v1666_v36 = vpop.f32.mrb[113].mxu1  ;;  %v2136_v37 = vpop.f32.mrb[131].mxu0  ;;  %v2449_v41 = vmax.f32 %v2131_v16, 0.0 }
 0x2d5   :  { %v1667_v38 = vadd.f32 %v1666_v36, %v10018_v22  ;;  %v2137_v39 = vadd.f32 %v2136_v37, %v10253_v23  ;;  %v1668_v40 = vpop.f32.mrb[114].mxu1  ;;  %2398 = vmatprep.mubr.bf16.mxu0 %v1886_v33  ;;  %v2450_v45 = vmax.f32 %v2133_v17, 0.0 }
 0x2d6   :  { %v2451_v42 = vmax.f32 %v2135_v35, 0.0  ;;  %v1669_v43 = vadd.f32 %v1668_v40, %v10012_v19  ;;  %v1670_v44 = vpop.f32.mrb[115].mxu1  ;;  %2399 = vmatmul.mubr.bf16.gmra.mrb[236].mxu0 %v1885_v30  ;;  %v1815_v49 = vmax.f32 %v1665_v34, 0.0 }
 0x2d7   :  { %v2452_v46 = vmax.f32 %v2137_v39, 0.0  ;;  %v1671_v47 = vadd.f32 %v1670_v44, %v10018_v22  ;;  %v1816_v53 = vmax.f32 %v1667_v38, 0.0 }
 0x2d8   :  { %v2577_v48 = vpack.c.bf16 %v2451_v42, %v2449_v41  ;;  %v1817_v50 = vmax.f32 %v1669_v43, 0.0 }
 0x2d9   :  { %v2140_v51 = vpop.f32.mrb[132].mxu0  ;;  %v2578_v52 = vpack.c.bf16 %v2452_v46, %v2450_v45  ;;  %v1818_v54 = vmax.f32 %v1671_v47, 0.0 }
 0x2da   :  { %v2141_v55 = vadd.f32 %v2140_v51, %v10247_v18  ;;  %v2142_v56 = vpop.f32.mrb[133].mxu0  ;;  %v1887_v57 = vpack.c.bf16 %v1817_v50, %v1815_v49 }
 0x2db   :  { %v2143_v58 = vadd.f32 %v2142_v56, %v10253_v23  ;;  %v1674_v59 = vpop.f32.mrb[116].mxu1  ;;  %v2144_v60 = vpop.f32.mrb[134].mxu0  ;;  %2874 = vmatprep.mubr.bf16.mxu1 %v2578_v52  ;;  %v1888_v61 = vpack.c.bf16 %v1818_v54, %v1816_v53 }
 0x2dc   :  { %v1675_v62 = vadd.f32 %v1674_v59, %v10012_v19  ;;  %v2145_v63 = vadd.f32 %v2144_v60, %v10247_v18  ;;  %v1676_v0 = vpop.f32.mrb[117].mxu1  ;;  %v2146_v1 = vpop.f32.mrb[135].mxu0  ;;  %2875 = vmatmul.mubr.bf16.vlgmr.msra.gmra.mrb[128].mxu1 %v2577_v48  ;;  %v2453_v7 = vmax.f32 %v2141_v55, 0.0 }
 0x2dd   :  { %v1677_v3 = vadd.f32 %v1676_v0, %v10018_v22  ;;  %v2147_v4 = vadd.f32 %v2146_v1, %v10253_v23  ;;  %v1678_v5 = vpop.f32.mrb[118].mxu1  ;;  %2408 = vmatprep.mubr.bf16.mxu0 %v1888_v61  ;;  %v2454_v12 = vmax.f32 %v2143_v58, 0.0  ;;  %v8986_v1 = vld [vmem:[%s12867_s1 + $0x4b0] ss:$8 sps:$4 sm:$0xff]  }
 0x2de   :  { %v2455_v9 = vmax.f32 %v2145_v63, 0.0  ;;  %v1679_v10 = vadd.f32 %v1678_v5, %v10012_v19  ;;  %v1680_v11 = vpop.f32.mrb[119].mxu1  ;;  %2409 = vmatmul.mubr.bf16.gmra.mrb[240].mxu0 %v1887_v57  ;;  %v1819_v20 = vmax.f32 %v1675_v62, 0.0  ;;  %v8988_v5 = vld [vmem:[%s12867_s1 + $0x4b4] ss:$8 sps:$4 sm:$0xff]  }
 0x2df   :  { %v2456_v13 = vmax.f32 %v2147_v4, 0.0  ;;  %v1681_v14 = vadd.f32 %v1680_v11, %v10018_v22  ;;  %v1820_v26 = vmax.f32 %v1677_v3, 0.0  ;;  %3610 = vmatprep.subr.bf16.mxu0 %v8988_v5 }
 0x2e0   :  { %v2579_v15 = vpack.c.bf16 %v2455_v9, %v2453_v7  ;;  %v1821_v21 = vmax.f32 %v1679_v10, 0.0  ;;  %3611 = vmatpush1.bf16.msra.mxu0 %v8986_v1 }
 0x2e1   :  { %v2150_v24 = vpop.f32.mrb[136].mxu0  ;;  %v2580_v25 = vpack.c.bf16 %v2456_v13, %v2454_v12  ;;  %v1822_v27 = vmax.f32 %v1681_v14, 0.0 }
 0x2e2   :  { %v2151_v28 = vadd.f32 %v2150_v24, %v10247_v18  ;;  %v2152_v16 = vpop.f32.mrb[137].mxu0  ;;  %v1889_v29 = vpack.c.bf16 %v1821_v21, %v1819_v20 }
 0x2e3   :  { %v2153_v30 = vadd.f32 %v2152_v16, %v10253_v23  ;;  %v1684_v17 = vpop.f32.mrb[120].mxu1  ;;  %v2154_v31 = vpop.f32.mrb[138].mxu0  ;;  %2884 = vmatprep.mubr.bf16.mxu1 %v2580_v25  ;;  %v1890_v32 = vpack.c.bf16 %v1822_v27, %v1820_v26 }
 0x2e4   :  { %v1685_v33 = vadd.f32 %v1684_v17, %v10012_v19  ;;  %v2155_v34 = vadd.f32 %v2154_v31, %v10247_v18  ;;  %v1686_v35 = vpop.f32.mrb[121].mxu1  ;;  %v2156_v36 = vpop.f32.mrb[139].mxu0  ;;  %2885 = vmatmul.mubr.bf16.gmra.mrb[132].mxu1 %v2579_v15  ;;  %v2457_v40 = vmax.f32 %v2151_v28, 0.0 }
 0x2e5   :  { %v1687_v37 = vadd.f32 %v1686_v35, %v10018_v22  ;;  %v2157_v38 = vadd.f32 %v2156_v36, %v10253_v23  ;;  %v1688_v39 = vpop.f32.mrb[122].mxu1  ;;  %2418 = vmatprep.mubr.bf16.mxu0 %v1890_v32  ;;  %v2458_v44 = vmax.f32 %v2153_v30, 0.0 }
 0x2e6   :  { %v2459_v41 = vmax.f32 %v2155_v34, 0.0  ;;  %v1689_v42 = vadd.f32 %v1688_v39, %v10012_v19  ;;  %v1690_v43 = vpop.f32.mrb[123].mxu1  ;;  %2419 = vmatmul.mubr.bf16.gmra.mrb[244].mxu0 %v1889_v29  ;;  %v1823_v48 = vmax.f32 %v1685_v33, 0.0 }
 0x2e7   :  { %v2460_v45 = vmax.f32 %v2157_v38, 0.0  ;;  %v1691_v46 = vadd.f32 %v1690_v43, %v10018_v22  ;;  %v1824_v52 = vmax.f32 %v1687_v37, 0.0 }
 0x2e8   :  { %v2581_v47 = vpack.c.bf16 %v2459_v41, %v2457_v40  ;;  %v1825_v49 = vmax.f32 %v1689_v42, 0.0 }
 0x2e9   :  { %v2160_v50 = vpop.f32.mrb[140].mxu0  ;;  %v2582_v51 = vpack.c.bf16 %v2460_v45, %v2458_v44  ;;  %v1826_v53 = vmax.f32 %v1691_v46, 0.0  ;;  %v8989_v45 = vld [vmem:[%s12867_s1 + $0x4c0] ss:$8 sps:$4 sm:$0xff]   ;;  %v8991_v46 = vld [vmem:[%s12867_s1 + $0x4c4] ss:$8 sps:$4 sm:$0xff]  }
 0x2ea   :  { %v2161_v54 = vadd.f32 %v2160_v50, %v10247_v18  ;;  %v2162_v55 = vpop.f32.mrb[141].mxu0  ;;  %v1891_v56 = vpack.c.bf16 %v1825_v49, %v1823_v48  ;;  %3612 = vmatprep.subr.bf16.mxu0 %v8991_v46  ;;  %v8998_v46 = vld [vmem:[%s12867_s1 + $0x4e0] ss:$8 sps:$4 sm:$0xff]  }
 0x2eb   :  { %v2163_v57 = vadd.f32 %v2162_v55, %v10253_v23  ;;  %v1694_v58 = vpop.f32.mrb[124].mxu1  ;;  %v2164_v59 = vpop.f32.mrb[142].mxu0  ;;  %2894 = vmatprep.mubr.bf16.mxu1 %v2582_v51  ;;  %v1892_v60 = vpack.c.bf16 %v1826_v53, %v1824_v52  ;;  %3613 = vmatpush1.bf16.msra.mxu0 %v8989_v45 }
 0x2ec   :  { %v1695_v61 = vadd.f32 %v1694_v58, %v10012_v19  ;;  %v2165_v62 = vadd.f32 %v2164_v59, %v10247_v18  ;;  %v1696_v63 = vpop.f32.mrb[125].mxu1  ;;  %v2166_v0 = vpop.f32.mrb[143].mxu0  ;;  %2895 = vmatmul.mubr.bf16.gmra.mrb[136].mxu1 %v2581_v47  ;;  %v2461_v6 = vmax.f32 %v2161_v54, 0.0 }
 0x2ed   :  { %v1697_v2 = vadd.f32 %v1696_v63, %v10018_v22  ;;  %v2167_v3 = vadd.f32 %v2166_v0, %v10253_v23  ;;  %v1698_v4 = vpop.f32.mrb[126].mxu1  ;;  %2428 = vmatprep.mubr.bf16.mxu0 %v1892_v60  ;;  %v2462_v11 = vmax.f32 %v2163_v57, 0.0 }
 0x2ee   :  { %v2463_v7 = vmax.f32 %v2165_v62, 0.0  ;;  %v1699_v9 = vadd.f32 %v1698_v4, %v10012_v19  ;;  %v1700_v10 = vpop.f32.mrb[127].mxu1  ;;  %2429 = vmatmul.mubr.bf16.gmra.mrb[248].mxu0 %v1891_v56  ;;  %v1827_v15 = vmax.f32 %v1695_v61, 0.0 }
 0x2ef   :  { %v2464_v12 = vmax.f32 %v2167_v3, 0.0  ;;  %v1701_v13 = vadd.f32 %v1700_v10, %v10018_v22  ;;  %v1828_v25 = vmax.f32 %v1697_v2, 0.0 }
 0x2f0   :  { %v2583_v14 = vpack.c.bf16 %v2463_v7, %v2461_v6  ;;  %v1829_v20 = vmax.f32 %v1699_v9, 0.0 }
 0x2f1   :  { %v2170_v21 = vpop.f32.mrb[144].mxu0  ;;  %v2584_v24 = vpack.c.bf16 %v2464_v12, %v2462_v11  ;;  %v1830_v26 = vmax.f32 %v1701_v13, 0.0  ;;  %v8992_v12 = vld [vmem:[%s12867_s1 + $0x4d0] ss:$8 sps:$4 sm:$0xff]   ;;  %v8994_v13 = vld [vmem:[%s12867_s1 + $0x4d4] ss:$8 sps:$4 sm:$0xff]  }
 0x2f2   :  { %v2171_v27 = vadd.f32 %v2170_v21, %v10247_v18  ;;  %v2172_v28 = vpop.f32.mrb[145].mxu0  ;;  %v1893_v16 = vpack.c.bf16 %v1829_v20, %v1827_v15  ;;  %3614 = vmatprep.subr.bf16.mxu0 %v8994_v13 }
 0x2f3   :  { %v2173_v19 = vadd.f32 %v2172_v28, %v10253_v23  ;;  %v2174_v29 = vpop.f32.mrb[146].mxu0  ;;  %2904 = vmatprep.mubr.bf16.mxu1 %v2584_v24  ;;  %v1894_v30 = vpack.c.bf16 %v1830_v26, %v1828_v25  ;;  %3615 = vmatpush1.bf16.msra.mxu0 %v8992_v12 }
 0x2f4   :  { %v2175_v22 = vadd.f32 %v2174_v29, %v10247_v18  ;;  %v2176_v17 = vpop.f32.mrb[147].mxu0  ;;  %2905 = vmatmul.mubr.bf16.gmra.mrb[140].mxu1 %v2583_v14  ;;  %v2465_v32 = vmax.f32 %v2171_v27, 0.0 }
 0x2f5   :  { %v2177_v31 = vadd.f32 %v2176_v17, %v10253_v23  ;;  %2438 = vmatprep.mubr.bf16.mxu0 %v1894_v30  ;;  %v2466_v34 = vmax.f32 %v2173_v19, 0.0 }
 0x2f6   :  { %v2467_v33 = vmax.f32 %v2175_v22, 0.0  ;;  %2439 = vmatmul.mubr.bf16.gmra.mrb[252].mxu0 %v1893_v16 }
 0x2f7   :  { %v2468_v35 = vmax.f32 %v2177_v31, 0.0 }
 0x2f8   :  { %v2585_v36 = vpack.c.bf16 %v2467_v33, %v2465_v32 }
 0x2f9   :  { %v2180_v37 = vpop.f32.mrb[148].mxu0  ;;  %v2586_v38 = vpack.c.bf16 %v2468_v35, %v2466_v34  ;;  %v8995_v35 = vld [vmem:[%s12867_s1 + $0x600] ss:$8 sps:$4 sm:$0xff]  }
 0x2fa   :  { %v2181_v39 = vadd.f32 %v2180_v37, %v10247_v18  ;;  %v2182_v40 = vpop.f32.mrb[149].mxu0 }
 0x2fb   :  { %v2183_v41 = vadd.f32 %v2182_v40, %v10253_v23  ;;  %v2184_v42 = vpop.f32.mrb[150].mxu0  ;;  %2914 = vmatprep.mubr.bf16.mxu1 %v2586_v38 }
 0x2fc   :  { %v2185_v43 = vadd.f32 %v2184_v42, %v10247_v18  ;;  %v2186_v44 = vpop.f32.mrb[151].mxu0  ;;  %2915 = vmatmul.mubr.bf16.gmra.mrb[144].mxu1 %v2585_v36  ;;  %v2469_v48 = vmax.f32 %v2181_v39, 0.0  ;;  %v8997_v36 = vld [vmem:[%s12867_s1 + $0x604] ss:$8 sps:$4 sm:$0xff]  }
 0x2fd   :  { %v2187_v47 = vadd.f32 %v2186_v44, %v10253_v23  ;;  %v2470_v50 = vmax.f32 %v2183_v41, 0.0  ;;  %4359 = vmatprep.subr.bf16.mxu1 %v8997_v36 }
 0x2fe   :  { %v2471_v49 = vmax.f32 %v2185_v43, 0.0  ;;  %4360 = vmatpush1.bf16.msra.mxu1 %v8995_v35 }
 0x2ff   :  { %v2472_v51 = vmax.f32 %v2187_v47, 0.0  ;;  %v9000_v47 = vld [vmem:[%s12867_s1 + $0x4e4] ss:$8 sps:$4 sm:$0xff]  }
 0x300   :  { %v2587_v52 = vpack.c.bf16 %v2471_v49, %v2469_v48  ;;  %3616 = vmatprep.subr.bf16.mxu0 %v9000_v47 }
 0x301   :  { %v2190_v53 = vpop.f32.mrb[152].mxu0  ;;  %v2588_v54 = vpack.c.bf16 %v2472_v51, %v2470_v50  ;;  %3617 = vmatpush1.bf16.msra.mxu0 %v8998_v46 }
 0x302   :  { %v2191_v55 = vadd.f32 %v2190_v53, %v10247_v18  ;;  %v2192_v56 = vpop.f32.mrb[153].mxu0 }
 0x303   :  { %v2193_v57 = vadd.f32 %v2192_v56, %v10253_v23  ;;  %v2194_v58 = vpop.f32.mrb[154].mxu0  ;;  %2924 = vmatprep.mubr.bf16.mxu1 %v2588_v54 }
 0x304   :  { %v2195_v59 = vadd.f32 %v2194_v58, %v10247_v18  ;;  %v2196_v60 = vpop.f32.mrb[155].mxu0  ;;  %2925 = vmatmul.mubr.bf16.gmra.mrb[148].mxu1 %v2587_v52  ;;  %v2473_v62 = vmax.f32 %v2191_v55, 0.0 }
 0x305   :  { %v2197_v61 = vadd.f32 %v2196_v60, %v10253_v23  ;;  %v2474_v0 = vmax.f32 %v2193_v57, 0.0 }
 0x306   :  { %v2475_v63 = vmax.f32 %v2195_v59, 0.0 }
 0x307   :  { %v2476_v1 = vmax.f32 %v2197_v61, 0.0 }
 0x308   :  { %v2589_v2 = vpack.c.bf16 %v2475_v63, %v2473_v62 }
 0x309   :  { %v2200_v3 = vpop.f32.mrb[156].mxu0  ;;  %v2590_v4 = vpack.c.bf16 %v2476_v1, %v2474_v0 }
 0x30a   :  { %v2201_v5 = vadd.f32 %v2200_v3, %v10247_v18  ;;  %v2202_v6 = vpop.f32.mrb[157].mxu0  ;;  %v9001_v3 = vld [vmem:[%s12867_s1 + $0x610] ss:$8 sps:$4 sm:$0xff]  }
 0x30b   :  { %v2203_v7 = vadd.f32 %v2202_v6, %v10253_v23  ;;  %v2204_v9 = vpop.f32.mrb[158].mxu0  ;;  %2934 = vmatprep.mubr.bf16.mxu1 %v2590_v4  ;;  %v9003_v4 = vld [vmem:[%s12867_s1 + $0x614] ss:$8 sps:$4 sm:$0xff]  }
 0x30c   :  { %v2205_v10 = vadd.f32 %v2204_v9, %v10247_v18  ;;  %v2206_v11 = vpop.f32.mrb[159].mxu0  ;;  %2935 = vmatmul.mubr.bf16.gmra.mrb[152].mxu1 %v2589_v2  ;;  %v2477_v15 = vmax.f32 %v2201_v5, 0.0  ;;  %4361 = vmatprep.subr.bf16.mxu1 %v9003_v4 }
 0x30d   :  { %v2207_v14 = vadd.f32 %v2206_v11, %v10253_v23  ;;  %v2478_v21 = vmax.f32 %v2203_v7, 0.0  ;;  %4362 = vmatpush1.bf16.msra.mxu1 %v9001_v3 }
 0x30e   :  { %v2479_v20 = vmax.f32 %v2205_v10, 0.0 }
 0x30f   :  { %v2480_v24 = vmax.f32 %v2207_v14, 0.0 }
 0x310   :  { %v2591_v25 = vpack.c.bf16 %v2479_v20, %v2477_v15  ;;  %v9004_v15 = vld [vmem:[%s12867_s1 + $0x4f0] ss:$8 sps:$4 sm:$0xff]   ;;  %v9006_v20 = vld [vmem:[%s12867_s1 + $0x4f4] ss:$8 sps:$4 sm:$0xff]  }
 0x311   :  { %v2210_v26 = vpop.f32.mrb[160].mxu0  ;;  %v2592_v27 = vpack.c.bf16 %v2480_v24, %v2478_v21  ;;  %3618 = vmatprep.subr.bf16.mxu0 %v9006_v20 }
 0x312   :  { %v2211_v28 = vadd.f32 %v2210_v26, %v10247_v18  ;;  %v2212_v16 = vpop.f32.mrb[161].mxu0  ;;  %3619 = vmatpush1.bf16.msra.mxu0 %v9004_v15 }
 0x313   :  { %v2213_v19 = vadd.f32 %v2212_v16, %v10253_v23  ;;  %v2214_v29 = vpop.f32.mrb[162].mxu0  ;;  %2944 = vmatprep.mubr.bf16.mxu1 %v2592_v27 }
 0x314   :  { %v2215_v30 = vadd.f32 %v2214_v29, %v10247_v18  ;;  %v2216_v22 = vpop.f32.mrb[163].mxu0  ;;  %2945 = vmatmul.mubr.bf16.gmra.mrb[156].mxu1 %v2591_v25  ;;  %v2481_v31 = vmax.f32 %v2211_v28, 0.0 }
 0x315   :  { %v2217_v17 = vadd.f32 %v2216_v22, %v10253_v23  ;;  %v2482_v33 = vmax.f32 %v2213_v19, 0.0 }
 0x316   :  { %v2483_v32 = vmax.f32 %v2215_v30, 0.0 }
 0x317   :  { %v2484_v34 = vmax.f32 %v2217_v17, 0.0 }
 0x318   :  { %v2593_v37 = vpack.c.bf16 %v2483_v32, %v2481_v31 }
 0x319   :  { %v2220_v38 = vpop.f32.mrb[164].mxu0  ;;  %v2594_v39 = vpack.c.bf16 %v2484_v34, %v2482_v33 }
 0x31a   :  { %v2221_v40 = vadd.f32 %v2220_v38, %v10247_v18  ;;  %v2222_v41 = vpop.f32.mrb[165].mxu0 }
 0x31b   :  { %v2223_v42 = vadd.f32 %v2222_v41, %v10253_v23  ;;  %v2224_v43 = vpop.f32.mrb[166].mxu0  ;;  %2954 = vmatprep.mubr.bf16.mxu1 %v2594_v39 }
 0x31c   :  { %v2225_v44 = vadd.f32 %v2224_v43, %v10247_v18  ;;  %v2226_v45 = vpop.f32.mrb[167].mxu0  ;;  %2955 = vmatmul.mubr.bf16.gmra.mrb[160].mxu1 %v2593_v37  ;;  %v2485_v49 = vmax.f32 %v2221_v40, 0.0  ;;  %v9007_v43 = vld [vmem:[%s12867_s1 + $0x620] ss:$8 sps:$4 sm:$0xff]  }
 0x31d   :  { %v2227_v48 = vadd.f32 %v2226_v45, %v10253_v23  ;;  %v2486_v51 = vmax.f32 %v2223_v42, 0.0 }
 0x31e   :  { %v2487_v50 = vmax.f32 %v2225_v44, 0.0  ;;  %v9009_v44 = vld [vmem:[%s12867_s1 + $0x624] ss:$8 sps:$4 sm:$0xff]  }
 0x31f   :  { %v2488_v52 = vmax.f32 %v2227_v48, 0.0  ;;  %4363 = vmatprep.subr.bf16.mxu1 %v9009_v44 }
 0x320   :  { %v2595_v53 = vpack.c.bf16 %v2487_v50, %v2485_v49  ;;  %4364 = vmatpush1.bf16.msra.mxu1 %v9007_v43  ;;  %v9015_v43 = vld [vmem:[%s12867_s1 + $0x644] ss:$8 sps:$4 sm:$0xff]  }
 0x321   :  { %v2230_v54 = vpop.f32.mrb[168].mxu0  ;;  %v2596_v55 = vpack.c.bf16 %v2488_v52, %v2486_v51 }
 0x322   :  { %v2231_v56 = vadd.f32 %v2230_v54, %v10247_v18  ;;  %v2232_v57 = vpop.f32.mrb[169].mxu0 }
 0x323   :  { %v2233_v58 = vadd.f32 %v2232_v57, %v10253_v23  ;;  %v2234_v59 = vpop.f32.mrb[170].mxu0  ;;  %2964 = vmatprep.mubr.bf16.mxu1 %v2596_v55 }
 0x324   :  { %v2235_v60 = vadd.f32 %v2234_v59, %v10247_v18  ;;  %v2236_v61 = vpop.f32.mrb[171].mxu0  ;;  %2965 = vmatmul.mubr.bf16.gmra.mrb[164].mxu1 %v2595_v53  ;;  %v2489_v63 = vmax.f32 %v2231_v56, 0.0 }
 0x325   :  { %v2237_v62 = vadd.f32 %v2236_v61, %v10253_v23  ;;  %v2490_v1 = vmax.f32 %v2233_v58, 0.0 }
 0x326   :  { %v2491_v0 = vmax.f32 %v2235_v60, 0.0 }
 0x327   :  { %v2492_v2 = vmax.f32 %v2237_v62, 0.0 }
 0x328   :  { %v2597_v5 = vpack.c.bf16 %v2491_v0, %v2489_v63 }
 0x329   :  { %v2240_v6 = vpop.f32.mrb[172].mxu0  ;;  %v2598_v7 = vpack.c.bf16 %v2492_v2, %v2490_v1 }
 0x32a   :  { %v2241_v9 = vadd.f32 %v2240_v6, %v10247_v18  ;;  %v2242_v10 = vpop.f32.mrb[173].mxu0 }
 0x32b   :  { %v2243_v11 = vadd.f32 %v2242_v10, %v10253_v23  ;;  %v2244_v12 = vpop.f32.mrb[174].mxu0  ;;  %2974 = vmatprep.mubr.bf16.mxu1 %v2598_v7  ;;  %v9010_v10 = vld [vmem:[%s12867_s1 + $0x630] ss:$8 sps:$4 sm:$0xff]  }
 0x32c   :  { %v2245_v13 = vadd.f32 %v2244_v12, %v10247_v18  ;;  %v2246_v14 = vpop.f32.mrb[175].mxu0  ;;  %2975 = vmatmul.mubr.bf16.gmra.mrb[168].mxu1 %v2597_v5  ;;  %v2493_v24 = vmax.f32 %v2241_v9, 0.0 }
 0x32d   :  { %v2247_v21 = vadd.f32 %v2246_v14, %v10253_v23  ;;  %v2494_v26 = vmax.f32 %v2243_v11, 0.0  ;;  %v9012_v11 = vld [vmem:[%s12867_s1 + $0x634] ss:$8 sps:$4 sm:$0xff]  }
 0x32e   :  { %v2495_v25 = vmax.f32 %v2245_v13, 0.0  ;;  %4365 = vmatprep.subr.bf16.mxu1 %v9012_v11 }
 0x32f   :  { %v2496_v27 = vmax.f32 %v2247_v21, 0.0  ;;  %4366 = vmatpush1.bf16.msra.mxu1 %v9010_v10  ;;  %v9018_v10 = vld [vmem:[%s12867_s1 + $0x654] ss:$8 sps:$4 sm:$0xff]  }
 0x330   :  { %v2599_v28 = vpack.c.bf16 %v2495_v25, %v2493_v24  ;;  %4367 = vmatprep.subr.bf16.mxu1 %v9015_v43 }
 0x331   :  { %v2250_v16 = vpop.f32.mrb[176].mxu0  ;;  %v2600_v19 = vpack.c.bf16 %v2496_v27, %v2494_v26 }
 0x332   :  { %v2251_v29 = vadd.f32 %v2250_v16, %v10247_v18  ;;  %v2252_v30 = vpop.f32.mrb[177].mxu0 }
 0x333   :  { %v2253_v22 = vadd.f32 %v2252_v30, %v10253_v23  ;;  %v2254_v17 = vpop.f32.mrb[178].mxu0  ;;  %2984 = vmatprep.mubr.bf16.mxu1 %v2600_v19 }
 0x334   :  { %v2255_v31 = vadd.f32 %v2254_v17, %v10247_v18  ;;  %v2256_v32 = vpop.f32.mrb[179].mxu0  ;;  %2985 = vmatmul.mubr.bf16.gmra.mrb[172].mxu1 %v2599_v28  ;;  %v2497_v34 = vmax.f32 %v2251_v29, 0.0 }
 0x335   :  { %v2257_v33 = vadd.f32 %v2256_v32, %v10253_v23  ;;  %v2498_v36 = vmax.f32 %v2253_v22, 0.0 }
 0x336   :  { %v2499_v35 = vmax.f32 %v2255_v31, 0.0 }
 0x337   :  { %v2500_v37 = vmax.f32 %v2257_v33, 0.0 }
 0x338   :  { %v2601_v38 = vpack.c.bf16 %v2499_v35, %v2497_v34 }
 0x339   :  { %v2260_v39 = vpop.f32.mrb[180].mxu0  ;;  %v2602_v40 = vpack.c.bf16 %v2500_v37, %v2498_v36 }
 0x33a   :  { %v2261_v41 = vadd.f32 %v2260_v39, %v10247_v18  ;;  %v2262_v42 = vpop.f32.mrb[181].mxu0 }
 0x33b   :  { %v2263_v45 = vadd.f32 %v2262_v42, %v10253_v23  ;;  %v2264_v46 = vpop.f32.mrb[182].mxu0  ;;  %2994 = vmatprep.mubr.bf16.mxu1 %v2602_v40  ;;  %v9013_v42 = vld [vmem:[%s12867_s1 + $0x640] ss:$8 sps:$4 sm:$0xff]  }
 0x33c   :  { %v2265_v47 = vadd.f32 %v2264_v46, %v10247_v18  ;;  %v2266_v48 = vpop.f32.mrb[183].mxu0  ;;  %2995 = vmatmul.mubr.bf16.gmra.mrb[176].mxu1 %v2601_v38  ;;  %v2501_v50 = vmax.f32 %v2261_v41, 0.0 }
 0x33d   :  { %v2267_v49 = vadd.f32 %v2266_v48, %v10253_v23  ;;  %v2502_v52 = vmax.f32 %v2263_v45, 0.0  ;;  %4368 = vmatpush1.bf16.msra.mxu1 %v9013_v42  ;;  %v9021_v42 = vld [vmem:[%s12867_s1 + $0x664] ss:$8 sps:$4 sm:$0xff]  }
 0x33e   :  { %v2503_v51 = vmax.f32 %v2265_v47, 0.0  ;;  %4369 = vmatprep.subr.bf16.mxu1 %v9018_v10 }
 0x33f   :  { %v2504_v53 = vmax.f32 %v2267_v49, 0.0 }
 0x340   :  { %v2603_v54 = vpack.c.bf16 %v2503_v51, %v2501_v50 }
 0x341   :  { %v2270_v55 = vpop.f32.mrb[184].mxu0  ;;  %v2604_v56 = vpack.c.bf16 %v2504_v53, %v2502_v52 }
 0x342   :  { %v2271_v57 = vadd.f32 %v2270_v55, %v10247_v18  ;;  %v2272_v58 = vpop.f32.mrb[185].mxu0 }
 0x343   :  { %v2273_v59 = vadd.f32 %v2272_v58, %v10253_v23  ;;  %v2274_v60 = vpop.f32.mrb[186].mxu0  ;;  %3004 = vmatprep.mubr.bf16.mxu1 %v2604_v56 }
 0x344   :  { %v2275_v61 = vadd.f32 %v2274_v60, %v10247_v18  ;;  %v2276_v62 = vpop.f32.mrb[187].mxu0  ;;  %3005 = vmatmul.mubr.bf16.gmra.mrb[180].mxu1 %v2603_v54  ;;  %v2505_v0 = vmax.f32 %v2271_v57, 0.0 }
 0x345   :  { %v2277_v63 = vadd.f32 %v2276_v62, %v10253_v23  ;;  %v2506_v2 = vmax.f32 %v2273_v59, 0.0 }
 0x346   :  { %v2507_v1 = vmax.f32 %v2275_v61, 0.0 }
 0x347   :  { %v2508_v3 = vmax.f32 %v2277_v63, 0.0 }
 0x348   :  { %v2605_v4 = vpack.c.bf16 %v2507_v1, %v2505_v0 }
 0x349   :  { %v2280_v5 = vpop.f32.mrb[188].mxu0  ;;  %v2606_v6 = vpack.c.bf16 %v2508_v3, %v2506_v2 }
 0x34a   :  { %v2281_v7 = vadd.f32 %v2280_v5, %v10247_v18  ;;  %v2282_v9 = vpop.f32.mrb[189].mxu0 }
 0x34b   :  { %v2283_v12 = vadd.f32 %v2282_v9, %v10253_v23  ;;  %v2284_v13 = vpop.f32.mrb[190].mxu0  ;;  %3014 = vmatprep.mubr.bf16.mxu1 %v2606_v6  ;;  %v9016_v9 = vld [vmem:[%s12867_s1 + $0x650] ss:$8 sps:$4 sm:$0xff]  }
 0x34c   :  { %v2285_v14 = vadd.f32 %v2284_v13, %v10247_v18  ;;  %v2286_v15 = vpop.f32.mrb[191].mxu0  ;;  %3015 = vmatmul.mubr.bf16.gmra.mrb[184].mxu1 %v2605_v4  ;;  %v2509_v21 = vmax.f32 %v2281_v7, 0.0 }
 0x34d   :  { %v2287_v20 = vadd.f32 %v2286_v15, %v10253_v23  ;;  %v2510_v25 = vmax.f32 %v2283_v12, 0.0  ;;  %4370 = vmatpush1.bf16.msra.mxu1 %v9016_v9  ;;  %v9024_v9 = vld [vmem:[%s12867_s1 + $0x674] ss:$8 sps:$4 sm:$0xff]  }
 0x34e   :  { %v2511_v24 = vmax.f32 %v2285_v14, 0.0  ;;  %4371 = vmatprep.subr.bf16.mxu1 %v9021_v42 }
 0x34f   :  { %v2512_v26 = vmax.f32 %v2287_v20, 0.0 }
 0x350   :  { %v2607_v27 = vpack.c.bf16 %v2511_v24, %v2509_v21 }
 0x351   :  { %v2290_v28 = vpop.f32.mrb[192].mxu0  ;;  %v2608_v16 = vpack.c.bf16 %v2512_v26, %v2510_v25 }
 0x352   :  { %v2291_v19 = vadd.f32 %v2290_v28, %v10247_v18  ;;  %v2292_v29 = vpop.f32.mrb[193].mxu0 }
 0x353   :  { %v2293_v30 = vadd.f32 %v2292_v29, %v10253_v23  ;;  %v2294_v22 = vpop.f32.mrb[194].mxu0  ;;  %3024 = vmatprep.mubr.bf16.mxu1 %v2608_v16 }
 0x354   :  { %v2295_v17 = vadd.f32 %v2294_v22, %v10247_v18  ;;  %v2296_v31 = vpop.f32.mrb[195].mxu0  ;;  %3025 = vmatmul.mubr.bf16.gmra.mrb[188].mxu1 %v2607_v27  ;;  %v2513_v33 = vmax.f32 %v2291_v19, 0.0 }
 0x355   :  { %v2297_v32 = vadd.f32 %v2296_v31, %v10253_v23  ;;  %v2514_v35 = vmax.f32 %v2293_v30, 0.0 }
 0x356   :  { %v2515_v34 = vmax.f32 %v2295_v17, 0.0 }
 0x357   :  { %v2516_v36 = vmax.f32 %v2297_v32, 0.0 }
 0x358   :  { %v2609_v37 = vpack.c.bf16 %v2515_v34, %v2513_v33 }
 0x359   :  { %v2300_v38 = vpop.f32.mrb[196].mxu0  ;;  %v2610_v39 = vpack.c.bf16 %v2516_v36, %v2514_v35 }
 0x35a   :  { %v2301_v40 = vadd.f32 %v2300_v38, %v10247_v18  ;;  %v2302_v41 = vpop.f32.mrb[197].mxu0 }
 0x35b   :  { %v2303_v44 = vadd.f32 %v2302_v41, %v10253_v23  ;;  %v2304_v45 = vpop.f32.mrb[198].mxu0  ;;  %3034 = vmatprep.mubr.bf16.mxu1 %v2610_v39  ;;  %v9019_v41 = vld [vmem:[%s12867_s1 + $0x660] ss:$8 sps:$4 sm:$0xff]  }
 0x35c   :  { %v2305_v46 = vadd.f32 %v2304_v45, %v10247_v18  ;;  %v2306_v47 = vpop.f32.mrb[199].mxu0  ;;  %3035 = vmatmul.mubr.bf16.gmra.mrb[192].mxu1 %v2609_v37  ;;  %v2517_v49 = vmax.f32 %v2301_v40, 0.0 }
 0x35d   :  { %v2307_v48 = vadd.f32 %v2306_v47, %v10253_v23  ;;  %v2518_v51 = vmax.f32 %v2303_v44, 0.0  ;;  %4372 = vmatpush1.bf16.msra.mxu1 %v9019_v41  ;;  %v9027_v41 = vld [vmem:[%s12867_s1 + $0x684] ss:$8 sps:$4 sm:$0xff]  }
 0x35e   :  { %v2519_v50 = vmax.f32 %v2305_v46, 0.0  ;;  %4373 = vmatprep.subr.bf16.mxu1 %v9024_v9  ;;  %v9030_v9 = vld [vmem:[%s12867_s1 + $0x694] ss:$8 sps:$4 sm:$0xff]  }
 0x35f   :  { %v2520_v52 = vmax.f32 %v2307_v48, 0.0 }
 0x360   :  { %v2611_v53 = vpack.c.bf16 %v2519_v50, %v2517_v49 }
 0x361   :  { %v2310_v54 = vpop.f32.mrb[200].mxu0  ;;  %v2612_v55 = vpack.c.bf16 %v2520_v52, %v2518_v51 }
 0x362   :  { %v2311_v56 = vadd.f32 %v2310_v54, %v10247_v18  ;;  %v2312_v57 = vpop.f32.mrb[201].mxu0 }
 0x363   :  { %v2313_v58 = vadd.f32 %v2312_v57, %v10253_v23  ;;  %v2314_v59 = vpop.f32.mrb[202].mxu0  ;;  %3044 = vmatprep.mubr.bf16.mxu1 %v2612_v55 }
 0x364   :  { %v2315_v60 = vadd.f32 %v2314_v59, %v10247_v18  ;;  %v2316_v61 = vpop.f32.mrb[203].mxu0  ;;  %3045 = vmatmul.mubr.bf16.gmra.mrb[196].mxu1 %v2611_v53  ;;  %v2521_v63 = vmax.f32 %v2311_v56, 0.0 }
 0x365   :  { %v2317_v62 = vadd.f32 %v2316_v61, %v10253_v23  ;;  %v2522_v1 = vmax.f32 %v2313_v58, 0.0 }
 0x366   :  { %v2523_v0 = vmax.f32 %v2315_v60, 0.0 }
 0x367   :  { %v2524_v2 = vmax.f32 %v2317_v62, 0.0 }
 0x368   :  { %v2613_v3 = vpack.c.bf16 %v2523_v0, %v2521_v63 }
 0x369   :  { %v2320_v4 = vpop.f32.mrb[204].mxu0  ;;  %v2614_v5 = vpack.c.bf16 %v2524_v2, %v2522_v1 }
 0x36a   :  { %v2321_v6 = vadd.f32 %v2320_v4, %v10247_v18  ;;  %v2322_v7 = vpop.f32.mrb[205].mxu0 }
 0x36b   :  { %v2323_v11 = vadd.f32 %v2322_v7, %v10253_v23  ;;  %v2324_v12 = vpop.f32.mrb[206].mxu0  ;;  %3054 = vmatprep.mubr.bf16.mxu1 %v2614_v5  ;;  %v9022_v7 = vld [vmem:[%s12867_s1 + $0x670] ss:$8 sps:$4 sm:$0xff]  }
 0x36c   :  { %v2325_v13 = vadd.f32 %v2324_v12, %v10247_v18  ;;  %v2326_v14 = vpop.f32.mrb[207].mxu0  ;;  %3055 = vmatmul.mubr.bf16.gmra.mrb[200].mxu1 %v2613_v3  ;;  %v2525_v20 = vmax.f32 %v2321_v6, 0.0 }
 0x36d   :  { %v2327_v15 = vadd.f32 %v2326_v14, %v10253_v23  ;;  %v2526_v24 = vmax.f32 %v2323_v11, 0.0  ;;  %4374 = vmatpush1.bf16.msra.mxu1 %v9022_v7  ;;  %v9028_v7 = vld [vmem:[%s12867_s1 + $0x690] ss:$8 sps:$4 sm:$0xff]  }
 0x36e   :  { %v2527_v21 = vmax.f32 %v2325_v13, 0.0  ;;  %4375 = vmatprep.subr.bf16.mxu1 %v9027_v41 }
 0x36f   :  { %v2528_v25 = vmax.f32 %v2327_v15, 0.0 }
 0x370   :  { %v2615_v26 = vpack.c.bf16 %v2527_v21, %v2525_v20 }
 0x371   :  { %v2330_v27 = vpop.f32.mrb[208].mxu0  ;;  %v2616_v28 = vpack.c.bf16 %v2528_v25, %v2526_v24 }
 0x372   :  { %v2331_v16 = vadd.f32 %v2330_v27, %v10247_v18  ;;  %v2332_v19 = vpop.f32.mrb[209].mxu0 }
 0x373   :  { %v2333_v29 = vadd.f32 %v2332_v19, %v10253_v23  ;;  %v2334_v30 = vpop.f32.mrb[210].mxu0  ;;  %3064 = vmatprep.mubr.bf16.mxu1 %v2616_v28 }
 0x374   :  { %v2335_v22 = vadd.f32 %v2334_v30, %v10247_v18  ;;  %v2336_v17 = vpop.f32.mrb[211].mxu0  ;;  %3065 = vmatmul.mubr.bf16.gmra.mrb[204].mxu1 %v2615_v26  ;;  %v2529_v32 = vmax.f32 %v2331_v16, 0.0 }
 0x375   :  { %v2337_v31 = vadd.f32 %v2336_v17, %v10253_v23  ;;  %v2530_v34 = vmax.f32 %v2333_v29, 0.0 }
 0x376   :  { %v2531_v33 = vmax.f32 %v2335_v22, 0.0 }
 0x377   :  { %v2532_v35 = vmax.f32 %v2337_v31, 0.0 }
 0x378   :  { %v2617_v36 = vpack.c.bf16 %v2531_v33, %v2529_v32 }
 0x379   :  { %v2340_v37 = vpop.f32.mrb[212].mxu0  ;;  %v2618_v38 = vpack.c.bf16 %v2532_v35, %v2530_v34 }
 0x37a   :  { %v2341_v39 = vadd.f32 %v2340_v37, %v10247_v18  ;;  %v2342_v40 = vpop.f32.mrb[213].mxu0 }
 0x37b   :  { %v2343_v43 = vadd.f32 %v2342_v40, %v10253_v23  ;;  %v2344_v44 = vpop.f32.mrb[214].mxu0  ;;  %3074 = vmatprep.mubr.bf16.mxu1 %v2618_v38  ;;  %v9025_v40 = vld [vmem:[%s12867_s1 + $0x680] ss:$8 sps:$4 sm:$0xff]  }
 0x37c   :  { %v2345_v45 = vadd.f32 %v2344_v44, %v10247_v18  ;;  %v2346_v46 = vpop.f32.mrb[215].mxu0  ;;  %3075 = vmatmul.mubr.bf16.gmra.mrb[208].mxu1 %v2617_v36  ;;  %v2533_v48 = vmax.f32 %v2341_v39, 0.0 }
 0x37d   :  { %v2347_v47 = vadd.f32 %v2346_v46, %v10253_v23  ;;  %v2534_v50 = vmax.f32 %v2343_v43, 0.0  ;;  %4376 = vmatpush1.bf16.msra.mxu1 %v9025_v40 }
 0x37e   :  { %v2535_v49 = vmax.f32 %v2345_v45, 0.0  ;;  %4377 = vmatprep.subr.bf16.mxu1 %v9030_v9 }
 0x37f   :  { %v2536_v51 = vmax.f32 %v2347_v47, 0.0 }
 0x380   :  { %v2619_v52 = vpack.c.bf16 %v2535_v49, %v2533_v48 }
 0x381   :  { %v2350_v53 = vpop.f32.mrb[216].mxu0  ;;  %v2620_v54 = vpack.c.bf16 %v2536_v51, %v2534_v50  ;;  %4378 = vmatpush1.bf16.msra.mxu1 %v9028_v7 }
 0x382   :  { %v2351_v55 = vadd.f32 %v2350_v53, %v10247_v18  ;;  %v2352_v56 = vpop.f32.mrb[217].mxu0 }
 0x383   :  { %v2353_v57 = vadd.f32 %v2352_v56, %v10253_v23  ;;  %v2354_v58 = vpop.f32.mrb[218].mxu0  ;;  %3084 = vmatprep.mubr.bf16.mxu1 %v2620_v54 }
 0x384   :  { %v2355_v59 = vadd.f32 %v2354_v58, %v10247_v18  ;;  %v2356_v60 = vpop.f32.mrb[219].mxu0  ;;  %3085 = vmatmul.mubr.bf16.gmra.mrb[212].mxu1 %v2619_v52  ;;  %v2537_v62 = vmax.f32 %v2351_v55, 0.0 }
 0x385   :  { %v2357_v61 = vadd.f32 %v2356_v60, %v10253_v23  ;;  %v2538_v0 = vmax.f32 %v2353_v57, 0.0 }
 0x386   :  { %v2539_v63 = vmax.f32 %v2355_v59, 0.0 }
 0x387   :  { %v2540_v1 = vmax.f32 %v2357_v61, 0.0 }
 0x388   :  { %v2621_v2 = vpack.c.bf16 %v2539_v63, %v2537_v62 }
 0x389   :  { %v2360_v3 = vpop.f32.mrb[220].mxu0  ;;  %v2622_v4 = vpack.c.bf16 %v2540_v1, %v2538_v0 }
 0x38a   :  { %v2361_v5 = vadd.f32 %v2360_v3, %v10247_v18  ;;  %v2362_v6 = vpop.f32.mrb[221].mxu0 }
 0x38b   :  { %v2363_v10 = vadd.f32 %v2362_v6, %v10253_v23  ;;  %v2364_v11 = vpop.f32.mrb[222].mxu0  ;;  %3094 = vmatprep.mubr.bf16.mxu1 %v2622_v4 }
 0x38c   :  { %v2365_v12 = vadd.f32 %v2364_v11, %v10247_v18  ;;  %v2366_v13 = vpop.f32.mrb[223].mxu0  ;;  %3095 = vmatmul.mubr.bf16.gmra.mrb[216].mxu1 %v2621_v2  ;;  %v2541_v15 = vmax.f32 %v2361_v5, 0.0  ;;  %v2676_v2 = vsub.s32 3, %v9749_v8 }
 0x38d   :  { %v2367_v14 = vadd.f32 %v2366_v13, %v10253_v23  ;;  %v2542_v21 = vmax.f32 %v2363_v10, 0.0 }
 0x38e   :  { %v2543_v20 = vmax.f32 %v2365_v12, 0.0 }
 0x38f   :  { %v2544_v24 = vmax.f32 %v2367_v14, 0.0  ;;  %v9245_v14 = vld [vmem:[%s12869_s2] sm:$0xff] }
 0x390   :  { %v2623_v25 = vpack.c.bf16 %v2543_v20, %v2541_v15  ;;  %v10482_v15 = vrot.slane %v9245_v14, %v2676_v2 }
 0x391   :  { %v2370_v26 = vpop.f32.mrb[224].mxu0  ;;  %v2624_v27 = vpack.c.bf16 %v2544_v24, %v2542_v21  ;;  %v9246_v21 = vld [vmem:[%s12869_s2 + $0x8] sm:$0xff] }
 0x392   :  { %v2371_v28 = vadd.f32 %v2370_v26, %v10247_v18  ;;  %v2372_v16 = vpop.f32.mrb[225].mxu0  ;;  %v10488_v24 = vrot.slane %v9246_v21, %v2676_v2 }
 0x393   :  { %v2373_v19 = vadd.f32 %v2372_v16, %v10253_v23  ;;  %v2374_v29 = vpop.f32.mrb[226].mxu0  ;;  %3104 = vmatprep.mubr.bf16.mxu1 %v2624_v27 }
 0x394   :  { %v2375_v30 = vadd.f32 %v2374_v29, %v10247_v18  ;;  %v2376_v22 = vpop.f32.mrb[227].mxu0  ;;  %3105 = vmatmul.mubr.bf16.gmra.mrb[220].mxu1 %v2623_v25  ;;  %v2545_v31 = vmax.f32 %v2371_v28, 0.0 }
 0x395   :  { %v2377_v17 = vadd.f32 %v2376_v22, %v10253_v23  ;;  %v2546_v33 = vmax.f32 %v2373_v19, 0.0 }
 0x396   :  { %v2547_v32 = vmax.f32 %v2375_v30, 0.0 }
 0x397   :  { %v2548_v34 = vmax.f32 %v2377_v17, 0.0 }
 0x398   :  { %v2625_v35 = vpack.c.bf16 %v2547_v32, %v2545_v31 }
 0x399   :  { %v2380_v36 = vpop.f32.mrb[228].mxu0  ;;  %v2626_v37 = vpack.c.bf16 %v2548_v34, %v2546_v33 }
 0x39a   :  { %v2381_v38 = vadd.f32 %v2380_v36, %v10247_v18  ;;  %v2382_v39 = vpop.f32.mrb[229].mxu0 }
 0x39b   :  { %v2383_v42 = vadd.f32 %v2382_v39, %v10253_v23  ;;  %v2384_v43 = vpop.f32.mrb[230].mxu0  ;;  %3114 = vmatprep.mubr.bf16.mxu1 %v2626_v37 }
 0x39c   :  { %v2385_v44 = vadd.f32 %v2384_v43, %v10247_v18  ;;  %v2386_v45 = vpop.f32.mrb[231].mxu0  ;;  %3115 = vmatmul.mubr.bf16.gmra.mrb[224].mxu1 %v2625_v35  ;;  %v2549_v47 = vmax.f32 %v2381_v38, 0.0 }
 0x39d   :  { %v2387_v46 = vadd.f32 %v2386_v45, %v10253_v23  ;;  %v2550_v49 = vmax.f32 %v2383_v42, 0.0 }
 0x39e   :  { %v2551_v48 = vmax.f32 %v2385_v44, 0.0 }
 0x39f   :  { %v2552_v50 = vmax.f32 %v2387_v46, 0.0 }
 0x3a0   :  { %v2627_v51 = vpack.c.bf16 %v2551_v48, %v2549_v47 }
 0x3a1   :  { %v2390_v52 = vpop.f32.mrb[232].mxu0  ;;  %v2628_v53 = vpack.c.bf16 %v2552_v50, %v2550_v49 }
 0x3a2   :  { %v2391_v54 = vadd.f32 %v2390_v52, %v10247_v18  ;;  %v2392_v55 = vpop.f32.mrb[233].mxu0 }
 0x3a3   :  { %v2393_v56 = vadd.f32 %v2392_v55, %v10253_v23  ;;  %v2394_v57 = vpop.f32.mrb[234].mxu0  ;;  %3124 = vmatprep.mubr.bf16.mxu1 %v2628_v53 }
 0x3a4   :  { %v2395_v58 = vadd.f32 %v2394_v57, %v10247_v18  ;;  %v2396_v59 = vpop.f32.mrb[235].mxu0  ;;  %3125 = vmatmul.mubr.bf16.gmra.mrb[228].mxu1 %v2627_v51  ;;  %v2553_v61 = vmax.f32 %v2391_v54, 0.0 }
 0x3a5   :  { %v2397_v60 = vadd.f32 %v2396_v59, %v10253_v23  ;;  %v2554_v63 = vmax.f32 %v2393_v56, 0.0 }
 0x3a6   :  { %v2555_v62 = vmax.f32 %v2395_v58, 0.0 }
 0x3a7   :  { %v2556_v0 = vmax.f32 %v2397_v60, 0.0 }
 0x3a8   :  { %v2629_v1 = vpack.c.bf16 %v2555_v62, %v2553_v61 }
 0x3a9   :  { %v2400_v3 = vpop.f32.mrb[236].mxu0  ;;  %v2630_v4 = vpack.c.bf16 %v2556_v0, %v2554_v63 }
 0x3aa   :  { %v2401_v5 = vadd.f32 %v2400_v3, %v10247_v18  ;;  %v2402_v6 = vpop.f32.mrb[237].mxu0 }
 0x3ab   :  { %v2403_v10 = vadd.f32 %v2402_v6, %v10253_v23  ;;  %v2404_v11 = vpop.f32.mrb[238].mxu0  ;;  %3134 = vmatprep.mubr.bf16.mxu1 %v2630_v4 }
 0x3ac   :  { %v2405_v12 = vadd.f32 %v2404_v11, %v10247_v18  ;;  %v2406_v13 = vpop.f32.mrb[239].mxu0  ;;  %3135 = vmatmul.mubr.bf16.gmra.mrb[232].mxu1 %v2629_v1  ;;  %v2557_v25 = vmax.f32 %v2401_v5, 0.0  ;;  %v9031_v1 = vld [vmem:[%s12867_s1 + $0x6a0] ss:$8 sps:$4 sm:$0xff]   ;;  %v9033_v5 = vld [vmem:[%s12867_s1 + $0x6a4] ss:$8 sps:$4 sm:$0xff]  }
 0x3ad   :  { %v2407_v20 = vadd.f32 %v2406_v13, %v10253_v23  ;;  %v2558_v27 = vmax.f32 %v2403_v10, 0.0  ;;  %4379 = vmatprep.subr.bf16.mxu1 %v9033_v5 }
 0x3ae   :  { %v2559_v26 = vmax.f32 %v2405_v12, 0.0  ;;  %4380 = vmatpush1.bf16.msra.mxu1 %v9031_v1 }
 0x3af   :  { %v2560_v28 = vmax.f32 %v2407_v20, 0.0  ;;  %v2876_v16 = vpop.f32.mrb[128].mxu1 }
 0x3b0   :  { %v2877_v19 = vadd.f32 %v2876_v16, %v10482_v15  ;;  %v2878_v29 = vpop.f32.mrb[129].mxu1  ;;  %v2631_v30 = vpack.c.bf16 %v2559_v26, %v2557_v25 }
 0x3b1   :  { %v2879_v22 = vadd.f32 %v2878_v29, %v10488_v24  ;;  %v2410_v17 = vpop.f32.mrb[240].mxu0  ;;  %v2880_v31 = vpop.f32.mrb[130].mxu1  ;;  %v2632_v32 = vpack.c.bf16 %v2560_v28, %v2558_v27 }
 0x3b2   :  { %v2411_v33 = vadd.f32 %v2410_v17, %v10247_v18  ;;  %v2881_v34 = vadd.f32 %v2880_v31, %v10482_v15  ;;  %v2412_v35 = vpop.f32.mrb[241].mxu0  ;;  %v2882_v36 = vpop.f32.mrb[131].mxu1  ;;  %v3195_v40 = vmax.f32 %v2877_v19, 0.0 }
 0x3b3   :  { %v2413_v37 = vadd.f32 %v2412_v35, %v10253_v23  ;;  %v2883_v38 = vadd.f32 %v2882_v36, %v10488_v24  ;;  %v2414_v39 = vpop.f32.mrb[242].mxu0  ;;  %3144 = vmatprep.mubr.bf16.mxu1 %v2632_v32  ;;  %v3196_v44 = vmax.f32 %v2879_v22, 0.0 }
 0x3b4   :  { %v3197_v41 = vmax.f32 %v2881_v34, 0.0  ;;  %v2415_v42 = vadd.f32 %v2414_v39, %v10247_v18  ;;  %v2416_v43 = vpop.f32.mrb[243].mxu0  ;;  %3145 = vmatmul.mubr.bf16.gmra.mrb[236].mxu1 %v2631_v30  ;;  %v2561_v47 = vmax.f32 %v2411_v33, 0.0 }
 0x3b5   :  { %v3198_v45 = vmax.f32 %v2883_v38, 0.0  ;;  %v2417_v46 = vadd.f32 %v2416_v43, %v10253_v23  ;;  %v2562_v50 = vmax.f32 %v2413_v37, 0.0 }
 0x3b6   :  { %v3323_v48 = vpack.c.bf16 %v3197_v41, %v3195_v40  ;;  %v2563_v49 = vmax.f32 %v2415_v42, 0.0 }
 0x3b7   :  { %v2564_v51 = vmax.f32 %v2417_v46, 0.0  ;;  %v2886_v52 = vpop.f32.mrb[132].mxu1  ;;  %v3324_v53 = vpack.c.bf16 %v3198_v45, %v3196_v44 }
 0x3b8   :  { %v2887_v54 = vadd.f32 %v2886_v52, %v10482_v15  ;;  %v2888_v55 = vpop.f32.mrb[133].mxu1  ;;  %v2633_v56 = vpack.c.bf16 %v2563_v49, %v2561_v47 }
 0x3b9   :  { %v2889_v57 = vadd.f32 %v2888_v55, %v10488_v24  ;;  %v2420_v58 = vpop.f32.mrb[244].mxu0  ;;  %v2890_v59 = vpop.f32.mrb[134].mxu1  ;;  %3620 = vmatprep.mubr.bf16.mxu0 %v3324_v53  ;;  %v2634_v60 = vpack.c.bf16 %v2564_v51, %v2562_v50 }
 0x3ba   :  { %v2421_v61 = vadd.f32 %v2420_v58, %v10247_v18  ;;  %v2891_v62 = vadd.f32 %v2890_v59, %v10482_v15  ;;  %v2422_v63 = vpop.f32.mrb[245].mxu0  ;;  %v2892_v0 = vpop.f32.mrb[135].mxu1  ;;  %3621 = vmatmul.mubr.bf16.vlgmr.msra.gmra.mrb[0].mxu0 %v3323_v48  ;;  %v3199_v6 = vmax.f32 %v2887_v54, 0.0 }
 0x3bb   :  { %v2423_v2 = vadd.f32 %v2422_v63, %v10253_v23  ;;  %v2893_v3 = vadd.f32 %v2892_v0, %v10488_v24  ;;  %v2424_v4 = vpop.f32.mrb[246].mxu0  ;;  %3154 = vmatprep.mubr.bf16.mxu1 %v2634_v60  ;;  %v3200_v11 = vmax.f32 %v2889_v57, 0.0  ;;  %v9034_v0 = vld [vmem:[%s12867_s1 + $0x6b0] ss:$8 sps:$4 sm:$0xff]  }
 0x3bc   :  { %v3201_v7 = vmax.f32 %v2891_v62, 0.0  ;;  %v2425_v9 = vadd.f32 %v2424_v4, %v10247_v18  ;;  %v2426_v10 = vpop.f32.mrb[247].mxu0  ;;  %3155 = vmatmul.mubr.bf16.gmra.mrb[240].mxu1 %v2633_v56  ;;  %v2565_v14 = vmax.f32 %v2421_v61, 0.0  ;;  %v9036_v4 = vld [vmem:[%s12867_s1 + $0x6b4] ss:$8 sps:$4 sm:$0xff]  }
 0x3bd   :  { %v3202_v12 = vmax.f32 %v2893_v3, 0.0  ;;  %v2427_v13 = vadd.f32 %v2426_v10, %v10253_v23  ;;  %v2566_v25 = vmax.f32 %v2423_v2, 0.0  ;;  %4381 = vmatprep.subr.bf16.mxu1 %v9036_v4 }
 0x3be   :  { %v3325_v20 = vpack.c.bf16 %v3201_v7, %v3199_v6  ;;  %v2567_v21 = vmax.f32 %v2425_v9, 0.0  ;;  %4382 = vmatpush1.bf16.msra.mxu1 %v9034_v0 }
 0x3bf   :  { %v2568_v26 = vmax.f32 %v2427_v13, 0.0  ;;  %v2896_v27 = vpop.f32.mrb[136].mxu1  ;;  %v3326_v28 = vpack.c.bf16 %v3202_v12, %v3200_v11 }
 0x3c0   :  { %v2897_v16 = vadd.f32 %v2896_v27, %v10482_v15  ;;  %v2898_v19 = vpop.f32.mrb[137].mxu1  ;;  %v2635_v29 = vpack.c.bf16 %v2567_v21, %v2565_v14 }
 0x3c1   :  { %v2899_v30 = vadd.f32 %v2898_v19, %v10488_v24  ;;  %v2430_v22 = vpop.f32.mrb[248].mxu0  ;;  %v2900_v17 = vpop.f32.mrb[138].mxu1  ;;  %3630 = vmatprep.mubr.bf16.mxu0 %v3326_v28  ;;  %v2636_v31 = vpack.c.bf16 %v2568_v26, %v2566_v25 }
 0x3c2   :  { %v2431_v32 = vadd.f32 %v2430_v22, %v10247_v18  ;;  %v2901_v33 = vadd.f32 %v2900_v17, %v10482_v15  ;;  %v2432_v34 = vpop.f32.mrb[249].mxu0  ;;  %v2902_v35 = vpop.f32.mrb[139].mxu1  ;;  %3631 = vmatmul.mubr.bf16.gmra.mrb[4].mxu0 %v3325_v20  ;;  %v3203_v39 = vmax.f32 %v2897_v16, 0.0 }
 0x3c3   :  { %v2433_v36 = vadd.f32 %v2432_v34, %v10253_v23  ;;  %v2903_v37 = vadd.f32 %v2902_v35, %v10488_v24  ;;  %v2434_v38 = vpop.f32.mrb[250].mxu0  ;;  %3164 = vmatprep.mubr.bf16.mxu1 %v2636_v31  ;;  %v3204_v43 = vmax.f32 %v2899_v30, 0.0 }
 0x3c4   :  { %v3205_v40 = vmax.f32 %v2901_v33, 0.0  ;;  %v2435_v41 = vadd.f32 %v2434_v38, %v10247_v18  ;;  %v2436_v42 = vpop.f32.mrb[251].mxu0  ;;  %3165 = vmatmul.mubr.bf16.gmra.mrb[244].mxu1 %v2635_v29  ;;  %v2569_v46 = vmax.f32 %v2431_v32, 0.0 }
 0x3c5   :  { %v3206_v44 = vmax.f32 %v2903_v37, 0.0  ;;  %v2437_v45 = vadd.f32 %v2436_v42, %v10253_v23  ;;  %v2570_v49 = vmax.f32 %v2433_v36, 0.0 }
 0x3c6   :  { %v3327_v47 = vpack.c.bf16 %v3205_v40, %v3203_v39  ;;  %v2571_v48 = vmax.f32 %v2435_v41, 0.0 }
 0x3c7   :  { %v2572_v50 = vmax.f32 %v2437_v45, 0.0  ;;  %v2906_v51 = vpop.f32.mrb[140].mxu1  ;;  %v3328_v52 = vpack.c.bf16 %v3206_v44, %v3204_v43  ;;  %v9037_v44 = vld [vmem:[%s12867_s1 + $0x6c0] ss:$8 sps:$4 sm:$0xff]   ;;  %v9039_v45 = vld [vmem:[%s12867_s1 + $0x6c4] ss:$8 sps:$4 sm:$0xff]  }
 0x3c8   :  { %v2907_v53 = vadd.f32 %v2906_v51, %v10482_v15  ;;  %v2908_v54 = vpop.f32.mrb[141].mxu1  ;;  %v2637_v55 = vpack.c.bf16 %v2571_v48, %v2569_v46  ;;  %4383 = vmatprep.subr.bf16.mxu1 %v9039_v45 }
 0x3c9   :  { %v2909_v56 = vadd.f32 %v2908_v54, %v10488_v24  ;;  %v2440_v57 = vpop.f32.mrb[252].mxu0  ;;  %v2910_v58 = vpop.f32.mrb[142].mxu1  ;;  %3640 = vmatprep.mubr.bf16.mxu0 %v3328_v52  ;;  %v2638_v59 = vpack.c.bf16 %v2572_v50, %v2570_v49  ;;  %4384 = vmatpush1.bf16.msra.mxu1 %v9037_v44  ;;  %v9045_v44 = vld [vmem:[%s12867_s1 + $0x6e4] ss:$8 sps:$4 sm:$0xff]  }
 0x3ca   :  { %v2441_v60 = vadd.f32 %v2440_v57, %v10247_v18  ;;  %v2911_v61 = vadd.f32 %v2910_v58, %v10482_v15  ;;  %v2442_v62 = vpop.f32.mrb[253].mxu0  ;;  %v2912_v63 = vpop.f32.mrb[143].mxu1  ;;  %3641 = vmatmul.mubr.bf16.gmra.mrb[8].mxu0 %v3327_v47  ;;  %v3207_v5 = vmax.f32 %v2907_v53, 0.0 }
 0x3cb   :  { %v2443_v1 = vadd.f32 %v2442_v62, %v10253_v23  ;;  %v2913_v2 = vadd.f32 %v2912_v63, %v10488_v24  ;;  %v2444_v3 = vpop.f32.mrb[254].mxu0  ;;  %3174 = vmatprep.mubr.bf16.mxu1 %v2638_v59  ;;  %v3208_v10 = vmax.f32 %v2909_v56, 0.0 }
 0x3cc   :  { %v3209_v6 = vmax.f32 %v2911_v61, 0.0  ;;  %v2445_v7 = vadd.f32 %v2444_v3, %v10247_v18  ;;  %v2446_v9 = vpop.f32.mrb[255].mxu0  ;;  %3175 = vmatmul.mubr.bf16.gmra.mrb[248].mxu1 %v2637_v55  ;;  %v2573_v13 = vmax.f32 %v2441_v60, 0.0 }
 0x3cd   :  { %v3210_v11 = vmax.f32 %v2913_v2, 0.0  ;;  %v2447_v12 = vadd.f32 %v2446_v9, %v10253_v23  ;;  %v2574_v21 = vmax.f32 %v2443_v1, 0.0 }
 0x3ce   :  { %v3329_v14 = vpack.c.bf16 %v3209_v6, %v3207_v5  ;;  %v2575_v20 = vmax.f32 %v2445_v7, 0.0 }
 0x3cf   :  { %v2576_v25 = vmax.f32 %v2447_v12, 0.0  ;;  %v2916_v26 = vpop.f32.mrb[144].mxu1  ;;  %v3330_v27 = vpack.c.bf16 %v3210_v11, %v3208_v10  ;;  %v9040_v11 = vld [vmem:[%s12867_s1 + $0x6d0] ss:$8 sps:$4 sm:$0xff]   ;;  %v9042_v12 = vld [vmem:[%s12867_s1 + $0x6d4] ss:$8 sps:$4 sm:$0xff]  }
 0x3d0   :  { %v2917_v28 = vadd.f32 %v2916_v26, %v10482_v15  ;;  %v2918_v16 = vpop.f32.mrb[145].mxu1  ;;  %v2639_v19 = vpack.c.bf16 %v2575_v20, %v2573_v13  ;;  %4385 = vmatprep.subr.bf16.mxu1 %v9042_v12 }
 0x3d1   :  { %v2919_v18 = vadd.f32 %v2918_v16, %v10488_v24  ;;  %v2920_v29 = vpop.f32.mrb[146].mxu1  ;;  %3650 = vmatprep.mubr.bf16.mxu0 %v3330_v27  ;;  %v2640_v30 = vpack.c.bf16 %v2576_v25, %v2574_v21  ;;  %4386 = vmatpush1.bf16.msra.mxu1 %v9040_v11  ;;  %v9048_v11 = vld [vmem:[%s12867_s1 + $0x6f4] ss:$8 sps:$4 sm:$0xff]  }
 0x3d2   :  { %v2921_v23 = vadd.f32 %v2920_v29, %v10482_v15  ;;  %v2922_v22 = vpop.f32.mrb[147].mxu1  ;;  %3651 = vmatmul.mubr.bf16.gmra.mrb[12].mxu0 %v3329_v14  ;;  %v3211_v31 = vmax.f32 %v2917_v28, 0.0  ;;  %4387 = vmatprep.subr.bf16.mxu1 %v9045_v44 }
 0x3d3   :  { %v2923_v17 = vadd.f32 %v2922_v22, %v10488_v24  ;;  %3184 = vmatprep.mubr.bf16.mxu1 %v2640_v30  ;;  %v3212_v33 = vmax.f32 %v2919_v18, 0.0 }
 0x3d4   :  { %v3213_v32 = vmax.f32 %v2921_v23, 0.0  ;;  %3185 = vmatmul.mubr.bf16.gmra.mrb[252].mxu1 %v2639_v19 }
 0x3d5   :  { %v3214_v34 = vmax.f32 %v2923_v17, 0.0 }
 0x3d6   :  { %v3331_v35 = vpack.c.bf16 %v3213_v32, %v3211_v31 }
 0x3d7   :  { %v2926_v36 = vpop.f32.mrb[148].mxu1  ;;  %v3332_v37 = vpack.c.bf16 %v3214_v34, %v3212_v33 }
 0x3d8   :  { %v2927_v38 = vadd.f32 %v2926_v36, %v10482_v15  ;;  %v2928_v39 = vpop.f32.mrb[149].mxu1 }
 0x3d9   :  { %v2929_v40 = vadd.f32 %v2928_v39, %v10488_v24  ;;  %v2930_v41 = vpop.f32.mrb[150].mxu1  ;;  %3660 = vmatprep.mubr.bf16.mxu0 %v3332_v37 }
 0x3da   :  { %v2931_v42 = vadd.f32 %v2930_v41, %v10482_v15  ;;  %v2932_v43 = vpop.f32.mrb[151].mxu1  ;;  %3661 = vmatmul.mubr.bf16.gmra.mrb[16].mxu0 %v3331_v35  ;;  %v3215_v47 = vmax.f32 %v2927_v38, 0.0 }
 0x3db   :  { %v2933_v46 = vadd.f32 %v2932_v43, %v10488_v24  ;;  %v3216_v49 = vmax.f32 %v2929_v40, 0.0  ;;  %v9043_v43 = vld [vmem:[%s12867_s1 + $0x6e0] ss:$8 sps:$4 sm:$0xff]  }
 0x3dc   :  { %v3217_v48 = vmax.f32 %v2931_v42, 0.0  ;;  %4388 = vmatpush1.bf16.msra.mxu1 %v9043_v43 }
 0x3dd   :  { %v3218_v50 = vmax.f32 %v2933_v46, 0.0  ;;  %4389 = vmatprep.subr.bf16.mxu1 %v9048_v11 }
 0x3de   :  { %v3333_v51 = vpack.c.bf16 %v3217_v48, %v3215_v47 }
 0x3df   :  { %v2936_v52 = vpop.f32.mrb[152].mxu1  ;;  %v3334_v53 = vpack.c.bf16 %v3218_v50, %v3216_v49 }
 0x3e0   :  { %v2937_v54 = vadd.f32 %v2936_v52, %v10482_v15  ;;  %v2938_v55 = vpop.f32.mrb[153].mxu1 }
 0x3e1   :  { %v2939_v56 = vadd.f32 %v2938_v55, %v10488_v24  ;;  %v2940_v57 = vpop.f32.mrb[154].mxu1  ;;  %3670 = vmatprep.mubr.bf16.mxu0 %v3334_v53 }
 0x3e2   :  { %v2941_v58 = vadd.f32 %v2940_v57, %v10482_v15  ;;  %v2942_v59 = vpop.f32.mrb[155].mxu1  ;;  %3671 = vmatmul.mubr.bf16.gmra.mrb[20].mxu0 %v3333_v51  ;;  %v3219_v61 = vmax.f32 %v2937_v54, 0.0 }
 0x3e3   :  { %v2943_v60 = vadd.f32 %v2942_v59, %v10488_v24  ;;  %v3220_v63 = vmax.f32 %v2939_v56, 0.0 }
 0x3e4   :  { %v3221_v62 = vmax.f32 %v2941_v58, 0.0 }
 0x3e5   :  { %v3222_v0 = vmax.f32 %v2943_v60, 0.0 }
 0x3e6   :  { %v3335_v1 = vpack.c.bf16 %v3221_v62, %v3219_v61 }
 0x3e7   :  { %v2946_v2 = vpop.f32.mrb[156].mxu1  ;;  %v3336_v3 = vpack.c.bf16 %v3222_v0, %v3220_v63 }
 0x3e8   :  { %v2947_v4 = vadd.f32 %v2946_v2, %v10482_v15  ;;  %v2948_v5 = vpop.f32.mrb[157].mxu1 }
 0x3e9   :  { %v2949_v6 = vadd.f32 %v2948_v5, %v10488_v24  ;;  %v2950_v7 = vpop.f32.mrb[158].mxu1  ;;  %3680 = vmatprep.mubr.bf16.mxu0 %v3336_v3 }
 0x3ea   :  { %v2951_v9 = vadd.f32 %v2950_v7, %v10482_v15  ;;  %v2952_v10 = vpop.f32.mrb[159].mxu1  ;;  %3681 = vmatmul.mubr.bf16.gmra.mrb[24].mxu0 %v3335_v1  ;;  %v3223_v14 = vmax.f32 %v2947_v4, 0.0 }
 0x3eb   :  { %v2953_v13 = vadd.f32 %v2952_v10, %v10488_v24  ;;  %v3224_v21 = vmax.f32 %v2949_v6, 0.0  ;;  %v9046_v10 = vld [vmem:[%s12867_s1 + $0x6f0] ss:$8 sps:$4 sm:$0xff]  }
 0x3ec   :  { %v3225_v20 = vmax.f32 %v2951_v9, 0.0  ;;  %4390 = vmatpush1.bf16.msra.mxu1 %v9046_v10 }
 0x3ed   :  { %v3226_v25 = vmax.f32 %v2953_v13, 0.0 }
 0x3ee   :  { %v3337_v26 = vpack.c.bf16 %v3225_v20, %v3223_v14 }
 0x3ef   :  { %v2956_v27 = vpop.f32.mrb[160].mxu1  ;;  %v3338_v28 = vpack.c.bf16 %v3226_v25, %v3224_v21 }
 0x3f0   :  { %v2957_v16 = vadd.f32 %v2956_v27, %v10482_v15  ;;  %v2958_v19 = vpop.f32.mrb[161].mxu1 }
 0x3f1   :  { %v2959_v18 = vadd.f32 %v2958_v19, %v10488_v24  ;;  %v2960_v29 = vpop.f32.mrb[162].mxu1  ;;  %3690 = vmatprep.mubr.bf16.mxu0 %v3338_v28 }
 0x3f2   :  { %v2961_v30 = vadd.f32 %v2960_v29, %v10482_v15  ;;  %v2962_v23 = vpop.f32.mrb[163].mxu1  ;;  %3691 = vmatmul.mubr.bf16.gmra.mrb[28].mxu0 %v3337_v26  ;;  %v3227_v17 = vmax.f32 %v2957_v16, 0.0 }
 0x3f3   :  { %v2963_v22 = vadd.f32 %v2962_v23, %v10488_v24  ;;  %v3228_v32 = vmax.f32 %v2959_v18, 0.0 }
 0x3f4   :  { %v3229_v31 = vmax.f32 %v2961_v30, 0.0 }
 0x3f5   :  { %v3230_v33 = vmax.f32 %v2963_v22, 0.0 }
 0x3f6   :  { %v3339_v34 = vpack.c.bf16 %v3229_v31, %v3227_v17 }
 0x3f7   :  { %v2966_v35 = vpop.f32.mrb[164].mxu1  ;;  %v3340_v36 = vpack.c.bf16 %v3230_v33, %v3228_v32 }
 0x3f8   :  { %v2967_v37 = vadd.f32 %v2966_v35, %v10482_v15  ;;  %v2968_v38 = vpop.f32.mrb[165].mxu1 }
 0x3f9   :  { %v2969_v39 = vadd.f32 %v2968_v38, %v10488_v24  ;;  %v2970_v40 = vpop.f32.mrb[166].mxu1  ;;  %3700 = vmatprep.mubr.bf16.mxu0 %v3340_v36 }
 0x3fa   :  { %v2971_v41 = vadd.f32 %v2970_v40, %v10482_v15  ;;  %v2972_v42 = vpop.f32.mrb[167].mxu1  ;;  %3701 = vmatmul.mubr.bf16.gmra.mrb[32].mxu0 %v3339_v34  ;;  %v3231_v46 = vmax.f32 %v2967_v37, 0.0 }
 0x3fb   :  { %v2973_v45 = vadd.f32 %v2972_v42, %v10488_v24  ;;  %v3232_v48 = vmax.f32 %v2969_v39, 0.0 }
 0x3fc   :  { %v3233_v47 = vmax.f32 %v2971_v41, 0.0 }
 0x3fd   :  { %v3234_v49 = vmax.f32 %v2973_v45, 0.0  ;;  %v9051_v45 = vld [vmem:[%s12867_s1 + $0x504] ss:$8 sps:$4 sm:$0xff]  }
 0x3fe   :  { %v3341_v50 = vpack.c.bf16 %v3233_v47, %v3231_v46  ;;  %4872 = vmatprep.subr.bf16.mxu1 %v9051_v45 }
 0x3ff   :  { %v2976_v51 = vpop.f32.mrb[168].mxu1  ;;  %v3342_v52 = vpack.c.bf16 %v3234_v49, %v3232_v48 }
 0x400   :  { %v2977_v53 = vadd.f32 %v2976_v51, %v10482_v15  ;;  %v2978_v54 = vpop.f32.mrb[169].mxu1 }
 0x401   :  { %v2979_v55 = vadd.f32 %v2978_v54, %v10488_v24  ;;  %v2980_v56 = vpop.f32.mrb[170].mxu1  ;;  %3710 = vmatprep.mubr.bf16.mxu0 %v3342_v52 }
 0x402   :  { %v2981_v57 = vadd.f32 %v2980_v56, %v10482_v15  ;;  %v2982_v58 = vpop.f32.mrb[171].mxu1  ;;  %3711 = vmatmul.mubr.bf16.gmra.mrb[36].mxu0 %v3341_v50  ;;  %v3235_v60 = vmax.f32 %v2977_v53, 0.0 }
 0x403   :  { %v2983_v59 = vadd.f32 %v2982_v58, %v10488_v24  ;;  %v3236_v62 = vmax.f32 %v2979_v55, 0.0 }
 0x404   :  { %v3237_v61 = vmax.f32 %v2981_v57, 0.0 }
 0x405   :  { %v3238_v63 = vmax.f32 %v2983_v59, 0.0 }
 0x406   :  { %v3343_v0 = vpack.c.bf16 %v3237_v61, %v3235_v60 }
 0x407   :  { %v2986_v1 = vpop.f32.mrb[172].mxu1  ;;  %v3344_v2 = vpack.c.bf16 %v3238_v63, %v3236_v62 }
 0x408   :  { %v2987_v3 = vadd.f32 %v2986_v1, %v10482_v15  ;;  %v2988_v4 = vpop.f32.mrb[173].mxu1 }
 0x409   :  { %v2989_v5 = vadd.f32 %v2988_v4, %v10488_v24  ;;  %v2990_v6 = vpop.f32.mrb[174].mxu1  ;;  %3720 = vmatprep.mubr.bf16.mxu0 %v3344_v2 }
 0x40a   :  { %v2991_v7 = vadd.f32 %v2990_v6, %v10482_v15  ;;  %v2992_v9 = vpop.f32.mrb[175].mxu1  ;;  %3721 = vmatmul.mubr.bf16.gmra.mrb[40].mxu0 %v3343_v0  ;;  %v3239_v13 = vmax.f32 %v2987_v3, 0.0 }
 0x40b   :  { %v2993_v12 = vadd.f32 %v2992_v9, %v10488_v24  ;;  %v3240_v20 = vmax.f32 %v2989_v5, 0.0 }
 0x40c   :  { %v3241_v14 = vmax.f32 %v2991_v7, 0.0 }
 0x40d   :  { %v3242_v21 = vmax.f32 %v2993_v12, 0.0 }
 0x40e   :  { %v3345_v25 = vpack.c.bf16 %v3241_v14, %v3239_v13 }
 0x40f   :  { %v2996_v26 = vpop.f32.mrb[176].mxu1  ;;  %v3346_v27 = vpack.c.bf16 %v3242_v21, %v3240_v20 }
 0x410   :  { %v2997_v28 = vadd.f32 %v2996_v26, %v10482_v15  ;;  %v2998_v16 = vpop.f32.mrb[177].mxu1 }
 0x411   :  { %v2999_v19 = vadd.f32 %v2998_v16, %v10488_v24  ;;  %v3000_v18 = vpop.f32.mrb[178].mxu1  ;;  %3730 = vmatprep.mubr.bf16.mxu0 %v3346_v27 }
 0x412   :  { %v3001_v29 = vadd.f32 %v3000_v18, %v10482_v15  ;;  %v3002_v30 = vpop.f32.mrb[179].mxu1  ;;  %3731 = vmatmul.mubr.bf16.gmra.mrb[44].mxu0 %v3345_v25  ;;  %v3243_v22 = vmax.f32 %v2997_v28, 0.0 }
 0x413   :  { %v3003_v23 = vadd.f32 %v3002_v30, %v10488_v24  ;;  %v3244_v31 = vmax.f32 %v2999_v19, 0.0 }
 0x414   :  { %v3245_v17 = vmax.f32 %v3001_v29, 0.0 }
 0x415   :  { %v3246_v32 = vmax.f32 %v3003_v23, 0.0 }
 0x416   :  { %v3347_v33 = vpack.c.bf16 %v3245_v17, %v3243_v22 }
 0x417   :  { %v3006_v34 = vpop.f32.mrb[180].mxu1  ;;  %v3348_v35 = vpack.c.bf16 %v3246_v32, %v3244_v31 }
 0x418   :  { %v3007_v36 = vadd.f32 %v3006_v34, %v10482_v15  ;;  %v3008_v37 = vpop.f32.mrb[181].mxu1 }
 0x419   :  { %v3009_v38 = vadd.f32 %v3008_v37, %v10488_v24  ;;  %v3010_v39 = vpop.f32.mrb[182].mxu1  ;;  %3740 = vmatprep.mubr.bf16.mxu0 %v3348_v35 }
 0x41a   :  { %v3011_v40 = vadd.f32 %v3010_v39, %v10482_v15  ;;  %v3012_v41 = vpop.f32.mrb[183].mxu1  ;;  %3741 = vmatmul.mubr.bf16.gmra.mrb[48].mxu0 %v3347_v33  ;;  %v3247_v43 = vmax.f32 %v3007_v36, 0.0 }
 0x41b   :  { %v3013_v42 = vadd.f32 %v3012_v41, %v10488_v24  ;;  %v3248_v46 = vmax.f32 %v3009_v38, 0.0 }
 0x41c   :  { %v3249_v44 = vmax.f32 %v3011_v40, 0.0 }
 0x41d   :  { %v3250_v47 = vmax.f32 %v3013_v42, 0.0 }
 0x41e   :  { %v3349_v48 = vpack.c.bf16 %v3249_v44, %v3247_v43 }
 0x41f   :  { %v3016_v49 = vpop.f32.mrb[184].mxu1  ;;  %v3350_v50 = vpack.c.bf16 %v3250_v47, %v3248_v46 }
 0x420   :  { %v3017_v51 = vadd.f32 %v3016_v49, %v10482_v15  ;;  %v3018_v52 = vpop.f32.mrb[185].mxu1 }
 0x421   :  { %v3019_v53 = vadd.f32 %v3018_v52, %v10488_v24  ;;  %v3020_v54 = vpop.f32.mrb[186].mxu1  ;;  %3750 = vmatprep.mubr.bf16.mxu0 %v3350_v50 }
 0x422   :  { %v3021_v55 = vadd.f32 %v3020_v54, %v10482_v15  ;;  %v3022_v56 = vpop.f32.mrb[187].mxu1  ;;  %3751 = vmatmul.mubr.bf16.gmra.mrb[52].mxu0 %v3349_v48  ;;  %v3251_v58 = vmax.f32 %v3017_v51, 0.0 }
 0x423   :  { %v3023_v57 = vadd.f32 %v3022_v56, %v10488_v24  ;;  %v3252_v60 = vmax.f32 %v3019_v53, 0.0 }
 0x424   :  { %v3253_v59 = vmax.f32 %v3021_v55, 0.0 }
 0x425   :  { %v3254_v61 = vmax.f32 %v3023_v57, 0.0 }
 0x426   :  { %v3351_v62 = vpack.c.bf16 %v3253_v59, %v3251_v58 }
 0x427   :  { %v3026_v63 = vpop.f32.mrb[188].mxu1  ;;  %v3352_v0 = vpack.c.bf16 %v3254_v61, %v3252_v60 }
 0x428   :  { %v3027_v1 = vadd.f32 %v3026_v63, %v10482_v15  ;;  %v3028_v2 = vpop.f32.mrb[189].mxu1 }
 0x429   :  { %v3029_v3 = vadd.f32 %v3028_v2, %v10488_v24  ;;  %v3030_v4 = vpop.f32.mrb[190].mxu1  ;;  %3760 = vmatprep.mubr.bf16.mxu0 %v3352_v0 }
 0x42a   :  { %v3031_v5 = vadd.f32 %v3030_v4, %v10482_v15  ;;  %v3032_v6 = vpop.f32.mrb[191].mxu1  ;;  %3761 = vmatmul.mubr.bf16.gmra.mrb[56].mxu0 %v3351_v62  ;;  %v3255_v9 = vmax.f32 %v3027_v1, 0.0 }
 0x42b   :  { %v3033_v7 = vadd.f32 %v3032_v6, %v10488_v24  ;;  %v3256_v11 = vmax.f32 %v3029_v3, 0.0 }
 0x42c   :  { %v3257_v10 = vmax.f32 %v3031_v5, 0.0 }
 0x42d   :  { %v3258_v12 = vmax.f32 %v3033_v7, 0.0 }
 0x42e   :  { %v3353_v13 = vpack.c.bf16 %v3257_v10, %v3255_v9 }
 0x42f   :  { %v3036_v14 = vpop.f32.mrb[192].mxu1  ;;  %v3354_v20 = vpack.c.bf16 %v3258_v12, %v3256_v11 }
 0x430   :  { %v3037_v21 = vadd.f32 %v3036_v14, %v10482_v15  ;;  %v3038_v25 = vpop.f32.mrb[193].mxu1 }
 0x431   :  { %v3039_v26 = vadd.f32 %v3038_v25, %v10488_v24  ;;  %v3040_v27 = vpop.f32.mrb[194].mxu1  ;;  %3770 = vmatprep.mubr.bf16.mxu0 %v3354_v20 }
 0x432   :  { %v3041_v28 = vadd.f32 %v3040_v27, %v10482_v15  ;;  %v3042_v16 = vpop.f32.mrb[195].mxu1  ;;  %3771 = vmatmul.mubr.bf16.gmra.mrb[60].mxu0 %v3353_v13  ;;  %v3259_v18 = vmax.f32 %v3037_v21, 0.0 }
 0x433   :  { %v3043_v19 = vadd.f32 %v3042_v16, %v10488_v24  ;;  %v3260_v30 = vmax.f32 %v3039_v26, 0.0 }
 0x434   :  { %v3261_v29 = vmax.f32 %v3041_v28, 0.0 }
 0x435   :  { %v3262_v23 = vmax.f32 %v3043_v19, 0.0 }
 0x436   :  { %v3355_v22 = vpack.c.bf16 %v3261_v29, %v3259_v18 }
 0x437   :  { %v3046_v17 = vpop.f32.mrb[196].mxu1  ;;  %v3356_v31 = vpack.c.bf16 %v3262_v23, %v3260_v30 }
 0x438   :  { %v3047_v32 = vadd.f32 %v3046_v17, %v10482_v15  ;;  %v3048_v33 = vpop.f32.mrb[197].mxu1 }
 0x439   :  { %v3049_v34 = vadd.f32 %v3048_v33, %v10488_v24  ;;  %v3050_v35 = vpop.f32.mrb[198].mxu1  ;;  %3780 = vmatprep.mubr.bf16.mxu0 %v3356_v31 }
 0x43a   :  { %v3051_v36 = vadd.f32 %v3050_v35, %v10482_v15  ;;  %v3052_v37 = vpop.f32.mrb[199].mxu1  ;;  %3781 = vmatmul.mubr.bf16.gmra.mrb[64].mxu0 %v3355_v22  ;;  %v3263_v39 = vmax.f32 %v3047_v32, 0.0 }
 0x43b   :  { %v3053_v38 = vadd.f32 %v3052_v37, %v10488_v24  ;;  %v3264_v41 = vmax.f32 %v3049_v34, 0.0 }
 0x43c   :  { %v3265_v40 = vmax.f32 %v3051_v36, 0.0 }
 0x43d   :  { %v3266_v42 = vmax.f32 %v3053_v38, 0.0 }
 0x43e   :  { %v3357_v43 = vpack.c.bf16 %v3265_v40, %v3263_v39 }
 0x43f   :  { %v3056_v44 = vpop.f32.mrb[200].mxu1  ;;  %v3358_v45 = vpack.c.bf16 %v3266_v42, %v3264_v41 }
 0x440   :  { %v3057_v46 = vadd.f32 %v3056_v44, %v10482_v15  ;;  %v3058_v47 = vpop.f32.mrb[201].mxu1 }
 0x441   :  { %v3059_v48 = vadd.f32 %v3058_v47, %v10488_v24  ;;  %v3060_v49 = vpop.f32.mrb[202].mxu1  ;;  %3790 = vmatprep.mubr.bf16.mxu0 %v3358_v45 }
 0x442   :  { %v3061_v50 = vadd.f32 %v3060_v49, %v10482_v15  ;;  %v3062_v51 = vpop.f32.mrb[203].mxu1  ;;  %3791 = vmatmul.mubr.bf16.gmra.mrb[68].mxu0 %v3357_v43  ;;  %v3267_v53 = vmax.f32 %v3057_v46, 0.0 }
 0x443   :  { %v3063_v52 = vadd.f32 %v3062_v51, %v10488_v24  ;;  %v3268_v55 = vmax.f32 %v3059_v48, 0.0 }
 0x444   :  { %v3269_v54 = vmax.f32 %v3061_v50, 0.0 }
 0x445   :  { %v3270_v56 = vmax.f32 %v3063_v52, 0.0 }
 0x446   :  { %v3359_v57 = vpack.c.bf16 %v3269_v54, %v3267_v53 }
 0x447   :  { %v3066_v58 = vpop.f32.mrb[204].mxu1  ;;  %v3360_v59 = vpack.c.bf16 %v3270_v56, %v3268_v55 }
 0x448   :  { %v3067_v60 = vadd.f32 %v3066_v58, %v10482_v15  ;;  %v3068_v61 = vpop.f32.mrb[205].mxu1 }
 0x449   :  { %v3069_v62 = vadd.f32 %v3068_v61, %v10488_v24  ;;  %v3070_v63 = vpop.f32.mrb[206].mxu1  ;;  %3800 = vmatprep.mubr.bf16.mxu0 %v3360_v59 }
 0x44a   :  { %v3071_v0 = vadd.f32 %v3070_v63, %v10482_v15  ;;  %v3072_v1 = vpop.f32.mrb[207].mxu1  ;;  %3801 = vmatmul.mubr.bf16.gmra.mrb[72].mxu0 %v3359_v57  ;;  %v3271_v3 = vmax.f32 %v3067_v60, 0.0 }
 0x44b   :  { %v3073_v2 = vadd.f32 %v3072_v1, %v10488_v24  ;;  %v3272_v5 = vmax.f32 %v3069_v62, 0.0 }
 0x44c   :  { %v3273_v4 = vmax.f32 %v3071_v0, 0.0 }
 0x44d   :  { %v3274_v6 = vmax.f32 %v3073_v2, 0.0 }
 0x44e   :  { %v3361_v7 = vpack.c.bf16 %v3273_v4, %v3271_v3 }
 0x44f   :  { %v3076_v9 = vpop.f32.mrb[208].mxu1  ;;  %v3362_v10 = vpack.c.bf16 %v3274_v6, %v3272_v5 }
 0x450   :  { %v3077_v11 = vadd.f32 %v3076_v9, %v10482_v15  ;;  %v3078_v12 = vpop.f32.mrb[209].mxu1 }
 0x451   :  { %v3079_v13 = vadd.f32 %v3078_v12, %v10488_v24  ;;  %v3080_v14 = vpop.f32.mrb[210].mxu1  ;;  %3810 = vmatprep.mubr.bf16.mxu0 %v3362_v10 }
 0x452   :  { %v3081_v20 = vadd.f32 %v3080_v14, %v10482_v15  ;;  %v3082_v21 = vpop.f32.mrb[211].mxu1  ;;  %3811 = vmatmul.mubr.bf16.gmra.mrb[76].mxu0 %v3361_v7  ;;  %v3275_v26 = vmax.f32 %v3077_v11, 0.0 }
 0x453   :  { %v3083_v25 = vadd.f32 %v3082_v21, %v10488_v24  ;;  %v3276_v28 = vmax.f32 %v3079_v13, 0.0 }
 0x454   :  { %v3277_v27 = vmax.f32 %v3081_v20, 0.0 }
 0x455   :  { %v3278_v16 = vmax.f32 %v3083_v25, 0.0 }
 0x456   :  { %v3363_v19 = vpack.c.bf16 %v3277_v27, %v3275_v26 }
 0x457   :  { %v3086_v18 = vpop.f32.mrb[212].mxu1  ;;  %v3364_v29 = vpack.c.bf16 %v3278_v16, %v3276_v28 }
 0x458   :  { %v3087_v30 = vadd.f32 %v3086_v18, %v10482_v15  ;;  %v3088_v23 = vpop.f32.mrb[213].mxu1 }
 0x459   :  { %v3089_v22 = vadd.f32 %v3088_v23, %v10488_v24  ;;  %v3090_v17 = vpop.f32.mrb[214].mxu1  ;;  %3820 = vmatprep.mubr.bf16.mxu0 %v3364_v29 }
 0x45a   :  { %v3091_v31 = vadd.f32 %v3090_v17, %v10482_v15  ;;  %v3092_v32 = vpop.f32.mrb[215].mxu1  ;;  %3821 = vmatmul.mubr.bf16.gmra.mrb[80].mxu0 %v3363_v19  ;;  %v3279_v34 = vmax.f32 %v3087_v30, 0.0 }
 0x45b   :  { %v3093_v33 = vadd.f32 %v3092_v32, %v10488_v24  ;;  %v3280_v36 = vmax.f32 %v3089_v22, 0.0 }
 0x45c   :  { %v3281_v35 = vmax.f32 %v3091_v31, 0.0 }
 0x45d   :  { %v3282_v37 = vmax.f32 %v3093_v33, 0.0 }
 0x45e   :  { %v3365_v38 = vpack.c.bf16 %v3281_v35, %v3279_v34 }
 0x45f   :  { %v3096_v39 = vpop.f32.mrb[216].mxu1  ;;  %v3366_v40 = vpack.c.bf16 %v3282_v37, %v3280_v36 }
 0x460   :  { %v3097_v41 = vadd.f32 %v3096_v39, %v10482_v15  ;;  %v3098_v42 = vpop.f32.mrb[217].mxu1 }
 0x461   :  { %v3099_v43 = vadd.f32 %v3098_v42, %v10488_v24  ;;  %v3100_v44 = vpop.f32.mrb[218].mxu1  ;;  %3830 = vmatprep.mubr.bf16.mxu0 %v3366_v40 }
 0x462   :  { %v3101_v45 = vadd.f32 %v3100_v44, %v10482_v15  ;;  %v3102_v46 = vpop.f32.mrb[219].mxu1  ;;  %3831 = vmatmul.mubr.bf16.gmra.mrb[84].mxu0 %v3365_v38  ;;  %v3283_v48 = vmax.f32 %v3097_v41, 0.0 }
 0x463   :  { %v3103_v47 = vadd.f32 %v3102_v46, %v10488_v24  ;;  %v3284_v50 = vmax.f32 %v3099_v43, 0.0 }
 0x464   :  { %v3285_v49 = vmax.f32 %v3101_v45, 0.0 }
 0x465   :  { %v3286_v51 = vmax.f32 %v3103_v47, 0.0 }
 0x466   :  { %v3367_v52 = vpack.c.bf16 %v3285_v49, %v3283_v48  ;;  %v3422_v48 = vsub.s32 4, %v9749_v8 }
 0x467   :  { %v3106_v53 = vpop.f32.mrb[220].mxu1  ;;  %v3368_v54 = vpack.c.bf16 %v3286_v51, %v3284_v50 }
 0x468   :  { %v3107_v55 = vadd.f32 %v3106_v53, %v10482_v15  ;;  %v3108_v56 = vpop.f32.mrb[221].mxu1 }
 0x469   :  { %v3109_v57 = vadd.f32 %v3108_v56, %v10488_v24  ;;  %v3110_v58 = vpop.f32.mrb[222].mxu1  ;;  %3840 = vmatprep.mubr.bf16.mxu0 %v3368_v54 }
 0x46a   :  { %v3111_v59 = vadd.f32 %v3110_v58, %v10482_v15  ;;  %v3112_v60 = vpop.f32.mrb[223].mxu1  ;;  %3841 = vmatmul.mubr.bf16.gmra.mrb[88].mxu0 %v3367_v52  ;;  %v3287_v62 = vmax.f32 %v3107_v55, 0.0 }
 0x46b   :  { %v3113_v61 = vadd.f32 %v3112_v60, %v10488_v24  ;;  %v3288_v0 = vmax.f32 %v3109_v57, 0.0  ;;  %v9247_v57 = vld [vmem:[%s12869_s2] sm:$0xff]  ;;  %v9248_v60 = vld [vmem:[%s12869_s2 + $0x8] sm:$0xff] }
 0x46c   :  { %v3289_v63 = vmax.f32 %v3111_v59, 0.0  ;;  %v10660_v58 = vrot.slane %v9247_v57, %v3422_v48 }
 0x46d   :  { %v3290_v1 = vmax.f32 %v3113_v61, 0.0  ;;  %v10666_v61 = vrot.slane %v9248_v60, %v3422_v48 }
 0x46e   :  { %v3369_v2 = vpack.c.bf16 %v3289_v63, %v3287_v62 }
 0x46f   :  { %v3116_v3 = vpop.f32.mrb[224].mxu1  ;;  %v3370_v4 = vpack.c.bf16 %v3290_v1, %v3288_v0 }
 0x470   :  { %v3117_v5 = vadd.f32 %v3116_v3, %v10482_v15  ;;  %v3118_v6 = vpop.f32.mrb[225].mxu1 }
 0x471   :  { %v3119_v7 = vadd.f32 %v3118_v6, %v10488_v24  ;;  %v3120_v9 = vpop.f32.mrb[226].mxu1  ;;  %3850 = vmatprep.mubr.bf16.mxu0 %v3370_v4 }
 0x472   :  { %v3121_v10 = vadd.f32 %v3120_v9, %v10482_v15  ;;  %v3122_v11 = vpop.f32.mrb[227].mxu1  ;;  %3851 = vmatmul.mubr.bf16.gmra.mrb[92].mxu0 %v3369_v2  ;;  %v3291_v13 = vmax.f32 %v3117_v5, 0.0 }
 0x473   :  { %v3123_v12 = vadd.f32 %v3122_v11, %v10488_v24  ;;  %v3292_v20 = vmax.f32 %v3119_v7, 0.0 }
 0x474   :  { %v3293_v14 = vmax.f32 %v3121_v10, 0.0 }
 0x475   :  { %v3294_v21 = vmax.f32 %v3123_v12, 0.0 }
 0x476   :  { %v3371_v25 = vpack.c.bf16 %v3293_v14, %v3291_v13 }
 0x477   :  { %v3126_v26 = vpop.f32.mrb[228].mxu1  ;;  %v3372_v27 = vpack.c.bf16 %v3294_v21, %v3292_v20 }
 0x478   :  { %v3127_v28 = vadd.f32 %v3126_v26, %v10482_v15  ;;  %v3128_v16 = vpop.f32.mrb[229].mxu1 }
 0x479   :  { %v3129_v19 = vadd.f32 %v3128_v16, %v10488_v24  ;;  %v3130_v18 = vpop.f32.mrb[230].mxu1  ;;  %3860 = vmatprep.mubr.bf16.mxu0 %v3372_v27 }
 0x47a   :  { %v3131_v29 = vadd.f32 %v3130_v18, %v10482_v15  ;;  %v3132_v30 = vpop.f32.mrb[231].mxu1  ;;  %3861 = vmatmul.mubr.bf16.gmra.mrb[96].mxu0 %v3371_v25  ;;  %v3295_v22 = vmax.f32 %v3127_v28, 0.0 }
 0x47b   :  { %v3133_v23 = vadd.f32 %v3132_v30, %v10488_v24  ;;  %v3296_v31 = vmax.f32 %v3129_v19, 0.0 }
 0x47c   :  { %v3297_v17 = vmax.f32 %v3131_v29, 0.0 }
 0x47d   :  { %v3298_v32 = vmax.f32 %v3133_v23, 0.0 }
 0x47e   :  { %v3373_v33 = vpack.c.bf16 %v3297_v17, %v3295_v22 }
 0x47f   :  { %v3136_v34 = vpop.f32.mrb[232].mxu1  ;;  %v3374_v35 = vpack.c.bf16 %v3298_v32, %v3296_v31 }
 0x480   :  { %v3137_v36 = vadd.f32 %v3136_v34, %v10482_v15  ;;  %v3138_v37 = vpop.f32.mrb[233].mxu1  ;;  %v9049_v34 = vld [vmem:[%s12867_s1 + $0x500] ss:$8 sps:$4 sm:$0xff]  }
 0x481   :  { %v3139_v38 = vadd.f32 %v3138_v37, %v10488_v24  ;;  %v3140_v39 = vpop.f32.mrb[234].mxu1  ;;  %3870 = vmatprep.mubr.bf16.mxu0 %v3374_v35 }
 0x482   :  { %v3141_v40 = vadd.f32 %v3140_v39, %v10482_v15  ;;  %v3142_v41 = vpop.f32.mrb[235].mxu1  ;;  %3871 = vmatmul.mubr.bf16.gmra.mrb[100].mxu0 %v3373_v33  ;;  %v3299_v43 = vmax.f32 %v3137_v36, 0.0 }
 0x483   :  { %v3143_v42 = vadd.f32 %v3142_v41, %v10488_v24  ;;  %v3300_v45 = vmax.f32 %v3139_v38, 0.0  ;;  %v9054_v38 = vld [vmem:[%s12867_s1 + $0x514] ss:$8 sps:$4 sm:$0xff]  }
 0x484   :  { %v3301_v44 = vmax.f32 %v3141_v40, 0.0 }
 0x485   :  { %v3302_v46 = vmax.f32 %v3143_v42, 0.0 }
 0x486   :  { %v3375_v47 = vpack.c.bf16 %v3301_v44, %v3299_v43 }
 0x487   :  { %v3146_v49 = vpop.f32.mrb[236].mxu1  ;;  %v3376_v50 = vpack.c.bf16 %v3302_v46, %v3300_v45 }
 0x488   :  { %v3147_v51 = vadd.f32 %v3146_v49, %v10482_v15  ;;  %v3148_v52 = vpop.f32.mrb[237].mxu1 }
 0x489   :  { %v3149_v53 = vadd.f32 %v3148_v52, %v10488_v24  ;;  %v3150_v54 = vpop.f32.mrb[238].mxu1  ;;  %3880 = vmatprep.mubr.bf16.mxu0 %v3376_v50  ;;  %v9052_v50 = vld [vmem:[%s12867_s1 + $0x510] ss:$8 sps:$4 sm:$0xff]  }
 0x48a   :  { %v3151_v55 = vadd.f32 %v3150_v54, %v10482_v15  ;;  %v3152_v56 = vpop.f32.mrb[239].mxu1  ;;  %3881 = vmatmul.mubr.bf16.gmra.mrb[104].mxu0 %v3375_v47  ;;  %v3303_v62 = vmax.f32 %v3147_v51, 0.0 }
 0x48b   :  { %v3153_v59 = vadd.f32 %v3152_v56, %v10488_v24  ;;  %v3304_v0 = vmax.f32 %v3149_v53, 0.0 }
 0x48c   :  { %v3305_v63 = vmax.f32 %v3151_v55, 0.0  ;;  %v9057_v55 = vld [vmem:[%s12867_s1 + $0x524] ss:$8 sps:$4 sm:$0xff]  }
 0x48d   :  { %v3306_v1 = vmax.f32 %v3153_v59, 0.0  ;;  %v3622_v2 = vpop.f32.mrb[0].mxu0 }
 0x48e   :  { %v3377_v3 = vpack.c.bf16 %v3305_v63, %v3303_v62  ;;  %v3623_v4 = vadd.f32 %v3622_v2, %v10660_v58  ;;  %v3624_v5 = vpop.f32.mrb[1].mxu0 }
 0x48f   :  { %v3625_v6 = vadd.f32 %v3624_v5, %v10666_v61  ;;  %v3156_v7 = vpop.f32.mrb[240].mxu1  ;;  %v3626_v9 = vpop.f32.mrb[2].mxu0  ;;  %v3378_v10 = vpack.c.bf16 %v3306_v1, %v3304_v0 }
 0x490   :  { %v3157_v11 = vadd.f32 %v3156_v7, %v10482_v15  ;;  %v3627_v12 = vadd.f32 %v3626_v9, %v10660_v58  ;;  %v3158_v13 = vpop.f32.mrb[241].mxu1  ;;  %v3628_v14 = vpop.f32.mrb[3].mxu0  ;;  %v3941_v26 = vmax.f32 %v3623_v4, 0.0  ;;  %v9055_v4 = vld [vmem:[%s12867_s1 + $0x520] ss:$8 sps:$4 sm:$0xff]  }
 0x491   :  { %v3159_v20 = vadd.f32 %v3158_v13, %v10488_v24  ;;  %v3629_v21 = vadd.f32 %v3628_v14, %v10666_v61  ;;  %v3160_v25 = vpop.f32.mrb[242].mxu1  ;;  %3890 = vmatprep.mubr.bf16.mxu0 %v3378_v10  ;;  %v3942_v19 = vmax.f32 %v3625_v6, 0.0  ;;  %v9060_v9 = vld [vmem:[%s12867_s1 + $0x534] ss:$8 sps:$4 sm:$0xff]  }
 0x492   :  { %v3943_v27 = vmax.f32 %v3627_v12, 0.0  ;;  %v3161_v28 = vadd.f32 %v3160_v25, %v10482_v15  ;;  %v3162_v16 = vpop.f32.mrb[243].mxu1  ;;  %3891 = vmatmul.mubr.bf16.gmra.mrb[108].mxu0 %v3377_v3  ;;  %v3307_v30 = vmax.f32 %v3157_v11, 0.0 }
 0x493   :  { %v3944_v18 = vmax.f32 %v3629_v21, 0.0  ;;  %v3163_v29 = vadd.f32 %v3162_v16, %v10488_v24  ;;  %v3308_v17 = vmax.f32 %v3159_v20, 0.0  ;;  %v9058_v16 = vld [vmem:[%s12867_s1 + $0x530] ss:$8 sps:$4 sm:$0xff]  }
 0x494   :  { %v4102_v23 = vpack.c.bf16 %v3943_v27, %v3941_v26  ;;  %v3309_v22 = vmax.f32 %v3161_v28, 0.0 }
 0x495   :  { %v3310_v31 = vmax.f32 %v3163_v29, 0.0  ;;  %v3632_v32 = vpop.f32.mrb[4].mxu0  ;;  %v4103_v33 = vpack.c.bf16 %v3944_v18, %v3942_v19 }
 0x496   :  { %v3379_v35 = vpack.c.bf16 %v3309_v22, %v3307_v30  ;;  %v3633_v36 = vadd.f32 %v3632_v32, %v10660_v58  ;;  %v3634_v37 = vpop.f32.mrb[5].mxu0 }
 0x497   :  { %v3635_v39 = vadd.f32 %v3634_v37, %v10666_v61  ;;  %v3166_v40 = vpop.f32.mrb[244].mxu1  ;;  %v3636_v41 = vpop.f32.mrb[6].mxu0  ;;  %4391 = vmatprep.mubr.bf16.mxu1 %v4103_v33  ;;  %v3380_v42 = vpack.c.bf16 %v3310_v31, %v3308_v17 }
 0x498   :  { %v3167_v43 = vadd.f32 %v3166_v40, %v10482_v15  ;;  %v3637_v44 = vadd.f32 %v3636_v41, %v10660_v58  ;;  %v3168_v45 = vpop.f32.mrb[245].mxu1  ;;  %v3638_v46 = vpop.f32.mrb[7].mxu0  ;;  %4392 = vmatmul.mubr.bf16.vlgmr.msra.gmra.mrb[0].mxu1 %v4102_v23  ;;  %v3945_v51 = vmax.f32 %v3633_v36, 0.0  ;;  %v9063_v23 = vld [vmem:[%s12867_s1 + $0x544] ss:$8 sps:$4 sm:$0xff]  }
 0x499   :  { %v3169_v47 = vadd.f32 %v3168_v45, %v10488_v24  ;;  %v3639_v48 = vadd.f32 %v3638_v46, %v10666_v61  ;;  %4873 = vmatpush1.bf16.msra.mxu1 %v9049_v34  ;;  %v3170_v49 = vpop.f32.mrb[246].mxu1  ;;  %3900 = vmatprep.mubr.bf16.mxu0 %v3380_v42  ;;  %v3946_v56 = vmax.f32 %v3635_v39, 0.0  ;;  %v9061_v39 = vld [vmem:[%s12867_s1 + $0x540] ss:$8 sps:$4 sm:$0xff]  }
 0x49a   :  { %v3947_v52 = vmax.f32 %v3637_v44, 0.0  ;;  %v3171_v53 = vadd.f32 %v3170_v49, %v10482_v15  ;;  %v3172_v54 = vpop.f32.mrb[247].mxu1  ;;  %3901 = vmatmul.mubr.bf16.gmra.mrb[112].mxu0 %v3379_v35  ;;  %4874 = vmatprep.subr.bf16.mxu1 %v9054_v38  ;;  %v3311_v60 = vmax.f32 %v3167_v43, 0.0  ;;  %v9066_v43 = vld [vmem:[%s12867_s1 + $0x554] ss:$8 sps:$4 sm:$0xff]  }
 0x49b   :  { %v3948_v57 = vmax.f32 %v3639_v48, 0.0  ;;  %v3173_v59 = vadd.f32 %v3172_v54, %v10488_v24  ;;  %v3312_v0 = vmax.f32 %v3169_v47, 0.0 }
 0x49c   :  { %v4104_v62 = vpack.c.bf16 %v3947_v52, %v3945_v51  ;;  %v3313_v63 = vmax.f32 %v3171_v53, 0.0 }
 0x49d   :  { %v3314_v1 = vmax.f32 %v3173_v59, 0.0  ;;  %v3642_v2 = vpop.f32.mrb[8].mxu0  ;;  %v4105_v3 = vpack.c.bf16 %v3948_v57, %v3946_v56  ;;  %4875 = vmatpush1.bf16.msra.mxu1 %v9052_v50 }
 0x49e   :  { %v3381_v5 = vpack.c.bf16 %v3313_v63, %v3311_v60  ;;  %v3643_v6 = vadd.f32 %v3642_v2, %v10660_v58  ;;  %v3644_v7 = vpop.f32.mrb[9].mxu0  ;;  %4876 = vmatprep.subr.bf16.mxu1 %v9057_v55  ;;  %v9064_v55 = vld [vmem:[%s12867_s1 + $0x550] ss:$8 sps:$4 sm:$0xff]  }
 0x49f   :  { %v3645_v10 = vadd.f32 %v3644_v7, %v10666_v61  ;;  %v3176_v11 = vpop.f32.mrb[248].mxu1  ;;  %v3646_v12 = vpop.f32.mrb[10].mxu0  ;;  %4401 = vmatprep.mubr.bf16.mxu1 %v4105_v3  ;;  %v3382_v13 = vpack.c.bf16 %v3314_v1, %v3312_v0 }
 0x4a0   :  { %v3177_v14 = vadd.f32 %v3176_v11, %v10482_v15  ;;  %v3647_v20 = vadd.f32 %v3646_v12, %v10660_v58  ;;  %v3178_v21 = vpop.f32.mrb[249].mxu1  ;;  %v3648_v25 = vpop.f32.mrb[11].mxu0  ;;  %4402 = vmatmul.mubr.bf16.gmra.mrb[4].mxu1 %v4104_v62  ;;  %v3949_v19 = vmax.f32 %v3643_v6, 0.0  ;;  %v9069_v62 = vld [vmem:[%s12867_s1 + $0x564] ss:$8 sps:$4 sm:$0xff]  }
 0x4a1   :  { %v3179_v26 = vadd.f32 %v3178_v21, %v10488_v24  ;;  %v3649_v27 = vadd.f32 %v3648_v25, %v10666_v61  ;;  %v3180_v28 = vpop.f32.mrb[250].mxu1  ;;  %3910 = vmatprep.mubr.bf16.mxu0 %v3382_v13  ;;  %4877 = vmatpush1.bf16.msra.mxu1 %v9055_v4  ;;  %v3950_v22 = vmax.f32 %v3645_v10, 0.0 }
 0x4a2   :  { %v3951_v18 = vmax.f32 %v3647_v20, 0.0  ;;  %v3181_v29 = vadd.f32 %v3180_v28, %v10482_v15  ;;  %v3182_v30 = vpop.f32.mrb[251].mxu1  ;;  %3911 = vmatmul.mubr.bf16.gmra.mrb[116].mxu0 %v3381_v5  ;;  %4878 = vmatprep.subr.bf16.mxu1 %v9060_v9  ;;  %v3315_v32 = vmax.f32 %v3177_v14, 0.0 }
 0x4a3   :  { %v3952_v17 = vmax.f32 %v3649_v27, 0.0  ;;  %v3183_v31 = vadd.f32 %v3182_v30, %v10488_v24  ;;  %v3316_v35 = vmax.f32 %v3179_v26, 0.0  ;;  %v9070_v27 = vld [vmem:[%s12867_s1 + $0x570] ss:$8 sps:$4 sm:$0xff]  }
 0x4a4   :  { %v4106_v33 = vpack.c.bf16 %v3951_v18, %v3949_v19  ;;  %v3317_v34 = vmax.f32 %v3181_v29, 0.0  ;;  %v9075_v19 = vld [vmem:[%s12867_s1 + $0x584] ss:$8 sps:$4 sm:$0xff]  }
 0x4a5   :  { %v3318_v36 = vmax.f32 %v3183_v31, 0.0  ;;  %v3652_v37 = vpop.f32.mrb[12].mxu0  ;;  %v4107_v38 = vpack.c.bf16 %v3952_v17, %v3950_v22  ;;  %4879 = vmatpush1.bf16.msra.mxu1 %v9058_v16  ;;  %v9073_v17 = vld [vmem:[%s12867_s1 + $0x580] ss:$8 sps:$4 sm:$0xff]  }
 0x4a6   :  { %v3383_v40 = vpack.c.bf16 %v3317_v34, %v3315_v32  ;;  %v3653_v41 = vadd.f32 %v3652_v37, %v10660_v58  ;;  %v3654_v42 = vpop.f32.mrb[13].mxu0  ;;  %4880 = vmatprep.subr.bf16.mxu1 %v9063_v23 }
 0x4a7   :  { %v3655_v44 = vadd.f32 %v3654_v42, %v10666_v61  ;;  %v3186_v45 = vpop.f32.mrb[252].mxu1  ;;  %v3656_v46 = vpop.f32.mrb[14].mxu0  ;;  %4411 = vmatprep.mubr.bf16.mxu1 %v4107_v38  ;;  %v3384_v47 = vpack.c.bf16 %v3318_v36, %v3316_v35 }
 0x4a8   :  { %v3187_v48 = vadd.f32 %v3186_v45, %v10482_v15  ;;  %v3657_v49 = vadd.f32 %v3656_v46, %v10660_v58  ;;  %v3188_v50 = vpop.f32.mrb[253].mxu1  ;;  %v3658_v51 = vpop.f32.mrb[15].mxu0  ;;  %4412 = vmatmul.mubr.bf16.gmra.mrb[8].mxu1 %v4106_v33  ;;  %v3953_v56 = vmax.f32 %v3653_v41, 0.0  ;;  %v9078_v33 = vld [vmem:[%s12867_s1 + $0x594] ss:$8 sps:$4 sm:$0xff]  }
 0x4a9   :  { %v3189_v52 = vadd.f32 %v3188_v50, %v10488_v24  ;;  %v3659_v53 = vadd.f32 %v3658_v51, %v10666_v61  ;;  %v3190_v54 = vpop.f32.mrb[254].mxu1  ;;  %3920 = vmatprep.mubr.bf16.mxu0 %v3384_v47  ;;  %4881 = vmatpush1.bf16.msra.mxu1 %v9061_v39  ;;  %v3954_v63 = vmax.f32 %v3655_v44, 0.0  ;;  %v9076_v39 = vld [vmem:[%s12867_s1 + $0x590] ss:$8 sps:$4 sm:$0xff]   ;;  %v9081_v45 = vld [vmem:[%s12867_s1 + $0x5a4] ss:$8 sps:$4 sm:$0xff]  }
 0x4aa   :  { %v3955_v57 = vmax.f32 %v3657_v49, 0.0  ;;  %v3191_v59 = vadd.f32 %v3190_v54, %v10482_v15  ;;  %v3192_v60 = vpop.f32.mrb[255].mxu1  ;;  %3921 = vmatmul.mubr.bf16.gmra.mrb[120].mxu0 %v3383_v40  ;;  %4882 = vmatprep.subr.bf16.mxu1 %v9066_v43  ;;  %v3319_v2 = vmax.f32 %v3187_v48, 0.0  ;;  %v9067_v15 = vld [vmem:[%s12867_s1 + $0x560] ss:$8 sps:$4 sm:$0xff]  }
 0x4ab   :  { %v3956_v0 = vmax.f32 %v3659_v53, 0.0  ;;  %v3193_v1 = vadd.f32 %v3192_v60, %v10488_v24  ;;  %v3320_v5 = vmax.f32 %v3189_v52, 0.0  ;;  %v9072_v24 = vld [vmem:[%s12867_s1 + $0x574] ss:$8 sps:$4 sm:$0xff]   ;;  %v9079_v48 = vld [vmem:[%s12867_s1 + $0x5a0] ss:$8 sps:$4 sm:$0xff]  }
 0x4ac   :  { %v4108_v3 = vpack.c.bf16 %v3955_v57, %v3953_v56  ;;  %v3321_v4 = vmax.f32 %v3191_v59, 0.0 }
 0x4ad   :  { %v3322_v6 = vmax.f32 %v3193_v1, 0.0  ;;  %v3662_v7 = vpop.f32.mrb[16].mxu0  ;;  %v4109_v9 = vpack.c.bf16 %v3956_v0, %v3954_v63  ;;  %4883 = vmatpush1.bf16.msra.mxu1 %v9064_v55 }
 0x4ae   :  { %v3385_v10 = vpack.c.bf16 %v3321_v4, %v3319_v2  ;;  %v3663_v11 = vadd.f32 %v3662_v7, %v10660_v58  ;;  %v3664_v12 = vpop.f32.mrb[17].mxu0  ;;  %4884 = vmatprep.subr.bf16.mxu1 %v9069_v62 }
 0x4af   :  { %v3665_v13 = vadd.f32 %v3664_v12, %v10666_v61  ;;  %v3666_v14 = vpop.f32.mrb[18].mxu0  ;;  %4421 = vmatprep.mubr.bf16.mxu1 %v4109_v9  ;;  %v3386_v20 = vpack.c.bf16 %v3322_v6, %v3320_v5 }
 0x4b0   :  { %v3667_v21 = vadd.f32 %v3666_v14, %v10660_v58  ;;  %v3668_v25 = vpop.f32.mrb[19].mxu0  ;;  %4422 = vmatmul.mubr.bf16.gmra.mrb[12].mxu1 %v4108_v3  ;;  %v3957_v28 = vmax.f32 %v3663_v11, 0.0 }
 0x4b1   :  { %v3669_v26 = vadd.f32 %v3668_v25, %v10666_v61  ;;  %3930 = vmatprep.mubr.bf16.mxu0 %v3386_v20  ;;  %4885 = vmatpush1.bf16.msra.mxu1 %v9067_v15  ;;  %v3958_v18 = vmax.f32 %v3665_v13, 0.0  ;;  %v9084_v13 = vld [vmem:[%s12867_s1 + $0x5b4] ss:$8 sps:$4 sm:$0xff]  }
 0x4b2   :  { %v3959_v16 = vmax.f32 %v3667_v21, 0.0  ;;  %3931 = vmatmul.mubr.bf16.gmra.mrb[124].mxu0 %v3385_v10  ;;  %4886 = vmatprep.subr.bf16.mxu1 %v9072_v24  ;;  %v9082_v24 = vld [vmem:[%s12867_s1 + $0x5b0] ss:$8 sps:$4 sm:$0xff]  }
 0x4b3   :  { %v3960_v29 = vmax.f32 %v3669_v26, 0.0 }
 0x4b4   :  { %v4110_v30 = vpack.c.bf16 %v3959_v16, %v3957_v28 }
 0x4b5   :  { %v3672_v23 = vpop.f32.mrb[20].mxu0  ;;  %v4111_v22 = vpack.c.bf16 %v3960_v29, %v3958_v18  ;;  %4887 = vmatpush1.bf16.msra.mxu1 %v9070_v27 }
 0x4b6   :  { %v3673_v31 = vadd.f32 %v3672_v23, %v10660_v58  ;;  %v3674_v32 = vpop.f32.mrb[21].mxu0  ;;  %4888 = vmatprep.subr.bf16.mxu1 %v9075_v19 }
 0x4b7   :  { %v3675_v34 = vadd.f32 %v3674_v32, %v10666_v61  ;;  %v3676_v35 = vpop.f32.mrb[22].mxu0  ;;  %4431 = vmatprep.mubr.bf16.mxu1 %v4111_v22 }
 0x4b8   :  { %v3677_v36 = vadd.f32 %v3676_v35, %v10660_v58  ;;  %v3678_v37 = vpop.f32.mrb[23].mxu0  ;;  %4432 = vmatmul.mubr.bf16.gmra.mrb[16].mxu1 %v4110_v30  ;;  %v3961_v40 = vmax.f32 %v3673_v31, 0.0 }
 0x4b9   :  { %v3679_v38 = vadd.f32 %v3678_v37, %v10666_v61  ;;  %4889 = vmatpush1.bf16.msra.mxu1 %v9073_v17  ;;  %v3962_v42 = vmax.f32 %v3675_v34, 0.0 }
 0x4ba   :  { %v3963_v41 = vmax.f32 %v3677_v36, 0.0  ;;  %4890 = vmatprep.subr.bf16.mxu1 %v9078_v33 }
 0x4bb   :  { %v3964_v43 = vmax.f32 %v3679_v38, 0.0 }
 0x4bc   :  { %v4112_v44 = vpack.c.bf16 %v3963_v41, %v3961_v40 }
 0x4bd   :  { %v3682_v46 = vpop.f32.mrb[24].mxu0  ;;  %v4113_v47 = vpack.c.bf16 %v3964_v43, %v3962_v42  ;;  %4891 = vmatpush1.bf16.msra.mxu1 %v9076_v39 }
 0x4be   :  { %v3683_v49 = vadd.f32 %v3682_v46, %v10660_v58  ;;  %v3684_v50 = vpop.f32.mrb[25].mxu0  ;;  %4892 = vmatprep.subr.bf16.mxu1 %v9081_v45  ;;  %v9087_v45 = vld [vmem:[%s12867_s1 + $0x5c4] ss:$8 sps:$4 sm:$0xff]  }
 0x4bf   :  { %v3685_v51 = vadd.f32 %v3684_v50, %v10666_v61  ;;  %v3686_v52 = vpop.f32.mrb[26].mxu0  ;;  %4441 = vmatprep.mubr.bf16.mxu1 %v4113_v47 }
 0x4c0   :  { %v3687_v53 = vadd.f32 %v3686_v52, %v10660_v58  ;;  %v3688_v54 = vpop.f32.mrb[27].mxu0  ;;  %4442 = vmatmul.mubr.bf16.gmra.mrb[20].mxu1 %v4112_v44  ;;  %v3965_v56 = vmax.f32 %v3683_v49, 0.0  ;;  %v9085_v44 = vld [vmem:[%s12867_s1 + $0x5c0] ss:$8 sps:$4 sm:$0xff]  }
 0x4c1   :  { %v3689_v55 = vadd.f32 %v3688_v54, %v10666_v61  ;;  %4893 = vmatpush1.bf16.msra.mxu1 %v9079_v48  ;;  %v3966_v59 = vmax.f32 %v3685_v51, 0.0 }
 0x4c2   :  { %v3967_v57 = vmax.f32 %v3687_v53, 0.0  ;;  %4894 = vmatprep.subr.bf16.mxu1 %v9084_v13 }
 0x4c3   :  { %v3968_v60 = vmax.f32 %v3689_v55, 0.0 }
 0x4c4   :  { %v4114_v62 = vpack.c.bf16 %v3967_v57, %v3965_v56 }
 0x4c5   :  { %v3692_v63 = vpop.f32.mrb[28].mxu0  ;;  %v4115_v0 = vpack.c.bf16 %v3968_v60, %v3966_v59  ;;  %4895 = vmatpush1.bf16.msra.mxu1 %v9082_v24  ;;  %v9090_v24 = vld [vmem:[%s12867_s1 + $0x5d4] ss:$8 sps:$4 sm:$0xff]  }
 0x4c6   :  { %v3693_v1 = vadd.f32 %v3692_v63, %v10660_v58  ;;  %v3694_v2 = vpop.f32.mrb[29].mxu0  ;;  %4896 = vmatprep.subr.bf16.mxu1 %v9087_v45  ;;  %v9094_v45 = vld [vmem:[%s12867_s1 + $0x5e0] ss:$8 sps:$4 sm:$0xff]  }
 0x4c7   :  { %v3695_v3 = vadd.f32 %v3694_v2, %v10666_v61  ;;  %v3696_v4 = vpop.f32.mrb[30].mxu0  ;;  %4451 = vmatprep.mubr.bf16.mxu1 %v4115_v0 }
 0x4c8   :  { %v3697_v5 = vadd.f32 %v3696_v4, %v10660_v58  ;;  %v3698_v6 = vpop.f32.mrb[31].mxu0  ;;  %4452 = vmatmul.mubr.bf16.gmra.mrb[24].mxu1 %v4114_v62  ;;  %v3969_v9 = vmax.f32 %v3693_v1, 0.0 }
 0x4c9   :  { %v3699_v7 = vadd.f32 %v3698_v6, %v10666_v61  ;;  %v3970_v10 = vmax.f32 %v3695_v3, 0.0  ;;  %4897 = vmatpush1.bf16.msra.mxu1 %v9085_v44 }
 0x4ca   :  { %v3971_v15 = vmax.f32 %v3697_v5, 0.0  ;;  %4898 = vmatprep.subr.bf16.mxu1 %v9090_v24 }
 0x4cb   :  { %v3972_v11 = vmax.f32 %v3699_v7, 0.0 }
 0x4cc   :  { %v4116_v12 = vpack.c.bf16 %v3971_v15, %v3969_v9 }
 0x4cd   :  { %v3702_v14 = vpop.f32.mrb[32].mxu0  ;;  %v4117_v20 = vpack.c.bf16 %v3972_v11, %v3970_v10 }
 0x4ce   :  { %v3703_v21 = vadd.f32 %v3702_v14, %v10660_v58  ;;  %v3704_v25 = vpop.f32.mrb[33].mxu0 }
 0x4cf   :  { %v3705_v26 = vadd.f32 %v3704_v25, %v10666_v61  ;;  %v3706_v27 = vpop.f32.mrb[34].mxu0  ;;  %4461 = vmatprep.mubr.bf16.mxu1 %v4117_v20 }
 0x4d0   :  { %v3707_v28 = vadd.f32 %v3706_v27, %v10660_v58  ;;  %v3708_v16 = vpop.f32.mrb[35].mxu0  ;;  %4462 = vmatmul.mubr.bf16.gmra.mrb[28].mxu1 %v4116_v12  ;;  %v3973_v18 = vmax.f32 %v3703_v21, 0.0  ;;  %v9088_v12 = vld [vmem:[%s12867_s1 + $0x5d0] ss:$8 sps:$4 sm:$0xff]  }
 0x4d1   :  { %v3709_v19 = vadd.f32 %v3708_v16, %v10666_v61  ;;  %v3974_v30 = vmax.f32 %v3705_v26, 0.0  ;;  %4899 = vmatpush1.bf16.msra.mxu1 %v9088_v12 }
 0x4d2   :  { %v3975_v29 = vmax.f32 %v3707_v28, 0.0 }
 0x4d3   :  { %v3976_v23 = vmax.f32 %v3709_v19, 0.0 }
 0x4d4   :  { %v4118_v22 = vpack.c.bf16 %v3975_v29, %v3973_v18 }
 0x4d5   :  { %v3712_v17 = vpop.f32.mrb[36].mxu0  ;;  %v4119_v31 = vpack.c.bf16 %v3976_v23, %v3974_v30 }
 0x4d6   :  { %v3713_v32 = vadd.f32 %v3712_v17, %v10660_v58  ;;  %v3714_v33 = vpop.f32.mrb[37].mxu0 }
 0x4d7   :  { %v3715_v34 = vadd.f32 %v3714_v33, %v10666_v61  ;;  %v3716_v35 = vpop.f32.mrb[38].mxu0  ;;  %4471 = vmatprep.mubr.bf16.mxu1 %v4119_v31 }
 0x4d8   :  { %v3717_v36 = vadd.f32 %v3716_v35, %v10660_v58  ;;  %v3718_v37 = vpop.f32.mrb[39].mxu0  ;;  %4472 = vmatmul.mubr.bf16.gmra.mrb[32].mxu1 %v4118_v22  ;;  %v3977_v39 = vmax.f32 %v3713_v32, 0.0 }
 0x4d9   :  { %v3719_v38 = vadd.f32 %v3718_v37, %v10666_v61  ;;  %v3978_v41 = vmax.f32 %v3715_v34, 0.0  ;;  %v9091_v37 = vld [vmem:[%s12867_s1 + $0x700] ss:$8 sps:$4 sm:$0xff]  }
 0x4da   :  { %v3979_v40 = vmax.f32 %v3717_v36, 0.0 }
 0x4db   :  { %v3980_v42 = vmax.f32 %v3719_v38, 0.0  ;;  %v9093_v38 = vld [vmem:[%s12867_s1 + $0x704] ss:$8 sps:$4 sm:$0xff]  }
 0x4dc   :  { %v4120_v43 = vpack.c.bf16 %v3979_v40, %v3977_v39  ;;  %5754 = vmatprep.subr.bf16.mxu0 %v9093_v38 }
 0x4dd   :  { %v3722_v46 = vpop.f32.mrb[40].mxu0  ;;  %v4121_v47 = vpack.c.bf16 %v3980_v42, %v3978_v41  ;;  %5755 = vmatpush1.bf16.msra.mxu0 %v9091_v37 }
 0x4de   :  { %v3723_v48 = vadd.f32 %v3722_v46, %v10660_v58  ;;  %v3724_v49 = vpop.f32.mrb[41].mxu0  ;;  %v9096_v46 = vld [vmem:[%s12867_s1 + $0x5e4] ss:$8 sps:$4 sm:$0xff]  }
 0x4df   :  { %v3725_v50 = vadd.f32 %v3724_v49, %v10666_v61  ;;  %v3726_v51 = vpop.f32.mrb[42].mxu0  ;;  %4481 = vmatprep.mubr.bf16.mxu1 %v4121_v47  ;;  %4900 = vmatprep.subr.bf16.mxu1 %v9096_v46 }
 0x4e0   :  { %v3727_v52 = vadd.f32 %v3726_v51, %v10660_v58  ;;  %v3728_v53 = vpop.f32.mrb[43].mxu0  ;;  %4482 = vmatmul.mubr.bf16.gmra.mrb[36].mxu1 %v4120_v43  ;;  %v3981_v55 = vmax.f32 %v3723_v48, 0.0 }
 0x4e1   :  { %v3729_v54 = vadd.f32 %v3728_v53, %v10666_v61  ;;  %v3982_v57 = vmax.f32 %v3725_v50, 0.0  ;;  %4901 = vmatpush1.bf16.msra.mxu1 %v9094_v45 }
 0x4e2   :  { %v3983_v56 = vmax.f32 %v3727_v52, 0.0 }
 0x4e3   :  { %v3984_v59 = vmax.f32 %v3729_v54, 0.0 }
 0x4e4   :  { %v4122_v60 = vpack.c.bf16 %v3983_v56, %v3981_v55 }
 0x4e5   :  { %v3732_v62 = vpop.f32.mrb[44].mxu0  ;;  %v4123_v63 = vpack.c.bf16 %v3984_v59, %v3982_v57 }
 0x4e6   :  { %v3733_v0 = vadd.f32 %v3732_v62, %v10660_v58  ;;  %v3734_v1 = vpop.f32.mrb[45].mxu0 }
 0x4e7   :  { %v3735_v2 = vadd.f32 %v3734_v1, %v10666_v61  ;;  %v3736_v3 = vpop.f32.mrb[46].mxu0  ;;  %4491 = vmatprep.mubr.bf16.mxu1 %v4123_v63 }
 0x4e8   :  { %v3737_v4 = vadd.f32 %v3736_v3, %v10660_v58  ;;  %v3738_v5 = vpop.f32.mrb[47].mxu0  ;;  %4492 = vmatmul.mubr.bf16.gmra.mrb[40].mxu1 %v4122_v60  ;;  %v3985_v7 = vmax.f32 %v3733_v0, 0.0 }
 0x4e9   :  { %v3739_v6 = vadd.f32 %v3738_v5, %v10666_v61  ;;  %v3986_v15 = vmax.f32 %v3735_v2, 0.0 }
 0x4ea   :  { %v3987_v9 = vmax.f32 %v3737_v4, 0.0 }
 0x4eb   :  { %v3988_v10 = vmax.f32 %v3739_v6, 0.0 }
 0x4ec   :  { %v4124_v11 = vpack.c.bf16 %v3987_v9, %v3985_v7  ;;  %v9097_v7 = vld [vmem:[%s12867_s1 + $0x710] ss:$8 sps:$4 sm:$0xff]   ;;  %v9099_v9 = vld [vmem:[%s12867_s1 + $0x714] ss:$8 sps:$4 sm:$0xff]  }
 0x4ed   :  { %v3742_v13 = vpop.f32.mrb[48].mxu0  ;;  %v4125_v14 = vpack.c.bf16 %v3988_v10, %v3986_v15  ;;  %5756 = vmatprep.subr.bf16.mxu0 %v9099_v9 }
 0x4ee   :  { %v3743_v20 = vadd.f32 %v3742_v13, %v10660_v58  ;;  %v3744_v21 = vpop.f32.mrb[49].mxu0  ;;  %5757 = vmatpush1.bf16.msra.mxu0 %v9097_v7 }
 0x4ef   :  { %v3745_v25 = vadd.f32 %v3744_v21, %v10666_v61  ;;  %v3746_v26 = vpop.f32.mrb[50].mxu0  ;;  %4501 = vmatprep.mubr.bf16.mxu1 %v4125_v14  ;;  %v9100_v14 = vld [vmem:[%s12867_s1 + $0x5f0] ss:$8 sps:$4 sm:$0xff]  }
 0x4f0   :  { %v3747_v27 = vadd.f32 %v3746_v26, %v10660_v58  ;;  %v3748_v28 = vpop.f32.mrb[51].mxu0  ;;  %4502 = vmatmul.mubr.bf16.gmra.mrb[44].mxu1 %v4124_v11  ;;  %v3989_v19 = vmax.f32 %v3743_v20, 0.0  ;;  %v9102_v20 = vld [vmem:[%s12867_s1 + $0x5f4] ss:$8 sps:$4 sm:$0xff]  }
 0x4f1   :  { %v3749_v16 = vadd.f32 %v3748_v28, %v10666_v61  ;;  %v3990_v29 = vmax.f32 %v3745_v25, 0.0  ;;  %4902 = vmatprep.subr.bf16.mxu1 %v9102_v20 }
 0x4f2   :  { %v3991_v18 = vmax.f32 %v3747_v27, 0.0  ;;  %4903 = vmatpush1.bf16.msra.mxu1 %v9100_v14 }
 0x4f3   :  { %v3992_v30 = vmax.f32 %v3749_v16, 0.0 }
 0x4f4   :  { %v4126_v23 = vpack.c.bf16 %v3991_v18, %v3989_v19 }
 0x4f5   :  { %v3752_v22 = vpop.f32.mrb[52].mxu0  ;;  %v4127_v17 = vpack.c.bf16 %v3992_v30, %v3990_v29  ;;  %v9103_v29 = vld [vmem:[%s12867_s1 + $0x720] ss:$8 sps:$4 sm:$0xff]   ;;  %v9105_v30 = vld [vmem:[%s12867_s1 + $0x724] ss:$8 sps:$4 sm:$0xff]  }
 0x4f6   :  { %v3753_v31 = vadd.f32 %v3752_v22, %v10660_v58  ;;  %v3754_v32 = vpop.f32.mrb[53].mxu0  ;;  %5758 = vmatprep.subr.bf16.mxu0 %v9105_v30 }
 0x4f7   :  { %v3755_v33 = vadd.f32 %v3754_v32, %v10666_v61  ;;  %v3756_v34 = vpop.f32.mrb[54].mxu0  ;;  %4511 = vmatprep.mubr.bf16.mxu1 %v4127_v17  ;;  %5759 = vmatpush1.bf16.msra.mxu0 %v9103_v29  ;;  %v9111_v29 = vld [vmem:[%s12867_s1 + $0x744] ss:$8 sps:$4 sm:$0xff]  }
 0x4f8   :  { %v3757_v35 = vadd.f32 %v3756_v34, %v10660_v58  ;;  %v3758_v36 = vpop.f32.mrb[55].mxu0  ;;  %4512 = vmatmul.mubr.bf16.gmra.mrb[48].mxu1 %v4126_v23  ;;  %v3993_v40 = vmax.f32 %v3753_v31, 0.0 }
 0x4f9   :  { %v3759_v39 = vadd.f32 %v3758_v36, %v10666_v61  ;;  %v3994_v42 = vmax.f32 %v3755_v33, 0.0 }
 0x4fa   :  { %v3995_v41 = vmax.f32 %v3757_v35, 0.0 }
 0x4fb   :  { %v3996_v43 = vmax.f32 %v3759_v39, 0.0 }
 0x4fc   :  { %v4128_v44 = vpack.c.bf16 %v3995_v41, %v3993_v40 }
 0x4fd   :  { %v3762_v47 = vpop.f32.mrb[56].mxu0  ;;  %v4129_v48 = vpack.c.bf16 %v3996_v43, %v3994_v42 }
 0x4fe   :  { %v3763_v49 = vadd.f32 %v3762_v47, %v10660_v58  ;;  %v3764_v50 = vpop.f32.mrb[57].mxu0 }
 0x4ff   :  { %v3765_v51 = vadd.f32 %v3764_v50, %v10666_v61  ;;  %v3766_v52 = vpop.f32.mrb[58].mxu0  ;;  %4521 = vmatprep.mubr.bf16.mxu1 %v4129_v48 }
 0x500   :  { %v3767_v53 = vadd.f32 %v3766_v52, %v10660_v58  ;;  %v3768_v54 = vpop.f32.mrb[59].mxu0  ;;  %4522 = vmatmul.mubr.bf16.gmra.mrb[52].mxu1 %v4128_v44  ;;  %v3997_v56 = vmax.f32 %v3763_v49, 0.0 }
 0x501   :  { %v3769_v55 = vadd.f32 %v3768_v54, %v10666_v61  ;;  %v3998_v59 = vmax.f32 %v3765_v51, 0.0 }
 0x502   :  { %v3999_v57 = vmax.f32 %v3767_v53, 0.0 }
 0x503   :  { %v4000_v60 = vmax.f32 %v3769_v55, 0.0 }
 0x504   :  { %v4130_v62 = vpack.c.bf16 %v3999_v57, %v3997_v56  ;;  %v9106_v56 = vld [vmem:[%s12867_s1 + $0x730] ss:$8 sps:$4 sm:$0xff]   ;;  %v9108_v57 = vld [vmem:[%s12867_s1 + $0x734] ss:$8 sps:$4 sm:$0xff]  }
 0x505   :  { %v3772_v63 = vpop.f32.mrb[60].mxu0  ;;  %v4131_v0 = vpack.c.bf16 %v4000_v60, %v3998_v59  ;;  %5760 = vmatprep.subr.bf16.mxu0 %v9108_v57 }
 0x506   :  { %v3773_v1 = vadd.f32 %v3772_v63, %v10660_v58  ;;  %v3774_v2 = vpop.f32.mrb[61].mxu0  ;;  %5761 = vmatpush1.bf16.msra.mxu0 %v9106_v56  ;;  %v9114_v56 = vld [vmem:[%s12867_s1 + $0x754] ss:$8 sps:$4 sm:$0xff]  }
 0x507   :  { %v3775_v3 = vadd.f32 %v3774_v2, %v10666_v61  ;;  %v3776_v4 = vpop.f32.mrb[62].mxu0  ;;  %4531 = vmatprep.mubr.bf16.mxu1 %v4131_v0  ;;  %5762 = vmatprep.subr.bf16.mxu0 %v9111_v29 }
 0x508   :  { %v3777_v5 = vadd.f32 %v3776_v4, %v10660_v58  ;;  %v3778_v6 = vpop.f32.mrb[63].mxu0  ;;  %4532 = vmatmul.mubr.bf16.gmra.mrb[56].mxu1 %v4130_v62  ;;  %v4001_v10 = vmax.f32 %v3773_v1, 0.0 }
 0x509   :  { %v3779_v15 = vadd.f32 %v3778_v6, %v10666_v61  ;;  %v4002_v12 = vmax.f32 %v3775_v3, 0.0 }
 0x50a   :  { %v4003_v11 = vmax.f32 %v3777_v5, 0.0 }
 0x50b   :  { %v4004_v24 = vmax.f32 %v3779_v15, 0.0 }
 0x50c   :  { %v4132_v13 = vpack.c.bf16 %v4003_v11, %v4001_v10 }
 0x50d   :  { %v3782_v21 = vpop.f32.mrb[64].mxu0  ;;  %v4133_v25 = vpack.c.bf16 %v4004_v24, %v4002_v12 }
 0x50e   :  { %v3783_v26 = vadd.f32 %v3782_v21, %v10660_v58  ;;  %v3784_v27 = vpop.f32.mrb[65].mxu0 }
 0x50f   :  { %v3785_v28 = vadd.f32 %v3784_v27, %v10666_v61  ;;  %v3786_v16 = vpop.f32.mrb[66].mxu0  ;;  %4541 = vmatprep.mubr.bf16.mxu1 %v4133_v25 }
 0x510   :  { %v3787_v19 = vadd.f32 %v3786_v16, %v10660_v58  ;;  %v3788_v18 = vpop.f32.mrb[67].mxu0  ;;  %4542 = vmatmul.mubr.bf16.gmra.mrb[60].mxu1 %v4132_v13  ;;  %v4005_v22 = vmax.f32 %v3783_v26, 0.0 }
 0x511   :  { %v3789_v23 = vadd.f32 %v3788_v18, %v10666_v61  ;;  %v4006_v31 = vmax.f32 %v3785_v28, 0.0  ;;  %v9109_v18 = vld [vmem:[%s12867_s1 + $0x740] ss:$8 sps:$4 sm:$0xff]  }
 0x512   :  { %v4007_v17 = vmax.f32 %v3787_v19, 0.0  ;;  %5763 = vmatpush1.bf16.msra.mxu0 %v9109_v18  ;;  %v9117_v18 = vld [vmem:[%s12867_s1 + $0x764] ss:$8 sps:$4 sm:$0xff]  }
 0x513   :  { %v4008_v32 = vmax.f32 %v3789_v23, 0.0  ;;  %5764 = vmatprep.subr.bf16.mxu0 %v9114_v56 }
 0x514   :  { %v4134_v33 = vpack.c.bf16 %v4007_v17, %v4005_v22 }
 0x515   :  { %v3792_v34 = vpop.f32.mrb[68].mxu0  ;;  %v4135_v35 = vpack.c.bf16 %v4008_v32, %v4006_v31 }
 0x516   :  { %v3793_v36 = vadd.f32 %v3792_v34, %v10660_v58  ;;  %v3794_v37 = vpop.f32.mrb[69].mxu0 }
 0x517   :  { %v3795_v38 = vadd.f32 %v3794_v37, %v10666_v61  ;;  %v3796_v39 = vpop.f32.mrb[70].mxu0  ;;  %4551 = vmatprep.mubr.bf16.mxu1 %v4135_v35 }
 0x518   :  { %v3797_v40 = vadd.f32 %v3796_v39, %v10660_v58  ;;  %v3798_v41 = vpop.f32.mrb[71].mxu0  ;;  %4552 = vmatmul.mubr.bf16.gmra.mrb[64].mxu1 %v4134_v33  ;;  %v4009_v43 = vmax.f32 %v3793_v36, 0.0 }
 0x519   :  { %v3799_v42 = vadd.f32 %v3798_v41, %v10666_v61  ;;  %v4010_v45 = vmax.f32 %v3795_v38, 0.0 }
 0x51a   :  { %v4011_v44 = vmax.f32 %v3797_v40, 0.0 }
 0x51b   :  { %v4012_v46 = vmax.f32 %v3799_v42, 0.0 }
 0x51c   :  { %v4136_v47 = vpack.c.bf16 %v4011_v44, %v4009_v43 }
 0x51d   :  { %v3802_v48 = vpop.f32.mrb[72].mxu0  ;;  %v4137_v49 = vpack.c.bf16 %v4012_v46, %v4010_v45 }
 0x51e   :  { %v3803_v50 = vadd.f32 %v3802_v48, %v10660_v58  ;;  %v3804_v51 = vpop.f32.mrb[73].mxu0 }
 0x51f   :  { %v3805_v52 = vadd.f32 %v3804_v51, %v10666_v61  ;;  %v3806_v53 = vpop.f32.mrb[74].mxu0  ;;  %4561 = vmatprep.mubr.bf16.mxu1 %v4137_v49 }
 0x520   :  { %v3807_v54 = vadd.f32 %v3806_v53, %v10660_v58  ;;  %v3808_v55 = vpop.f32.mrb[75].mxu0  ;;  %4562 = vmatmul.mubr.bf16.gmra.mrb[68].mxu1 %v4136_v47  ;;  %v4013_v60 = vmax.f32 %v3803_v50, 0.0 }
 0x521   :  { %v3809_v59 = vadd.f32 %v3808_v55, %v10666_v61  ;;  %v4014_v63 = vmax.f32 %v3805_v52, 0.0  ;;  %v9112_v55 = vld [vmem:[%s12867_s1 + $0x750] ss:$8 sps:$4 sm:$0xff]  }
 0x522   :  { %v4015_v62 = vmax.f32 %v3807_v54, 0.0  ;;  %5765 = vmatpush1.bf16.msra.mxu0 %v9112_v55  ;;  %v9120_v55 = vld [vmem:[%s12867_s1 + $0x774] ss:$8 sps:$4 sm:$0xff]  }
 0x523   :  { %v4016_v0 = vmax.f32 %v3809_v59, 0.0  ;;  %5766 = vmatprep.subr.bf16.mxu0 %v9117_v18 }
 0x524   :  { %v4138_v1 = vpack.c.bf16 %v4015_v62, %v4013_v60 }
 0x525   :  { %v3812_v2 = vpop.f32.mrb[76].mxu0  ;;  %v4139_v3 = vpack.c.bf16 %v4016_v0, %v4014_v63 }
 0x526   :  { %v3813_v4 = vadd.f32 %v3812_v2, %v10660_v58  ;;  %v3814_v5 = vpop.f32.mrb[77].mxu0 }
 0x527   :  { %v3815_v6 = vadd.f32 %v3814_v5, %v10666_v61  ;;  %v3816_v7 = vpop.f32.mrb[78].mxu0  ;;  %4571 = vmatprep.mubr.bf16.mxu1 %v4139_v3 }
 0x528   :  { %v3817_v9 = vadd.f32 %v3816_v7, %v10660_v58  ;;  %v3818_v15 = vpop.f32.mrb[79].mxu0  ;;  %4572 = vmatmul.mubr.bf16.gmra.mrb[72].mxu1 %v4138_v1  ;;  %v4017_v11 = vmax.f32 %v3813_v4, 0.0 }
 0x529   :  { %v3819_v10 = vadd.f32 %v3818_v15, %v10666_v61  ;;  %v4018_v24 = vmax.f32 %v3815_v6, 0.0 }
 0x52a   :  { %v4019_v12 = vmax.f32 %v3817_v9, 0.0 }
 0x52b   :  { %v4020_v13 = vmax.f32 %v3819_v10, 0.0 }
 0x52c   :  { %v4140_v14 = vpack.c.bf16 %v4019_v12, %v4017_v11 }
 0x52d   :  { %v3822_v20 = vpop.f32.mrb[80].mxu0  ;;  %v4141_v21 = vpack.c.bf16 %v4020_v13, %v4018_v24 }
 0x52e   :  { %v3823_v25 = vadd.f32 %v3822_v20, %v10660_v58  ;;  %v3824_v26 = vpop.f32.mrb[81].mxu0 }
 0x52f   :  { %v3825_v27 = vadd.f32 %v3824_v26, %v10666_v61  ;;  %v3826_v28 = vpop.f32.mrb[82].mxu0  ;;  %4581 = vmatprep.mubr.bf16.mxu1 %v4141_v21 }
 0x530   :  { %v3827_v16 = vadd.f32 %v3826_v28, %v10660_v58  ;;  %v3828_v19 = vpop.f32.mrb[83].mxu0  ;;  %4582 = vmatmul.mubr.bf16.gmra.mrb[76].mxu1 %v4140_v14  ;;  %v4021_v23 = vmax.f32 %v3823_v25, 0.0 }
 0x531   :  { %v3829_v30 = vadd.f32 %v3828_v19, %v10666_v61  ;;  %v4022_v17 = vmax.f32 %v3825_v27, 0.0  ;;  %v9115_v19 = vld [vmem:[%s12867_s1 + $0x760] ss:$8 sps:$4 sm:$0xff]  }
 0x532   :  { %v4023_v22 = vmax.f32 %v3827_v16, 0.0  ;;  %5767 = vmatpush1.bf16.msra.mxu0 %v9115_v19  ;;  %v9123_v19 = vld [vmem:[%s12867_s1 + $0x784] ss:$8 sps:$4 sm:$0xff]  }
 0x533   :  { %v4024_v31 = vmax.f32 %v3829_v30, 0.0  ;;  %5768 = vmatprep.subr.bf16.mxu0 %v9120_v55 }
 0x534   :  { %v4142_v32 = vpack.c.bf16 %v4023_v22, %v4021_v23 }
 0x535   :  { %v3832_v33 = vpop.f32.mrb[84].mxu0  ;;  %v4143_v34 = vpack.c.bf16 %v4024_v31, %v4022_v17 }
 0x536   :  { %v3833_v35 = vadd.f32 %v3832_v33, %v10660_v58  ;;  %v3834_v36 = vpop.f32.mrb[85].mxu0 }
 0x537   :  { %v3835_v37 = vadd.f32 %v3834_v36, %v10666_v61  ;;  %v3836_v38 = vpop.f32.mrb[86].mxu0  ;;  %4591 = vmatprep.mubr.bf16.mxu1 %v4143_v34 }
 0x538   :  { %v3837_v39 = vadd.f32 %v3836_v38, %v10660_v58  ;;  %v3838_v40 = vpop.f32.mrb[87].mxu0  ;;  %4592 = vmatmul.mubr.bf16.gmra.mrb[80].mxu1 %v4142_v32  ;;  %v4025_v42 = vmax.f32 %v3833_v35, 0.0 }
 0x539   :  { %v3839_v41 = vadd.f32 %v3838_v40, %v10666_v61  ;;  %v4026_v44 = vmax.f32 %v3835_v37, 0.0 }
 0x53a   :  { %v4027_v43 = vmax.f32 %v3837_v39, 0.0 }
 0x53b   :  { %v4028_v45 = vmax.f32 %v3839_v41, 0.0 }
 0x53c   :  { %v4144_v46 = vpack.c.bf16 %v4027_v43, %v4025_v42 }
 0x53d   :  { %v3842_v47 = vpop.f32.mrb[88].mxu0  ;;  %v4145_v48 = vpack.c.bf16 %v4028_v45, %v4026_v44 }
 0x53e   :  { %v3843_v49 = vadd.f32 %v3842_v47, %v10660_v58  ;;  %v3844_v50 = vpop.f32.mrb[89].mxu0 }
 0x53f   :  { %v3845_v51 = vadd.f32 %v3844_v50, %v10666_v61  ;;  %v3846_v52 = vpop.f32.mrb[90].mxu0  ;;  %4601 = vmatprep.mubr.bf16.mxu1 %v4145_v48 }
 0x540   :  { %v3847_v53 = vadd.f32 %v3846_v52, %v10660_v58  ;;  %v3848_v54 = vpop.f32.mrb[91].mxu0  ;;  %4602 = vmatmul.mubr.bf16.gmra.mrb[84].mxu1 %v4144_v46  ;;  %v4029_v59 = vmax.f32 %v3843_v49, 0.0 }
 0x541   :  { %v3849_v57 = vadd.f32 %v3848_v54, %v10666_v61  ;;  %v4030_v62 = vmax.f32 %v3845_v51, 0.0  ;;  %v9118_v54 = vld [vmem:[%s12867_s1 + $0x770] ss:$8 sps:$4 sm:$0xff]  }
 0x542   :  { %v4031_v60 = vmax.f32 %v3847_v53, 0.0  ;;  %5769 = vmatpush1.bf16.msra.mxu0 %v9118_v54  ;;  %v9126_v54 = vld [vmem:[%s12867_s1 + $0x794] ss:$8 sps:$4 sm:$0xff]  }
 0x543   :  { %v4032_v63 = vmax.f32 %v3849_v57, 0.0  ;;  %5770 = vmatprep.subr.bf16.mxu0 %v9123_v19  ;;  %v9256_v19 = vld [vmem:[%s12868_s0 + $0x30] ss:$8 sps:$4 sm:$0xff]  }
 0x544   :  { %v4146_v0 = vpack.c.bf16 %v4031_v60, %v4029_v59 }
 0x545   :  { %v3852_v1 = vpop.f32.mrb[92].mxu0  ;;  %v4147_v2 = vpack.c.bf16 %v4032_v63, %v4030_v62 }
 0x546   :  { %v3853_v3 = vadd.f32 %v3852_v1, %v10660_v58  ;;  %v3854_v4 = vpop.f32.mrb[93].mxu0 }
 0x547   :  { %v3855_v5 = vadd.f32 %v3854_v4, %v10666_v61  ;;  %v3856_v6 = vpop.f32.mrb[94].mxu0  ;;  %4611 = vmatprep.mubr.bf16.mxu1 %v4147_v2 }
 0x548   :  { %v3857_v7 = vadd.f32 %v3856_v6, %v10660_v58  ;;  %v3858_v9 = vpop.f32.mrb[95].mxu0  ;;  %4612 = vmatmul.mubr.bf16.gmra.mrb[88].mxu1 %v4146_v0  ;;  %v4033_v10 = vmax.f32 %v3853_v3, 0.0 }
 0x549   :  { %v3859_v15 = vadd.f32 %v3858_v9, %v10666_v61  ;;  %v4034_v12 = vmax.f32 %v3855_v5, 0.0 }
 0x54a   :  { %v4035_v11 = vmax.f32 %v3857_v7, 0.0 }
 0x54b   :  { %v4036_v24 = vmax.f32 %v3859_v15, 0.0 }
 0x54c   :  { %v4148_v13 = vpack.c.bf16 %v4035_v11, %v4033_v10 }
 0x54d   :  { %v3862_v14 = vpop.f32.mrb[96].mxu0  ;;  %v4149_v20 = vpack.c.bf16 %v4036_v24, %v4034_v12 }
 0x54e   :  { %v3863_v21 = vadd.f32 %v3862_v14, %v10660_v58  ;;  %v3864_v25 = vpop.f32.mrb[97].mxu0 }
 0x54f   :  { %v3865_v26 = vadd.f32 %v3864_v25, %v10666_v61  ;;  %v3866_v27 = vpop.f32.mrb[98].mxu0  ;;  %4621 = vmatprep.mubr.bf16.mxu1 %v4149_v20 }
 0x550   :  { %v3867_v28 = vadd.f32 %v3866_v27, %v10660_v58  ;;  %v3868_v16 = vpop.f32.mrb[99].mxu0  ;;  %4622 = vmatmul.mubr.bf16.gmra.mrb[92].mxu1 %v4148_v13  ;;  %v4037_v30 = vmax.f32 %v3863_v21, 0.0 }
 0x551   :  { %v3869_v29 = vadd.f32 %v3868_v16, %v10666_v61  ;;  %v4038_v22 = vmax.f32 %v3865_v26, 0.0  ;;  %v9121_v16 = vld [vmem:[%s12867_s1 + $0x780] ss:$8 sps:$4 sm:$0xff]  }
 0x552   :  { %v4039_v23 = vmax.f32 %v3867_v28, 0.0  ;;  %5771 = vmatpush1.bf16.msra.mxu0 %v9121_v16  ;;  %v9255_v16 = vld [vmem:[%s12868_s0 + $0x34] ss:$8 sps:$4 sm:$0xff]  }
 0x553   :  { %v4040_v17 = vmax.f32 %v3869_v29, 0.0  ;;  %5772 = vmatprep.subr.bf16.mxu0 %v9126_v54  ;;  %v9277_v54 = vld [vmem:[%s12868_s0 + $0xe4] ss:$8 sps:$4 sm:$0xff]  }
 0x554   :  { %v4150_v31 = vpack.c.bf16 %v4039_v23, %v4037_v30 }
 0x555   :  { %v3872_v32 = vpop.f32.mrb[100].mxu0  ;;  %v4151_v33 = vpack.c.bf16 %v4040_v17, %v4038_v22 }
 0x556   :  { %v3873_v34 = vadd.f32 %v3872_v32, %v10660_v58  ;;  %v3874_v35 = vpop.f32.mrb[101].mxu0 }
 0x557   :  { %v3875_v36 = vadd.f32 %v3874_v35, %v10666_v61  ;;  %v3876_v37 = vpop.f32.mrb[102].mxu0  ;;  %4631 = vmatprep.mubr.bf16.mxu1 %v4151_v33 }
 0x558   :  { %v3877_v38 = vadd.f32 %v3876_v37, %v10660_v58  ;;  %v3878_v39 = vpop.f32.mrb[103].mxu0  ;;  %4632 = vmatmul.mubr.bf16.gmra.mrb[96].mxu1 %v4150_v31  ;;  %v4041_v41 = vmax.f32 %v3873_v34, 0.0 }
 0x559   :  { %v3879_v40 = vadd.f32 %v3878_v39, %v10666_v61  ;;  %v4042_v43 = vmax.f32 %v3875_v36, 0.0 }
 0x55a   :  { %v4043_v42 = vmax.f32 %v3877_v38, 0.0 }
 0x55b   :  { %v4044_v44 = vmax.f32 %v3879_v40, 0.0 }
 0x55c   :  { %v4152_v45 = vpack.c.bf16 %v4043_v42, %v4041_v41 }
 0x55d   :  { %v3882_v46 = vpop.f32.mrb[104].mxu0  ;;  %v4153_v47 = vpack.c.bf16 %v4044_v44, %v4042_v43 }
 0x55e   :  { %v3883_v48 = vadd.f32 %v3882_v46, %v10660_v58  ;;  %v3884_v49 = vpop.f32.mrb[105].mxu0 }
 0x55f   :  { %v3885_v50 = vadd.f32 %v3884_v49, %v10666_v61  ;;  %v3886_v51 = vpop.f32.mrb[106].mxu0  ;;  %4641 = vmatprep.mubr.bf16.mxu1 %v4153_v47 }
 0x560   :  { %v3887_v52 = vadd.f32 %v3886_v51, %v10660_v58  ;;  %v3888_v53 = vpop.f32.mrb[107].mxu0  ;;  %4642 = vmatmul.mubr.bf16.gmra.mrb[100].mxu1 %v4152_v45  ;;  %v4045_v57 = vmax.f32 %v3883_v48, 0.0 }
 0x561   :  { %v3889_v56 = vadd.f32 %v3888_v53, %v10666_v61  ;;  %v4046_v60 = vmax.f32 %v3885_v50, 0.0  ;;  %v9124_v53 = vld [vmem:[%s12867_s1 + $0x790] ss:$8 sps:$4 sm:$0xff]  }
 0x562   :  { %v4047_v59 = vmax.f32 %v3887_v52, 0.0  ;;  %5773 = vmatpush1.bf16.msra.mxu0 %v9124_v53  ;;  %v9276_v53 = vld [vmem:[%s12868_s0 + $0xd0] ss:$8 sps:$4 sm:$0xff]  }
 0x563   :  { %v4048_v62 = vmax.f32 %v3889_v56, 0.0 }
 0x564   :  { %v4154_v63 = vpack.c.bf16 %v4047_v59, %v4045_v57 }
 0x565   :  { %v3892_v0 = vpop.f32.mrb[108].mxu0  ;;  %v4155_v1 = vpack.c.bf16 %v4048_v62, %v4046_v60 }
 0x566   :  { %v3893_v2 = vadd.f32 %v3892_v0, %v10660_v58  ;;  %v3894_v3 = vpop.f32.mrb[109].mxu0 }
 0x567   :  { %v3895_v4 = vadd.f32 %v3894_v3, %v10666_v61  ;;  %v3896_v5 = vpop.f32.mrb[110].mxu0  ;;  %4651 = vmatprep.mubr.bf16.mxu1 %v4155_v1 }
 0x568   :  { %v3897_v6 = vadd.f32 %v3896_v5, %v10660_v58  ;;  %v3898_v7 = vpop.f32.mrb[111].mxu0  ;;  %4652 = vmatmul.mubr.bf16.gmra.mrb[104].mxu1 %v4154_v63  ;;  %v4049_v15 = vmax.f32 %v3893_v2, 0.0 }
 0x569   :  { %v3899_v9 = vadd.f32 %v3898_v7, %v10666_v61  ;;  %v4050_v11 = vmax.f32 %v3895_v4, 0.0 }
 0x56a   :  { %v4051_v10 = vmax.f32 %v3897_v6, 0.0 }
 0x56b   :  { %v4052_v12 = vmax.f32 %v3899_v9, 0.0 }
 0x56c   :  { %v4156_v24 = vpack.c.bf16 %v4051_v10, %v4049_v15 }
 0x56d   :  { %v3902_v13 = vpop.f32.mrb[112].mxu0  ;;  %v4157_v14 = vpack.c.bf16 %v4052_v12, %v4050_v11 }
 0x56e   :  { %v3903_v20 = vadd.f32 %v3902_v13, %v10660_v58  ;;  %v3904_v21 = vpop.f32.mrb[113].mxu0  ;;  %v9127_v13 = vld [vmem:[%s12867_s1 + $0x7a0] ss:$8 sps:$4 sm:$0xff]  }
 0x56f   :  { %v3905_v25 = vadd.f32 %v3904_v21, %v10666_v61  ;;  %v3906_v26 = vpop.f32.mrb[114].mxu0  ;;  %4661 = vmatprep.mubr.bf16.mxu1 %v4157_v14  ;;  %v9250_v14 = vld [vmem:[%s12868_s0] ss:$8 sps:$4 sm:$0xff]   ;;  %v9252_v21 = vld [vmem:[%s12868_s0 + $0x10] ss:$8 sps:$4 sm:$0xff]  }
 0x570   :  { %v3907_v27 = vadd.f32 %v3906_v26, %v10660_v58  ;;  %v3908_v28 = vpop.f32.mrb[115].mxu0  ;;  %4662 = vmatmul.mubr.bf16.gmra.mrb[108].mxu1 %v4156_v24  ;;  %v4053_v29 = vmax.f32 %v3903_v20, 0.0  ;;  %v9251_v20 = vld [vmem:[%s12868_s0 + $0x14] ss:$8 sps:$4 sm:$0xff]  }
 0x571   :  { %v3909_v18 = vadd.f32 %v3908_v28, %v10666_v61  ;;  %v4054_v23 = vmax.f32 %v3905_v25, 0.0  ;;  %v9130_v25 = vld [vmem:[%s12867_s1 + $0x7b0] ss:$8 sps:$4 sm:$0xff]   ;;  %v9132_v26 = vld [vmem:[%s12867_s1 + $0x7b4] ss:$8 sps:$4 sm:$0xff]  }
 0x572   :  { %v4055_v30 = vmax.f32 %v3907_v27, 0.0  ;;  %v9253_v27 = vld [vmem:[%s12868_s0 + $0x24] ss:$8 sps:$4 sm:$0xff]   ;;  %v9254_v28 = vld [vmem:[%s12868_s0 + $0x20] ss:$8 sps:$4 sm:$0xff]  }
 0x573   :  { %v4056_v22 = vmax.f32 %v3909_v18, 0.0  ;;  %v9133_v18 = vld [vmem:[%s12867_s1 + $0x7c0] ss:$8 sps:$4 sm:$0xff]  }
 0x574   :  { %v4158_v17 = vpack.c.bf16 %v4055_v30, %v4053_v29  ;;  %v9135_v29 = vld [vmem:[%s12867_s1 + $0x7c4] ss:$8 sps:$4 sm:$0xff]  }
 0x575   :  { %v3912_v31 = vpop.f32.mrb[116].mxu0  ;;  %v4159_v32 = vpack.c.bf16 %v4056_v22, %v4054_v23  ;;  %v9257_v30 = vld [vmem:[%s12868_s0 + $0x44] ss:$8 sps:$4 sm:$0xff]   ;;  %v9258_v23 = vld [vmem:[%s12868_s0 + $0x40] ss:$8 sps:$4 sm:$0xff]  }
 0x576   :  { %v3913_v33 = vadd.f32 %v3912_v31, %v10660_v58  ;;  %v3914_v34 = vpop.f32.mrb[117].mxu0  ;;  %v9259_v22 = vld [vmem:[%s12868_s0 + $0x54] ss:$8 sps:$4 sm:$0xff]   ;;  %v9136_v31 = vld [vmem:[%s12867_s1 + $0x7d0] ss:$8 sps:$4 sm:$0xff]  }
 0x577   :  { %v3915_v35 = vadd.f32 %v3914_v34, %v10666_v61  ;;  %v3916_v36 = vpop.f32.mrb[118].mxu0  ;;  %4671 = vmatprep.mubr.bf16.mxu1 %v4159_v32  ;;  %v9138_v32 = vld [vmem:[%s12867_s1 + $0x7d4] ss:$8 sps:$4 sm:$0xff]   ;;  %v9262_v34 = vld [vmem:[%s12868_s0 + $0x60] ss:$8 sps:$4 sm:$0xff]  }
 0x578   :  { %v3917_v37 = vadd.f32 %v3916_v36, %v10660_v58  ;;  %v3918_v38 = vpop.f32.mrb[119].mxu0  ;;  %4672 = vmatmul.mubr.bf16.gmra.mrb[112].mxu1 %v4158_v17  ;;  %v4057_v40 = vmax.f32 %v3913_v33, 0.0  ;;  %v9260_v17 = vld [vmem:[%s12868_s0 + $0x50] ss:$8 sps:$4 sm:$0xff]   ;;  %v9261_v33 = vld [vmem:[%s12868_s0 + $0x64] ss:$8 sps:$4 sm:$0xff]  }
 0x579   :  { %v3919_v39 = vadd.f32 %v3918_v38, %v10666_v61  ;;  %v4058_v42 = vmax.f32 %v3915_v35, 0.0  ;;  %v9263_v35 = vld [vmem:[%s12868_s0 + $0x74] ss:$8 sps:$4 sm:$0xff]   ;;  %v9264_v36 = vld [vmem:[%s12868_s0 + $0x70] ss:$8 sps:$4 sm:$0xff]  }
 0x57a   :  { %v4059_v41 = vmax.f32 %v3917_v37, 0.0  ;;  %v9139_v37 = vld [vmem:[%s12867_s1 + $0x7e0] ss:$8 sps:$4 sm:$0xff]   ;;  %v9141_v38 = vld [vmem:[%s12867_s1 + $0x7e4] ss:$8 sps:$4 sm:$0xff]  }
 0x57b   :  { %v4060_v43 = vmax.f32 %v3919_v39, 0.0  ;;  %v9265_v39 = vld [vmem:[%s12868_s0 + $0x84] ss:$8 sps:$4 sm:$0xff]  }
 0x57c   :  { %v4160_v44 = vpack.c.bf16 %v4059_v41, %v4057_v40  ;;  %v9266_v40 = vld [vmem:[%s12868_s0 + $0x80] ss:$8 sps:$4 sm:$0xff]   ;;  %v9267_v41 = vld [vmem:[%s12868_s0 + $0x94] ss:$8 sps:$4 sm:$0xff]  }
 0x57d   :  { %v3922_v45 = vpop.f32.mrb[120].mxu0  ;;  %v4161_v46 = vpack.c.bf16 %v4060_v43, %v4058_v42  ;;  %v9268_v42 = vld [vmem:[%s12868_s0 + $0x90] ss:$8 sps:$4 sm:$0xff]  }
 0x57e   :  { %v3923_v47 = vadd.f32 %v3922_v45, %v10660_v58  ;;  %v3924_v48 = vpop.f32.mrb[121].mxu0  ;;  %v9142_v43 = vld [vmem:[%s12867_s1 + $0x7f0] ss:$8 sps:$4 sm:$0xff]   ;;  %v9269_v45 = vld [vmem:[%s12868_s0 + $0xa4] ss:$8 sps:$4 sm:$0xff]  }
 0x57f   :  { %v3925_v49 = vadd.f32 %v3924_v48, %v10666_v61  ;;  %v3926_v50 = vpop.f32.mrb[122].mxu0  ;;  %4681 = vmatprep.mubr.bf16.mxu1 %v4161_v46  ;;  %v9270_v46 = vld [vmem:[%s12868_s0 + $0xa0] ss:$8 sps:$4 sm:$0xff]   ;;  %v9272_v48 = vld [vmem:[%s12868_s0 + $0xb0] ss:$8 sps:$4 sm:$0xff]  }
 0x580   :  { %v3927_v51 = vadd.f32 %v3926_v50, %v10660_v58  ;;  %v3928_v52 = vpop.f32.mrb[123].mxu0  ;;  %4682 = vmatmul.mubr.bf16.gmra.mrb[116].mxu1 %v4160_v44  ;;  %v4061_v56 = vmax.f32 %v3923_v47, 0.0  ;;  %v9144_v44 = vld [vmem:[%s12867_s1 + $0x7f4] ss:$8 sps:$4 sm:$0xff]   ;;  %v9274_v50 = vld [vmem:[%s12868_s0 + $0xc0] ss:$8 sps:$4 sm:$0xff]  }
 0x581   :  { %v3929_v55 = vadd.f32 %v3928_v52, %v10666_v61  ;;  %v4062_v59 = vmax.f32 %v3925_v49, 0.0  ;;  %v9271_v47 = vld [vmem:[%s12868_s0 + $0xb4] ss:$8 sps:$4 sm:$0xff]   ;;  %v9273_v49 = vld [vmem:[%s12868_s0 + $0xc4] ss:$8 sps:$4 sm:$0xff]  }
 0x582   :  { %v4063_v57 = vmax.f32 %v3927_v51, 0.0  ;;  %v9275_v51 = vld [vmem:[%s12868_s0 + $0xd4] ss:$8 sps:$4 sm:$0xff]   ;;  %v9147_v52 = vld [vmem:[%s12867_s1 + $0x804] ss:$8 sps:$4 sm:$0xff]  }
 0x583   :  { %v4064_v60 = vmax.f32 %v3929_v55, 0.0  ;;  %v9278_v55 = vld [vmem:[%s12868_s0 + $0xe0] ss:$8 sps:$4 sm:$0xff]  }
 0x584   :  { %v4162_v62 = vpack.c.bf16 %v4063_v57, %v4061_v56  ;;  %v9279_v56 = vld [vmem:[%s12868_s0 + $0xf4] ss:$8 sps:$4 sm:$0xff]   ;;  %v9280_v57 = vld [vmem:[%s12868_s0 + $0xf0] ss:$8 sps:$4 sm:$0xff]  }
 0x585   :  { %v3932_v63 = vpop.f32.mrb[124].mxu0  ;;  %v4163_v0 = vpack.c.bf16 %v4064_v60, %v4062_v59  ;;  %v9281_v59 = vld [vmem:[%s12868_s0 + $0x104] ss:$8 sps:$4 sm:$0xff]   ;;  %v9282_v60 = vld [vmem:[%s12868_s0 + $0x100] ss:$8 sps:$4 sm:$0xff]  }
 0x586   :  { %v3933_v1 = vadd.f32 %v3932_v63, %v10660_v58  ;;  %v3934_v2 = vpop.f32.mrb[125].mxu0  ;;  %v9284_v63 = vld [vmem:[%s12868_s0 + $0x110] ss:$8 sps:$4 sm:$0xff]  }
 0x587   :  { %v3935_v3 = vadd.f32 %v3934_v2, %v10666_v61  ;;  %v3936_v4 = vpop.f32.mrb[126].mxu0  ;;  %4691 = vmatprep.mubr.bf16.mxu1 %v4163_v0  ;;  %v9285_v0 = vld [vmem:[%s12868_s0 + $0x124] ss:$8 sps:$4 sm:$0xff]   ;;  %v9287_v2 = vld [vmem:[%s12868_s0 + $0x134] ss:$8 sps:$4 sm:$0xff]  }
 0x588   :  { %v3937_v5 = vadd.f32 %v3936_v4, %v10660_v58  ;;  %v3938_v6 = vpop.f32.mrb[127].mxu0  ;;  %4692 = vmatmul.mubr.bf16.gmra.mrb[120].mxu1 %v4162_v62  ;;  %v4065_v9 = vmax.f32 %v3933_v1, 0.0  ;;  %v9129_v58 = vld [vmem:[%s12867_s1 + $0x7a4] ss:$8 sps:$4 sm:$0xff]   ;;  %v9283_v62 = vld [vmem:[%s12868_s0 + $0x114] ss:$8 sps:$4 sm:$0xff]  }
 0x589   :  { %v3939_v7 = vadd.f32 %v3938_v6, %v10666_v61  ;;  %v4066_v10 = vmax.f32 %v3935_v3, 0.0  ;;  %v9249_v61 = vld [vmem:[%s12868_s0 + $0x4] ss:$8 sps:$4 sm:$0xff]   ;;  %5774 = vmatprep.subr.bf16.mxu0 %v9129_v58  ;;  %v9286_v1 = vld [vmem:[%s12868_s0 + $0x120] ss:$8 sps:$4 sm:$0xff]  }
 0x58a   :  { %v4067_v15 = vmax.f32 %v3937_v5, 0.0  ;;  %5775 = vmatpush1.bf16.msra.mxu0 %v9127_v13  ;;  %v9288_v3 = vld [vmem:[%s12868_s0 + $0x130] ss:$8 sps:$4 sm:$0xff]   ;;  %v9289_v4 = vld [vmem:[%s12868_s0 + $0x144] ss:$8 sps:$4 sm:$0xff]  }
 0x58b   :  { %v4068_v11 = vmax.f32 %v3939_v7, 0.0  ;;  %5776 = vmatprep.subr.bf16.mxu0 %v9132_v26  ;;  %v9290_v5 = vld [vmem:[%s12868_s0 + $0x140] ss:$8 sps:$4 sm:$0xff]   ;;  %v9291_v6 = vld [vmem:[%s12868_s0 + $0x154] ss:$8 sps:$4 sm:$0xff]  }
 0x58c   :  { %v4164_v12 = vpack.c.bf16 %v4067_v15, %v4065_v9  ;;  %v9292_v7 = vld [vmem:[%s12868_s0 + $0x150] ss:$8 sps:$4 sm:$0xff]   ;;  %v9293_v9 = vld [vmem:[%s12868_s0 + $0x164] ss:$8 sps:$4 sm:$0xff]   ;;  %v9294_v15 = vld [vmem:[%s12868_s0 + $0x160] ss:$8 sps:$4 sm:$0xff]  }
 0x58d   :  { %v4165_v24 = vpack.c.bf16 %v4068_v11, %v4066_v10  ;;  %v9295_v10 = vld [vmem:[%s12868_s0 + $0x174] ss:$8 sps:$4 sm:$0xff]   ;;  %v9296_v11 = vld [vmem:[%s12868_s0 + $0x170] ss:$8 sps:$4 sm:$0xff]   ;;  %v9304_v26 = vld [vmem:[%s12869_s2 + $0x8] sm:$0xff] }
 0x58e   :  { %5777 = vmatpush1.bf16.msra.mxu0 %v9130_v25  ;;  %v9299_v13 = vld [vmem:[%s12868_s0 + $0x194] ss:$8 sps:$4 sm:$0xff]   ;;  %v9300_v58 = vld [vmem:[%s12868_s0 + $0x190] ss:$8 sps:$4 sm:$0xff]  }
 0x58f   :  { %4701 = vmatprep.mubr.bf16.mxu1 %v4165_v24  ;;  %5778 = vmatprep.subr.bf16.mxu0 %v9135_v29  ;;  %v9298_v24 = vld [vmem:[%s12868_s0 + $0x180] ss:$8 sps:$4 sm:$0xff]  }
 0x590   :  { %4702 = vmatmul.mubr.bf16.gmra.mrb[124].mxu1 %v4164_v12  ;;  %v9297_v12 = vld [vmem:[%s12868_s0 + $0x184] ss:$8 sps:$4 sm:$0xff]  }
 0x591   :  { %4904 = vmatprep.mubr.bf16.mxu1 %v9249_v61  ;;  %v9301_v61 = vld [vmem:[%s12868_s0 + $0x1a4] ss:$8 sps:$4 sm:$0xff]  }
 0x592   :  { %5779 = vmatpush1.bf16.msra.mxu0 %v9133_v18 }
 0x593   :  { %5780 = vmatprep.subr.bf16.mxu0 %v9138_v32 }
 0x596   :  { %5781 = vmatpush1.bf16.msra.mxu0 %v9136_v31 }
 0x597   :  { %5782 = vmatprep.subr.bf16.mxu0 %v9141_v38 }
 0x598   :  { %4905 = vmatmul.mubr.bf16.vlgmr.msra.gmra.mrb[0].mxu1 %v9250_v14  ;;  %v5227_v14 = vsub.s32 5, %v9749_v8 }
 0x599   :  { %4914 = vmatprep.mubr.bf16.mxu1 %v9251_v20  ;;  %v9302_v20 = vld [vmem:[%s12868_s0 + $0x1a0] ss:$8 sps:$4 sm:$0xff]  }
 0x59a   :  { %5783 = vmatpush1.bf16.msra.mxu0 %v9139_v37 }
 0x59b   :  { %5784 = vmatprep.subr.bf16.mxu0 %v9144_v44 }
 0x59e   :  { %5785 = vmatpush1.bf16.msra.mxu0 %v9142_v43  ;;  %v9150_v43 = vld [vmem:[%s12867_s1 + $0x814] ss:$8 sps:$4 sm:$0xff]  }
 0x59f   :  { %6500 = vmatprep.subr.bf16.mxu0 %v9147_v52  ;;  %v9308_v52 = vld [vmem:[%s12868_s0 + $0x1c0] ss:$8 sps:$4 sm:$0xff]  }
 0x5a0   :  { %4915 = vmatmul.mubr.bf16.gmra.mrb[4].mxu1 %v9252_v21  ;;  %v9303_v21 = vld [vmem:[%s12869_s2] sm:$0xff] }
 0x5a1   :  { %4924 = vmatprep.mubr.bf16.mxu1 %v9253_v27  ;;  %v11170_v25 = vrot.slane %v9303_v21, %v5227_v14  ;;  %v11175_v27 = vrot.slane %v9304_v26, %v5227_v14 }
 0x5a8   :  { %4925 = vmatmul.mubr.bf16.gmra.mrb[8].mxu1 %v9254_v28  ;;  %v9305_v28 = vld [vmem:[%s12868_s0 + $0x1b4] ss:$8 sps:$4 sm:$0xff]  }
 0x5a9   :  { %4934 = vmatprep.mubr.bf16.mxu1 %v9255_v16 }
 0x5b0   :  { %4935 = vmatmul.mubr.bf16.gmra.mrb[12].mxu1 %v9256_v19 }
 0x5b1   :  { %4944 = vmatprep.mubr.bf16.mxu1 %v9257_v30 }
 0x5b8   :  { %4945 = vmatmul.mubr.bf16.gmra.mrb[16].mxu1 %v9258_v23 }
 0x5b9   :  { %4954 = vmatprep.mubr.bf16.mxu1 %v9259_v22 }
 0x5c0   :  { %4955 = vmatmul.mubr.bf16.gmra.mrb[20].mxu1 %v9260_v17 }
 0x5c1   :  { %4964 = vmatprep.mubr.bf16.mxu1 %v9261_v33  ;;  %v9306_v33 = vld [vmem:[%s12868_s0 + $0x1b0] ss:$8 sps:$4 sm:$0xff]  }
 0x5c8   :  { %4965 = vmatmul.mubr.bf16.gmra.mrb[24].mxu1 %v9262_v34 }
 0x5c9   :  { %4974 = vmatprep.mubr.bf16.mxu1 %v9263_v35 }
 0x5d0   :  { %4975 = vmatmul.mubr.bf16.gmra.mrb[28].mxu1 %v9264_v36  ;;  %v9307_v36 = vld [vmem:[%s12868_s0 + $0x1c4] ss:$8 sps:$4 sm:$0xff]  }
 0x5d1   :  { %4984 = vmatprep.mubr.bf16.mxu1 %v9265_v39 }
 0x5d8   :  { %4985 = vmatmul.mubr.bf16.gmra.mrb[32].mxu1 %v9266_v40  ;;  %v9145_v40 = vld [vmem:[%s12867_s1 + $0x800] ss:$8 sps:$4 sm:$0xff]  }
 0x5d9   :  { %4994 = vmatprep.mubr.bf16.mxu1 %v9267_v41 }
 0x5e0   :  { %4995 = vmatmul.mubr.bf16.gmra.mrb[36].mxu1 %v9268_v42 }
 0x5e1   :  { %5004 = vmatprep.mubr.bf16.mxu1 %v9269_v45 }
 0x5e8   :  { %5005 = vmatmul.mubr.bf16.gmra.mrb[40].mxu1 %v9270_v46 }
 0x5e9   :  { %5014 = vmatprep.mubr.bf16.mxu1 %v9271_v47 }
 0x5f0   :  { %5015 = vmatmul.mubr.bf16.gmra.mrb[44].mxu1 %v9272_v48 }
 0x5f1   :  { %5024 = vmatprep.mubr.bf16.mxu1 %v9273_v49  ;;  %v9148_v49 = vld [vmem:[%s12867_s1 + $0x810] ss:$8 sps:$4 sm:$0xff]  }
 0x5f8   :  { %5025 = vmatmul.mubr.bf16.gmra.mrb[48].mxu1 %v9274_v50 }
 0x5f9   :  { %5034 = vmatprep.mubr.bf16.mxu1 %v9275_v51 }
 0x600   :  { %5035 = vmatmul.mubr.bf16.gmra.mrb[52].mxu1 %v9276_v53  ;;  %v9153_v53 = vld [vmem:[%s12867_s1 + $0x824] ss:$8 sps:$4 sm:$0xff]  }
 0x601   :  { %5044 = vmatprep.mubr.bf16.mxu1 %v9277_v54 }
 0x608   :  { %5045 = vmatmul.mubr.bf16.gmra.mrb[56].mxu1 %v9278_v55 }
 0x609   :  { %5054 = vmatprep.mubr.bf16.mxu1 %v9279_v56  ;;  %v9309_v56 = vld [vmem:[%s12868_s0 + $0x1d4] ss:$8 sps:$4 sm:$0xff]  }
 0x610   :  { %5055 = vmatmul.mubr.bf16.gmra.mrb[60].mxu1 %v9280_v57 }
 0x611   :  { %5064 = vmatprep.mubr.bf16.mxu1 %v9281_v59 }
 0x618   :  { %5065 = vmatmul.mubr.bf16.gmra.mrb[64].mxu1 %v9282_v60 }
 0x619   :  { %5074 = vmatprep.mubr.bf16.mxu1 %v9283_v62  ;;  %v9151_v62 = vld [vmem:[%s12867_s1 + $0x820] ss:$8 sps:$4 sm:$0xff]  }
 0x620   :  { %5075 = vmatmul.mubr.bf16.gmra.mrb[68].mxu1 %v9284_v63 }
 0x621   :  { %5084 = vmatprep.mubr.bf16.mxu1 %v9285_v0 }
 0x628   :  { %5085 = vmatmul.mubr.bf16.gmra.mrb[72].mxu1 %v9286_v1  ;;  %v9156_v1 = vld [vmem:[%s12867_s1 + $0x834] ss:$8 sps:$4 sm:$0xff]  }
 0x629   :  { %5094 = vmatprep.mubr.bf16.mxu1 %v9287_v2 }
 0x630   :  { %5095 = vmatmul.mubr.bf16.gmra.mrb[76].mxu1 %v9288_v3 }
 0x631   :  { %5104 = vmatprep.mubr.bf16.mxu1 %v9289_v4 }
 0x638   :  { %5105 = vmatmul.mubr.bf16.gmra.mrb[80].mxu1 %v9290_v5 }
 0x639   :  { %5114 = vmatprep.mubr.bf16.mxu1 %v9291_v6 }
 0x640   :  { %5115 = vmatmul.mubr.bf16.gmra.mrb[84].mxu1 %v9292_v7  ;;  %v9154_v7 = vld [vmem:[%s12867_s1 + $0x830] ss:$8 sps:$4 sm:$0xff]  }
 0x641   :  { %5124 = vmatprep.mubr.bf16.mxu1 %v9293_v9 }
 0x648   :  { %5125 = vmatmul.mubr.bf16.gmra.mrb[88].mxu1 %v9294_v15 }
 0x649   :  { %5134 = vmatprep.mubr.bf16.mxu1 %v9295_v10  ;;  %v9310_v10 = vld [vmem:[%s12868_s0 + $0x1d0] ss:$8 sps:$4 sm:$0xff]  }
 0x650   :  { %5135 = vmatmul.mubr.bf16.gmra.mrb[92].mxu1 %v9296_v11  ;;  %v9159_v11 = vld [vmem:[%s12867_s1 + $0x844] ss:$8 sps:$4 sm:$0xff]  }
 0x651   :  { %5144 = vmatprep.mubr.bf16.mxu1 %v9297_v12 }
 0x658   :  { %5145 = vmatmul.mubr.bf16.gmra.mrb[96].mxu1 %v9298_v24 }
 0x659   :  { %5154 = vmatprep.mubr.bf16.mxu1 %v9299_v13  ;;  %v9311_v13 = vld [vmem:[%s12868_s0 + $0x1e4] ss:$8 sps:$4 sm:$0xff]  }
 0x660   :  { %5155 = vmatmul.mubr.bf16.gmra.mrb[100].mxu1 %v9300_v58 }
 0x661   :  { %5164 = vmatprep.mubr.bf16.mxu1 %v9301_v61 }
 0x668   :  { %5165 = vmatmul.mubr.bf16.gmra.mrb[104].mxu1 %v9302_v20  ;;  %v9157_v20 = vld [vmem:[%s12867_s1 + $0x840] ss:$8 sps:$4 sm:$0xff]  }
 0x669   :  { %5174 = vmatprep.mubr.bf16.mxu1 %v9305_v28  ;;  %v9162_v28 = vld [vmem:[%s12867_s1 + $0x854] ss:$8 sps:$4 sm:$0xff]  }
 0x66b   :  { %v4906_v16 = vpop.f32.mrb[0].mxu1 }
 0x66c   :  { %v5233_v19 = vadd.f32 %v11170_v25, %v4906_v16  ;;  %v4908_v18 = vpop.f32.mrb[1].mxu1 }
 0x66d   :  { %v5234_v29 = vadd.f32 %v11175_v27, %v4908_v18  ;;  %v4910_v30 = vpop.f32.mrb[2].mxu1 }
 0x66e   :  { %v5235_v23 = vadd.f32 %v11170_v25, %v4910_v30  ;;  %v4912_v22 = vpop.f32.mrb[3].mxu1  ;;  %v5361_v31 = vmax.f32 %v5233_v19, 0.0 }
 0x66f   :  { %v5236_v17 = vadd.f32 %v11175_v27, %v4912_v22  ;;  %v5362_v34 = vmax.f32 %v5234_v29, 0.0 }
 0x670   :  { %v5363_v32 = vmax.f32 %v5235_v23, 0.0  ;;  %5175 = vmatmul.mubr.bf16.gmra.mrb[108].mxu1 %v9306_v33  ;;  %v9160_v23 = vld [vmem:[%s12867_s1 + $0x850] ss:$8 sps:$4 sm:$0xff]  }
 0x671   :  { %v5364_v35 = vmax.f32 %v5236_v17, 0.0  ;;  %5184 = vmatprep.mubr.bf16.mxu1 %v9307_v36 }
 0x672   :  { %v5489_v37 = vpack.c.bf16 %v5363_v32, %v5361_v31  ;;  %v9312_v31 = vld [vmem:[%s12868_s0 + $0x1e0] ss:$8 sps:$4 sm:$0xff]   ;;  %v9165_v32 = vld [vmem:[%s12867_s1 + $0x864] ss:$8 sps:$4 sm:$0xff]  }
 0x673   :  { %v5490_v38 = vpack.c.bf16 %v5364_v35, %v5362_v34  ;;  %v4916_v39 = vpop.f32.mrb[4].mxu1  ;;  %v9313_v35 = vld [vmem:[%s12868_s0 + $0x1f4] ss:$8 sps:$4 sm:$0xff]  }
 0x674   :  { %v5237_v41 = vadd.f32 %v11170_v25, %v4916_v39  ;;  %v4918_v42 = vpop.f32.mrb[5].mxu1  ;;  %v9163_v39 = vld [vmem:[%s12867_s1 + $0x860] ss:$8 sps:$4 sm:$0xff]  }
 0x675   :  { %v5238_v44 = vadd.f32 %v11175_v27, %v4918_v42  ;;  %v4920_v45 = vpop.f32.mrb[6].mxu1  ;;  %5786 = vmatprep.mubr.bf16.mxu0 %v5490_v38  ;;  %v9168_v42 = vld [vmem:[%s12867_s1 + $0x874] ss:$8 sps:$4 sm:$0xff]  }
 0x676   :  { %v5239_v46 = vadd.f32 %v11170_v25, %v4920_v45  ;;  %v4922_v47 = vpop.f32.mrb[7].mxu1  ;;  %5787 = vmatmul.mubr.bf16.vlgmr.msra.gmra.mrb[128].mxu0 %v5489_v37  ;;  %v5365_v50 = vmax.f32 %v5237_v41, 0.0 }
 0x677   :  { %v5240_v48 = vadd.f32 %v11175_v27, %v4922_v47  ;;  %6501 = vmatpush1.bf16.msra.mxu0 %v9145_v40  ;;  %v5366_v54 = vmax.f32 %v5238_v44, 0.0 }
 0x678   :  { %v5367_v51 = vmax.f32 %v5239_v46, 0.0  ;;  %5185 = vmatmul.mubr.bf16.gmra.mrb[112].mxu1 %v9308_v52  ;;  %6502 = vmatprep.subr.bf16.mxu0 %v9150_v43  ;;  %v9171_v52 = vld [vmem:[%s12867_s1 + $0x884] ss:$8 sps:$4 sm:$0xff]  }
 0x679   :  { %v5368_v55 = vmax.f32 %v5240_v48, 0.0  ;;  %5194 = vmatprep.mubr.bf16.mxu1 %v9309_v56  ;;  %v9166_v48 = vld [vmem:[%s12867_s1 + $0x870] ss:$8 sps:$4 sm:$0xff]  }
 0x67a   :  { %v5491_v57 = vpack.c.bf16 %v5367_v51, %v5365_v50  ;;  %v9314_v51 = vld [vmem:[%s12868_s0 + $0x1f0] ss:$8 sps:$4 sm:$0xff]  }
 0x67b   :  { %v5492_v59 = vpack.c.bf16 %v5368_v55, %v5366_v54  ;;  %v4926_v60 = vpop.f32.mrb[8].mxu1  ;;  %6503 = vmatpush1.bf16.msra.mxu0 %v9148_v49 }
 0x67c   :  { %v5241_v63 = vadd.f32 %v11170_v25, %v4926_v60  ;;  %v4928_v0 = vpop.f32.mrb[9].mxu1  ;;  %6504 = vmatprep.subr.bf16.mxu0 %v9153_v53 }
 0x67d   :  { %v5242_v2 = vadd.f32 %v11175_v27, %v4928_v0  ;;  %v4930_v3 = vpop.f32.mrb[10].mxu1  ;;  %5796 = vmatprep.mubr.bf16.mxu0 %v5492_v59  ;;  %v9169_v59 = vld [vmem:[%s12867_s1 + $0x880] ss:$8 sps:$4 sm:$0xff]  }
 0x67e   :  { %v5243_v4 = vadd.f32 %v11170_v25, %v4930_v3  ;;  %v4932_v5 = vpop.f32.mrb[11].mxu1  ;;  %5797 = vmatmul.mubr.bf16.gmra.mrb[132].mxu0 %v5491_v57  ;;  %v5369_v9 = vmax.f32 %v5241_v63, 0.0  ;;  %v9174_v63 = vld [vmem:[%s12867_s1 + $0x894] ss:$8 sps:$4 sm:$0xff]  }
 0x67f   :  { %v5244_v6 = vadd.f32 %v11175_v27, %v4932_v5  ;;  %6505 = vmatpush1.bf16.msra.mxu0 %v9151_v62  ;;  %v5370_v12 = vmax.f32 %v5242_v2, 0.0  ;;  %v9172_v5 = vld [vmem:[%s12867_s1 + $0x890] ss:$8 sps:$4 sm:$0xff]  }
 0x680   :  { %v5371_v15 = vmax.f32 %v5243_v4, 0.0  ;;  %5195 = vmatmul.mubr.bf16.gmra.mrb[116].mxu1 %v9310_v10  ;;  %6506 = vmatprep.subr.bf16.mxu0 %v9156_v1 }
 0x681   :  { %v5372_v24 = vmax.f32 %v5244_v6, 0.0  ;;  %5204 = vmatprep.mubr.bf16.mxu1 %v9311_v13  ;;  %v9175_v13 = vld [vmem:[%s12867_s1 + $0x8a0] ss:$8 sps:$4 sm:$0xff]  }
 0x682   :  { %v5493_v58 = vpack.c.bf16 %v5371_v15, %v5369_v9 }
 0x683   :  { %v5494_v61 = vpack.c.bf16 %v5372_v24, %v5370_v12  ;;  %v4936_v14 = vpop.f32.mrb[12].mxu1  ;;  %6507 = vmatpush1.bf16.msra.mxu0 %v9154_v7 }
 0x684   :  { %v5245_v21 = vadd.f32 %v11170_v25, %v4936_v14  ;;  %v4938_v26 = vpop.f32.mrb[13].mxu1  ;;  %6508 = vmatprep.subr.bf16.mxu0 %v9159_v11  ;;  %v9177_v11 = vld [vmem:[%s12867_s1 + $0x8a4] ss:$8 sps:$4 sm:$0xff]  }
 0x685   :  { %v5246_v16 = vadd.f32 %v11175_v27, %v4938_v26  ;;  %v4940_v19 = vpop.f32.mrb[14].mxu1  ;;  %5806 = vmatprep.mubr.bf16.mxu0 %v5494_v61 }
 0x686   :  { %v5247_v18 = vadd.f32 %v11170_v25, %v4940_v19  ;;  %v4942_v29 = vpop.f32.mrb[15].mxu1  ;;  %5807 = vmatmul.mubr.bf16.gmra.mrb[136].mxu0 %v5493_v58  ;;  %v5373_v22 = vmax.f32 %v5245_v21, 0.0 }
 0x687   :  { %v5248_v30 = vadd.f32 %v11175_v27, %v4942_v29  ;;  %6509 = vmatpush1.bf16.msra.mxu0 %v9157_v20  ;;  %v5374_v33 = vmax.f32 %v5246_v16, 0.0 }
 0x688   :  { %v5375_v17 = vmax.f32 %v5247_v18, 0.0  ;;  %5205 = vmatmul.mubr.bf16.gmra.mrb[120].mxu1 %v9312_v31  ;;  %6510 = vmatprep.subr.bf16.mxu0 %v9162_v28 }
 0x689   :  { %v5376_v34 = vmax.f32 %v5248_v30, 0.0  ;;  %5214 = vmatprep.mubr.bf16.mxu1 %v9313_v35 }
 0x68a   :  { %v5495_v36 = vpack.c.bf16 %v5375_v17, %v5373_v22 }
 0x68b   :  { %v5496_v37 = vpack.c.bf16 %v5376_v34, %v5374_v33  ;;  %v4946_v38 = vpop.f32.mrb[16].mxu1  ;;  %6511 = vmatpush1.bf16.msra.mxu0 %v9160_v23 }
 0x68c   :  { %v5249_v40 = vadd.f32 %v11170_v25, %v4946_v38  ;;  %v4948_v41 = vpop.f32.mrb[17].mxu1  ;;  %6512 = vmatprep.subr.bf16.mxu0 %v9165_v32 }
 0x68d   :  { %v5250_v43 = vadd.f32 %v11175_v27, %v4948_v41  ;;  %v4950_v44 = vpop.f32.mrb[18].mxu1  ;;  %5816 = vmatprep.mubr.bf16.mxu0 %v5496_v37 }
 0x68e   :  { %v5251_v45 = vadd.f32 %v11170_v25, %v4950_v44  ;;  %v4952_v46 = vpop.f32.mrb[19].mxu1  ;;  %5817 = vmatmul.mubr.bf16.gmra.mrb[140].mxu0 %v5495_v36  ;;  %v5377_v49 = vmax.f32 %v5249_v40, 0.0 }
 0x68f   :  { %v5252_v47 = vadd.f32 %v11175_v27, %v4952_v46  ;;  %6513 = vmatpush1.bf16.msra.mxu0 %v9163_v39  ;;  %v5378_v53 = vmax.f32 %v5250_v43, 0.0  ;;  %v9180_v43 = vld [vmem:[%s12867_s1 + $0x8b4] ss:$8 sps:$4 sm:$0xff]  }
 0x690   :  { %v5379_v50 = vmax.f32 %v5251_v45, 0.0  ;;  %5215 = vmatmul.mubr.bf16.gmra.mrb[124].mxu1 %v9314_v51  ;;  %6514 = vmatprep.subr.bf16.mxu0 %v9168_v42  ;;  %v9178_v42 = vld [vmem:[%s12867_s1 + $0x8b0] ss:$8 sps:$4 sm:$0xff]  }
 0x691   :  { %v5380_v54 = vmax.f32 %v5252_v47, 0.0 }
 0x692   :  { %v5497_v55 = vpack.c.bf16 %v5379_v50, %v5377_v49 }
 0x693   :  { %v5498_v56 = vpack.c.bf16 %v5380_v54, %v5378_v53  ;;  %v4956_v57 = vpop.f32.mrb[20].mxu1  ;;  %6515 = vmatpush1.bf16.msra.mxu0 %v9166_v48 }
 0x694   :  { %v5253_v60 = vadd.f32 %v11170_v25, %v4956_v57  ;;  %v4958_v62 = vpop.f32.mrb[21].mxu1  ;;  %6516 = vmatprep.subr.bf16.mxu0 %v9171_v52 }
 0x695   :  { %v5254_v0 = vadd.f32 %v11175_v27, %v4958_v62  ;;  %v4960_v1 = vpop.f32.mrb[22].mxu1  ;;  %5826 = vmatprep.mubr.bf16.mxu0 %v5498_v56 }
 0x696   :  { %v5255_v2 = vadd.f32 %v11170_v25, %v4960_v1  ;;  %v4962_v3 = vpop.f32.mrb[23].mxu1  ;;  %5827 = vmatmul.mubr.bf16.gmra.mrb[144].mxu0 %v5497_v55  ;;  %v5381_v6 = vmax.f32 %v5253_v60, 0.0 }
 0x697   :  { %v5256_v4 = vadd.f32 %v11175_v27, %v4962_v3  ;;  %6517 = vmatpush1.bf16.msra.mxu0 %v9169_v59  ;;  %v5382_v9 = vmax.f32 %v5254_v0, 0.0 }
 0x698   :  { %v5383_v7 = vmax.f32 %v5255_v2, 0.0  ;;  %6518 = vmatprep.subr.bf16.mxu0 %v9174_v63 }
 0x699   :  { %v5384_v15 = vmax.f32 %v5256_v4, 0.0 }
 0x69a   :  { %v5499_v10 = vpack.c.bf16 %v5383_v7, %v5381_v6 }
 0x69b   :  { %v5500_v12 = vpack.c.bf16 %v5384_v15, %v5382_v9  ;;  %v4966_v24 = vpop.f32.mrb[24].mxu1  ;;  %6519 = vmatpush1.bf16.msra.mxu0 %v9172_v5 }
 0x69c   :  { %v5257_v58 = vadd.f32 %v11170_v25, %v4966_v24  ;;  %v4968_v61 = vpop.f32.mrb[25].mxu1  ;;  %6520 = vmatprep.subr.bf16.mxu0 %v9177_v11  ;;  %v9183_v11 = vld [vmem:[%s12867_s1 + $0x8c4] ss:$8 sps:$4 sm:$0xff]  }
 0x69d   :  { %v5258_v14 = vadd.f32 %v11175_v27, %v4968_v61  ;;  %v4970_v20 = vpop.f32.mrb[26].mxu1  ;;  %5836 = vmatprep.mubr.bf16.mxu0 %v5500_v12 }
 0x69e   :  { %v5259_v21 = vadd.f32 %v11170_v25, %v4970_v20  ;;  %v4972_v26 = vpop.f32.mrb[27].mxu1  ;;  %5837 = vmatmul.mubr.bf16.gmra.mrb[148].mxu0 %v5499_v10  ;;  %v5385_v16 = vmax.f32 %v5257_v58, 0.0  ;;  %v9181_v10 = vld [vmem:[%s12867_s1 + $0x8c0] ss:$8 sps:$4 sm:$0xff]  }
 0x69f   :  { %v5260_v28 = vadd.f32 %v11175_v27, %v4972_v26  ;;  %6521 = vmatpush1.bf16.msra.mxu0 %v9175_v13  ;;  %v5386_v18 = vmax.f32 %v5258_v14, 0.0 }
 0x6a0   :  { %v5387_v19 = vmax.f32 %v5259_v21, 0.0  ;;  %6522 = vmatprep.subr.bf16.mxu0 %v9180_v43 }
 0x6a1   :  { %v5388_v29 = vmax.f32 %v5260_v28, 0.0 }
 0x6a2   :  { %v5501_v30 = vpack.c.bf16 %v5387_v19, %v5385_v16 }
 0x6a3   :  { %v5502_v23 = vpack.c.bf16 %v5388_v29, %v5386_v18  ;;  %v4976_v22 = vpop.f32.mrb[28].mxu1  ;;  %6523 = vmatpush1.bf16.msra.mxu0 %v9178_v42  ;;  %v9186_v42 = vld [vmem:[%s12867_s1 + $0x8d4] ss:$8 sps:$4 sm:$0xff]  }
 0x6a4   :  { %v5261_v17 = vadd.f32 %v11170_v25, %v4976_v22  ;;  %v4978_v31 = vpop.f32.mrb[29].mxu1  ;;  %6524 = vmatprep.subr.bf16.mxu0 %v9183_v11  ;;  %v9190_v11 = vld [vmem:[%s12867_s1 + $0x8e0] ss:$8 sps:$4 sm:$0xff]  }
 0x6a5   :  { %v5262_v32 = vadd.f32 %v11175_v27, %v4978_v31  ;;  %v4980_v33 = vpop.f32.mrb[30].mxu1  ;;  %5846 = vmatprep.mubr.bf16.mxu0 %v5502_v23 }
 0x6a6   :  { %v5263_v34 = vadd.f32 %v11170_v25, %v4980_v33  ;;  %v4982_v35 = vpop.f32.mrb[31].mxu1  ;;  %5847 = vmatmul.mubr.bf16.gmra.mrb[152].mxu0 %v5501_v30  ;;  %v5389_v37 = vmax.f32 %v5261_v17, 0.0 }
 0x6a7   :  { %v5264_v36 = vadd.f32 %v11175_v27, %v4982_v35  ;;  %v5390_v39 = vmax.f32 %v5262_v32, 0.0  ;;  %6525 = vmatpush1.bf16.msra.mxu0 %v9181_v10 }
 0x6a8   :  { %v5391_v38 = vmax.f32 %v5263_v34, 0.0  ;;  %6526 = vmatprep.subr.bf16.mxu0 %v9186_v42 }
 0x6a9   :  { %v5392_v40 = vmax.f32 %v5264_v36, 0.0 }
 0x6aa   :  { %v5503_v41 = vpack.c.bf16 %v5391_v38, %v5389_v37 }
 0x6ab   :  { %v5504_v44 = vpack.c.bf16 %v5392_v40, %v5390_v39  ;;  %v4986_v45 = vpop.f32.mrb[32].mxu1 }
 0x6ac   :  { %v5265_v46 = vadd.f32 %v11170_v25, %v4986_v45  ;;  %v4988_v47 = vpop.f32.mrb[33].mxu1 }
 0x6ad   :  { %v5266_v48 = vadd.f32 %v11175_v27, %v4988_v47  ;;  %v4990_v49 = vpop.f32.mrb[34].mxu1  ;;  %5856 = vmatprep.mubr.bf16.mxu0 %v5504_v44 }
 0x6ae   :  { %v5267_v50 = vadd.f32 %v11170_v25, %v4990_v49  ;;  %v4992_v51 = vpop.f32.mrb[35].mxu1  ;;  %5857 = vmatmul.mubr.bf16.gmra.mrb[156].mxu0 %v5503_v41  ;;  %v5393_v53 = vmax.f32 %v5265_v46, 0.0  ;;  %v9184_v41 = vld [vmem:[%s12867_s1 + $0x8d0] ss:$8 sps:$4 sm:$0xff]  }
 0x6af   :  { %v5268_v52 = vadd.f32 %v11175_v27, %v4992_v51  ;;  %v5394_v55 = vmax.f32 %v5266_v48, 0.0  ;;  %6527 = vmatpush1.bf16.msra.mxu0 %v9184_v41 }
 0x6b0   :  { %v5395_v54 = vmax.f32 %v5267_v50, 0.0 }
 0x6b1   :  { %v5396_v56 = vmax.f32 %v5268_v52, 0.0 }
 0x6b2   :  { %v5505_v57 = vpack.c.bf16 %v5395_v54, %v5393_v53 }
 0x6b3   :  { %v5506_v59 = vpack.c.bf16 %v5396_v56, %v5394_v55  ;;  %v4996_v60 = vpop.f32.mrb[36].mxu1 }
 0x6b4   :  { %v5269_v62 = vadd.f32 %v11170_v25, %v4996_v60  ;;  %v4998_v63 = vpop.f32.mrb[37].mxu1 }
 0x6b5   :  { %v5270_v0 = vadd.f32 %v11175_v27, %v4998_v63  ;;  %v5000_v1 = vpop.f32.mrb[38].mxu1  ;;  %5866 = vmatprep.mubr.bf16.mxu0 %v5506_v59 }
 0x6b6   :  { %v5271_v2 = vadd.f32 %v11170_v25, %v5000_v1  ;;  %v5002_v3 = vpop.f32.mrb[39].mxu1  ;;  %5867 = vmatmul.mubr.bf16.gmra.mrb[160].mxu0 %v5505_v57  ;;  %v5397_v5 = vmax.f32 %v5269_v62, 0.0 }
 0x6b7   :  { %v5272_v4 = vadd.f32 %v11175_v27, %v5002_v3  ;;  %v5398_v7 = vmax.f32 %v5270_v0, 0.0 }
 0x6b8   :  { %v5399_v6 = vmax.f32 %v5271_v2, 0.0 }
 0x6b9   :  { %v5400_v9 = vmax.f32 %v5272_v4, 0.0 }
 0x6ba   :  { %v5507_v15 = vpack.c.bf16 %v5399_v6, %v5397_v5  ;;  %v9187_v6 = vld [vmem:[%s12867_s1 + $0x900] ss:$8 sps:$4 sm:$0xff]  }
 0x6bb   :  { %v5508_v12 = vpack.c.bf16 %v5400_v9, %v5398_v7  ;;  %v5006_v24 = vpop.f32.mrb[40].mxu1  ;;  %v9189_v7 = vld [vmem:[%s12867_s1 + $0x904] ss:$8 sps:$4 sm:$0xff]  }
 0x6bc   :  { %v5273_v13 = vadd.f32 %v11170_v25, %v5006_v24  ;;  %v5008_v58 = vpop.f32.mrb[41].mxu1  ;;  %7246 = vmatprep.subr.bf16.mxu1 %v9189_v7 }
 0x6bd   :  { %v5274_v61 = vadd.f32 %v11175_v27, %v5008_v58  ;;  %v5010_v14 = vpop.f32.mrb[42].mxu1  ;;  %5876 = vmatprep.mubr.bf16.mxu0 %v5508_v12  ;;  %v9192_v12 = vld [vmem:[%s12867_s1 + $0x8e4] ss:$8 sps:$4 sm:$0xff]   ;;  %7247 = vmatpush1.bf16.msra.mxu1 %v9187_v6 }
 0x6be   :  { %v5275_v20 = vadd.f32 %v11170_v25, %v5010_v14  ;;  %v5012_v21 = vpop.f32.mrb[43].mxu1  ;;  %5877 = vmatmul.mubr.bf16.gmra.mrb[164].mxu0 %v5507_v15  ;;  %v5401_v28 = vmax.f32 %v5273_v13, 0.0  ;;  %6528 = vmatprep.subr.bf16.mxu0 %v9192_v12 }
 0x6bf   :  { %v5276_v26 = vadd.f32 %v11175_v27, %v5012_v21  ;;  %v5402_v19 = vmax.f32 %v5274_v61, 0.0  ;;  %6529 = vmatpush1.bf16.msra.mxu0 %v9190_v11 }
 0x6c0   :  { %v5403_v16 = vmax.f32 %v5275_v20, 0.0 }
 0x6c1   :  { %v5404_v18 = vmax.f32 %v5276_v26, 0.0 }
 0x6c2   :  { %v5509_v29 = vpack.c.bf16 %v5403_v16, %v5401_v28 }
 0x6c3   :  { %v5510_v30 = vpack.c.bf16 %v5404_v18, %v5402_v19  ;;  %v5016_v23 = vpop.f32.mrb[44].mxu1 }
 0x6c4   :  { %v5277_v22 = vadd.f32 %v11170_v25, %v5016_v23  ;;  %v5018_v17 = vpop.f32.mrb[45].mxu1 }
 0x6c5   :  { %v5278_v31 = vadd.f32 %v11175_v27, %v5018_v17  ;;  %v5020_v32 = vpop.f32.mrb[46].mxu1  ;;  %5886 = vmatprep.mubr.bf16.mxu0 %v5510_v30 }
 0x6c6   :  { %v5279_v33 = vadd.f32 %v11170_v25, %v5020_v32  ;;  %v5022_v34 = vpop.f32.mrb[47].mxu1  ;;  %5887 = vmatmul.mubr.bf16.gmra.mrb[168].mxu0 %v5509_v29  ;;  %v5405_v36 = vmax.f32 %v5277_v22, 0.0 }
 0x6c7   :  { %v5280_v35 = vadd.f32 %v11175_v27, %v5022_v34  ;;  %v5406_v38 = vmax.f32 %v5278_v31, 0.0 }
 0x6c8   :  { %v5407_v37 = vmax.f32 %v5279_v33, 0.0 }
 0x6c9   :  { %v5408_v39 = vmax.f32 %v5280_v35, 0.0 }
 0x6ca   :  { %v5511_v40 = vpack.c.bf16 %v5407_v37, %v5405_v36 }
 0x6cb   :  { %v5512_v43 = vpack.c.bf16 %v5408_v39, %v5406_v38  ;;  %v5026_v44 = vpop.f32.mrb[48].mxu1  ;;  %v9193_v39 = vld [vmem:[%s12867_s1 + $0x910] ss:$8 sps:$4 sm:$0xff]  }
 0x6cc   :  { %v5281_v45 = vadd.f32 %v11170_v25, %v5026_v44  ;;  %v5028_v46 = vpop.f32.mrb[49].mxu1  ;;  %v9196_v44 = vld [vmem:[%s12867_s1 + $0x8f0] ss:$8 sps:$4 sm:$0xff]  }
 0x6cd   :  { %v5282_v47 = vadd.f32 %v11175_v27, %v5028_v46  ;;  %v5030_v48 = vpop.f32.mrb[50].mxu1  ;;  %5896 = vmatprep.mubr.bf16.mxu0 %v5512_v43 }
 0x6ce   :  { %v5283_v49 = vadd.f32 %v11170_v25, %v5030_v48  ;;  %v5032_v50 = vpop.f32.mrb[51].mxu1  ;;  %5897 = vmatmul.mubr.bf16.gmra.mrb[172].mxu0 %v5511_v40  ;;  %v5409_v52 = vmax.f32 %v5281_v45, 0.0  ;;  %v9195_v40 = vld [vmem:[%s12867_s1 + $0x914] ss:$8 sps:$4 sm:$0xff]  }
 0x6cf   :  { %v5284_v51 = vadd.f32 %v11175_v27, %v5032_v50  ;;  %v5410_v54 = vmax.f32 %v5282_v47, 0.0  ;;  %7248 = vmatprep.subr.bf16.mxu1 %v9195_v40  ;;  %v9198_v45 = vld [vmem:[%s12867_s1 + $0x8f4] ss:$8 sps:$4 sm:$0xff]   ;;  %v9202_v40 = vld [vmem:[%s12867_s1 + $0x930] ss:$8 sps:$4 sm:$0xff]  }
 0x6d0   :  { %v5411_v53 = vmax.f32 %v5283_v49, 0.0  ;;  %7249 = vmatpush1.bf16.msra.mxu1 %v9193_v39  ;;  %6530 = vmatprep.subr.bf16.mxu0 %v9198_v45 }
 0x6d1   :  { %v5412_v55 = vmax.f32 %v5284_v51, 0.0  ;;  %6531 = vmatpush1.bf16.msra.mxu0 %v9196_v44 }
 0x6d2   :  { %v5513_v56 = vpack.c.bf16 %v5411_v53, %v5409_v52 }
 0x6d3   :  { %v5514_v57 = vpack.c.bf16 %v5412_v55, %v5410_v54  ;;  %v5036_v59 = vpop.f32.mrb[52].mxu1 }
 0x6d4   :  { %v5285_v60 = vadd.f32 %v11170_v25, %v5036_v59  ;;  %v5038_v62 = vpop.f32.mrb[53].mxu1 }
 0x6d5   :  { %v5286_v63 = vadd.f32 %v11175_v27, %v5038_v62  ;;  %v5040_v0 = vpop.f32.mrb[54].mxu1  ;;  %5906 = vmatprep.mubr.bf16.mxu0 %v5514_v57 }
 0x6d6   :  { %v5287_v1 = vadd.f32 %v11170_v25, %v5040_v0  ;;  %v5042_v2 = vpop.f32.mrb[55].mxu1  ;;  %5907 = vmatmul.mubr.bf16.gmra.mrb[176].mxu0 %v5513_v56  ;;  %v5413_v4 = vmax.f32 %v5285_v60, 0.0 }
 0x6d7   :  { %v5288_v3 = vadd.f32 %v11175_v27, %v5042_v2  ;;  %v5414_v9 = vmax.f32 %v5286_v63, 0.0 }
 0x6d8   :  { %v5415_v5 = vmax.f32 %v5287_v1, 0.0 }
 0x6d9   :  { %v5416_v15 = vmax.f32 %v5288_v3, 0.0 }
 0x6da   :  { %v5515_v10 = vpack.c.bf16 %v5415_v5, %v5413_v4 }
 0x6db   :  { %v5516_v24 = vpack.c.bf16 %v5416_v15, %v5414_v9  ;;  %v5046_v13 = vpop.f32.mrb[56].mxu1  ;;  %v9199_v15 = vld [vmem:[%s12867_s1 + $0x920] ss:$8 sps:$4 sm:$0xff]  }
 0x6dc   :  { %v5289_v58 = vadd.f32 %v11170_v25, %v5046_v13  ;;  %v5048_v61 = vpop.f32.mrb[57].mxu1 }
 0x6dd   :  { %v5290_v14 = vadd.f32 %v11175_v27, %v5048_v61  ;;  %v5050_v20 = vpop.f32.mrb[58].mxu1  ;;  %5916 = vmatprep.mubr.bf16.mxu0 %v5516_v24 }
 0x6de   :  { %v5291_v21 = vadd.f32 %v11170_v25, %v5050_v20  ;;  %v5052_v26 = vpop.f32.mrb[59].mxu1  ;;  %5917 = vmatmul.mubr.bf16.gmra.mrb[180].mxu0 %v5515_v10  ;;  %v5417_v16 = vmax.f32 %v5289_v58, 0.0  ;;  %v9201_v10 = vld [vmem:[%s12867_s1 + $0x924] ss:$8 sps:$4 sm:$0xff]  }
 0x6df   :  { %v5292_v28 = vadd.f32 %v11175_v27, %v5052_v26  ;;  %v5418_v18 = vmax.f32 %v5290_v14, 0.0  ;;  %7250 = vmatprep.subr.bf16.mxu1 %v9201_v10 }
 0x6e0   :  { %v5419_v19 = vmax.f32 %v5291_v21, 0.0  ;;  %7251 = vmatpush1.bf16.msra.mxu1 %v9199_v15  ;;  %v9207_v15 = vld [vmem:[%s12867_s1 + $0x944] ss:$8 sps:$4 sm:$0xff]  }
 0x6e1   :  { %v5420_v29 = vmax.f32 %v5292_v28, 0.0 }
 0x6e2   :  { %v5517_v30 = vpack.c.bf16 %v5419_v19, %v5417_v16 }
 0x6e3   :  { %v5518_v23 = vpack.c.bf16 %v5420_v29, %v5418_v18  ;;  %v5056_v22 = vpop.f32.mrb[60].mxu1 }
 0x6e4   :  { %v5293_v17 = vadd.f32 %v11170_v25, %v5056_v22  ;;  %v5058_v31 = vpop.f32.mrb[61].mxu1 }
 0x6e5   :  { %v5294_v32 = vadd.f32 %v11175_v27, %v5058_v31  ;;  %v5060_v33 = vpop.f32.mrb[62].mxu1  ;;  %5926 = vmatprep.mubr.bf16.mxu0 %v5518_v23 }
 0x6e6   :  { %v5295_v34 = vadd.f32 %v11170_v25, %v5060_v33  ;;  %v5062_v35 = vpop.f32.mrb[63].mxu1  ;;  %5927 = vmatmul.mubr.bf16.gmra.mrb[184].mxu0 %v5517_v30  ;;  %v5421_v37 = vmax.f32 %v5293_v17, 0.0 }
 0x6e7   :  { %v5296_v36 = vadd.f32 %v11175_v27, %v5062_v35  ;;  %v5422_v41 = vmax.f32 %v5294_v32, 0.0 }
 0x6e8   :  { %v5423_v38 = vmax.f32 %v5295_v34, 0.0 }
 0x6e9   :  { %v5424_v42 = vmax.f32 %v5296_v36, 0.0 }
 0x6ea   :  { %v5519_v43 = vpack.c.bf16 %v5423_v38, %v5421_v37 }
 0x6eb   :  { %v5520_v46 = vpack.c.bf16 %v5424_v42, %v5422_v41  ;;  %v5066_v47 = vpop.f32.mrb[64].mxu1  ;;  %v9204_v41 = vld [vmem:[%s12867_s1 + $0x934] ss:$8 sps:$4 sm:$0xff]  }
 0x6ec   :  { %v5297_v48 = vadd.f32 %v11170_v25, %v5066_v47  ;;  %v5068_v49 = vpop.f32.mrb[65].mxu1  ;;  %7252 = vmatprep.subr.bf16.mxu1 %v9204_v41 }
 0x6ed   :  { %v5298_v50 = vadd.f32 %v11175_v27, %v5068_v49  ;;  %v5070_v51 = vpop.f32.mrb[66].mxu1  ;;  %5936 = vmatprep.mubr.bf16.mxu0 %v5520_v46  ;;  %7253 = vmatpush1.bf16.msra.mxu1 %v9202_v40  ;;  %v9210_v40 = vld [vmem:[%s12867_s1 + $0x954] ss:$8 sps:$4 sm:$0xff]  }
 0x6ee   :  { %v5299_v52 = vadd.f32 %v11170_v25, %v5070_v51  ;;  %v5072_v53 = vpop.f32.mrb[67].mxu1  ;;  %5937 = vmatmul.mubr.bf16.gmra.mrb[188].mxu0 %v5519_v43  ;;  %v5425_v55 = vmax.f32 %v5297_v48, 0.0  ;;  %7254 = vmatprep.subr.bf16.mxu1 %v9207_v15 }
 0x6ef   :  { %v5300_v54 = vadd.f32 %v11175_v27, %v5072_v53  ;;  %v5426_v57 = vmax.f32 %v5298_v50, 0.0 }
 0x6f0   :  { %v5427_v56 = vmax.f32 %v5299_v52, 0.0 }
 0x6f1   :  { %v5428_v59 = vmax.f32 %v5300_v54, 0.0 }
 0x6f2   :  { %v5521_v60 = vpack.c.bf16 %v5427_v56, %v5425_v55 }
 0x6f3   :  { %v5522_v62 = vpack.c.bf16 %v5428_v59, %v5426_v57  ;;  %v5076_v63 = vpop.f32.mrb[68].mxu1 }
 0x6f4   :  { %v5301_v0 = vadd.f32 %v11170_v25, %v5076_v63  ;;  %v5078_v1 = vpop.f32.mrb[69].mxu1 }
 0x6f5   :  { %v5302_v2 = vadd.f32 %v11175_v27, %v5078_v1  ;;  %v5080_v3 = vpop.f32.mrb[70].mxu1  ;;  %5946 = vmatprep.mubr.bf16.mxu0 %v5522_v62 }
 0x6f6   :  { %v5303_v4 = vadd.f32 %v11170_v25, %v5080_v3  ;;  %v5082_v5 = vpop.f32.mrb[71].mxu1  ;;  %5947 = vmatmul.mubr.bf16.gmra.mrb[192].mxu0 %v5521_v60  ;;  %v5429_v7 = vmax.f32 %v5301_v0, 0.0 }
 0x6f7   :  { %v5304_v6 = vadd.f32 %v11175_v27, %v5082_v5  ;;  %v5430_v11 = vmax.f32 %v5302_v2, 0.0 }
 0x6f8   :  { %v5431_v9 = vmax.f32 %v5303_v4, 0.0 }
 0x6f9   :  { %v5432_v12 = vmax.f32 %v5304_v6, 0.0 }
 0x6fa   :  { %v5523_v24 = vpack.c.bf16 %v5431_v9, %v5429_v7  ;;  %v9205_v9 = vld [vmem:[%s12867_s1 + $0x940] ss:$8 sps:$4 sm:$0xff]  }
 0x6fb   :  { %v5524_v13 = vpack.c.bf16 %v5432_v12, %v5430_v11  ;;  %v5086_v58 = vpop.f32.mrb[72].mxu1  ;;  %7255 = vmatpush1.bf16.msra.mxu1 %v9205_v9  ;;  %v9213_v9 = vld [vmem:[%s12867_s1 + $0x964] ss:$8 sps:$4 sm:$0xff]  }
 0x6fc   :  { %v5305_v61 = vadd.f32 %v11170_v25, %v5086_v58  ;;  %v5088_v14 = vpop.f32.mrb[73].mxu1  ;;  %7256 = vmatprep.subr.bf16.mxu1 %v9210_v40 }
 0x6fd   :  { %v5306_v20 = vadd.f32 %v11175_v27, %v5088_v14  ;;  %v5090_v21 = vpop.f32.mrb[74].mxu1  ;;  %5956 = vmatprep.mubr.bf16.mxu0 %v5524_v13 }
 0x6fe   :  { %v5307_v26 = vadd.f32 %v11170_v25, %v5090_v21  ;;  %v5092_v28 = vpop.f32.mrb[75].mxu1  ;;  %5957 = vmatmul.mubr.bf16.gmra.mrb[196].mxu0 %v5523_v24  ;;  %v5433_v19 = vmax.f32 %v5305_v61, 0.0 }
 0x6ff   :  { %v5308_v16 = vadd.f32 %v11175_v27, %v5092_v28  ;;  %v5434_v29 = vmax.f32 %v5306_v20, 0.0 }
 0x700   :  { %v5435_v18 = vmax.f32 %v5307_v26, 0.0 }
 0x701   :  { %v5436_v30 = vmax.f32 %v5308_v16, 0.0 }
 0x702   :  { %v5525_v23 = vpack.c.bf16 %v5435_v18, %v5433_v19 }
 0x703   :  { %v5526_v22 = vpack.c.bf16 %v5436_v30, %v5434_v29  ;;  %v5096_v17 = vpop.f32.mrb[76].mxu1 }
 0x704   :  { %v5309_v31 = vadd.f32 %v11170_v25, %v5096_v17  ;;  %v5098_v32 = vpop.f32.mrb[77].mxu1 }
 0x705   :  { %v5310_v33 = vadd.f32 %v11175_v27, %v5098_v32  ;;  %v5100_v34 = vpop.f32.mrb[78].mxu1  ;;  %5966 = vmatprep.mubr.bf16.mxu0 %v5526_v22 }
 0x706   :  { %v5311_v35 = vadd.f32 %v11170_v25, %v5100_v34  ;;  %v5102_v36 = vpop.f32.mrb[79].mxu1  ;;  %5967 = vmatmul.mubr.bf16.gmra.mrb[200].mxu0 %v5525_v23  ;;  %v5437_v38 = vmax.f32 %v5309_v31, 0.0 }
 0x707   :  { %v5312_v37 = vadd.f32 %v11175_v27, %v5102_v36  ;;  %v5438_v42 = vmax.f32 %v5310_v33, 0.0 }
 0x708   :  { %v5439_v39 = vmax.f32 %v5311_v35, 0.0 }
 0x709   :  { %v5440_v43 = vmax.f32 %v5312_v37, 0.0 }
 0x70a   :  { %v5527_v44 = vpack.c.bf16 %v5439_v39, %v5437_v38  ;;  %v9208_v39 = vld [vmem:[%s12867_s1 + $0x950] ss:$8 sps:$4 sm:$0xff]  }
 0x70b   :  { %v5528_v45 = vpack.c.bf16 %v5440_v43, %v5438_v42  ;;  %v5106_v46 = vpop.f32.mrb[80].mxu1  ;;  %7257 = vmatpush1.bf16.msra.mxu1 %v9208_v39  ;;  %v9316_v39 = vld [vmem:[%s12869_s2 + $0x8] sm:$0xff] }
 0x70c   :  { %v5313_v47 = vadd.f32 %v11170_v25, %v5106_v46  ;;  %v5108_v48 = vpop.f32.mrb[81].mxu1  ;;  %7258 = vmatprep.subr.bf16.mxu1 %v9213_v9 }
 0x70d   :  { %v5314_v49 = vadd.f32 %v11175_v27, %v5108_v48  ;;  %v5110_v50 = vpop.f32.mrb[82].mxu1  ;;  %5976 = vmatprep.mubr.bf16.mxu0 %v5528_v45 }
 0x70e   :  { %v5315_v51 = vadd.f32 %v11170_v25, %v5110_v50  ;;  %v5112_v52 = vpop.f32.mrb[83].mxu1  ;;  %5977 = vmatmul.mubr.bf16.gmra.mrb[204].mxu0 %v5527_v44  ;;  %v5441_v54 = vmax.f32 %v5313_v47, 0.0 }
 0x70f   :  { %v5316_v53 = vadd.f32 %v11175_v27, %v5112_v52  ;;  %v5442_v56 = vmax.f32 %v5314_v49, 0.0 }
 0x710   :  { %v5443_v55 = vmax.f32 %v5315_v51, 0.0 }
 0x711   :  { %v5444_v57 = vmax.f32 %v5316_v53, 0.0 }
 0x712   :  { %v5529_v59 = vpack.c.bf16 %v5443_v55, %v5441_v54 }
 0x713   :  { %v5530_v60 = vpack.c.bf16 %v5444_v57, %v5442_v56  ;;  %v5116_v62 = vpop.f32.mrb[84].mxu1 }
 0x714   :  { %v5317_v63 = vadd.f32 %v11170_v25, %v5116_v62  ;;  %v5118_v0 = vpop.f32.mrb[85].mxu1 }
 0x715   :  { %v5318_v1 = vadd.f32 %v11175_v27, %v5118_v0  ;;  %v5120_v2 = vpop.f32.mrb[86].mxu1  ;;  %5986 = vmatprep.mubr.bf16.mxu0 %v5530_v60 }
 0x716   :  { %v5319_v3 = vadd.f32 %v11170_v25, %v5120_v2  ;;  %v5122_v4 = vpop.f32.mrb[87].mxu1  ;;  %5987 = vmatmul.mubr.bf16.gmra.mrb[208].mxu0 %v5529_v59  ;;  %v5445_v6 = vmax.f32 %v5317_v63, 0.0 }
 0x717   :  { %v5320_v5 = vadd.f32 %v11175_v27, %v5122_v4  ;;  %v5446_v10 = vmax.f32 %v5318_v1, 0.0 }
 0x718   :  { %v5447_v7 = vmax.f32 %v5319_v3, 0.0 }
 0x719   :  { %v5448_v11 = vmax.f32 %v5320_v5, 0.0 }
 0x71a   :  { %v5531_v12 = vpack.c.bf16 %v5447_v7, %v5445_v6  ;;  %v9211_v7 = vld [vmem:[%s12867_s1 + $0x960] ss:$8 sps:$4 sm:$0xff]  }
 0x71b   :  { %v5532_v24 = vpack.c.bf16 %v5448_v11, %v5446_v10  ;;  %v5126_v13 = vpop.f32.mrb[88].mxu1  ;;  %7259 = vmatpush1.bf16.msra.mxu1 %v9211_v7 }
 0x71c   :  { %v5321_v58 = vadd.f32 %v11170_v25, %v5126_v13  ;;  %v5128_v61 = vpop.f32.mrb[89].mxu1 }
 0x71d   :  { %v5322_v14 = vadd.f32 %v11175_v27, %v5128_v61  ;;  %v5130_v20 = vpop.f32.mrb[90].mxu1  ;;  %5996 = vmatprep.mubr.bf16.mxu0 %v5532_v24 }
 0x71e   :  { %v5323_v21 = vadd.f32 %v11170_v25, %v5130_v20  ;;  %v5132_v26 = vpop.f32.mrb[91].mxu1  ;;  %5997 = vmatmul.mubr.bf16.gmra.mrb[212].mxu0 %v5531_v12  ;;  %v5449_v16 = vmax.f32 %v5321_v58, 0.0 }
 0x71f   :  { %v5324_v28 = vadd.f32 %v11175_v27, %v5132_v26  ;;  %v5450_v18 = vmax.f32 %v5322_v14, 0.0 }
 0x720   :  { %v5451_v19 = vmax.f32 %v5323_v21, 0.0 }
 0x721   :  { %v5452_v29 = vmax.f32 %v5324_v28, 0.0 }
 0x722   :  { %v5533_v30 = vpack.c.bf16 %v5451_v19, %v5449_v16 }
 0x723   :  { %v5534_v23 = vpack.c.bf16 %v5452_v29, %v5450_v18  ;;  %v5136_v22 = vpop.f32.mrb[92].mxu1 }
 0x724   :  { %v5325_v17 = vadd.f32 %v11170_v25, %v5136_v22  ;;  %v5138_v31 = vpop.f32.mrb[93].mxu1 }
 0x725   :  { %v5326_v32 = vadd.f32 %v11175_v27, %v5138_v31  ;;  %v5140_v33 = vpop.f32.mrb[94].mxu1  ;;  %6006 = vmatprep.mubr.bf16.mxu0 %v5534_v23 }
 0x726   :  { %v5327_v34 = vadd.f32 %v11170_v25, %v5140_v33  ;;  %v5142_v35 = vpop.f32.mrb[95].mxu1  ;;  %6007 = vmatmul.mubr.bf16.gmra.mrb[216].mxu0 %v5533_v30  ;;  %v5453_v37 = vmax.f32 %v5325_v17, 0.0  ;;  %v5588_v30 = vsub.s32 6, %v9749_v8 }
 0x727   :  { %v5328_v36 = vadd.f32 %v11175_v27, %v5142_v35  ;;  %v5454_v41 = vmax.f32 %v5326_v32, 0.0 }
 0x728   :  { %v5455_v38 = vmax.f32 %v5327_v34, 0.0  ;;  %v11463_v40 = vrot.slane %v9316_v39, %v5588_v30 }
 0x729   :  { %v5456_v42 = vmax.f32 %v5328_v36, 0.0  ;;  %v9315_v36 = vld [vmem:[%s12869_s2] sm:$0xff] }
 0x72a   :  { %v5535_v43 = vpack.c.bf16 %v5455_v38, %v5453_v37  ;;  %v11457_v37 = vrot.slane %v9315_v36, %v5588_v30 }
 0x72b   :  { %v5536_v44 = vpack.c.bf16 %v5456_v42, %v5454_v41  ;;  %v5146_v45 = vpop.f32.mrb[96].mxu1 }
 0x72c   :  { %v5329_v46 = vadd.f32 %v11170_v25, %v5146_v45  ;;  %v5148_v47 = vpop.f32.mrb[97].mxu1 }
 0x72d   :  { %v5330_v48 = vadd.f32 %v11175_v27, %v5148_v47  ;;  %v5150_v49 = vpop.f32.mrb[98].mxu1  ;;  %6016 = vmatprep.mubr.bf16.mxu0 %v5536_v44  ;;  %v9216_v44 = vld [vmem:[%s12867_s1 + $0x974] ss:$8 sps:$4 sm:$0xff]  }
 0x72e   :  { %v5331_v50 = vadd.f32 %v11170_v25, %v5150_v49  ;;  %v5152_v51 = vpop.f32.mrb[99].mxu1  ;;  %6017 = vmatmul.mubr.bf16.gmra.mrb[220].mxu0 %v5535_v43  ;;  %v5457_v53 = vmax.f32 %v5329_v46, 0.0  ;;  %v9214_v43 = vld [vmem:[%s12867_s1 + $0x970] ss:$8 sps:$4 sm:$0xff]   ;;  %7260 = vmatprep.subr.bf16.mxu1 %v9216_v44 }
 0x72f   :  { %v5332_v52 = vadd.f32 %v11175_v27, %v5152_v51  ;;  %v5458_v55 = vmax.f32 %v5330_v48, 0.0  ;;  %7261 = vmatpush1.bf16.msra.mxu1 %v9214_v43 }
 0x730   :  { %v5459_v54 = vmax.f32 %v5331_v50, 0.0 }
 0x731   :  { %v5460_v56 = vmax.f32 %v5332_v52, 0.0 }
 0x732   :  { %v5537_v57 = vpack.c.bf16 %v5459_v54, %v5457_v53 }
 0x733   :  { %v5538_v59 = vpack.c.bf16 %v5460_v56, %v5458_v55  ;;  %v5156_v60 = vpop.f32.mrb[100].mxu1 }
 0x734   :  { %v5333_v62 = vadd.f32 %v11170_v25, %v5156_v60  ;;  %v5158_v63 = vpop.f32.mrb[101].mxu1 }
 0x735   :  { %v5334_v0 = vadd.f32 %v11175_v27, %v5158_v63  ;;  %v5160_v1 = vpop.f32.mrb[102].mxu1  ;;  %6026 = vmatprep.mubr.bf16.mxu0 %v5538_v59 }
 0x736   :  { %v5335_v2 = vadd.f32 %v11170_v25, %v5160_v1  ;;  %v5162_v3 = vpop.f32.mrb[103].mxu1  ;;  %6027 = vmatmul.mubr.bf16.gmra.mrb[224].mxu0 %v5537_v57  ;;  %v5461_v5 = vmax.f32 %v5333_v62, 0.0 }
 0x737   :  { %v5336_v4 = vadd.f32 %v11175_v27, %v5162_v3  ;;  %v5462_v15 = vmax.f32 %v5334_v0, 0.0 }
 0x738   :  { %v5463_v6 = vmax.f32 %v5335_v2, 0.0 }
 0x739   :  { %v5464_v10 = vmax.f32 %v5336_v4, 0.0 }
 0x73a   :  { %v5539_v11 = vpack.c.bf16 %v5463_v6, %v5461_v5 }
 0x73b   :  { %v5540_v12 = vpack.c.bf16 %v5464_v10, %v5462_v15  ;;  %v5166_v24 = vpop.f32.mrb[104].mxu1 }
 0x73c   :  { %v5337_v13 = vadd.f32 %v11170_v25, %v5166_v24  ;;  %v5168_v58 = vpop.f32.mrb[105].mxu1 }
 0x73d   :  { %v5338_v61 = vadd.f32 %v11175_v27, %v5168_v58  ;;  %v5170_v14 = vpop.f32.mrb[106].mxu1  ;;  %6036 = vmatprep.mubr.bf16.mxu0 %v5540_v12 }
 0x73e   :  { %v5339_v20 = vadd.f32 %v11170_v25, %v5170_v14  ;;  %v5172_v21 = vpop.f32.mrb[107].mxu1  ;;  %6037 = vmatmul.mubr.bf16.gmra.mrb[228].mxu0 %v5539_v11  ;;  %v5465_v28 = vmax.f32 %v5337_v13, 0.0 }
 0x73f   :  { %v5340_v26 = vadd.f32 %v11175_v27, %v5172_v21  ;;  %v5466_v19 = vmax.f32 %v5338_v61, 0.0 }
 0x740   :  { %v5467_v16 = vmax.f32 %v5339_v20, 0.0 }
 0x741   :  { %v5468_v18 = vmax.f32 %v5340_v26, 0.0 }
 0x742   :  { %v5541_v29 = vpack.c.bf16 %v5467_v16, %v5465_v28 }
 0x743   :  { %v5542_v23 = vpack.c.bf16 %v5468_v18, %v5466_v19  ;;  %v5176_v22 = vpop.f32.mrb[108].mxu1 }
 0x744   :  { %v5341_v17 = vadd.f32 %v11170_v25, %v5176_v22  ;;  %v5178_v31 = vpop.f32.mrb[109].mxu1 }
 0x745   :  { %v5342_v32 = vadd.f32 %v11175_v27, %v5178_v31  ;;  %v5180_v33 = vpop.f32.mrb[110].mxu1  ;;  %6046 = vmatprep.mubr.bf16.mxu0 %v5542_v23 }
 0x746   :  { %v5343_v34 = vadd.f32 %v11170_v25, %v5180_v33  ;;  %v5182_v35 = vpop.f32.mrb[111].mxu1  ;;  %6047 = vmatmul.mubr.bf16.gmra.mrb[232].mxu0 %v5541_v29  ;;  %v5469_v41 = vmax.f32 %v5341_v17, 0.0 }
 0x747   :  { %v5344_v38 = vadd.f32 %v11175_v27, %v5182_v35  ;;  %v5470_v45 = vmax.f32 %v5342_v32, 0.0 }
 0x748   :  { %v5471_v42 = vmax.f32 %v5343_v34, 0.0 }
 0x749   :  { %v5472_v46 = vmax.f32 %v5344_v38, 0.0  ;;  %v5788_v47 = vpop.f32.mrb[128].mxu0 }
 0x74a   :  { %v5543_v48 = vpack.c.bf16 %v5471_v42, %v5469_v41  ;;  %v5789_v49 = vadd.f32 %v5788_v47, %v11457_v37  ;;  %v5790_v50 = vpop.f32.mrb[129].mxu0  ;;  %v9217_v41 = vld [vmem:[%s12867_s1 + $0x980] ss:$8 sps:$4 sm:$0xff]   ;;  %v9219_v42 = vld [vmem:[%s12867_s1 + $0x984] ss:$8 sps:$4 sm:$0xff]  }
 0x74b   :  { %v5544_v51 = vpack.c.bf16 %v5472_v46, %v5470_v45  ;;  %v5791_v52 = vadd.f32 %v5790_v50, %v11463_v40  ;;  %v5186_v53 = vpop.f32.mrb[112].mxu1  ;;  %v5792_v54 = vpop.f32.mrb[130].mxu0  ;;  %7262 = vmatprep.subr.bf16.mxu1 %v9219_v42 }
 0x74c   :  { %v5345_v55 = vadd.f32 %v11170_v25, %v5186_v53  ;;  %v5793_v56 = vadd.f32 %v5792_v54, %v11457_v37  ;;  %v5188_v57 = vpop.f32.mrb[113].mxu1  ;;  %v5794_v59 = vpop.f32.mrb[131].mxu0  ;;  %v6107_v0 = vmax.f32 %v5789_v49, 0.0  ;;  %7263 = vmatpush1.bf16.msra.mxu1 %v9217_v41 }
 0x74d   :  { %v5346_v60 = vadd.f32 %v11175_v27, %v5188_v57  ;;  %v5795_v62 = vadd.f32 %v5794_v59, %v11463_v40  ;;  %v5190_v63 = vpop.f32.mrb[114].mxu1  ;;  %6056 = vmatprep.mubr.bf16.mxu0 %v5544_v51  ;;  %v6108_v4 = vmax.f32 %v5791_v52, 0.0 }
 0x74e   :  { %v6109_v1 = vmax.f32 %v5793_v56, 0.0  ;;  %v5347_v2 = vadd.f32 %v11170_v25, %v5190_v63  ;;  %v5192_v3 = vpop.f32.mrb[115].mxu1  ;;  %6057 = vmatmul.mubr.bf16.gmra.mrb[236].mxu0 %v5543_v48  ;;  %v5473_v7 = vmax.f32 %v5345_v55, 0.0 }
 0x74f   :  { %v6110_v5 = vmax.f32 %v5795_v62, 0.0  ;;  %v5348_v6 = vadd.f32 %v11175_v27, %v5192_v3  ;;  %v5474_v10 = vmax.f32 %v5346_v60, 0.0 }
 0x750   :  { %v11479_v9 = vpack.c.bf16 %v6109_v1, %v6107_v0  ;;  %v5475_v15 = vmax.f32 %v5347_v2, 0.0 }
 0x751   :  { %v11481_v11 = vpack.c.bf16 %v6110_v5, %v6108_v4  ;;  %v5476_v12 = vmax.f32 %v5348_v6, 0.0  ;;  %v5798_v24 = vpop.f32.mrb[132].mxu0 }
 0x752   :  { %v5545_v13 = vpack.c.bf16 %v5475_v15, %v5473_v7  ;;  %v5799_v58 = vadd.f32 %v5798_v24, %v11457_v37  ;;  %v5800_v61 = vpop.f32.mrb[133].mxu0 }
 0x753   :  { %v5546_v14 = vpack.c.bf16 %v5476_v12, %v5474_v10  ;;  %v5801_v20 = vadd.f32 %v5800_v61, %v11463_v40  ;;  %v5196_v21 = vpop.f32.mrb[116].mxu1  ;;  %v5802_v26 = vpop.f32.mrb[134].mxu0 }
 0x754   :  { %v5349_v28 = vadd.f32 %v11170_v25, %v5196_v21  ;;  %v5803_v16 = vadd.f32 %v5802_v26, %v11457_v37  ;;  %v5198_v19 = vpop.f32.mrb[117].mxu1  ;;  %v5804_v18 = vpop.f32.mrb[135].mxu0  ;;  %v6111_v22 = vmax.f32 %v5799_v58, 0.0 }
 0x755   :  { %v5350_v29 = vadd.f32 %v11175_v27, %v5198_v19  ;;  %v5805_v30 = vadd.f32 %v5804_v18, %v11463_v40  ;;  %v5200_v23 = vpop.f32.mrb[118].mxu1  ;;  %6066 = vmatprep.mubr.bf16.mxu0 %v5546_v14  ;;  %v6112_v33 = vmax.f32 %v5801_v20, 0.0 }
 0x756   :  { %v6113_v17 = vmax.f32 %v5803_v16, 0.0  ;;  %v5351_v31 = vadd.f32 %v11170_v25, %v5200_v23  ;;  %v5202_v32 = vpop.f32.mrb[119].mxu1  ;;  %6067 = vmatmul.mubr.bf16.gmra.mrb[240].mxu0 %v5545_v13  ;;  %v5477_v36 = vmax.f32 %v5349_v28, 0.0 }
 0x757   :  { %v6114_v34 = vmax.f32 %v5805_v30, 0.0  ;;  %v5352_v35 = vadd.f32 %v11175_v27, %v5202_v32  ;;  %v5478_v43 = vmax.f32 %v5350_v29, 0.0 }
 0x758   :  { %v11491_v38 = vpack.c.bf16 %v6113_v17, %v6111_v22  ;;  %v5479_v39 = vmax.f32 %v5351_v31, 0.0 }
 0x759   :  { %v11499_v44 = vpack.c.bf16 %v6114_v34, %v6112_v33  ;;  %v5480_v45 = vmax.f32 %v5352_v35, 0.0  ;;  %v5808_v46 = vpop.f32.mrb[136].mxu0 }
 0x75a   :  { %v5547_v47 = vpack.c.bf16 %v5479_v39, %v5477_v36  ;;  %v5809_v48 = vadd.f32 %v5808_v46, %v11457_v37  ;;  %v5810_v49 = vpop.f32.mrb[137].mxu0 }
 0x75b   :  { %v5548_v50 = vpack.c.bf16 %v5480_v45, %v5478_v43  ;;  %v5811_v51 = vadd.f32 %v5810_v49, %v11463_v40  ;;  %v5206_v52 = vpop.f32.mrb[120].mxu1  ;;  %v5812_v53 = vpop.f32.mrb[138].mxu0  ;;  %v9220_v43 = vld [vmem:[%s12867_s1 + $0x990] ss:$8 sps:$4 sm:$0xff]   ;;  %v9222_v45 = vld [vmem:[%s12867_s1 + $0x994] ss:$8 sps:$4 sm:$0xff]  }
 0x75c   :  { %v5353_v54 = vadd.f32 %v11170_v25, %v5206_v52  ;;  %v5813_v55 = vadd.f32 %v5812_v53, %v11457_v37  ;;  %v5208_v56 = vpop.f32.mrb[121].mxu1  ;;  %v5814_v57 = vpop.f32.mrb[139].mxu0  ;;  %v6115_v63 = vmax.f32 %v5809_v48, 0.0  ;;  %7264 = vmatprep.subr.bf16.mxu1 %v9222_v45 }
 0x75d   :  { %v5354_v59 = vadd.f32 %v11175_v27, %v5208_v56  ;;  %v5815_v60 = vadd.f32 %v5814_v57, %v11463_v40  ;;  %v5210_v62 = vpop.f32.mrb[122].mxu1  ;;  %6076 = vmatprep.mubr.bf16.mxu0 %v5548_v50  ;;  %v6116_v3 = vmax.f32 %v5811_v51, 0.0  ;;  %7265 = vmatpush1.bf16.msra.mxu1 %v9220_v43 }
 0x75e   :  { %v6117_v0 = vmax.f32 %v5813_v55, 0.0  ;;  %v5355_v1 = vadd.f32 %v11170_v25, %v5210_v62  ;;  %v5212_v2 = vpop.f32.mrb[123].mxu1  ;;  %6077 = vmatmul.mubr.bf16.gmra.mrb[244].mxu0 %v5547_v47  ;;  %v5481_v6 = vmax.f32 %v5353_v54, 0.0 }
 0x75f   :  { %v6118_v4 = vmax.f32 %v5815_v60, 0.0  ;;  %v5356_v5 = vadd.f32 %v11175_v27, %v5212_v2  ;;  %v5482_v10 = vmax.f32 %v5354_v59, 0.0 }
 0x760   :  { %v11509_v7 = vpack.c.bf16 %v6117_v0, %v6115_v63  ;;  %v5483_v15 = vmax.f32 %v5355_v1, 0.0 }
 0x761   :  { %v11511_v12 = vpack.c.bf16 %v6118_v4, %v6116_v3  ;;  %v5484_v24 = vmax.f32 %v5356_v5, 0.0  ;;  %v5818_v13 = vpop.f32.mrb[140].mxu0 }
 0x762   :  { %v5549_v58 = vpack.c.bf16 %v5483_v15, %v5481_v6  ;;  %v5819_v61 = vadd.f32 %v5818_v13, %v11457_v37  ;;  %v5820_v14 = vpop.f32.mrb[141].mxu0 }
 0x763   :  { %v5550_v20 = vpack.c.bf16 %v5484_v24, %v5482_v10  ;;  %v5821_v21 = vadd.f32 %v5820_v14, %v11463_v40  ;;  %v5216_v26 = vpop.f32.mrb[124].mxu1  ;;  %v5822_v28 = vpop.f32.mrb[142].mxu0  ;;  %v9223_v14 = vld [vmem:[%s12867_s1 + $0x9a0] ss:$8 sps:$4 sm:$0xff]  }
 0x764   :  { %v5357_v16 = vadd.f32 %v11170_v25, %v5216_v26  ;;  %v5823_v19 = vadd.f32 %v5822_v28, %v11457_v37  ;;  %v5218_v18 = vpop.f32.mrb[125].mxu1  ;;  %v5824_v29 = vpop.f32.mrb[143].mxu0  ;;  %v6119_v17 = vmax.f32 %v5819_v61, 0.0 }
 0x765   :  { %v5358_v30 = vadd.f32 %v11175_v27, %v5218_v18  ;;  %v5825_v23 = vadd.f32 %v5824_v29, %v11463_v40  ;;  %v5220_v22 = vpop.f32.mrb[126].mxu1  ;;  %6086 = vmatprep.mubr.bf16.mxu0 %v5550_v20  ;;  %v6120_v34 = vmax.f32 %v5821_v21, 0.0  ;;  %v9225_v20 = vld [vmem:[%s12867_s1 + $0x9a4] ss:$8 sps:$4 sm:$0xff]  }
 0x766   :  { %v6121_v31 = vmax.f32 %v5823_v19, 0.0  ;;  %v5359_v32 = vadd.f32 %v11170_v25, %v5220_v22  ;;  %v5222_v33 = vpop.f32.mrb[127].mxu1  ;;  %6087 = vmatmul.mubr.bf16.gmra.mrb[248].mxu0 %v5549_v58  ;;  %v5485_v39 = vmax.f32 %v5357_v16, 0.0  ;;  %7266 = vmatprep.subr.bf16.mxu1 %v9225_v20  ;;  %v9229_v20 = vld [vmem:[%s12867_s1 + $0x9c0] ss:$8 sps:$4 sm:$0xff]  }
 0x767   :  { %v6122_v35 = vmax.f32 %v5825_v23, 0.0  ;;  %v5360_v36 = vadd.f32 %v11175_v27, %v5222_v33  ;;  %v5486_v46 = vmax.f32 %v5358_v30, 0.0  ;;  %7267 = vmatpush1.bf16.msra.mxu1 %v9223_v14 }
 0x768   :  { %v11521_v41 = vpack.c.bf16 %v6121_v31, %v6119_v17  ;;  %v5487_v42 = vmax.f32 %v5359_v32, 0.0 }
 0x769   :  { %v11529_v25 = vpack.c.bf16 %v6122_v35, %v6120_v34  ;;  %v5488_v47 = vmax.f32 %v5360_v36, 0.0  ;;  %v5828_v48 = vpop.f32.mrb[144].mxu0 }
 0x76a   :  { %v5551_v49 = vpack.c.bf16 %v5487_v42, %v5485_v39  ;;  %v5829_v27 = vadd.f32 %v5828_v48, %v11457_v37  ;;  %v5830_v50 = vpop.f32.mrb[145].mxu0 }
 0x76b   :  { %v5552_v51 = vpack.c.bf16 %v5488_v47, %v5486_v46  ;;  %v5831_v52 = vadd.f32 %v5830_v50, %v11463_v40  ;;  %v5832_v53 = vpop.f32.mrb[146].mxu0 }
 0x76c   :  { %v5833_v54 = vadd.f32 %v5832_v53, %v11457_v37  ;;  %v5834_v55 = vpop.f32.mrb[147].mxu0  ;;  %v6123_v57 = vmax.f32 %v5829_v27, 0.0  ;;  %v9228_v27 = vld [vmem:[%s12867_s1 + $0x9b4] ss:$8 sps:$4 sm:$0xff]  }
 0x76d   :  { %v5835_v56 = vadd.f32 %v5834_v55, %v11463_v40  ;;  %6096 = vmatprep.mubr.bf16.mxu0 %v5552_v51  ;;  %v6124_v60 = vmax.f32 %v5831_v52, 0.0  ;;  %7268 = vmatprep.subr.bf16.mxu1 %v9228_v27  ;;  %v9232_v27 = vld [vmem:[%s12867_s1 + $0x9d0] ss:$8 sps:$4 sm:$0xff]  }
 0x76e   :  { %v6125_v59 = vmax.f32 %v5833_v54, 0.0  ;;  %6097 = vmatmul.mubr.bf16.gmra.mrb[252].mxu0 %v5551_v49  ;;  %v9226_v49 = vld [vmem:[%s12867_s1 + $0x9b0] ss:$8 sps:$4 sm:$0xff]  }
 0x76f   :  { %v6126_v62 = vmax.f32 %v5835_v56, 0.0  ;;  %6532 = vmatprep.mubr.bf16.mxu0 %v11481_v11  ;;  %7269 = vmatpush1.bf16.msra.mxu1 %v9226_v49 }
 0x770   :  { %v11536_v63 = vpack.c.bf16 %v6125_v59, %v6123_v57 }
 0x771   :  { %v11538_v0 = vpack.c.bf16 %v6126_v62, %v6124_v60  ;;  %v5838_v1 = vpop.f32.mrb[148].mxu0 }
 0x772   :  { %v5839_v2 = vadd.f32 %v5838_v1, %v11457_v37  ;;  %v5840_v3 = vpop.f32.mrb[149].mxu0 }
 0x773   :  { %v5841_v4 = vadd.f32 %v5840_v3, %v11463_v40  ;;  %v5842_v5 = vpop.f32.mrb[150].mxu0 }
 0x774   :  { %v5843_v6 = vadd.f32 %v5842_v5, %v11457_v37  ;;  %v5844_v15 = vpop.f32.mrb[151].mxu0  ;;  %v6127_v24 = vmax.f32 %v5839_v2, 0.0 }
 0x775   :  { %v5845_v10 = vadd.f32 %v5844_v15, %v11463_v40  ;;  %v6128_v11 = vmax.f32 %v5841_v4, 0.0 }
 0x776   :  { %v6129_v13 = vmax.f32 %v5843_v6, 0.0  ;;  %6533 = vmatmul.mubr.bf16.vlgmr.msra.gmra.mrb[0].mxu0 %v11479_v9 }
 0x777   :  { %v6130_v58 = vmax.f32 %v5845_v10, 0.0  ;;  %6542 = vmatprep.mubr.bf16.mxu0 %v11499_v44 }
 0x778   :  { %v11546_v61 = vpack.c.bf16 %v6129_v13, %v6127_v24 }
 0x779   :  { %v11554_v21 = vpack.c.bf16 %v6130_v58, %v6128_v11  ;;  %v5848_v26 = vpop.f32.mrb[152].mxu0 }
 0x77a   :  { %v5849_v28 = vadd.f32 %v5848_v26, %v11457_v37  ;;  %v5850_v9 = vpop.f32.mrb[153].mxu0  ;;  %v9231_v26 = vld [vmem:[%s12867_s1 + $0x9c4] ss:$8 sps:$4 sm:$0xff]  }
 0x77b   :  { %v5851_v16 = vadd.f32 %v5850_v9, %v11463_v40  ;;  %v5852_v44 = vpop.f32.mrb[154].mxu0  ;;  %7270 = vmatprep.subr.bf16.mxu1 %v9231_v26  ;;  %v9235_v26 = vld [vmem:[%s12867_s1 + $0x9e0] ss:$8 sps:$4 sm:$0xff]  }
 0x77c   :  { %v5853_v19 = vadd.f32 %v5852_v44, %v11457_v37  ;;  %v5854_v18 = vpop.f32.mrb[155].mxu0  ;;  %v6131_v30 = vmax.f32 %v5849_v28, 0.0  ;;  %7271 = vmatpush1.bf16.msra.mxu1 %v9229_v20 }
 0x77d   :  { %v5855_v29 = vadd.f32 %v5854_v18, %v11463_v40  ;;  %v6132_v22 = vmax.f32 %v5851_v16, 0.0 }
 0x77e   :  { %v6133_v23 = vmax.f32 %v5853_v19, 0.0  ;;  %6543 = vmatmul.mubr.bf16.gmra.mrb[4].mxu0 %v11491_v38 }
 0x77f   :  { %v6134_v17 = vmax.f32 %v5855_v29, 0.0  ;;  %6552 = vmatprep.mubr.bf16.mxu0 %v11511_v12 }
 0x780   :  { %v11562_v31 = vpack.c.bf16 %v6133_v23, %v6131_v30 }
 0x781   :  { %v11564_v32 = vpack.c.bf16 %v6134_v17, %v6132_v22  ;;  %v5858_v33 = vpop.f32.mrb[156].mxu0 }
 0x782   :  { %v5859_v34 = vadd.f32 %v5858_v33, %v11457_v37  ;;  %v5860_v35 = vpop.f32.mrb[157].mxu0 }
 0x783   :  { %v5861_v36 = vadd.f32 %v5860_v35, %v11463_v40  ;;  %v5862_v39 = vpop.f32.mrb[158].mxu0 }
 0x784   :  { %v5863_v42 = vadd.f32 %v5862_v39, %v11457_v37  ;;  %v5864_v43 = vpop.f32.mrb[159].mxu0  ;;  %v6135_v45 = vmax.f32 %v5859_v34, 0.0 }
 0x785   :  { %v5865_v38 = vadd.f32 %v5864_v43, %v11463_v40  ;;  %v6136_v12 = vmax.f32 %v5861_v36, 0.0 }
 0x786   :  { %v6137_v46 = vmax.f32 %v5863_v42, 0.0  ;;  %6553 = vmatmul.mubr.bf16.gmra.mrb[8].mxu0 %v11509_v7 }
 0x787   :  { %v6138_v47 = vmax.f32 %v5865_v38, 0.0  ;;  %6562 = vmatprep.mubr.bf16.mxu0 %v11529_v25 }
 0x788   :  { %v11572_v48 = vpack.c.bf16 %v6137_v46, %v6135_v45 }
 0x789   :  { %v11580_v50 = vpack.c.bf16 %v6138_v47, %v6136_v12  ;;  %v5868_v51 = vpop.f32.mrb[160].mxu0 }
 0x78a   :  { %v5869_v52 = vadd.f32 %v5868_v51, %v11457_v37  ;;  %v5870_v7 = vpop.f32.mrb[161].mxu0  ;;  %v9234_v51 = vld [vmem:[%s12867_s1 + $0x9d4] ss:$8 sps:$4 sm:$0xff]  }
 0x78b   :  { %v5871_v53 = vadd.f32 %v5870_v7, %v11463_v40  ;;  %v5872_v25 = vpop.f32.mrb[162].mxu0  ;;  %7272 = vmatprep.subr.bf16.mxu1 %v9234_v51  ;;  %v9238_v51 = vld [vmem:[%s12867_s1 + $0x9f0] ss:$8 sps:$4 sm:$0xff]  }
 0x78c   :  { %v5873_v54 = vadd.f32 %v5872_v25, %v11457_v37  ;;  %v5874_v55 = vpop.f32.mrb[163].mxu0  ;;  %v6139_v57 = vmax.f32 %v5869_v52, 0.0  ;;  %7273 = vmatpush1.bf16.msra.mxu1 %v9232_v27 }
 0x78d   :  { %v5875_v56 = vadd.f32 %v5874_v55, %v11463_v40  ;;  %v6140_v60 = vmax.f32 %v5871_v53, 0.0 }
 0x78e   :  { %v6141_v59 = vmax.f32 %v5873_v54, 0.0  ;;  %6563 = vmatmul.mubr.bf16.gmra.mrb[12].mxu0 %v11521_v41 }
 0x78f   :  { %v6142_v62 = vmax.f32 %v5875_v56, 0.0  ;;  %6572 = vmatprep.mubr.bf16.mxu0 %v11538_v0 }
 0x790   :  { %v11588_v1 = vpack.c.bf16 %v6141_v59, %v6139_v57 }
 0x791   :  { %v11590_v2 = vpack.c.bf16 %v6142_v62, %v6140_v60  ;;  %v5878_v3 = vpop.f32.mrb[164].mxu0 }
 0x792   :  { %v5879_v4 = vadd.f32 %v5878_v3, %v11457_v37  ;;  %v5880_v5 = vpop.f32.mrb[165].mxu0 }
 0x793   :  { %v5881_v6 = vadd.f32 %v5880_v5, %v11463_v40  ;;  %v5882_v15 = vpop.f32.mrb[166].mxu0 }
 0x794   :  { %v5883_v10 = vadd.f32 %v5882_v15, %v11457_v37  ;;  %v5884_v24 = vpop.f32.mrb[167].mxu0  ;;  %v6143_v13 = vmax.f32 %v5879_v4, 0.0 }
 0x795   :  { %v5885_v41 = vadd.f32 %v5884_v24, %v11463_v40  ;;  %v6144_v0 = vmax.f32 %v5881_v6, 0.0 }
 0x796   :  { %v6145_v11 = vmax.f32 %v5883_v10, 0.0  ;;  %6573 = vmatmul.mubr.bf16.gmra.mrb[16].mxu0 %v11536_v63 }
 0x797   :  { %v6146_v58 = vmax.f32 %v5885_v41, 0.0  ;;  %6582 = vmatprep.mubr.bf16.mxu0 %v11554_v21 }
 0x798   :  { %v11598_v14 = vpack.c.bf16 %v6145_v11, %v6143_v13 }
 0x799   :  { %v11606_v28 = vpack.c.bf16 %v6146_v58, %v6144_v0  ;;  %v5888_v9 = vpop.f32.mrb[168].mxu0 }
 0x79a   :  { %v5889_v16 = vadd.f32 %v5888_v9, %v11457_v37  ;;  %v5890_v63 = vpop.f32.mrb[169].mxu0  ;;  %v9237_v9 = vld [vmem:[%s12867_s1 + $0x9e4] ss:$8 sps:$4 sm:$0xff]  }
 0x79b   :  { %v5891_v44 = vadd.f32 %v5890_v63, %v11463_v40  ;;  %v5892_v21 = vpop.f32.mrb[170].mxu0  ;;  %7274 = vmatprep.subr.bf16.mxu1 %v9237_v9 }
 0x79c   :  { %v5893_v19 = vadd.f32 %v5892_v21, %v11457_v37  ;;  %v5894_v18 = vpop.f32.mrb[171].mxu0  ;;  %v6147_v30 = vmax.f32 %v5889_v16, 0.0  ;;  %7275 = vmatpush1.bf16.msra.mxu1 %v9235_v26 }
 0x79d   :  { %v5895_v29 = vadd.f32 %v5894_v18, %v11463_v40  ;;  %v6148_v22 = vmax.f32 %v5891_v44, 0.0 }
 0x79e   :  { %v6149_v23 = vmax.f32 %v5893_v19, 0.0  ;;  %6583 = vmatmul.mubr.bf16.gmra.mrb[20].mxu0 %v11546_v61 }
 0x79f   :  { %v6150_v17 = vmax.f32 %v5895_v29, 0.0  ;;  %6592 = vmatprep.mubr.bf16.mxu0 %v11564_v32 }
 0x7a0   :  { %v11614_v33 = vpack.c.bf16 %v6149_v23, %v6147_v30 }
 0x7a1   :  { %v11616_v34 = vpack.c.bf16 %v6150_v17, %v6148_v22  ;;  %v5898_v35 = vpop.f32.mrb[172].mxu0 }
 0x7a2   :  { %v5899_v36 = vadd.f32 %v5898_v35, %v11457_v37  ;;  %v5900_v39 = vpop.f32.mrb[173].mxu0 }
 0x7a3   :  { %v5901_v42 = vadd.f32 %v5900_v39, %v11463_v40  ;;  %v5902_v43 = vpop.f32.mrb[174].mxu0 }
 0x7a4   :  { %v5903_v38 = vadd.f32 %v5902_v43, %v11457_v37  ;;  %v5904_v45 = vpop.f32.mrb[175].mxu0  ;;  %v6151_v46 = vmax.f32 %v5899_v36, 0.0 }
 0x7a5   :  { %v5905_v61 = vadd.f32 %v5904_v45, %v11463_v40  ;;  %v6152_v32 = vmax.f32 %v5901_v42, 0.0 }
 0x7a6   :  { %v6153_v12 = vmax.f32 %v5903_v38, 0.0  ;;  %6593 = vmatmul.mubr.bf16.gmra.mrb[24].mxu0 %v11562_v31 }
 0x7a7   :  { %v6154_v47 = vmax.f32 %v5905_v61, 0.0  ;;  %6602 = vmatprep.mubr.bf16.mxu0 %v11580_v50 }
 0x7a8   :  { %v11624_v49 = vpack.c.bf16 %v6153_v12, %v6151_v46 }
 0x7a9   :  { %v11632_v52 = vpack.c.bf16 %v6154_v47, %v6152_v32  ;;  %v5908_v7 = vpop.f32.mrb[176].mxu0 }
 0x7aa   :  { %v5909_v53 = vadd.f32 %v5908_v7, %v11457_v37  ;;  %v5910_v31 = vpop.f32.mrb[177].mxu0  ;;  %v9240_v7 = vld [vmem:[%s12867_s1 + $0x9f4] ss:$8 sps:$4 sm:$0xff]  }
 0x7ab   :  { %v5911_v25 = vadd.f32 %v5910_v31, %v11463_v40  ;;  %v5912_v50 = vpop.f32.mrb[178].mxu0  ;;  %7276 = vmatprep.subr.bf16.mxu1 %v9240_v7 }
 0x7ac   :  { %v5913_v54 = vadd.f32 %v5912_v50, %v11457_v37  ;;  %v5914_v55 = vpop.f32.mrb[179].mxu0  ;;  %v6155_v57 = vmax.f32 %v5909_v53, 0.0  ;;  %7277 = vmatpush1.bf16.msra.mxu1 %v9238_v51 }
 0x7ad   :  { %v5915_v56 = vadd.f32 %v5914_v55, %v11463_v40  ;;  %v6156_v60 = vmax.f32 %v5911_v25, 0.0 }
 0x7ae   :  { %v6157_v59 = vmax.f32 %v5913_v54, 0.0  ;;  %6603 = vmatmul.mubr.bf16.gmra.mrb[28].mxu0 %v11572_v48 }
 0x7af   :  { %v6158_v62 = vmax.f32 %v5915_v56, 0.0  ;;  %6612 = vmatprep.mubr.bf16.mxu0 %v11590_v2 }
 0x7b0   :  { %v11640_v3 = vpack.c.bf16 %v6157_v59, %v6155_v57 }
 0x7b1   :  { %v11642_v4 = vpack.c.bf16 %v6158_v62, %v6156_v60  ;;  %v5918_v5 = vpop.f32.mrb[180].mxu0 }
 0x7b2   :  { %v5919_v6 = vadd.f32 %v5918_v5, %v11457_v37  ;;  %v5920_v15 = vpop.f32.mrb[181].mxu0 }
 0x7b3   :  { %v5921_v10 = vadd.f32 %v5920_v15, %v11463_v40  ;;  %v5922_v24 = vpop.f32.mrb[182].mxu0 }
 0x7b4   :  { %v5923_v41 = vadd.f32 %v5922_v24, %v11457_v37  ;;  %v5924_v13 = vpop.f32.mrb[183].mxu0  ;;  %v6159_v11 = vmax.f32 %v5919_v6, 0.0 }
 0x7b5   :  { %v5925_v48 = vadd.f32 %v5924_v13, %v11463_v40  ;;  %v6160_v2 = vmax.f32 %v5921_v10, 0.0 }
 0x7b6   :  { %v6161_v0 = vmax.f32 %v5923_v41, 0.0  ;;  %6613 = vmatmul.mubr.bf16.gmra.mrb[32].mxu0 %v11588_v1 }
 0x7b7   :  { %v6162_v58 = vmax.f32 %v5925_v48, 0.0  ;;  %6622 = vmatprep.mubr.bf16.mxu0 %v11606_v28 }
 0x7b8   :  { %v11650_v20 = vpack.c.bf16 %v6161_v0, %v6159_v11 }
 0x7b9   :  { %v11658_v16 = vpack.c.bf16 %v6162_v58, %v6160_v2  ;;  %v5928_v63 = vpop.f32.mrb[184].mxu0 }
 0x7ba   :  { %v5929_v44 = vadd.f32 %v5928_v63, %v11457_v37  ;;  %v5930_v1 = vpop.f32.mrb[185].mxu0 }
 0x7bb   :  { %v5931_v21 = vadd.f32 %v5930_v1, %v11463_v40  ;;  %v5932_v28 = vpop.f32.mrb[186].mxu0 }
 0x7bc   :  { %v5933_v19 = vadd.f32 %v5932_v28, %v11457_v37  ;;  %v5934_v18 = vpop.f32.mrb[187].mxu0  ;;  %v6163_v30 = vmax.f32 %v5929_v44, 0.0 }
 0x7bd   :  { %v5935_v29 = vadd.f32 %v5934_v18, %v11463_v40  ;;  %v6164_v22 = vmax.f32 %v5931_v21, 0.0 }
 0x7be   :  { %v6165_v23 = vmax.f32 %v5933_v19, 0.0  ;;  %6623 = vmatmul.mubr.bf16.gmra.mrb[36].mxu0 %v11598_v14 }
 0x7bf   :  { %v6166_v17 = vmax.f32 %v5935_v29, 0.0  ;;  %6632 = vmatprep.mubr.bf16.mxu0 %v11616_v34 }
 0x7c0   :  { %v11666_v35 = vpack.c.bf16 %v6165_v23, %v6163_v30 }
 0x7c1   :  { %v11668_v36 = vpack.c.bf16 %v6166_v17, %v6164_v22  ;;  %v5938_v39 = vpop.f32.mrb[188].mxu0 }
 0x7c2   :  { %v5939_v42 = vadd.f32 %v5938_v39, %v11457_v37  ;;  %v5940_v43 = vpop.f32.mrb[189].mxu0 }
 0x7c3   :  { %v5941_v38 = vadd.f32 %v5940_v43, %v11463_v40  ;;  %v5942_v45 = vpop.f32.mrb[190].mxu0 }
 0x7c4   :  { %v5943_v61 = vadd.f32 %v5942_v45, %v11457_v37  ;;  %v5944_v46 = vpop.f32.mrb[191].mxu0  ;;  %v6167_v12 = vmax.f32 %v5939_v42, 0.0 }
 0x7c5   :  { %v5945_v14 = vadd.f32 %v5944_v46, %v11463_v40  ;;  %v6168_v34 = vmax.f32 %v5941_v38, 0.0 }
 0x7c6   :  { %v6169_v32 = vmax.f32 %v5943_v61, 0.0  ;;  %6633 = vmatmul.mubr.bf16.gmra.mrb[40].mxu0 %v11614_v33 }
 0x7c7   :  { %v6170_v47 = vmax.f32 %v5945_v14, 0.0  ;;  %6642 = vmatprep.mubr.bf16.mxu0 %v11632_v52 }
 0x7c8   :  { %v11676_v27 = vpack.c.bf16 %v6169_v32, %v6167_v12 }
 0x7c9   :  { %v11684_v53 = vpack.c.bf16 %v6170_v47, %v6168_v34  ;;  %v5948_v31 = vpop.f32.mrb[192].mxu0 }
 0x7ca   :  { %v5949_v25 = vadd.f32 %v5948_v31, %v11457_v37  ;;  %v5950_v33 = vpop.f32.mrb[193].mxu0 }
 0x7cb   :  { %v5951_v50 = vadd.f32 %v5950_v33, %v11463_v40  ;;  %v5952_v52 = vpop.f32.mrb[194].mxu0 }
 0x7cc   :  { %v5953_v54 = vadd.f32 %v5952_v52, %v11457_v37  ;;  %v5954_v55 = vpop.f32.mrb[195].mxu0  ;;  %v6171_v57 = vmax.f32 %v5949_v25, 0.0 }
 0x7cd   :  { %v5955_v56 = vadd.f32 %v5954_v55, %v11463_v40  ;;  %v6172_v60 = vmax.f32 %v5951_v50, 0.0 }
 0x7ce   :  { %v6173_v59 = vmax.f32 %v5953_v54, 0.0  ;;  %6643 = vmatmul.mubr.bf16.gmra.mrb[44].mxu0 %v11624_v49 }
 0x7cf   :  { %v6174_v62 = vmax.f32 %v5955_v56, 0.0  ;;  %6652 = vmatprep.mubr.bf16.mxu0 %v11642_v4 }
 0x7d0   :  { %v11692_v5 = vpack.c.bf16 %v6173_v59, %v6171_v57 }
 0x7d1   :  { %v6268_v6 = vpack.c.bf16 %v6174_v62, %v6172_v60  ;;  %v5958_v15 = vpop.f32.mrb[196].mxu0 }
 0x7d2   :  { %v5959_v10 = vadd.f32 %v5958_v15, %v11457_v37  ;;  %v5960_v24 = vpop.f32.mrb[197].mxu0 }
 0x7d3   :  { %v5961_v41 = vadd.f32 %v5960_v24, %v11463_v40  ;;  %v5962_v13 = vpop.f32.mrb[198].mxu0 }
 0x7d4   :  { %v5963_v48 = vadd.f32 %v5962_v13, %v11457_v37  ;;  %v5964_v11 = vpop.f32.mrb[199].mxu0  ;;  %v6175_v49 = vmax.f32 %v5959_v10, 0.0 }
 0x7d5   :  { %v5965_v0 = vadd.f32 %v5964_v11, %v11463_v40  ;;  %v6176_v4 = vmax.f32 %v5961_v41, 0.0 }
 0x7d6   :  { %v6177_v2 = vmax.f32 %v5963_v48, 0.0  ;;  %6653 = vmatmul.mubr.bf16.gmra.mrb[48].mxu0 %v11640_v3 }
 0x7d7   :  { %v6178_v58 = vmax.f32 %v5965_v0, 0.0  ;;  %6662 = vmatprep.mubr.bf16.mxu0 %v11658_v16 }
 0x7d8   :  { %v11700_v26 = vpack.c.bf16 %v6177_v2, %v6175_v49 }
 0x7d9   :  { %v6270_v9 = vpack.c.bf16 %v6178_v58, %v6176_v4  ;;  %v5968_v63 = vpop.f32.mrb[200].mxu0 }
 0x7da   :  { %v5969_v44 = vadd.f32 %v5968_v63, %v11457_v37  ;;  %v5970_v1 = vpop.f32.mrb[201].mxu0 }
 0x7db   :  { %v5971_v21 = vadd.f32 %v5970_v1, %v11463_v40  ;;  %v5972_v28 = vpop.f32.mrb[202].mxu0 }
 0x7dc   :  { %v5973_v19 = vadd.f32 %v5972_v28, %v11457_v37  ;;  %v5974_v18 = vpop.f32.mrb[203].mxu0  ;;  %v6179_v3 = vmax.f32 %v5969_v44, 0.0 }
 0x7dd   :  { %v5975_v29 = vadd.f32 %v5974_v18, %v11463_v40  ;;  %v6180_v16 = vmax.f32 %v5971_v21, 0.0 }
 0x7de   :  { %v6181_v30 = vmax.f32 %v5973_v19, 0.0  ;;  %6663 = vmatmul.mubr.bf16.gmra.mrb[52].mxu0 %v11650_v20 }
 0x7df   :  { %v6182_v23 = vmax.f32 %v5975_v29, 0.0  ;;  %6672 = vmatprep.mubr.bf16.mxu0 %v11668_v36 }
 0x7e0   :  { %v11708_v22 = vpack.c.bf16 %v6181_v30, %v6179_v3 }
 0x7e1   :  { %v6272_v17 = vpack.c.bf16 %v6182_v23, %v6180_v16  ;;  %v5978_v39 = vpop.f32.mrb[204].mxu0 }
 0x7e2   :  { %v5979_v42 = vadd.f32 %v5978_v39, %v11457_v37  ;;  %v5980_v43 = vpop.f32.mrb[205].mxu0 }
 0x7e3   :  { %v5981_v38 = vadd.f32 %v5980_v43, %v11463_v40  ;;  %v5982_v45 = vpop.f32.mrb[206].mxu0 }
 0x7e4   :  { %v5983_v61 = vadd.f32 %v5982_v45, %v11457_v37  ;;  %v5984_v46 = vpop.f32.mrb[207].mxu0  ;;  %v6183_v20 = vmax.f32 %v5979_v42, 0.0 }
 0x7e5   :  { %v5985_v14 = vadd.f32 %v5984_v46, %v11463_v40  ;;  %v6184_v36 = vmax.f32 %v5981_v38, 0.0 }
 0x7e6   :  { %v6185_v12 = vmax.f32 %v5983_v61, 0.0  ;;  %6673 = vmatmul.mubr.bf16.gmra.mrb[56].mxu0 %v11666_v35 }
 0x7e7   :  { %v6186_v32 = vmax.f32 %v5985_v14, 0.0  ;;  %6682 = vmatprep.mubr.bf16.mxu0 %v11684_v53 }
 0x7e8   :  { %v11716_v34 = vpack.c.bf16 %v6185_v12, %v6183_v20 }
 0x7e9   :  { %v6274_v47 = vpack.c.bf16 %v6186_v32, %v6184_v36  ;;  %v5988_v51 = vpop.f32.mrb[208].mxu0 }
 0x7ea   :  { %v5989_v7 = vadd.f32 %v5988_v51, %v11457_v37  ;;  %v5990_v31 = vpop.f32.mrb[209].mxu0 }
 0x7eb   :  { %v5991_v25 = vadd.f32 %v5990_v31, %v11463_v40  ;;  %v5992_v33 = vpop.f32.mrb[210].mxu0 }
 0x7ec   :  { %v5993_v50 = vadd.f32 %v5992_v33, %v11457_v37  ;;  %v5994_v52 = vpop.f32.mrb[211].mxu0  ;;  %v6187_v35 = vmax.f32 %v5989_v7, 0.0 }
 0x7ed   :  { %v5995_v54 = vadd.f32 %v5994_v52, %v11463_v40  ;;  %v6188_v53 = vmax.f32 %v5991_v25, 0.0 }
 0x7ee   :  { %v6189_v55 = vmax.f32 %v5993_v50, 0.0  ;;  %6683 = vmatmul.mubr.bf16.gmra.mrb[60].mxu0 %v11676_v27 }
 0x7ef   :  { %v6190_v56 = vmax.f32 %v5995_v54, 0.0  ;;  %6692 = vmatprep.mubr.bf16.mxu0 %v6268_v6 }
 0x7f0   :  { %v11723_v57 = vpack.c.bf16 %v6189_v55, %v6187_v35 }
 0x7f1   :  { %v6276_v59 = vpack.c.bf16 %v6190_v56, %v6188_v53  ;;  %v5998_v60 = vpop.f32.mrb[212].mxu0 }
 0x7f2   :  { %v5999_v62 = vadd.f32 %v5998_v60, %v11457_v37  ;;  %v6000_v15 = vpop.f32.mrb[213].mxu0 }
 0x7f3   :  { %v6001_v10 = vadd.f32 %v6000_v15, %v11463_v40  ;;  %v6002_v24 = vpop.f32.mrb[214].mxu0 }
 0x7f4   :  { %v6003_v41 = vadd.f32 %v6002_v24, %v11457_v37  ;;  %v6004_v13 = vpop.f32.mrb[215].mxu0  ;;  %v6191_v11 = vmax.f32 %v5999_v62, 0.0 }
 0x7f5   :  { %v6005_v48 = vadd.f32 %v6004_v13, %v11463_v40  ;;  %v6192_v6 = vmax.f32 %v6001_v10, 0.0 }
 0x7f6   :  { %v6193_v27 = vmax.f32 %v6003_v41, 0.0  ;;  %6693 = vmatmul.mubr.bf16.gmra.mrb[64].mxu0 %v11692_v5 }
 0x7f7   :  { %v6194_v0 = vmax.f32 %v6005_v48, 0.0  ;;  %6702 = vmatprep.mubr.bf16.mxu0 %v6270_v9 }
 0x7f8   :  { %v11730_v49 = vpack.c.bf16 %v6193_v27, %v6191_v11 }
 0x7f9   :  { %v6278_v2 = vpack.c.bf16 %v6194_v0, %v6192_v6  ;;  %v6008_v4 = vpop.f32.mrb[216].mxu0 }
 0x7fa   :  { %v6009_v58 = vadd.f32 %v6008_v4, %v11457_v37  ;;  %v6010_v63 = vpop.f32.mrb[217].mxu0 }
 0x7fb   :  { %v6011_v44 = vadd.f32 %v6010_v63, %v11463_v40  ;;  %v6012_v1 = vpop.f32.mrb[218].mxu0 }
 0x7fc   :  { %v6013_v21 = vadd.f32 %v6012_v1, %v11457_v37  ;;  %v6014_v28 = vpop.f32.mrb[219].mxu0  ;;  %v6195_v18 = vmax.f32 %v6009_v58, 0.0 }
 0x7fd   :  { %v6015_v19 = vadd.f32 %v6014_v28, %v11463_v40  ;;  %v6196_v9 = vmax.f32 %v6011_v44, 0.0 }
 0x7fe   :  { %v6197_v5 = vmax.f32 %v6013_v21, 0.0  ;;  %6703 = vmatmul.mubr.bf16.gmra.mrb[68].mxu0 %v11700_v26 }
 0x7ff   :  { %v6198_v29 = vmax.f32 %v6015_v19, 0.0  ;;  %6712 = vmatprep.mubr.bf16.mxu0 %v6272_v17 }
 0x800   :  { %v11737_v3 = vpack.c.bf16 %v6197_v5, %v6195_v18 }
 0x801   :  { %v6280_v30 = vpack.c.bf16 %v6198_v29, %v6196_v9  ;;  %v6018_v16 = vpop.f32.mrb[220].mxu0 }
 0x802   :  { %v6019_v23 = vadd.f32 %v6018_v16, %v11457_v37  ;;  %v6020_v39 = vpop.f32.mrb[221].mxu0 }
 0x803   :  { %v6021_v42 = vadd.f32 %v6020_v39, %v11463_v40  ;;  %v6022_v43 = vpop.f32.mrb[222].mxu0 }
 0x804   :  { %v6023_v38 = vadd.f32 %v6022_v43, %v11457_v37  ;;  %v6024_v45 = vpop.f32.mrb[223].mxu0  ;;  %v6199_v46 = vmax.f32 %v6019_v23, 0.0 }
 0x805   :  { %v6025_v61 = vadd.f32 %v6024_v45, %v11463_v40  ;;  %v6200_v17 = vmax.f32 %v6021_v42, 0.0 }
 0x806   :  { %v6201_v26 = vmax.f32 %v6023_v38, 0.0  ;;  %6713 = vmatmul.mubr.bf16.gmra.mrb[72].mxu0 %v11708_v22 }
 0x807   :  { %v6202_v14 = vmax.f32 %v6025_v61, 0.0  ;;  %6722 = vmatprep.mubr.bf16.mxu0 %v6274_v47 }
 0x808   :  { %v11744_v20 = vpack.c.bf16 %v6201_v26, %v6199_v46 }
 0x809   :  { %v6282_v12 = vpack.c.bf16 %v6202_v14, %v6200_v17  ;;  %v6028_v36 = vpop.f32.mrb[224].mxu0 }
 0x80a   :  { %v6029_v32 = vadd.f32 %v6028_v36, %v11457_v37  ;;  %v6030_v51 = vpop.f32.mrb[225].mxu0 }
 0x80b   :  { %v6031_v7 = vadd.f32 %v6030_v51, %v11463_v40  ;;  %v6032_v31 = vpop.f32.mrb[226].mxu0 }
 0x80c   :  { %v6033_v25 = vadd.f32 %v6032_v31, %v11457_v37  ;;  %v6034_v33 = vpop.f32.mrb[227].mxu0  ;;  %v6203_v52 = vmax.f32 %v6029_v32, 0.0 }
 0x80d   :  { %v6035_v50 = vadd.f32 %v6034_v33, %v11463_v40  ;;  %v6204_v47 = vmax.f32 %v6031_v7, 0.0 }
 0x80e   :  { %v6205_v22 = vmax.f32 %v6033_v25, 0.0  ;;  %6723 = vmatmul.mubr.bf16.gmra.mrb[76].mxu0 %v11716_v34 }
 0x80f   :  { %v6206_v54 = vmax.f32 %v6035_v50, 0.0  ;;  %6732 = vmatprep.mubr.bf16.mxu0 %v6276_v59 }
 0x810   :  { %v11751_v35 = vpack.c.bf16 %v6205_v22, %v6203_v52 }
 0x811   :  { %v6284_v55 = vpack.c.bf16 %v6206_v54, %v6204_v47  ;;  %v6038_v53 = vpop.f32.mrb[228].mxu0 }
 0x812   :  { %v6039_v56 = vadd.f32 %v6038_v53, %v11457_v37  ;;  %v6040_v60 = vpop.f32.mrb[229].mxu0 }
 0x813   :  { %v6041_v62 = vadd.f32 %v6040_v60, %v11463_v40  ;;  %v6042_v15 = vpop.f32.mrb[230].mxu0 }
 0x814   :  { %v6043_v10 = vadd.f32 %v6042_v15, %v11457_v37  ;;  %v6044_v24 = vpop.f32.mrb[231].mxu0  ;;  %v6207_v13 = vmax.f32 %v6039_v56, 0.0 }
 0x815   :  { %v6045_v41 = vadd.f32 %v6044_v24, %v11463_v40  ;;  %v6208_v59 = vmax.f32 %v6041_v62, 0.0 }
 0x816   :  { %v6209_v34 = vmax.f32 %v6043_v10, 0.0  ;;  %6733 = vmatmul.mubr.bf16.gmra.mrb[80].mxu0 %v11723_v57 }
 0x817   :  { %v6210_v48 = vmax.f32 %v6045_v41, 0.0  ;;  %6742 = vmatprep.mubr.bf16.mxu0 %v6278_v2 }
 0x818   :  { %v11758_v11 = vpack.c.bf16 %v6209_v34, %v6207_v13 }
 0x819   :  { %v6286_v27 = vpack.c.bf16 %v6210_v48, %v6208_v59  ;;  %v6048_v6 = vpop.f32.mrb[232].mxu0 }
 0x81a   :  { %v6049_v0 = vadd.f32 %v6048_v6, %v11457_v37  ;;  %v6050_v4 = vpop.f32.mrb[233].mxu0 }
 0x81b   :  { %v6051_v58 = vadd.f32 %v6050_v4, %v11463_v40  ;;  %v6052_v63 = vpop.f32.mrb[234].mxu0 }
 0x81c   :  { %v6053_v44 = vadd.f32 %v6052_v63, %v11457_v37  ;;  %v6054_v1 = vpop.f32.mrb[235].mxu0  ;;  %v6211_v28 = vmax.f32 %v6049_v0, 0.0 }
 0x81d   :  { %v6055_v21 = vadd.f32 %v6054_v1, %v11463_v40  ;;  %v6212_v2 = vmax.f32 %v6051_v58, 0.0 }
 0x81e   :  { %v6213_v57 = vmax.f32 %v6053_v44, 0.0  ;;  %6743 = vmatmul.mubr.bf16.gmra.mrb[84].mxu0 %v11730_v49 }
 0x81f   :  { %v6214_v19 = vmax.f32 %v6055_v21, 0.0  ;;  %6752 = vmatprep.mubr.bf16.mxu0 %v6280_v30 }
 0x820   :  { %v11765_v18 = vpack.c.bf16 %v6213_v57, %v6211_v28 }
 0x821   :  { %v6288_v5 = vpack.c.bf16 %v6214_v19, %v6212_v2  ;;  %v6058_v9 = vpop.f32.mrb[236].mxu0 }
 0x822   :  { %v6059_v29 = vadd.f32 %v6058_v9, %v11457_v37  ;;  %v6060_v16 = vpop.f32.mrb[237].mxu0 }
 0x823   :  { %v6061_v23 = vadd.f32 %v6060_v16, %v11463_v40  ;;  %v6062_v39 = vpop.f32.mrb[238].mxu0 }
 0x824   :  { %v6063_v42 = vadd.f32 %v6062_v39, %v11457_v37  ;;  %v6064_v43 = vpop.f32.mrb[239].mxu0  ;;  %v6215_v45 = vmax.f32 %v6059_v29, 0.0  ;;  %v6334_v29 = vsub.s32 7, %v9749_v8 }
 0x825   :  { %v6065_v38 = vadd.f32 %v6064_v43, %v11463_v40  ;;  %v6216_v30 = vmax.f32 %v6061_v23, 0.0 }
 0x826   :  { %v6217_v49 = vmax.f32 %v6063_v42, 0.0  ;;  %6753 = vmatmul.mubr.bf16.gmra.mrb[88].mxu0 %v11737_v3 }
 0x827   :  { %v6218_v61 = vmax.f32 %v6065_v38, 0.0  ;;  %6762 = vmatprep.mubr.bf16.mxu0 %v6282_v12  ;;  %v9317_v38 = vld [vmem:[%s12869_s2] sm:$0xff] }
 0x828   :  { %v11772_v46 = vpack.c.bf16 %v6217_v49, %v6215_v45  ;;  %v11812_v45 = vrot.slane %v9317_v38, %v6334_v29 }
 0x829   :  { %v11774_v26 = vpack.c.bf16 %v6218_v61, %v6216_v30  ;;  %v6068_v17 = vpop.f32.mrb[240].mxu0 }
 0x82a   :  { %v6069_v14 = vadd.f32 %v6068_v17, %v11457_v37  ;;  %v6070_v36 = vpop.f32.mrb[241].mxu0 }
 0x82b   :  { %v6071_v32 = vadd.f32 %v6070_v36, %v11463_v40  ;;  %v6072_v51 = vpop.f32.mrb[242].mxu0 }
 0x82c   :  { %v6073_v7 = vadd.f32 %v6072_v51, %v11457_v37  ;;  %v6074_v31 = vpop.f32.mrb[243].mxu0  ;;  %v6219_v3 = vmax.f32 %v6069_v14, 0.0 }
 0x82d   :  { %v6075_v25 = vadd.f32 %v6074_v31, %v11463_v40  ;;  %v6220_v12 = vmax.f32 %v6071_v32, 0.0 }
 0x82e   :  { %v6221_v33 = vmax.f32 %v6073_v7, 0.0  ;;  %6763 = vmatmul.mubr.bf16.gmra.mrb[92].mxu0 %v11744_v20 }
 0x82f   :  { %v6222_v50 = vmax.f32 %v6075_v25, 0.0  ;;  %6772 = vmatprep.mubr.bf16.mxu0 %v6284_v55 }
 0x830   :  { %v11781_v52 = vpack.c.bf16 %v6221_v33, %v6219_v3 }
 0x831   :  { %v11783_v22 = vpack.c.bf16 %v6222_v50, %v6220_v12  ;;  %v6078_v47 = vpop.f32.mrb[244].mxu0 }
 0x832   :  { %v6079_v54 = vadd.f32 %v6078_v47, %v11457_v37  ;;  %v6080_v53 = vpop.f32.mrb[245].mxu0 }
 0x833   :  { %v6081_v56 = vadd.f32 %v6080_v53, %v11463_v40  ;;  %v6082_v60 = vpop.f32.mrb[246].mxu0 }
 0x834   :  { %v6083_v62 = vadd.f32 %v6082_v60, %v11457_v37  ;;  %v6084_v15 = vpop.f32.mrb[247].mxu0  ;;  %v6223_v20 = vmax.f32 %v6079_v54, 0.0 }
 0x835   :  { %v6085_v10 = vadd.f32 %v6084_v15, %v11463_v40  ;;  %v6224_v55 = vmax.f32 %v6081_v56, 0.0 }
 0x836   :  { %v6225_v24 = vmax.f32 %v6083_v62, 0.0  ;;  %6773 = vmatmul.mubr.bf16.gmra.mrb[96].mxu0 %v11751_v35 }
 0x837   :  { %v6226_v41 = vmax.f32 %v6085_v10, 0.0  ;;  %6782 = vmatprep.mubr.bf16.mxu0 %v6286_v27 }
 0x838   :  { %v11790_v13 = vpack.c.bf16 %v6225_v24, %v6223_v20 }
 0x839   :  { %v11792_v34 = vpack.c.bf16 %v6226_v41, %v6224_v55  ;;  %v6088_v59 = vpop.f32.mrb[248].mxu0 }
 0x83a   :  { %v6089_v48 = vadd.f32 %v6088_v59, %v11457_v37  ;;  %v6090_v6 = vpop.f32.mrb[249].mxu0 }
 0x83b   :  { %v6091_v0 = vadd.f32 %v6090_v6, %v11463_v40  ;;  %v6092_v4 = vpop.f32.mrb[250].mxu0 }
 0x83c   :  { %v6093_v58 = vadd.f32 %v6092_v4, %v11457_v37  ;;  %v6094_v63 = vpop.f32.mrb[251].mxu0  ;;  %v6227_v35 = vmax.f32 %v6089_v48, 0.0 }
 0x83d   :  { %v6095_v44 = vadd.f32 %v6094_v63, %v11463_v40  ;;  %v6228_v27 = vmax.f32 %v6091_v0, 0.0 }
 0x83e   :  { %v6229_v1 = vmax.f32 %v6093_v58, 0.0  ;;  %6783 = vmatmul.mubr.bf16.gmra.mrb[100].mxu0 %v11758_v11 }
 0x83f   :  { %v6230_v21 = vmax.f32 %v6095_v44, 0.0  ;;  %6792 = vmatprep.mubr.bf16.mxu0 %v6288_v5 }
 0x840   :  { %v11799_v28 = vpack.c.bf16 %v6229_v1, %v6227_v35 }
 0x841   :  { %v11801_v57 = vpack.c.bf16 %v6230_v21, %v6228_v27  ;;  %v6098_v2 = vpop.f32.mrb[252].mxu0 }
 0x842   :  { %v6099_v19 = vadd.f32 %v6098_v2, %v11457_v37  ;;  %v6100_v9 = vpop.f32.mrb[253].mxu0 }
 0x843   :  { %v6101_v16 = vadd.f32 %v6100_v9, %v11463_v40  ;;  %v6102_v23 = vpop.f32.mrb[254].mxu0 }
 0x844   :  { %v6103_v39 = vadd.f32 %v6102_v23, %v11457_v37  ;;  %v6104_v42 = vpop.f32.mrb[255].mxu0  ;;  %v6231_v43 = vmax.f32 %v6099_v19, 0.0  ;;  %v9318_v37 = vld [vmem:[%s12869_s2 + $0x8] sm:$0xff] }
 0x845   :  { %v6105_v11 = vadd.f32 %v6104_v42, %v11463_v40  ;;  %v6232_v49 = vmax.f32 %v6101_v16, 0.0  ;;  %v11818_v30 = vrot.slane %v9318_v37, %v6334_v29 }
 0x846   :  { %v6233_v5 = vmax.f32 %v6103_v39, 0.0  ;;  %6793 = vmatmul.mubr.bf16.gmra.mrb[104].mxu0 %v11765_v18 }
 0x847   :  { %v6234_v8 = vmax.f32 %v6105_v11, 0.0  ;;  %6802 = vmatprep.mubr.bf16.mxu0 %v11774_v26 }
 0x848   :  { %v11820_v40 = vpack.c.bf16 %v6233_v5, %v6231_v43 }
 0x849   :  { %v11822_v61 = vpack.c.bf16 %v6234_v8, %v6232_v49  ;;  %v6534_v18 = vpop.f32.mrb[0].mxu0 }
 0x84a   :  { %v6535_v17 = vadd.f32 %v6534_v18, %v11812_v45  ;;  %v6536_v14 = vpop.f32.mrb[1].mxu0 }
 0x84b   :  { %v6537_v36 = vadd.f32 %v6536_v14, %v11818_v30  ;;  %v6538_v32 = vpop.f32.mrb[2].mxu0 }
 0x84c   :  { %v6853_v51 = vmax.f32 %v6535_v17, 0.0  ;;  %v6539_v26 = vadd.f32 %v6538_v32, %v11812_v45  ;;  %v6540_v7 = vpop.f32.mrb[3].mxu0 }
 0x84d   :  { %v6854_v31 = vmax.f32 %v6537_v36, 0.0  ;;  %v6541_v25 = vadd.f32 %v6540_v7, %v11818_v30 }
 0x84e   :  { %7599 = vst [vmem:[%s12870_s3] sm:$0xff] %v6853_v51  ;;  %v6855_v3 = vmax.f32 %v6539_v26, 0.0  ;;  %6803 = vmatmul.mubr.bf16.gmra.mrb[108].mxu0 %v11772_v46 }
 0x84f   :  { %7600 = vst [vmem:[%s12870_s3 + $0x8] sm:$0xff] %v6854_v31  ;;  %v6856_v33 = vmax.f32 %v6541_v25, 0.0  ;;  %6812 = vmatprep.mubr.bf16.mxu0 %v11783_v22 }
 0x850   :  { %v6981_v12 = vpack.c.bf16 %v6855_v3, %v6853_v51  ;;  %7601 = vst [vmem:[%s12870_s3 + $0x10] sm:$0xff] %v6855_v3 }
 0x851   :  { %v6982_v50 = vpack.c.bf16 %v6856_v33, %v6854_v31  ;;  %7602 = vst [vmem:[%s12870_s3 + $0x18] sm:$0xff] %v6856_v33  ;;  %v6544_v47 = vpop.f32.mrb[4].mxu0 }
 0x852   :  { %v6545_v46 = vadd.f32 %v6544_v47, %v11812_v45  ;;  %v6546_v54 = vpop.f32.mrb[5].mxu0 }
 0x853   :  { %v6547_v53 = vadd.f32 %v6546_v54, %v11818_v30  ;;  %v6548_v56 = vpop.f32.mrb[6].mxu0  ;;  %7278 = vmatprep.mubr.bf16.mxu1 %v6982_v50 }
 0x854   :  { %v6857_v60 = vmax.f32 %v6545_v46, 0.0  ;;  %v6549_v22 = vadd.f32 %v6548_v56, %v11812_v45  ;;  %v6550_v62 = vpop.f32.mrb[7].mxu0  ;;  %7279 = vmatmul.mubr.bf16.vlgmr.msra.gmra.mrb[128].mxu1 %v6981_v12 }
 0x855   :  { %v6858_v15 = vmax.f32 %v6547_v53, 0.0  ;;  %v6551_v10 = vadd.f32 %v6550_v62, %v11818_v30 }
 0x856   :  { %7603 = vst [vmem:[%s12870_s3 + $0x20] sm:$0xff] %v6857_v60  ;;  %v6859_v20 = vmax.f32 %v6549_v22, 0.0  ;;  %6813 = vmatmul.mubr.bf16.gmra.mrb[112].mxu0 %v11781_v52 }
 0x857   :  { %7604 = vst [vmem:[%s12870_s3 + $0x28] sm:$0xff] %v6858_v15  ;;  %v6860_v24 = vmax.f32 %v6551_v10, 0.0  ;;  %6822 = vmatprep.mubr.bf16.mxu0 %v11792_v34 }
 0x858   :  { %v6983_v55 = vpack.c.bf16 %v6859_v20, %v6857_v60  ;;  %7605 = vst [vmem:[%s12870_s3 + $0x30] sm:$0xff] %v6859_v20 }
 0x859   :  { %v6984_v41 = vpack.c.bf16 %v6860_v24, %v6858_v15  ;;  %7606 = vst [vmem:[%s12870_s3 + $0x38] sm:$0xff] %v6860_v24  ;;  %v6554_v59 = vpop.f32.mrb[8].mxu0 }
 0x85a   :  { %v6555_v52 = vadd.f32 %v6554_v59, %v11812_v45  ;;  %v6556_v48 = vpop.f32.mrb[9].mxu0 }
 0x85b   :  { %v6557_v6 = vadd.f32 %v6556_v48, %v11818_v30  ;;  %v6558_v0 = vpop.f32.mrb[10].mxu0  ;;  %7288 = vmatprep.mubr.bf16.mxu1 %v6984_v41 }
 0x85c   :  { %v6861_v4 = vmax.f32 %v6555_v52, 0.0  ;;  %v6559_v34 = vadd.f32 %v6558_v0, %v11812_v45  ;;  %v6560_v58 = vpop.f32.mrb[11].mxu0  ;;  %7289 = vmatmul.mubr.bf16.gmra.mrb[132].mxu1 %v6983_v55 }
 0x85d   :  { %v6862_v63 = vmax.f32 %v6557_v6, 0.0  ;;  %v6561_v44 = vadd.f32 %v6560_v58, %v11818_v30 }
 0x85e   :  { %7607 = vst [vmem:[%s12870_s3 + $0x40] sm:$0xff] %v6861_v4  ;;  %v6863_v35 = vmax.f32 %v6559_v34, 0.0  ;;  %6823 = vmatmul.mubr.bf16.gmra.mrb[116].mxu0 %v11790_v13 }
 0x85f   :  { %7608 = vst [vmem:[%s12870_s3 + $0x48] sm:$0xff] %v6862_v63  ;;  %v6864_v1 = vmax.f32 %v6561_v44, 0.0  ;;  %6832 = vmatprep.mubr.bf16.mxu0 %v11801_v57 }
 0x860   :  { %v6985_v27 = vpack.c.bf16 %v6863_v35, %v6861_v4  ;;  %7609 = vst [vmem:[%s12870_s3 + $0x50] sm:$0xff] %v6863_v35 }
 0x861   :  { %v6986_v21 = vpack.c.bf16 %v6864_v1, %v6862_v63  ;;  %7610 = vst [vmem:[%s12870_s3 + $0x58] sm:$0xff] %v6864_v1  ;;  %v6564_v2 = vpop.f32.mrb[12].mxu0 }
 0x862   :  { %v6565_v13 = vadd.f32 %v6564_v2, %v11812_v45  ;;  %v6566_v19 = vpop.f32.mrb[13].mxu0 }
 0x863   :  { %v6567_v9 = vadd.f32 %v6566_v19, %v11818_v30  ;;  %v6568_v29 = vpop.f32.mrb[14].mxu0  ;;  %7298 = vmatprep.mubr.bf16.mxu1 %v6986_v21 }
 0x864   :  { %v6865_v16 = vmax.f32 %v6565_v13, 0.0  ;;  %v6569_v57 = vadd.f32 %v6568_v29, %v11812_v45  ;;  %v6570_v23 = vpop.f32.mrb[15].mxu0  ;;  %7299 = vmatmul.mubr.bf16.gmra.mrb[136].mxu1 %v6985_v27 }
 0x865   :  { %v6866_v39 = vmax.f32 %v6567_v9, 0.0  ;;  %v6571_v42 = vadd.f32 %v6570_v23, %v11818_v30 }
 0x866   :  { %7611 = vst [vmem:[%s12870_s3 + $0x60] sm:$0xff] %v6865_v16  ;;  %v6867_v11 = vmax.f32 %v6569_v57, 0.0  ;;  %6833 = vmatmul.mubr.bf16.gmra.mrb[120].mxu0 %v11799_v28 }
 0x867   :  { %7612 = vst [vmem:[%s12870_s3 + $0x68] sm:$0xff] %v6866_v39  ;;  %v6868_v43 = vmax.f32 %v6571_v42, 0.0  ;;  %6842 = vmatprep.mubr.bf16.mxu0 %v11822_v61 }
 0x868   :  { %v6987_v5 = vpack.c.bf16 %v6867_v11, %v6865_v16  ;;  %7613 = vst [vmem:[%s12870_s3 + $0x70] sm:$0xff] %v6867_v11 }
 0x869   :  { %v6988_v38 = vpack.c.bf16 %v6868_v43, %v6866_v39  ;;  %7614 = vst [vmem:[%s12870_s3 + $0x78] sm:$0xff] %v6868_v43  ;;  %v6574_v49 = vpop.f32.mrb[16].mxu0 }
 0x86a   :  { %v6575_v28 = vadd.f32 %v6574_v49, %v11812_v45  ;;  %v6576_v8 = vpop.f32.mrb[17].mxu0 }
 0x86b   :  { %v6577_v37 = vadd.f32 %v6576_v8, %v11818_v30  ;;  %v6578_v18 = vpop.f32.mrb[18].mxu0  ;;  %7308 = vmatprep.mubr.bf16.mxu1 %v6988_v38 }
 0x86c   :  { %v6869_v17 = vmax.f32 %v6575_v28, 0.0  ;;  %v6579_v61 = vadd.f32 %v6578_v18, %v11812_v45  ;;  %v6580_v14 = vpop.f32.mrb[19].mxu0  ;;  %7309 = vmatmul.mubr.bf16.gmra.mrb[140].mxu1 %v6987_v5 }
 0x86d   :  { %v6870_v36 = vmax.f32 %v6577_v37, 0.0  ;;  %v6581_v32 = vadd.f32 %v6580_v14, %v11818_v30 }
 0x86e   :  { %7615 = vst [vmem:[%s12870_s3 + $0x80] sm:$0xff] %v6869_v17  ;;  %v6871_v51 = vmax.f32 %v6579_v61, 0.0  ;;  %6843 = vmatmul.mubr.bf16.gmra.mrb[124].mxu0 %v11820_v40 }
 0x86f   :  { %7616 = vst [vmem:[%s12870_s3 + $0x88] sm:$0xff] %v6870_v36  ;;  %v6872_v26 = vmax.f32 %v6581_v32, 0.0 }
 0x870   :  { %v6989_v7 = vpack.c.bf16 %v6871_v51, %v6869_v17  ;;  %7617 = vst [vmem:[%s12870_s3 + $0x90] sm:$0xff] %v6871_v51 }
 0x871   :  { %v6990_v31 = vpack.c.bf16 %v6872_v26, %v6870_v36  ;;  %7618 = vst [vmem:[%s12870_s3 + $0x98] sm:$0xff] %v6872_v26  ;;  %v6584_v25 = vpop.f32.mrb[20].mxu0 }
 0x872   :  { %v6585_v3 = vadd.f32 %v6584_v25, %v11812_v45  ;;  %v6586_v33 = vpop.f32.mrb[21].mxu0 }
 0x873   :  { %v6587_v40 = vadd.f32 %v6586_v33, %v11818_v30  ;;  %v6588_v12 = vpop.f32.mrb[22].mxu0  ;;  %7318 = vmatprep.mubr.bf16.mxu1 %v6990_v31 }
 0x874   :  { %v6873_v50 = vmax.f32 %v6585_v3, 0.0  ;;  %v6589_v47 = vadd.f32 %v6588_v12, %v11812_v45  ;;  %v6590_v46 = vpop.f32.mrb[23].mxu0  ;;  %7319 = vmatmul.mubr.bf16.gmra.mrb[144].mxu1 %v6989_v7 }
 0x875   :  { %v6874_v54 = vmax.f32 %v6587_v40, 0.0  ;;  %v6591_v53 = vadd.f32 %v6590_v46, %v11818_v30 }
 0x876   :  { %7619 = vst [vmem:[%s12870_s3 + $0xa0] sm:$0xff] %v6873_v50  ;;  %v6875_v56 = vmax.f32 %v6589_v47, 0.0 }
 0x877   :  { %7620 = vst [vmem:[%s12870_s3 + $0xa8] sm:$0xff] %v6874_v54  ;;  %v6876_v60 = vmax.f32 %v6591_v53, 0.0 }
 0x878   :  { %v6991_v22 = vpack.c.bf16 %v6875_v56, %v6873_v50  ;;  %7621 = vst [vmem:[%s12870_s3 + $0xb0] sm:$0xff] %v6875_v56 }
 0x879   :  { %v6992_v62 = vpack.c.bf16 %v6876_v60, %v6874_v54  ;;  %7622 = vst [vmem:[%s12870_s3 + $0xb8] sm:$0xff] %v6876_v60  ;;  %v6594_v15 = vpop.f32.mrb[24].mxu0 }
 0x87a   :  { %v6595_v10 = vadd.f32 %v6594_v15, %v11812_v45  ;;  %v6596_v20 = vpop.f32.mrb[25].mxu0 }
 0x87b   :  { %v6597_v24 = vadd.f32 %v6596_v20, %v11818_v30  ;;  %v6598_v55 = vpop.f32.mrb[26].mxu0  ;;  %7328 = vmatprep.mubr.bf16.mxu1 %v6992_v62 }
 0x87c   :  { %v6877_v41 = vmax.f32 %v6595_v10, 0.0  ;;  %v6599_v59 = vadd.f32 %v6598_v55, %v11812_v45  ;;  %v6600_v52 = vpop.f32.mrb[27].mxu0  ;;  %7329 = vmatmul.mubr.bf16.gmra.mrb[148].mxu1 %v6991_v22 }
 0x87d   :  { %v6878_v48 = vmax.f32 %v6597_v24, 0.0  ;;  %v6601_v6 = vadd.f32 %v6600_v52, %v11818_v30 }
 0x87e   :  { %7623 = vst [vmem:[%s12870_s3 + $0xc0] sm:$0xff] %v6877_v41  ;;  %v6879_v0 = vmax.f32 %v6599_v59, 0.0 }
 0x87f   :  { %7624 = vst [vmem:[%s12870_s3 + $0xc8] sm:$0xff] %v6878_v48  ;;  %v6880_v4 = vmax.f32 %v6601_v6, 0.0 }
 0x880   :  { %v6993_v34 = vpack.c.bf16 %v6879_v0, %v6877_v41  ;;  %7625 = vst [vmem:[%s12870_s3 + $0xd0] sm:$0xff] %v6879_v0 }
 0x881   :  { %v6994_v58 = vpack.c.bf16 %v6880_v4, %v6878_v48  ;;  %7626 = vst [vmem:[%s12870_s3 + $0xd8] sm:$0xff] %v6880_v4  ;;  %v6604_v63 = vpop.f32.mrb[28].mxu0 }
 0x882   :  { %v6605_v44 = vadd.f32 %v6604_v63, %v11812_v45  ;;  %v6606_v35 = vpop.f32.mrb[29].mxu0 }
 0x883   :  { %v6607_v1 = vadd.f32 %v6606_v35, %v11818_v30  ;;  %v6608_v27 = vpop.f32.mrb[30].mxu0  ;;  %7338 = vmatprep.mubr.bf16.mxu1 %v6994_v58 }
 0x884   :  { %v6881_v21 = vmax.f32 %v6605_v44, 0.0  ;;  %v6609_v2 = vadd.f32 %v6608_v27, %v11812_v45  ;;  %v6610_v13 = vpop.f32.mrb[31].mxu0  ;;  %7339 = vmatmul.mubr.bf16.gmra.mrb[152].mxu1 %v6993_v34 }
 0x885   :  { %v6882_v19 = vmax.f32 %v6607_v1, 0.0  ;;  %v6611_v9 = vadd.f32 %v6610_v13, %v11818_v30 }
 0x886   :  { %7627 = vst [vmem:[%s12870_s3 + $0xe0] sm:$0xff] %v6881_v21  ;;  %v6883_v29 = vmax.f32 %v6609_v2, 0.0 }
 0x887   :  { %7628 = vst [vmem:[%s12870_s3 + $0xe8] sm:$0xff] %v6882_v19  ;;  %v6884_v16 = vmax.f32 %v6611_v9, 0.0 }
 0x888   :  { %v6995_v57 = vpack.c.bf16 %v6883_v29, %v6881_v21  ;;  %7629 = vst [vmem:[%s12870_s3 + $0xf0] sm:$0xff] %v6883_v29 }
 0x889   :  { %v6996_v23 = vpack.c.bf16 %v6884_v16, %v6882_v19  ;;  %7630 = vst [vmem:[%s12870_s3 + $0xf8] sm:$0xff] %v6884_v16  ;;  %v6614_v39 = vpop.f32.mrb[32].mxu0 }
 0x88a   :  { %v6615_v42 = vadd.f32 %v6614_v39, %v11812_v45  ;;  %v6616_v11 = vpop.f32.mrb[33].mxu0 }
 0x88b   :  { %v6617_v43 = vadd.f32 %v6616_v11, %v11818_v30  ;;  %v6618_v5 = vpop.f32.mrb[34].mxu0  ;;  %7348 = vmatprep.mubr.bf16.mxu1 %v6996_v23 }
 0x88c   :  { %v6885_v38 = vmax.f32 %v6615_v42, 0.0  ;;  %v6619_v49 = vadd.f32 %v6618_v5, %v11812_v45  ;;  %v6620_v28 = vpop.f32.mrb[35].mxu0  ;;  %7349 = vmatmul.mubr.bf16.gmra.mrb[156].mxu1 %v6995_v57 }
 0x88d   :  { %v6886_v8 = vmax.f32 %v6617_v43, 0.0  ;;  %v6621_v37 = vadd.f32 %v6620_v28, %v11818_v30 }
 0x88e   :  { %7631 = vst [vmem:[%s12870_s3 + $0x100] sm:$0xff] %v6885_v38  ;;  %v6887_v18 = vmax.f32 %v6619_v49, 0.0 }
 0x88f   :  { %7632 = vst [vmem:[%s12870_s3 + $0x108] sm:$0xff] %v6886_v8  ;;  %v6888_v17 = vmax.f32 %v6621_v37, 0.0 }
 0x890   :  { %v6997_v61 = vpack.c.bf16 %v6887_v18, %v6885_v38  ;;  %7633 = vst [vmem:[%s12870_s3 + $0x110] sm:$0xff] %v6887_v18 }
 0x891   :  { %v6998_v14 = vpack.c.bf16 %v6888_v17, %v6886_v8  ;;  %7634 = vst [vmem:[%s12870_s3 + $0x118] sm:$0xff] %v6888_v17  ;;  %v6624_v36 = vpop.f32.mrb[36].mxu0 }
 0x892   :  { %v6625_v32 = vadd.f32 %v6624_v36, %v11812_v45  ;;  %v6626_v51 = vpop.f32.mrb[37].mxu0 }
 0x893   :  { %v6627_v26 = vadd.f32 %v6626_v51, %v11818_v30  ;;  %v6628_v7 = vpop.f32.mrb[38].mxu0  ;;  %7358 = vmatprep.mubr.bf16.mxu1 %v6998_v14 }
 0x894   :  { %v6889_v31 = vmax.f32 %v6625_v32, 0.0  ;;  %v6629_v25 = vadd.f32 %v6628_v7, %v11812_v45  ;;  %v6630_v3 = vpop.f32.mrb[39].mxu0  ;;  %7359 = vmatmul.mubr.bf16.gmra.mrb[160].mxu1 %v6997_v61 }
 0x895   :  { %v6890_v33 = vmax.f32 %v6627_v26, 0.0  ;;  %v6631_v40 = vadd.f32 %v6630_v3, %v11818_v30 }
 0x896   :  { %7635 = vst [vmem:[%s12870_s3 + $0x120] sm:$0xff] %v6889_v31  ;;  %v6891_v12 = vmax.f32 %v6629_v25, 0.0 }
 0x897   :  { %7636 = vst [vmem:[%s12870_s3 + $0x128] sm:$0xff] %v6890_v33  ;;  %v6892_v50 = vmax.f32 %v6631_v40, 0.0 }
 0x898   :  { %v6999_v47 = vpack.c.bf16 %v6891_v12, %v6889_v31  ;;  %7637 = vst [vmem:[%s12870_s3 + $0x130] sm:$0xff] %v6891_v12 }
 0x899   :  { %v7000_v46 = vpack.c.bf16 %v6892_v50, %v6890_v33  ;;  %7638 = vst [vmem:[%s12870_s3 + $0x138] sm:$0xff] %v6892_v50  ;;  %v6634_v54 = vpop.f32.mrb[40].mxu0 }
 0x89a   :  { %v6635_v53 = vadd.f32 %v6634_v54, %v11812_v45  ;;  %v6636_v56 = vpop.f32.mrb[41].mxu0 }
 0x89b   :  { %v6637_v60 = vadd.f32 %v6636_v56, %v11818_v30  ;;  %v6638_v22 = vpop.f32.mrb[42].mxu0  ;;  %7368 = vmatprep.mubr.bf16.mxu1 %v7000_v46 }
 0x89c   :  { %v6893_v62 = vmax.f32 %v6635_v53, 0.0  ;;  %v6639_v15 = vadd.f32 %v6638_v22, %v11812_v45  ;;  %v6640_v10 = vpop.f32.mrb[43].mxu0  ;;  %7369 = vmatmul.mubr.bf16.gmra.mrb[164].mxu1 %v6999_v47 }
 0x89d   :  { %v6894_v20 = vmax.f32 %v6637_v60, 0.0  ;;  %v6641_v24 = vadd.f32 %v6640_v10, %v11818_v30 }
 0x89e   :  { %7639 = vst [vmem:[%s12870_s3 + $0x140] sm:$0xff] %v6893_v62  ;;  %v6895_v55 = vmax.f32 %v6639_v15, 0.0 }
 0x89f   :  { %7640 = vst [vmem:[%s12870_s3 + $0x148] sm:$0xff] %v6894_v20  ;;  %v6896_v41 = vmax.f32 %v6641_v24, 0.0 }
 0x8a0   :  { %v7001_v59 = vpack.c.bf16 %v6895_v55, %v6893_v62  ;;  %7641 = vst [vmem:[%s12870_s3 + $0x150] sm:$0xff] %v6895_v55 }
 0x8a1   :  { %v7002_v52 = vpack.c.bf16 %v6896_v41, %v6894_v20  ;;  %7642 = vst [vmem:[%s12870_s3 + $0x158] sm:$0xff] %v6896_v41  ;;  %v6644_v48 = vpop.f32.mrb[44].mxu0 }
 0x8a2   :  { %v6645_v6 = vadd.f32 %v6644_v48, %v11812_v45  ;;  %v6646_v0 = vpop.f32.mrb[45].mxu0 }
 0x8a3   :  { %v6647_v4 = vadd.f32 %v6646_v0, %v11818_v30  ;;  %v6648_v34 = vpop.f32.mrb[46].mxu0  ;;  %7378 = vmatprep.mubr.bf16.mxu1 %v7002_v52 }
 0x8a4   :  { %v6897_v58 = vmax.f32 %v6645_v6, 0.0  ;;  %v6649_v63 = vadd.f32 %v6648_v34, %v11812_v45  ;;  %v6650_v44 = vpop.f32.mrb[47].mxu0  ;;  %7379 = vmatmul.mubr.bf16.gmra.mrb[168].mxu1 %v7001_v59 }
 0x8a5   :  { %v6898_v35 = vmax.f32 %v6647_v4, 0.0  ;;  %v6651_v1 = vadd.f32 %v6650_v44, %v11818_v30 }
 0x8a6   :  { %7643 = vst [vmem:[%s12870_s3 + $0x160] sm:$0xff] %v6897_v58  ;;  %v6899_v27 = vmax.f32 %v6649_v63, 0.0 }
 0x8a7   :  { %7644 = vst [vmem:[%s12870_s3 + $0x168] sm:$0xff] %v6898_v35  ;;  %v6900_v21 = vmax.f32 %v6651_v1, 0.0 }
 0x8a8   :  { %v7003_v2 = vpack.c.bf16 %v6899_v27, %v6897_v58  ;;  %7645 = vst [vmem:[%s12870_s3 + $0x170] sm:$0xff] %v6899_v27 }
 0x8a9   :  { %v7004_v13 = vpack.c.bf16 %v6900_v21, %v6898_v35  ;;  %7646 = vst [vmem:[%s12870_s3 + $0x178] sm:$0xff] %v6900_v21  ;;  %v6654_v19 = vpop.f32.mrb[48].mxu0 }
 0x8aa   :  { %v6655_v9 = vadd.f32 %v6654_v19, %v11812_v45  ;;  %v6656_v29 = vpop.f32.mrb[49].mxu0 }
 0x8ab   :  { %v6657_v16 = vadd.f32 %v6656_v29, %v11818_v30  ;;  %v6658_v57 = vpop.f32.mrb[50].mxu0  ;;  %7388 = vmatprep.mubr.bf16.mxu1 %v7004_v13 }
 0x8ac   :  { %v6901_v23 = vmax.f32 %v6655_v9, 0.0  ;;  %v6659_v39 = vadd.f32 %v6658_v57, %v11812_v45  ;;  %v6660_v42 = vpop.f32.mrb[51].mxu0  ;;  %7389 = vmatmul.mubr.bf16.gmra.mrb[172].mxu1 %v7003_v2 }
 0x8ad   :  { %v6902_v11 = vmax.f32 %v6657_v16, 0.0  ;;  %v6661_v43 = vadd.f32 %v6660_v42, %v11818_v30 }
 0x8ae   :  { %7647 = vst [vmem:[%s12870_s3 + $0x180] sm:$0xff] %v6901_v23  ;;  %v6903_v5 = vmax.f32 %v6659_v39, 0.0 }
 0x8af   :  { %7648 = vst [vmem:[%s12870_s3 + $0x188] sm:$0xff] %v6902_v11  ;;  %v6904_v38 = vmax.f32 %v6661_v43, 0.0 }
 0x8b0   :  { %v7005_v49 = vpack.c.bf16 %v6903_v5, %v6901_v23  ;;  %7649 = vst [vmem:[%s12870_s3 + $0x190] sm:$0xff] %v6903_v5 }
 0x8b1   :  { %v7006_v28 = vpack.c.bf16 %v6904_v38, %v6902_v11  ;;  %7650 = vst [vmem:[%s12870_s3 + $0x198] sm:$0xff] %v6904_v38  ;;  %v6664_v8 = vpop.f32.mrb[52].mxu0 }
 0x8b2   :  { %v6665_v37 = vadd.f32 %v6664_v8, %v11812_v45  ;;  %v6666_v18 = vpop.f32.mrb[53].mxu0 }
 0x8b3   :  { %v6667_v17 = vadd.f32 %v6666_v18, %v11818_v30  ;;  %v6668_v61 = vpop.f32.mrb[54].mxu0  ;;  %7398 = vmatprep.mubr.bf16.mxu1 %v7006_v28 }
 0x8b4   :  { %v6905_v14 = vmax.f32 %v6665_v37, 0.0  ;;  %v6669_v36 = vadd.f32 %v6668_v61, %v11812_v45  ;;  %v6670_v32 = vpop.f32.mrb[55].mxu0  ;;  %7399 = vmatmul.mubr.bf16.gmra.mrb[176].mxu1 %v7005_v49 }
 0x8b5   :  { %v6906_v51 = vmax.f32 %v6667_v17, 0.0  ;;  %v6671_v26 = vadd.f32 %v6670_v32, %v11818_v30 }
 0x8b6   :  { %7651 = vst [vmem:[%s12870_s3 + $0x1a0] sm:$0xff] %v6905_v14  ;;  %v6907_v7 = vmax.f32 %v6669_v36, 0.0 }
 0x8b7   :  { %7652 = vst [vmem:[%s12870_s3 + $0x1a8] sm:$0xff] %v6906_v51  ;;  %v6908_v31 = vmax.f32 %v6671_v26, 0.0 }
 0x8b8   :  { %v7007_v25 = vpack.c.bf16 %v6907_v7, %v6905_v14  ;;  %7653 = vst [vmem:[%s12870_s3 + $0x1b0] sm:$0xff] %v6907_v7 }
 0x8b9   :  { %v7008_v3 = vpack.c.bf16 %v6908_v31, %v6906_v51  ;;  %7654 = vst [vmem:[%s12870_s3 + $0x1b8] sm:$0xff] %v6908_v31  ;;  %v6674_v33 = vpop.f32.mrb[56].mxu0 }
 0x8ba   :  { %v6675_v40 = vadd.f32 %v6674_v33, %v11812_v45  ;;  %v6676_v12 = vpop.f32.mrb[57].mxu0 }
 0x8bb   :  { %v6677_v50 = vadd.f32 %v6676_v12, %v11818_v30  ;;  %v6678_v47 = vpop.f32.mrb[58].mxu0  ;;  %7408 = vmatprep.mubr.bf16.mxu1 %v7008_v3 }
 0x8bc   :  { %v6909_v46 = vmax.f32 %v6675_v40, 0.0  ;;  %v6679_v54 = vadd.f32 %v6678_v47, %v11812_v45  ;;  %v6680_v53 = vpop.f32.mrb[59].mxu0  ;;  %7409 = vmatmul.mubr.bf16.gmra.mrb[180].mxu1 %v7007_v25 }
 0x8bd   :  { %v6910_v56 = vmax.f32 %v6677_v50, 0.0  ;;  %v6681_v60 = vadd.f32 %v6680_v53, %v11818_v30 }
 0x8be   :  { %7655 = vst [vmem:[%s12870_s3 + $0x1c0] sm:$0xff] %v6909_v46  ;;  %v6911_v22 = vmax.f32 %v6679_v54, 0.0 }
 0x8bf   :  { %7656 = vst [vmem:[%s12870_s3 + $0x1c8] sm:$0xff] %v6910_v56  ;;  %v6912_v62 = vmax.f32 %v6681_v60, 0.0 }
 0x8c0   :  { %v7009_v15 = vpack.c.bf16 %v6911_v22, %v6909_v46  ;;  %7657 = vst [vmem:[%s12870_s3 + $0x1d0] sm:$0xff] %v6911_v22 }
 0x8c1   :  { %v7010_v10 = vpack.c.bf16 %v6912_v62, %v6910_v56  ;;  %7658 = vst [vmem:[%s12870_s3 + $0x1d8] sm:$0xff] %v6912_v62  ;;  %v6684_v20 = vpop.f32.mrb[60].mxu0 }
 0x8c2   :  { %v6685_v24 = vadd.f32 %v6684_v20, %v11812_v45  ;;  %v6686_v55 = vpop.f32.mrb[61].mxu0 }
 0x8c3   :  { %v6687_v41 = vadd.f32 %v6686_v55, %v11818_v30  ;;  %v6688_v59 = vpop.f32.mrb[62].mxu0  ;;  %7418 = vmatprep.mubr.bf16.mxu1 %v7010_v10 }
 0x8c4   :  { %v6913_v52 = vmax.f32 %v6685_v24, 0.0  ;;  %v6689_v48 = vadd.f32 %v6688_v59, %v11812_v45  ;;  %v6690_v6 = vpop.f32.mrb[63].mxu0  ;;  %7419 = vmatmul.mubr.bf16.gmra.mrb[184].mxu1 %v7009_v15 }
 0x8c5   :  { %v6914_v0 = vmax.f32 %v6687_v41, 0.0  ;;  %v6691_v4 = vadd.f32 %v6690_v6, %v11818_v30 }
 0x8c6   :  { %7659 = vst [vmem:[%s12870_s3 + $0x1e0] sm:$0xff] %v6913_v52  ;;  %v6915_v34 = vmax.f32 %v6689_v48, 0.0 }
 0x8c7   :  { %7660 = vst [vmem:[%s12870_s3 + $0x1e8] sm:$0xff] %v6914_v0  ;;  %v6916_v58 = vmax.f32 %v6691_v4, 0.0 }
 0x8c8   :  { %v7011_v63 = vpack.c.bf16 %v6915_v34, %v6913_v52  ;;  %7661 = vst [vmem:[%s12870_s3 + $0x1f0] sm:$0xff] %v6915_v34 }
 0x8c9   :  { %v7012_v44 = vpack.c.bf16 %v6916_v58, %v6914_v0  ;;  %7662 = vst [vmem:[%s12870_s3 + $0x1f8] sm:$0xff] %v6916_v58  ;;  %v6694_v35 = vpop.f32.mrb[64].mxu0 }
 0x8ca   :  { %v6695_v1 = vadd.f32 %v6694_v35, %v11812_v45  ;;  %v6696_v27 = vpop.f32.mrb[65].mxu0 }
 0x8cb   :  { %v6697_v21 = vadd.f32 %v6696_v27, %v11818_v30  ;;  %v6698_v2 = vpop.f32.mrb[66].mxu0  ;;  %7428 = vmatprep.mubr.bf16.mxu1 %v7012_v44 }
 0x8cc   :  { %v6917_v13 = vmax.f32 %v6695_v1, 0.0  ;;  %v6699_v19 = vadd.f32 %v6698_v2, %v11812_v45  ;;  %v6700_v9 = vpop.f32.mrb[67].mxu0  ;;  %7429 = vmatmul.mubr.bf16.gmra.mrb[188].mxu1 %v7011_v63 }
 0x8cd   :  { %v6918_v29 = vmax.f32 %v6697_v21, 0.0  ;;  %v6701_v16 = vadd.f32 %v6700_v9, %v11818_v30 }
 0x8ce   :  { %7663 = vst [vmem:[%s12870_s3 + $0x200] sm:$0xff] %v6917_v13  ;;  %v6919_v57 = vmax.f32 %v6699_v19, 0.0 }
 0x8cf   :  { %7664 = vst [vmem:[%s12870_s3 + $0x208] sm:$0xff] %v6918_v29  ;;  %v6920_v23 = vmax.f32 %v6701_v16, 0.0 }
 0x8d0   :  { %v7013_v39 = vpack.c.bf16 %v6919_v57, %v6917_v13  ;;  %7665 = vst [vmem:[%s12870_s3 + $0x210] sm:$0xff] %v6919_v57 }
 0x8d1   :  { %v7014_v42 = vpack.c.bf16 %v6920_v23, %v6918_v29  ;;  %7666 = vst [vmem:[%s12870_s3 + $0x218] sm:$0xff] %v6920_v23  ;;  %v6704_v11 = vpop.f32.mrb[68].mxu0 }
 0x8d2   :  { %v6705_v43 = vadd.f32 %v6704_v11, %v11812_v45  ;;  %v6706_v5 = vpop.f32.mrb[69].mxu0 }
 0x8d3   :  { %v6707_v38 = vadd.f32 %v6706_v5, %v11818_v30  ;;  %v6708_v49 = vpop.f32.mrb[70].mxu0  ;;  %7438 = vmatprep.mubr.bf16.mxu1 %v7014_v42 }
 0x8d4   :  { %v6921_v28 = vmax.f32 %v6705_v43, 0.0  ;;  %v6709_v8 = vadd.f32 %v6708_v49, %v11812_v45  ;;  %v6710_v37 = vpop.f32.mrb[71].mxu0  ;;  %7439 = vmatmul.mubr.bf16.gmra.mrb[192].mxu1 %v7013_v39 }
 0x8d5   :  { %v6922_v18 = vmax.f32 %v6707_v38, 0.0  ;;  %v6711_v17 = vadd.f32 %v6710_v37, %v11818_v30 }
 0x8d6   :  { %7667 = vst [vmem:[%s12870_s3 + $0x220] sm:$0xff] %v6921_v28  ;;  %v6923_v61 = vmax.f32 %v6709_v8, 0.0 }
 0x8d7   :  { %7668 = vst [vmem:[%s12870_s3 + $0x228] sm:$0xff] %v6922_v18  ;;  %v6924_v14 = vmax.f32 %v6711_v17, 0.0 }
 0x8d8   :  { %v7015_v36 = vpack.c.bf16 %v6923_v61, %v6921_v28  ;;  %7669 = vst [vmem:[%s12870_s3 + $0x230] sm:$0xff] %v6923_v61 }
 0x8d9   :  { %v7016_v32 = vpack.c.bf16 %v6924_v14, %v6922_v18  ;;  %7670 = vst [vmem:[%s12870_s3 + $0x238] sm:$0xff] %v6924_v14  ;;  %v6714_v51 = vpop.f32.mrb[72].mxu0 }
 0x8da   :  { %v6715_v26 = vadd.f32 %v6714_v51, %v11812_v45  ;;  %v6716_v7 = vpop.f32.mrb[73].mxu0 }
 0x8db   :  { %v6717_v31 = vadd.f32 %v6716_v7, %v11818_v30  ;;  %v6718_v25 = vpop.f32.mrb[74].mxu0  ;;  %7448 = vmatprep.mubr.bf16.mxu1 %v7016_v32 }
 0x8dc   :  { %v6925_v3 = vmax.f32 %v6715_v26, 0.0  ;;  %v6719_v33 = vadd.f32 %v6718_v25, %v11812_v45  ;;  %v6720_v40 = vpop.f32.mrb[75].mxu0  ;;  %7449 = vmatmul.mubr.bf16.gmra.mrb[196].mxu1 %v7015_v36 }
 0x8dd   :  { %v6926_v12 = vmax.f32 %v6717_v31, 0.0  ;;  %v6721_v50 = vadd.f32 %v6720_v40, %v11818_v30 }
 0x8de   :  { %7671 = vst [vmem:[%s12870_s3 + $0x240] sm:$0xff] %v6925_v3  ;;  %v6927_v47 = vmax.f32 %v6719_v33, 0.0 }
 0x8df   :  { %7672 = vst [vmem:[%s12870_s3 + $0x248] sm:$0xff] %v6926_v12  ;;  %v6928_v46 = vmax.f32 %v6721_v50, 0.0 }
 0x8e0   :  { %v7017_v54 = vpack.c.bf16 %v6927_v47, %v6925_v3  ;;  %7673 = vst [vmem:[%s12870_s3 + $0x250] sm:$0xff] %v6927_v47 }
 0x8e1   :  { %v7018_v53 = vpack.c.bf16 %v6928_v46, %v6926_v12  ;;  %7674 = vst [vmem:[%s12870_s3 + $0x258] sm:$0xff] %v6928_v46  ;;  %v6724_v56 = vpop.f32.mrb[76].mxu0 }
 0x8e2   :  { %v6725_v60 = vadd.f32 %v6724_v56, %v11812_v45  ;;  %v6726_v22 = vpop.f32.mrb[77].mxu0 }
 0x8e3   :  { %v6727_v62 = vadd.f32 %v6726_v22, %v11818_v30  ;;  %v6728_v15 = vpop.f32.mrb[78].mxu0  ;;  %7458 = vmatprep.mubr.bf16.mxu1 %v7018_v53 }
 0x8e4   :  { %v6929_v10 = vmax.f32 %v6725_v60, 0.0  ;;  %v6729_v20 = vadd.f32 %v6728_v15, %v11812_v45  ;;  %v6730_v24 = vpop.f32.mrb[79].mxu0  ;;  %7459 = vmatmul.mubr.bf16.gmra.mrb[200].mxu1 %v7017_v54 }
 0x8e5   :  { %v6930_v55 = vmax.f32 %v6727_v62, 0.0  ;;  %v6731_v41 = vadd.f32 %v6730_v24, %v11818_v30 }
 0x8e6   :  { %7675 = vst [vmem:[%s12870_s3 + $0x260] sm:$0xff] %v6929_v10  ;;  %v6931_v59 = vmax.f32 %v6729_v20, 0.0 }
 0x8e7   :  { %7676 = vst [vmem:[%s12870_s3 + $0x268] sm:$0xff] %v6930_v55  ;;  %v6932_v52 = vmax.f32 %v6731_v41, 0.0 }
 0x8e8   :  { %v7019_v48 = vpack.c.bf16 %v6931_v59, %v6929_v10  ;;  %7677 = vst [vmem:[%s12870_s3 + $0x270] sm:$0xff] %v6931_v59 }
 0x8e9   :  { %v7020_v6 = vpack.c.bf16 %v6932_v52, %v6930_v55  ;;  %7678 = vst [vmem:[%s12870_s3 + $0x278] sm:$0xff] %v6932_v52  ;;  %v6734_v0 = vpop.f32.mrb[80].mxu0 }
 0x8ea   :  { %v6735_v4 = vadd.f32 %v6734_v0, %v11812_v45  ;;  %v6736_v34 = vpop.f32.mrb[81].mxu0 }
 0x8eb   :  { %v6737_v58 = vadd.f32 %v6736_v34, %v11818_v30  ;;  %v6738_v63 = vpop.f32.mrb[82].mxu0  ;;  %7468 = vmatprep.mubr.bf16.mxu1 %v7020_v6 }
 0x8ec   :  { %v6933_v44 = vmax.f32 %v6735_v4, 0.0  ;;  %v6739_v35 = vadd.f32 %v6738_v63, %v11812_v45  ;;  %v6740_v1 = vpop.f32.mrb[83].mxu0  ;;  %7469 = vmatmul.mubr.bf16.gmra.mrb[204].mxu1 %v7019_v48 }
 0x8ed   :  { %v6934_v27 = vmax.f32 %v6737_v58, 0.0  ;;  %v6741_v21 = vadd.f32 %v6740_v1, %v11818_v30 }
 0x8ee   :  { %7679 = vst [vmem:[%s12870_s3 + $0x280] sm:$0xff] %v6933_v44  ;;  %v6935_v2 = vmax.f32 %v6739_v35, 0.0 }
 0x8ef   :  { %7680 = vst [vmem:[%s12870_s3 + $0x288] sm:$0xff] %v6934_v27  ;;  %v6936_v13 = vmax.f32 %v6741_v21, 0.0 }
 0x8f0   :  { %v7021_v19 = vpack.c.bf16 %v6935_v2, %v6933_v44  ;;  %7681 = vst [vmem:[%s12870_s3 + $0x290] sm:$0xff] %v6935_v2 }
 0x8f1   :  { %v7022_v9 = vpack.c.bf16 %v6936_v13, %v6934_v27  ;;  %7682 = vst [vmem:[%s12870_s3 + $0x298] sm:$0xff] %v6936_v13  ;;  %v6744_v29 = vpop.f32.mrb[84].mxu0 }
 0x8f2   :  { %v6745_v16 = vadd.f32 %v6744_v29, %v11812_v45  ;;  %v6746_v57 = vpop.f32.mrb[85].mxu0 }
 0x8f3   :  { %v6747_v23 = vadd.f32 %v6746_v57, %v11818_v30  ;;  %v6748_v39 = vpop.f32.mrb[86].mxu0  ;;  %7478 = vmatprep.mubr.bf16.mxu1 %v7022_v9 }
 0x8f4   :  { %v6937_v42 = vmax.f32 %v6745_v16, 0.0  ;;  %v6749_v11 = vadd.f32 %v6748_v39, %v11812_v45  ;;  %v6750_v43 = vpop.f32.mrb[87].mxu0  ;;  %7479 = vmatmul.mubr.bf16.gmra.mrb[208].mxu1 %v7021_v19 }
 0x8f5   :  { %v6938_v5 = vmax.f32 %v6747_v23, 0.0  ;;  %v6751_v38 = vadd.f32 %v6750_v43, %v11818_v30 }
 0x8f6   :  { %7683 = vst [vmem:[%s12870_s3 + $0x2a0] sm:$0xff] %v6937_v42  ;;  %v6939_v49 = vmax.f32 %v6749_v11, 0.0 }
 0x8f7   :  { %7684 = vst [vmem:[%s12870_s3 + $0x2a8] sm:$0xff] %v6938_v5  ;;  %v6940_v28 = vmax.f32 %v6751_v38, 0.0 }
 0x8f8   :  { %v7023_v8 = vpack.c.bf16 %v6939_v49, %v6937_v42  ;;  %7685 = vst [vmem:[%s12870_s3 + $0x2b0] sm:$0xff] %v6939_v49 }
 0x8f9   :  { %v7024_v37 = vpack.c.bf16 %v6940_v28, %v6938_v5  ;;  %7686 = vst [vmem:[%s12870_s3 + $0x2b8] sm:$0xff] %v6940_v28  ;;  %v6754_v18 = vpop.f32.mrb[88].mxu0 }
 0x8fa   :  { %v6755_v17 = vadd.f32 %v6754_v18, %v11812_v45  ;;  %v6756_v61 = vpop.f32.mrb[89].mxu0 }
 0x8fb   :  { %v6757_v14 = vadd.f32 %v6756_v61, %v11818_v30  ;;  %v6758_v36 = vpop.f32.mrb[90].mxu0  ;;  %7488 = vmatprep.mubr.bf16.mxu1 %v7024_v37 }
 0x8fc   :  { %v6941_v32 = vmax.f32 %v6755_v17, 0.0  ;;  %v6759_v51 = vadd.f32 %v6758_v36, %v11812_v45  ;;  %v6760_v26 = vpop.f32.mrb[91].mxu0  ;;  %7489 = vmatmul.mubr.bf16.gmra.mrb[212].mxu1 %v7023_v8 }
 0x8fd   :  { %v6942_v7 = vmax.f32 %v6757_v14, 0.0  ;;  %v6761_v31 = vadd.f32 %v6760_v26, %v11818_v30 }
 0x8fe   :  { %7687 = vst [vmem:[%s12870_s3 + $0x2c0] sm:$0xff] %v6941_v32  ;;  %v6943_v25 = vmax.f32 %v6759_v51, 0.0 }
 0x8ff   :  { %7688 = vst [vmem:[%s12870_s3 + $0x2c8] sm:$0xff] %v6942_v7  ;;  %v6944_v3 = vmax.f32 %v6761_v31, 0.0 }
 0x900   :  { %v7025_v33 = vpack.c.bf16 %v6943_v25, %v6941_v32  ;;  %7689 = vst [vmem:[%s12870_s3 + $0x2d0] sm:$0xff] %v6943_v25 }
 0x901   :  { %v7026_v40 = vpack.c.bf16 %v6944_v3, %v6942_v7  ;;  %7690 = vst [vmem:[%s12870_s3 + $0x2d8] sm:$0xff] %v6944_v3  ;;  %v6764_v12 = vpop.f32.mrb[92].mxu0 }
 0x902   :  { %v6765_v50 = vadd.f32 %v6764_v12, %v11812_v45  ;;  %v6766_v47 = vpop.f32.mrb[93].mxu0 }
 0x903   :  { %v6767_v46 = vadd.f32 %v6766_v47, %v11818_v30  ;;  %v6768_v54 = vpop.f32.mrb[94].mxu0  ;;  %7498 = vmatprep.mubr.bf16.mxu1 %v7026_v40 }
 0x904   :  { %v6945_v53 = vmax.f32 %v6765_v50, 0.0  ;;  %v6769_v56 = vadd.f32 %v6768_v54, %v11812_v45  ;;  %v6770_v60 = vpop.f32.mrb[95].mxu0  ;;  %7499 = vmatmul.mubr.bf16.gmra.mrb[216].mxu1 %v7025_v33  ;;  %v12272_v54 = vld [vmem:[%s12869_s2 + $0x10] ss:$0 sm:$0xff] }
 0x905   :  { %v6946_v22 = vmax.f32 %v6767_v46, 0.0  ;;  %v6771_v62 = vadd.f32 %v6770_v60, %v11818_v30 }
 0x906   :  { %7691 = vst [vmem:[%s12870_s3 + $0x2e0] sm:$0xff] %v6945_v53  ;;  %v6947_v15 = vmax.f32 %v6769_v56, 0.0  ;;  %v12280_v56 = vld [vmem:[%s12869_s2 + $0x18] ss:$0 sm:$0xff] }
 0x907   :  { %7692 = vst [vmem:[%s12870_s3 + $0x2e8] sm:$0xff] %v6946_v22  ;;  %v6948_v10 = vmax.f32 %v6771_v62, 0.0 }
 0x908   :  { %v7027_v20 = vpack.c.bf16 %v6947_v15, %v6945_v53  ;;  %7693 = vst [vmem:[%s12870_s3 + $0x2f0] sm:$0xff] %v6947_v15 }
 0x909   :  { %v7028_v24 = vpack.c.bf16 %v6948_v10, %v6946_v22  ;;  %7694 = vst [vmem:[%s12870_s3 + $0x2f8] sm:$0xff] %v6948_v10  ;;  %v6774_v55 = vpop.f32.mrb[96].mxu0 }
 0x90a   :  { %v6775_v41 = vadd.f32 %v6774_v55, %v11812_v45  ;;  %v6776_v59 = vpop.f32.mrb[97].mxu0 }
 0x90b   :  { %v6777_v52 = vadd.f32 %v6776_v59, %v11818_v30  ;;  %v6778_v48 = vpop.f32.mrb[98].mxu0  ;;  %7508 = vmatprep.mubr.bf16.mxu1 %v7028_v24 }
 0x90c   :  { %v6949_v6 = vmax.f32 %v6775_v41, 0.0  ;;  %v6779_v0 = vadd.f32 %v6778_v48, %v11812_v45  ;;  %v6780_v4 = vpop.f32.mrb[99].mxu0  ;;  %7509 = vmatmul.mubr.bf16.gmra.mrb[220].mxu1 %v7027_v20 }
 0x90d   :  { %v6950_v34 = vmax.f32 %v6777_v52, 0.0  ;;  %v6781_v58 = vadd.f32 %v6780_v4, %v11818_v30 }
 0x90e   :  { %7695 = vst [vmem:[%s12870_s3 + $0x300] sm:$0xff] %v6949_v6  ;;  %v6951_v63 = vmax.f32 %v6779_v0, 0.0 }
 0x90f   :  { %7696 = vst [vmem:[%s12870_s3 + $0x308] sm:$0xff] %v6950_v34  ;;  %v6952_v44 = vmax.f32 %v6781_v58, 0.0 }
 0x910   :  { %v7029_v35 = vpack.c.bf16 %v6951_v63, %v6949_v6  ;;  %7697 = vst [vmem:[%s12870_s3 + $0x310] sm:$0xff] %v6951_v63 }
 0x911   :  { %v7030_v1 = vpack.c.bf16 %v6952_v44, %v6950_v34  ;;  %7698 = vst [vmem:[%s12870_s3 + $0x318] sm:$0xff] %v6952_v44  ;;  %v6784_v27 = vpop.f32.mrb[100].mxu0 }
 0x912   :  { %v6785_v21 = vadd.f32 %v6784_v27, %v11812_v45  ;;  %v6786_v2 = vpop.f32.mrb[101].mxu0 }
 0x913   :  { %v6787_v13 = vadd.f32 %v6786_v2, %v11818_v30  ;;  %v6788_v19 = vpop.f32.mrb[102].mxu0  ;;  %7518 = vmatprep.mubr.bf16.mxu1 %v7030_v1 }
 0x914   :  { %v6953_v9 = vmax.f32 %v6785_v21, 0.0  ;;  %v6789_v29 = vadd.f32 %v6788_v19, %v11812_v45  ;;  %v6790_v16 = vpop.f32.mrb[103].mxu0  ;;  %7519 = vmatmul.mubr.bf16.gmra.mrb[224].mxu1 %v7029_v35 }
 0x915   :  { %v6954_v57 = vmax.f32 %v6787_v13, 0.0  ;;  %v6791_v23 = vadd.f32 %v6790_v16, %v11818_v30 }
 0x916   :  { %7699 = vst [vmem:[%s12870_s3 + $0x320] sm:$0xff] %v6953_v9  ;;  %v6955_v39 = vmax.f32 %v6789_v29, 0.0 }
 0x917   :  { %7700 = vst [vmem:[%s12870_s3 + $0x328] sm:$0xff] %v6954_v57  ;;  %v6956_v42 = vmax.f32 %v6791_v23, 0.0 }
 0x918   :  { %v7031_v11 = vpack.c.bf16 %v6955_v39, %v6953_v9  ;;  %7701 = vst [vmem:[%s12870_s3 + $0x330] sm:$0xff] %v6955_v39 }
 0x919   :  { %v7032_v43 = vpack.c.bf16 %v6956_v42, %v6954_v57  ;;  %7702 = vst [vmem:[%s12870_s3 + $0x338] sm:$0xff] %v6956_v42  ;;  %v6794_v5 = vpop.f32.mrb[104].mxu0 }
 0x91a   :  { %v6795_v38 = vadd.f32 %v6794_v5, %v11812_v45  ;;  %v6796_v49 = vpop.f32.mrb[105].mxu0 }
 0x91b   :  { %v6797_v28 = vadd.f32 %v6796_v49, %v11818_v30  ;;  %v6798_v8 = vpop.f32.mrb[106].mxu0  ;;  %7528 = vmatprep.mubr.bf16.mxu1 %v7032_v43 }
 0x91c   :  { %v6957_v37 = vmax.f32 %v6795_v38, 0.0  ;;  %v6799_v18 = vadd.f32 %v6798_v8, %v11812_v45  ;;  %v6800_v17 = vpop.f32.mrb[107].mxu0  ;;  %7529 = vmatmul.mubr.bf16.gmra.mrb[228].mxu1 %v7031_v11 }
 0x91d   :  { %v6958_v61 = vmax.f32 %v6797_v28, 0.0  ;;  %v6801_v14 = vadd.f32 %v6800_v17, %v11818_v30 }
 0x91e   :  { %7703 = vst [vmem:[%s12870_s3 + $0x340] sm:$0xff] %v6957_v37  ;;  %v6959_v36 = vmax.f32 %v6799_v18, 0.0 }
 0x91f   :  { %7704 = vst [vmem:[%s12870_s3 + $0x348] sm:$0xff] %v6958_v61  ;;  %v6960_v32 = vmax.f32 %v6801_v14, 0.0 }
 0x920   :  { %v7033_v51 = vpack.c.bf16 %v6959_v36, %v6957_v37  ;;  %7705 = vst [vmem:[%s12870_s3 + $0x350] sm:$0xff] %v6959_v36 }
 0x921   :  { %v7034_v26 = vpack.c.bf16 %v6960_v32, %v6958_v61  ;;  %7706 = vst [vmem:[%s12870_s3 + $0x358] sm:$0xff] %v6960_v32  ;;  %v6804_v7 = vpop.f32.mrb[108].mxu0 }
 0x922   :  { %v6805_v31 = vadd.f32 %v6804_v7, %v11812_v45  ;;  %v6806_v25 = vpop.f32.mrb[109].mxu0 }
 0x923   :  { %v6807_v3 = vadd.f32 %v6806_v25, %v11818_v30  ;;  %v6808_v33 = vpop.f32.mrb[110].mxu0  ;;  %7538 = vmatprep.mubr.bf16.mxu1 %v7034_v26 }
 0x924   :  { %v6961_v40 = vmax.f32 %v6805_v31, 0.0  ;;  %v6809_v12 = vadd.f32 %v6808_v33, %v11812_v45  ;;  %v6810_v50 = vpop.f32.mrb[111].mxu0  ;;  %7539 = vmatmul.mubr.bf16.gmra.mrb[232].mxu1 %v7033_v51 }
 0x925   :  { %v6962_v47 = vmax.f32 %v6807_v3, 0.0  ;;  %v6811_v46 = vadd.f32 %v6810_v50, %v11818_v30 }
 0x926   :  { %7707 = vst [vmem:[%s12870_s3 + $0x360] sm:$0xff] %v6961_v40  ;;  %v6963_v53 = vmax.f32 %v6809_v12, 0.0 }
 0x927   :  { %7708 = vst [vmem:[%s12870_s3 + $0x368] sm:$0xff] %v6962_v47  ;;  %v6964_v60 = vmax.f32 %v6811_v46, 0.0  ;;  %v7280_v22 = vpop.f32.mrb[128].mxu1 }
 0x928   :  { %v7035_v62 = vpack.c.bf16 %v6963_v53, %v6961_v40  ;;  %7709 = vst [vmem:[%s12870_s3 + $0x370] sm:$0xff] %v6963_v53  ;;  %v7281_v15 = vadd.f32 %v12272_v54, %v7280_v22  ;;  %v7282_v10 = vpop.f32.mrb[129].mxu1 }
 0x929   :  { %v7036_v20 = vpack.c.bf16 %v6964_v60, %v6962_v47  ;;  %7710 = vst [vmem:[%s12870_s3 + $0x378] sm:$0xff] %v6964_v60  ;;  %v7283_v24 = vadd.f32 %v12280_v56, %v7282_v10  ;;  %v6814_v55 = vpop.f32.mrb[112].mxu0  ;;  %v7284_v41 = vpop.f32.mrb[130].mxu1 }
 0x92a   :  { %7727 = vst [vmem:[%s12871_s4] sm:$0xff] %v7281_v15  ;;  %v6815_v59 = vadd.f32 %v6814_v55, %v11812_v45  ;;  %v7285_v52 = vadd.f32 %v12272_v54, %v7284_v41  ;;  %v6816_v48 = vpop.f32.mrb[113].mxu0  ;;  %v7286_v6 = vpop.f32.mrb[131].mxu1 }
 0x92b   :  { %7728 = vst [vmem:[%s12871_s4 + $0x8] sm:$0xff] %v7283_v24  ;;  %v6817_v0 = vadd.f32 %v6816_v48, %v11818_v30  ;;  %v7287_v4 = vadd.f32 %v12280_v56, %v7286_v6  ;;  %v6818_v34 = vpop.f32.mrb[114].mxu0  ;;  %7548 = vmatprep.mubr.bf16.mxu1 %v7036_v20 }
 0x92c   :  { %v6965_v58 = vmax.f32 %v6815_v59, 0.0  ;;  %7729 = vst [vmem:[%s12871_s4 + $0x10] sm:$0xff] %v7285_v52  ;;  %v6819_v63 = vadd.f32 %v6818_v34, %v11812_v45  ;;  %v6820_v44 = vpop.f32.mrb[115].mxu0  ;;  %7549 = vmatmul.mubr.bf16.gmra.mrb[236].mxu1 %v7035_v62 }
 0x92d   :  { %v6966_v35 = vmax.f32 %v6817_v0, 0.0  ;;  %7730 = vst [vmem:[%s12871_s4 + $0x18] sm:$0xff] %v7287_v4  ;;  %v6821_v1 = vadd.f32 %v6820_v44, %v11818_v30 }
 0x92e   :  { %7711 = vst [vmem:[%s12870_s3 + $0x380] sm:$0xff] %v6965_v58  ;;  %v6967_v27 = vmax.f32 %v6819_v63, 0.0 }
 0x92f   :  { %7712 = vst [vmem:[%s12870_s3 + $0x388] sm:$0xff] %v6966_v35  ;;  %v6968_v21 = vmax.f32 %v6821_v1, 0.0  ;;  %v7290_v2 = vpop.f32.mrb[132].mxu1 }
 0x930   :  { %v7037_v13 = vpack.c.bf16 %v6967_v27, %v6965_v58  ;;  %7713 = vst [vmem:[%s12870_s3 + $0x390] sm:$0xff] %v6967_v27  ;;  %v7291_v19 = vadd.f32 %v12272_v54, %v7290_v2  ;;  %v7292_v9 = vpop.f32.mrb[133].mxu1 }
 0x931   :  { %v7038_v29 = vpack.c.bf16 %v6968_v21, %v6966_v35  ;;  %7714 = vst [vmem:[%s12870_s3 + $0x398] sm:$0xff] %v6968_v21  ;;  %v7293_v16 = vadd.f32 %v12280_v56, %v7292_v9  ;;  %v6824_v57 = vpop.f32.mrb[116].mxu0  ;;  %v7294_v23 = vpop.f32.mrb[134].mxu1 }
 0x932   :  { %7731 = vst [vmem:[%s12871_s4 + $0x20] sm:$0xff] %v7291_v19  ;;  %v6825_v39 = vadd.f32 %v6824_v57, %v11812_v45  ;;  %v7295_v42 = vadd.f32 %v12272_v54, %v7294_v23  ;;  %v6826_v11 = vpop.f32.mrb[117].mxu0  ;;  %v7296_v43 = vpop.f32.mrb[135].mxu1 }
 0x933   :  { %7732 = vst [vmem:[%s12871_s4 + $0x28] sm:$0xff] %v7293_v16  ;;  %v6827_v5 = vadd.f32 %v6826_v11, %v11818_v30  ;;  %v7297_v38 = vadd.f32 %v12280_v56, %v7296_v43  ;;  %v6828_v49 = vpop.f32.mrb[118].mxu0  ;;  %7558 = vmatprep.mubr.bf16.mxu1 %v7038_v29 }
 0x934   :  { %v6969_v28 = vmax.f32 %v6825_v39, 0.0  ;;  %7733 = vst [vmem:[%s12871_s4 + $0x30] sm:$0xff] %v7295_v42  ;;  %v6829_v8 = vadd.f32 %v6828_v49, %v11812_v45  ;;  %v6830_v37 = vpop.f32.mrb[119].mxu0  ;;  %7559 = vmatmul.mubr.bf16.gmra.mrb[240].mxu1 %v7037_v13 }
 0x935   :  { %v6970_v18 = vmax.f32 %v6827_v5, 0.0  ;;  %7734 = vst [vmem:[%s12871_s4 + $0x38] sm:$0xff] %v7297_v38  ;;  %v6831_v17 = vadd.f32 %v6830_v37, %v11818_v30 }
 0x936   :  { %7715 = vst [vmem:[%s12870_s3 + $0x3a0] sm:$0xff] %v6969_v28  ;;  %v6971_v61 = vmax.f32 %v6829_v8, 0.0 }
 0x937   :  { %7716 = vst [vmem:[%s12870_s3 + $0x3a8] sm:$0xff] %v6970_v18  ;;  %v6972_v14 = vmax.f32 %v6831_v17, 0.0  ;;  %v7300_v36 = vpop.f32.mrb[136].mxu1 }
 0x938   :  { %v7039_v32 = vpack.c.bf16 %v6971_v61, %v6969_v28  ;;  %7717 = vst [vmem:[%s12870_s3 + $0x3b0] sm:$0xff] %v6971_v61  ;;  %v7301_v51 = vadd.f32 %v12272_v54, %v7300_v36  ;;  %v7302_v26 = vpop.f32.mrb[137].mxu1 }
 0x939   :  { %v7040_v7 = vpack.c.bf16 %v6972_v14, %v6970_v18  ;;  %7718 = vst [vmem:[%s12870_s3 + $0x3b8] sm:$0xff] %v6972_v14  ;;  %v7303_v31 = vadd.f32 %v12280_v56, %v7302_v26  ;;  %v6834_v25 = vpop.f32.mrb[120].mxu0  ;;  %v7304_v3 = vpop.f32.mrb[138].mxu1 }
 0x93a   :  { %7735 = vst [vmem:[%s12871_s4 + $0x40] sm:$0xff] %v7301_v51  ;;  %v6835_v33 = vadd.f32 %v6834_v25, %v11812_v45  ;;  %v7305_v40 = vadd.f32 %v12272_v54, %v7304_v3  ;;  %v6836_v12 = vpop.f32.mrb[121].mxu0  ;;  %v7306_v50 = vpop.f32.mrb[139].mxu1 }
 0x93b   :  { %7736 = vst [vmem:[%s12871_s4 + $0x48] sm:$0xff] %v7303_v31  ;;  %v6837_v47 = vadd.f32 %v6836_v12, %v11818_v30  ;;  %v7307_v46 = vadd.f32 %v12280_v56, %v7306_v50  ;;  %v6838_v53 = vpop.f32.mrb[122].mxu0  ;;  %7568 = vmatprep.mubr.bf16.mxu1 %v7040_v7 }
 0x93c   :  { %v6973_v60 = vmax.f32 %v6835_v33, 0.0  ;;  %7737 = vst [vmem:[%s12871_s4 + $0x50] sm:$0xff] %v7305_v40  ;;  %v6839_v22 = vadd.f32 %v6838_v53, %v11812_v45  ;;  %v6840_v62 = vpop.f32.mrb[123].mxu0  ;;  %7569 = vmatmul.mubr.bf16.gmra.mrb[244].mxu1 %v7039_v32 }
 0x93d   :  { %v6974_v15 = vmax.f32 %v6837_v47, 0.0  ;;  %7738 = vst [vmem:[%s12871_s4 + $0x58] sm:$0xff] %v7307_v46  ;;  %v6841_v10 = vadd.f32 %v6840_v62, %v11818_v30 }
 0x93e   :  { %7719 = vst [vmem:[%s12870_s3 + $0x3c0] sm:$0xff] %v6973_v60  ;;  %v6975_v20 = vmax.f32 %v6839_v22, 0.0 }
 0x93f   :  { %7720 = vst [vmem:[%s12870_s3 + $0x3c8] sm:$0xff] %v6974_v15  ;;  %v6976_v24 = vmax.f32 %v6841_v10, 0.0  ;;  %v7310_v55 = vpop.f32.mrb[140].mxu1 }
 0x940   :  { %v7041_v41 = vpack.c.bf16 %v6975_v20, %v6973_v60  ;;  %7721 = vst [vmem:[%s12870_s3 + $0x3d0] sm:$0xff] %v6975_v20  ;;  %v7311_v59 = vadd.f32 %v12272_v54, %v7310_v55  ;;  %v7312_v52 = vpop.f32.mrb[141].mxu1 }
 0x941   :  { %v7042_v48 = vpack.c.bf16 %v6976_v24, %v6974_v15  ;;  %7722 = vst [vmem:[%s12870_s3 + $0x3d8] sm:$0xff] %v6976_v24  ;;  %v7313_v6 = vadd.f32 %v12280_v56, %v7312_v52  ;;  %v6844_v0 = vpop.f32.mrb[124].mxu0  ;;  %v7314_v4 = vpop.f32.mrb[142].mxu1 }
 0x942   :  { %7739 = vst [vmem:[%s12871_s4 + $0x60] sm:$0xff] %v7311_v59  ;;  %v6845_v34 = vadd.f32 %v6844_v0, %v11812_v45  ;;  %v7315_v58 = vadd.f32 %v12272_v54, %v7314_v4  ;;  %v6846_v63 = vpop.f32.mrb[125].mxu0  ;;  %v7316_v44 = vpop.f32.mrb[143].mxu1 }
 0x943   :  { %7740 = vst [vmem:[%s12871_s4 + $0x68] sm:$0xff] %v7313_v6  ;;  %v6847_v35 = vadd.f32 %v6846_v63, %v11818_v30  ;;  %v7317_v1 = vadd.f32 %v12280_v56, %v7316_v44  ;;  %v6848_v27 = vpop.f32.mrb[126].mxu0  ;;  %7578 = vmatprep.mubr.bf16.mxu1 %v7042_v48 }
 0x944   :  { %v6977_v21 = vmax.f32 %v6845_v34, 0.0  ;;  %7741 = vst [vmem:[%s12871_s4 + $0x70] sm:$0xff] %v7315_v58  ;;  %v6849_v2 = vadd.f32 %v6848_v27, %v11812_v45  ;;  %v6850_v13 = vpop.f32.mrb[127].mxu0  ;;  %7579 = vmatmul.mubr.bf16.gmra.mrb[248].mxu1 %v7041_v41 }
 0x945   :  { %v6978_v19 = vmax.f32 %v6847_v35, 0.0  ;;  %7742 = vst [vmem:[%s12871_s4 + $0x78] sm:$0xff] %v7317_v1  ;;  %v6851_v9 = vadd.f32 %v6850_v13, %v11818_v30 }
 0x946   :  { %7723 = vst [vmem:[%s12870_s3 + $0x3e0] sm:$0xff] %v6977_v21  ;;  %v6979_v29 = vmax.f32 %v6849_v2, 0.0 }
 0x947   :  { %7724 = vst [vmem:[%s12870_s3 + $0x3e8] sm:$0xff] %v6978_v19  ;;  %v6980_v16 = vmax.f32 %v6851_v9, 0.0  ;;  %v7320_v45 = vpop.f32.mrb[144].mxu1 }
 0x948   :  { %v7043_v57 = vpack.c.bf16 %v6979_v29, %v6977_v21  ;;  %7725 = vst [vmem:[%s12870_s3 + $0x3f0] sm:$0xff] %v6979_v29  ;;  %v7321_v23 = vadd.f32 %v12272_v54, %v7320_v45  ;;  %v7322_v39 = vpop.f32.mrb[145].mxu1 }
 0x949   :  { %v7044_v30 = vpack.c.bf16 %v6980_v16, %v6978_v19  ;;  %7726 = vst [vmem:[%s12870_s3 + $0x3f8] sm:$0xff] %v6980_v16  ;;  %v7323_v42 = vadd.f32 %v12280_v56, %v7322_v39  ;;  %v7324_v11 = vpop.f32.mrb[146].mxu1 }
 0x94a   :  { %7743 = vst [vmem:[%s12871_s4 + $0x80] sm:$0xff] %v7321_v23  ;;  %v7325_v43 = vadd.f32 %v12272_v54, %v7324_v11  ;;  %v7326_v5 = vpop.f32.mrb[147].mxu1 }
 0x94b   :  { %7744 = vst [vmem:[%s12871_s4 + $0x88] sm:$0xff] %v7323_v42  ;;  %v7327_v38 = vadd.f32 %v12280_v56, %v7326_v5  ;;  %7588 = vmatprep.mubr.bf16.mxu1 %v7044_v30 }
 0x94c   :  { %7745 = vst [vmem:[%s12871_s4 + $0x90] sm:$0xff] %v7325_v43  ;;  %7589 = vmatmul.mubr.bf16.gmra.mrb[252].mxu1 %v7043_v57 }
 0x94d   :  { %7746 = vst [vmem:[%s12871_s4 + $0x98] sm:$0xff] %v7327_v38 }
 0x94f   :  { %v7330_v49 = vpop.f32.mrb[148].mxu1 }
 0x950   :  { %v7331_v28 = vadd.f32 %v12272_v54, %v7330_v49  ;;  %v7332_v8 = vpop.f32.mrb[149].mxu1 }
 0x951   :  { %v7333_v37 = vadd.f32 %v12280_v56, %v7332_v8  ;;  %v7334_v18 = vpop.f32.mrb[150].mxu1 }
 0x952   :  { %7747 = vst [vmem:[%s12871_s4 + $0xa0] sm:$0xff] %v7331_v28  ;;  %v7335_v17 = vadd.f32 %v12272_v54, %v7334_v18  ;;  %v7336_v61 = vpop.f32.mrb[151].mxu1 }
 0x953   :  { %7748 = vst [vmem:[%s12871_s4 + $0xa8] sm:$0xff] %v7333_v37  ;;  %v7337_v14 = vadd.f32 %v12280_v56, %v7336_v61 }
 0x954   :  { %7749 = vst [vmem:[%s12871_s4 + $0xb0] sm:$0xff] %v7335_v17 }
 0x955   :  { %7750 = vst [vmem:[%s12871_s4 + $0xb8] sm:$0xff] %v7337_v14 }
 0x957   :  { %v7340_v36 = vpop.f32.mrb[152].mxu1 }
 0x958   :  { %v7341_v32 = vadd.f32 %v12272_v54, %v7340_v36  ;;  %v7342_v51 = vpop.f32.mrb[153].mxu1 }
 0x959   :  { %v7343_v26 = vadd.f32 %v12280_v56, %v7342_v51  ;;  %v7344_v7 = vpop.f32.mrb[154].mxu1 }
 0x95a   :  { %7751 = vst [vmem:[%s12871_s4 + $0xc0] sm:$0xff] %v7341_v32  ;;  %v7345_v31 = vadd.f32 %v12272_v54, %v7344_v7  ;;  %v7346_v25 = vpop.f32.mrb[155].mxu1 }
 0x95b   :  { %7752 = vst [vmem:[%s12871_s4 + $0xc8] sm:$0xff] %v7343_v26  ;;  %v7347_v3 = vadd.f32 %v12280_v56, %v7346_v25 }
 0x95c   :  { %7753 = vst [vmem:[%s12871_s4 + $0xd0] sm:$0xff] %v7345_v31 }
 0x95d   :  { %7754 = vst [vmem:[%s12871_s4 + $0xd8] sm:$0xff] %v7347_v3 }
 0x95f   :  { %v7350_v33 = vpop.f32.mrb[156].mxu1 }
 0x960   :  { %v7351_v40 = vadd.f32 %v12272_v54, %v7350_v33  ;;  %v7352_v12 = vpop.f32.mrb[157].mxu1 }
 0x961   :  { %v7353_v50 = vadd.f32 %v12280_v56, %v7352_v12  ;;  %v7354_v47 = vpop.f32.mrb[158].mxu1 }
 0x962   :  { %7755 = vst [vmem:[%s12871_s4 + $0xe0] sm:$0xff] %v7351_v40  ;;  %v7355_v46 = vadd.f32 %v12272_v54, %v7354_v47  ;;  %v7356_v53 = vpop.f32.mrb[159].mxu1 }
 0x963   :  { %7756 = vst [vmem:[%s12871_s4 + $0xe8] sm:$0xff] %v7353_v50  ;;  %v7357_v60 = vadd.f32 %v12280_v56, %v7356_v53 }
 0x964   :  { %7757 = vst [vmem:[%s12871_s4 + $0xf0] sm:$0xff] %v7355_v46 }
 0x965   :  { %7758 = vst [vmem:[%s12871_s4 + $0xf8] sm:$0xff] %v7357_v60 }
 0x967   :  { %v7360_v22 = vpop.f32.mrb[160].mxu1 }
 0x968   :  { %v7361_v62 = vadd.f32 %v12272_v54, %v7360_v22  ;;  %v7362_v15 = vpop.f32.mrb[161].mxu1 }
 0x969   :  { %v7363_v10 = vadd.f32 %v12280_v56, %v7362_v15  ;;  %v7364_v20 = vpop.f32.mrb[162].mxu1 }
 0x96a   :  { %7759 = vst [vmem:[%s12871_s4 + $0x100] sm:$0xff] %v7361_v62  ;;  %v7365_v24 = vadd.f32 %v12272_v54, %v7364_v20  ;;  %v7366_v55 = vpop.f32.mrb[163].mxu1 }
 0x96b   :  { %7760 = vst [vmem:[%s12871_s4 + $0x108] sm:$0xff] %v7363_v10  ;;  %v7367_v41 = vadd.f32 %v12280_v56, %v7366_v55 }
 0x96c   :  { %7761 = vst [vmem:[%s12871_s4 + $0x110] sm:$0xff] %v7365_v24 }
 0x96d   :  { %7762 = vst [vmem:[%s12871_s4 + $0x118] sm:$0xff] %v7367_v41 }
 0x96f   :  { %v7370_v59 = vpop.f32.mrb[164].mxu1 }
 0x970   :  { %v7371_v52 = vadd.f32 %v12272_v54, %v7370_v59  ;;  %v7372_v48 = vpop.f32.mrb[165].mxu1 }
 0x971   :  { %v7373_v6 = vadd.f32 %v12280_v56, %v7372_v48  ;;  %v7374_v0 = vpop.f32.mrb[166].mxu1 }
 0x972   :  { %7763 = vst [vmem:[%s12871_s4 + $0x120] sm:$0xff] %v7371_v52  ;;  %v7375_v4 = vadd.f32 %v12272_v54, %v7374_v0  ;;  %v7376_v34 = vpop.f32.mrb[167].mxu1 }
 0x973   :  { %7764 = vst [vmem:[%s12871_s4 + $0x128] sm:$0xff] %v7373_v6  ;;  %v7377_v58 = vadd.f32 %v12280_v56, %v7376_v34 }
 0x974   :  { %7765 = vst [vmem:[%s12871_s4 + $0x130] sm:$0xff] %v7375_v4 }
 0x975   :  { %7766 = vst [vmem:[%s12871_s4 + $0x138] sm:$0xff] %v7377_v58 }
 0x977   :  { %v7380_v63 = vpop.f32.mrb[168].mxu1 }
 0x978   :  { %v7381_v44 = vadd.f32 %v12272_v54, %v7380_v63  ;;  %v7382_v35 = vpop.f32.mrb[169].mxu1 }
 0x979   :  { %v7383_v1 = vadd.f32 %v12280_v56, %v7382_v35  ;;  %v7384_v27 = vpop.f32.mrb[170].mxu1 }
 0x97a   :  { %7767 = vst [vmem:[%s12871_s4 + $0x140] sm:$0xff] %v7381_v44  ;;  %v7385_v21 = vadd.f32 %v12272_v54, %v7384_v27  ;;  %v7386_v2 = vpop.f32.mrb[171].mxu1 }
 0x97b   :  { %7768 = vst [vmem:[%s12871_s4 + $0x148] sm:$0xff] %v7383_v1  ;;  %v7387_v13 = vadd.f32 %v12280_v56, %v7386_v2 }
 0x97c   :  { %7769 = vst [vmem:[%s12871_s4 + $0x150] sm:$0xff] %v7385_v21 }
 0x97d   :  { %7770 = vst [vmem:[%s12871_s4 + $0x158] sm:$0xff] %v7387_v13 }
 0x97f   :  { %v7390_v19 = vpop.f32.mrb[172].mxu1 }
 0x980   :  { %v7391_v9 = vadd.f32 %v12272_v54, %v7390_v19  ;;  %v7392_v29 = vpop.f32.mrb[173].mxu1 }
 0x981   :  { %v7393_v16 = vadd.f32 %v12280_v56, %v7392_v29  ;;  %v7394_v45 = vpop.f32.mrb[174].mxu1 }
 0x982   :  { %7771 = vst [vmem:[%s12871_s4 + $0x160] sm:$0xff] %v7391_v9  ;;  %v7395_v57 = vadd.f32 %v12272_v54, %v7394_v45  ;;  %v7396_v23 = vpop.f32.mrb[175].mxu1 }
 0x983   :  { %7772 = vst [vmem:[%s12871_s4 + $0x168] sm:$0xff] %v7393_v16  ;;  %v7397_v39 = vadd.f32 %v12280_v56, %v7396_v23 }
 0x984   :  { %7773 = vst [vmem:[%s12871_s4 + $0x170] sm:$0xff] %v7395_v57 }
 0x985   :  { %7774 = vst [vmem:[%s12871_s4 + $0x178] sm:$0xff] %v7397_v39 }
 0x987   :  { %v7400_v30 = vpop.f32.mrb[176].mxu1 }
 0x988   :  { %v7401_v42 = vadd.f32 %v12272_v54, %v7400_v30  ;;  %v7402_v11 = vpop.f32.mrb[177].mxu1 }
 0x989   :  { %v7403_v43 = vadd.f32 %v12280_v56, %v7402_v11  ;;  %v7404_v5 = vpop.f32.mrb[178].mxu1 }
 0x98a   :  { %7775 = vst [vmem:[%s12871_s4 + $0x180] sm:$0xff] %v7401_v42  ;;  %v7405_v38 = vadd.f32 %v12272_v54, %v7404_v5  ;;  %v7406_v49 = vpop.f32.mrb[179].mxu1 }
 0x98b   :  { %7776 = vst [vmem:[%s12871_s4 + $0x188] sm:$0xff] %v7403_v43  ;;  %v7407_v28 = vadd.f32 %v12280_v56, %v7406_v49 }
 0x98c   :  { %7777 = vst [vmem:[%s12871_s4 + $0x190] sm:$0xff] %v7405_v38 }
 0x98d   :  { %7778 = vst [vmem:[%s12871_s4 + $0x198] sm:$0xff] %v7407_v28 }
 0x98f   :  { %v7410_v8 = vpop.f32.mrb[180].mxu1 }
 0x990   :  { %v7411_v37 = vadd.f32 %v12272_v54, %v7410_v8  ;;  %v7412_v18 = vpop.f32.mrb[181].mxu1 }
 0x991   :  { %v7413_v17 = vadd.f32 %v12280_v56, %v7412_v18  ;;  %v7414_v61 = vpop.f32.mrb[182].mxu1 }
 0x992   :  { %7779 = vst [vmem:[%s12871_s4 + $0x1a0] sm:$0xff] %v7411_v37  ;;  %v7415_v14 = vadd.f32 %v12272_v54, %v7414_v61  ;;  %v7416_v36 = vpop.f32.mrb[183].mxu1 }
 0x993   :  { %7780 = vst [vmem:[%s12871_s4 + $0x1a8] sm:$0xff] %v7413_v17  ;;  %v7417_v32 = vadd.f32 %v12280_v56, %v7416_v36 }
 0x994   :  { %7781 = vst [vmem:[%s12871_s4 + $0x1b0] sm:$0xff] %v7415_v14 }
 0x995   :  { %7782 = vst [vmem:[%s12871_s4 + $0x1b8] sm:$0xff] %v7417_v32 }
 0x997   :  { %v7420_v51 = vpop.f32.mrb[184].mxu1 }
 0x998   :  { %v7421_v26 = vadd.f32 %v12272_v54, %v7420_v51  ;;  %v7422_v7 = vpop.f32.mrb[185].mxu1 }
 0x999   :  { %v7423_v31 = vadd.f32 %v12280_v56, %v7422_v7  ;;  %v7424_v25 = vpop.f32.mrb[186].mxu1 }
 0x99a   :  { %7783 = vst [vmem:[%s12871_s4 + $0x1c0] sm:$0xff] %v7421_v26  ;;  %v7425_v3 = vadd.f32 %v12272_v54, %v7424_v25  ;;  %v7426_v33 = vpop.f32.mrb[187].mxu1 }
 0x99b   :  { %7784 = vst [vmem:[%s12871_s4 + $0x1c8] sm:$0xff] %v7423_v31  ;;  %v7427_v40 = vadd.f32 %v12280_v56, %v7426_v33 }
 0x99c   :  { %7785 = vst [vmem:[%s12871_s4 + $0x1d0] sm:$0xff] %v7425_v3 }
 0x99d   :  { %7786 = vst [vmem:[%s12871_s4 + $0x1d8] sm:$0xff] %v7427_v40 }
 0x99f   :  { %v7430_v12 = vpop.f32.mrb[188].mxu1 }
 0x9a0   :  { %v7431_v50 = vadd.f32 %v12272_v54, %v7430_v12  ;;  %v7432_v47 = vpop.f32.mrb[189].mxu1 }
 0x9a1   :  { %v7433_v46 = vadd.f32 %v12280_v56, %v7432_v47  ;;  %v7434_v53 = vpop.f32.mrb[190].mxu1 }
 0x9a2   :  { %7787 = vst [vmem:[%s12871_s4 + $0x1e0] sm:$0xff] %v7431_v50  ;;  %v7435_v60 = vadd.f32 %v12272_v54, %v7434_v53  ;;  %v7436_v22 = vpop.f32.mrb[191].mxu1 }
 0x9a3   :  { %7788 = vst [vmem:[%s12871_s4 + $0x1e8] sm:$0xff] %v7433_v46  ;;  %v7437_v62 = vadd.f32 %v12280_v56, %v7436_v22 }
 0x9a4   :  { %7789 = vst [vmem:[%s12871_s4 + $0x1f0] sm:$0xff] %v7435_v60 }
 0x9a5   :  { %7790 = vst [vmem:[%s12871_s4 + $0x1f8] sm:$0xff] %v7437_v62 }
 0x9a7   :  { %v7440_v15 = vpop.f32.mrb[192].mxu1 }
 0x9a8   :  { %v7441_v10 = vadd.f32 %v12272_v54, %v7440_v15  ;;  %v7442_v20 = vpop.f32.mrb[193].mxu1 }
 0x9a9   :  { %v7443_v24 = vadd.f32 %v12280_v56, %v7442_v20  ;;  %v7444_v55 = vpop.f32.mrb[194].mxu1 }
 0x9aa   :  { %7791 = vst [vmem:[%s12871_s4 + $0x200] sm:$0xff] %v7441_v10  ;;  %v7445_v41 = vadd.f32 %v12272_v54, %v7444_v55  ;;  %v7446_v59 = vpop.f32.mrb[195].mxu1 }
 0x9ab   :  { %7792 = vst [vmem:[%s12871_s4 + $0x208] sm:$0xff] %v7443_v24  ;;  %v7447_v52 = vadd.f32 %v12280_v56, %v7446_v59 }
 0x9ac   :  { %7793 = vst [vmem:[%s12871_s4 + $0x210] sm:$0xff] %v7445_v41 }
 0x9ad   :  { %7794 = vst [vmem:[%s12871_s4 + $0x218] sm:$0xff] %v7447_v52 }
 0x9af   :  { %v7450_v48 = vpop.f32.mrb[196].mxu1 }
 0x9b0   :  { %v7451_v6 = vadd.f32 %v12272_v54, %v7450_v48  ;;  %v7452_v0 = vpop.f32.mrb[197].mxu1 }
 0x9b1   :  { %v7453_v4 = vadd.f32 %v12280_v56, %v7452_v0  ;;  %v7454_v34 = vpop.f32.mrb[198].mxu1 }
 0x9b2   :  { %7795 = vst [vmem:[%s12871_s4 + $0x220] sm:$0xff] %v7451_v6  ;;  %v7455_v58 = vadd.f32 %v12272_v54, %v7454_v34  ;;  %v7456_v63 = vpop.f32.mrb[199].mxu1 }
 0x9b3   :  { %7796 = vst [vmem:[%s12871_s4 + $0x228] sm:$0xff] %v7453_v4  ;;  %v7457_v44 = vadd.f32 %v12280_v56, %v7456_v63 }
 0x9b4   :  { %7797 = vst [vmem:[%s12871_s4 + $0x230] sm:$0xff] %v7455_v58 }
 0x9b5   :  { %7798 = vst [vmem:[%s12871_s4 + $0x238] sm:$0xff] %v7457_v44 }
 0x9b7   :  { %v7460_v35 = vpop.f32.mrb[200].mxu1 }
 0x9b8   :  { %v7461_v1 = vadd.f32 %v12272_v54, %v7460_v35  ;;  %v7462_v27 = vpop.f32.mrb[201].mxu1 }
 0x9b9   :  { %v7463_v21 = vadd.f32 %v12280_v56, %v7462_v27  ;;  %v7464_v2 = vpop.f32.mrb[202].mxu1 }
 0x9ba   :  { %7799 = vst [vmem:[%s12871_s4 + $0x240] sm:$0xff] %v7461_v1  ;;  %v7465_v13 = vadd.f32 %v12272_v54, %v7464_v2  ;;  %v7466_v19 = vpop.f32.mrb[203].mxu1 }
 0x9bb   :  { %7800 = vst [vmem:[%s12871_s4 + $0x248] sm:$0xff] %v7463_v21  ;;  %v7467_v9 = vadd.f32 %v12280_v56, %v7466_v19 }
 0x9bc   :  { %7801 = vst [vmem:[%s12871_s4 + $0x250] sm:$0xff] %v7465_v13 }
 0x9bd   :  { %7802 = vst [vmem:[%s12871_s4 + $0x258] sm:$0xff] %v7467_v9 }
 0x9bf   :  { %v7470_v29 = vpop.f32.mrb[204].mxu1 }
 0x9c0   :  { %v7471_v16 = vadd.f32 %v12272_v54, %v7470_v29  ;;  %v7472_v45 = vpop.f32.mrb[205].mxu1 }
 0x9c1   :  { %v7473_v57 = vadd.f32 %v12280_v56, %v7472_v45  ;;  %v7474_v23 = vpop.f32.mrb[206].mxu1 }
 0x9c2   :  { %7803 = vst [vmem:[%s12871_s4 + $0x260] sm:$0xff] %v7471_v16  ;;  %v7475_v39 = vadd.f32 %v12272_v54, %v7474_v23  ;;  %v7476_v30 = vpop.f32.mrb[207].mxu1 }
 0x9c3   :  { %7804 = vst [vmem:[%s12871_s4 + $0x268] sm:$0xff] %v7473_v57  ;;  %v7477_v42 = vadd.f32 %v12280_v56, %v7476_v30 }
 0x9c4   :  { %7805 = vst [vmem:[%s12871_s4 + $0x270] sm:$0xff] %v7475_v39 }
 0x9c5   :  { %7806 = vst [vmem:[%s12871_s4 + $0x278] sm:$0xff] %v7477_v42 }
 0x9c7   :  { %v7480_v11 = vpop.f32.mrb[208].mxu1 }
 0x9c8   :  { %v7481_v43 = vadd.f32 %v12272_v54, %v7480_v11  ;;  %v7482_v5 = vpop.f32.mrb[209].mxu1 }
 0x9c9   :  { %v7483_v38 = vadd.f32 %v12280_v56, %v7482_v5  ;;  %v7484_v49 = vpop.f32.mrb[210].mxu1 }
 0x9ca   :  { %7807 = vst [vmem:[%s12871_s4 + $0x280] sm:$0xff] %v7481_v43  ;;  %v7485_v28 = vadd.f32 %v12272_v54, %v7484_v49  ;;  %v7486_v8 = vpop.f32.mrb[211].mxu1 }
 0x9cb   :  { %7808 = vst [vmem:[%s12871_s4 + $0x288] sm:$0xff] %v7483_v38  ;;  %v7487_v37 = vadd.f32 %v12280_v56, %v7486_v8 }
 0x9cc   :  { %7809 = vst [vmem:[%s12871_s4 + $0x290] sm:$0xff] %v7485_v28 }
 0x9cd   :  { %7810 = vst [vmem:[%s12871_s4 + $0x298] sm:$0xff] %v7487_v37 }
 0x9cf   :  { %v7490_v18 = vpop.f32.mrb[212].mxu1 }
 0x9d0   :  { %v7491_v17 = vadd.f32 %v12272_v54, %v7490_v18  ;;  %v7492_v61 = vpop.f32.mrb[213].mxu1 }
 0x9d1   :  { %v7493_v14 = vadd.f32 %v12280_v56, %v7492_v61  ;;  %v7494_v36 = vpop.f32.mrb[214].mxu1 }
 0x9d2   :  { %7811 = vst [vmem:[%s12871_s4 + $0x2a0] sm:$0xff] %v7491_v17  ;;  %v7495_v32 = vadd.f32 %v12272_v54, %v7494_v36  ;;  %v7496_v51 = vpop.f32.mrb[215].mxu1 }
 0x9d3   :  { %7812 = vst [vmem:[%s12871_s4 + $0x2a8] sm:$0xff] %v7493_v14  ;;  %v7497_v26 = vadd.f32 %v12280_v56, %v7496_v51 }
 0x9d4   :  { %7813 = vst [vmem:[%s12871_s4 + $0x2b0] sm:$0xff] %v7495_v32 }
 0x9d5   :  { %7814 = vst [vmem:[%s12871_s4 + $0x2b8] sm:$0xff] %v7497_v26 }
 0x9d7   :  { %v7500_v7 = vpop.f32.mrb[216].mxu1 }
 0x9d8   :  { %v7501_v31 = vadd.f32 %v12272_v54, %v7500_v7  ;;  %v7502_v25 = vpop.f32.mrb[217].mxu1 }
 0x9d9   :  { %v7503_v3 = vadd.f32 %v12280_v56, %v7502_v25  ;;  %v7504_v33 = vpop.f32.mrb[218].mxu1 }
 0x9da   :  { %7815 = vst [vmem:[%s12871_s4 + $0x2c0] sm:$0xff] %v7501_v31  ;;  %v7505_v40 = vadd.f32 %v12272_v54, %v7504_v33  ;;  %v7506_v12 = vpop.f32.mrb[219].mxu1 }
 0x9db   :  { %7816 = vst [vmem:[%s12871_s4 + $0x2c8] sm:$0xff] %v7503_v3  ;;  %v7507_v50 = vadd.f32 %v12280_v56, %v7506_v12 }
 0x9dc   :  { %7817 = vst [vmem:[%s12871_s4 + $0x2d0] sm:$0xff] %v7505_v40 }
 0x9dd   :  { %7818 = vst [vmem:[%s12871_s4 + $0x2d8] sm:$0xff] %v7507_v50 }
 0x9df   :  { %v7510_v47 = vpop.f32.mrb[220].mxu1 }
 0x9e0   :  { %v7511_v46 = vadd.f32 %v12272_v54, %v7510_v47  ;;  %v7512_v53 = vpop.f32.mrb[221].mxu1 }
 0x9e1   :  { %v7513_v60 = vadd.f32 %v12280_v56, %v7512_v53  ;;  %v7514_v22 = vpop.f32.mrb[222].mxu1 }
 0x9e2   :  { %7819 = vst [vmem:[%s12871_s4 + $0x2e0] sm:$0xff] %v7511_v46  ;;  %v7515_v62 = vadd.f32 %v12272_v54, %v7514_v22  ;;  %v7516_v15 = vpop.f32.mrb[223].mxu1 }
 0x9e3   :  { %7820 = vst [vmem:[%s12871_s4 + $0x2e8] sm:$0xff] %v7513_v60  ;;  %v7517_v10 = vadd.f32 %v12280_v56, %v7516_v15 }
 0x9e4   :  { %7821 = vst [vmem:[%s12871_s4 + $0x2f0] sm:$0xff] %v7515_v62 }
 0x9e5   :  { %7822 = vst [vmem:[%s12871_s4 + $0x2f8] sm:$0xff] %v7517_v10 }
 0x9e7   :  { %v7520_v20 = vpop.f32.mrb[224].mxu1 }
 0x9e8   :  { %v7521_v24 = vadd.f32 %v12272_v54, %v7520_v20  ;;  %v7522_v55 = vpop.f32.mrb[225].mxu1 }
 0x9e9   :  { %v7523_v41 = vadd.f32 %v12280_v56, %v7522_v55  ;;  %v7524_v59 = vpop.f32.mrb[226].mxu1 }
 0x9ea   :  { %7823 = vst [vmem:[%s12871_s4 + $0x300] sm:$0xff] %v7521_v24  ;;  %v7525_v52 = vadd.f32 %v12272_v54, %v7524_v59  ;;  %v7526_v48 = vpop.f32.mrb[227].mxu1 }
 0x9eb   :  { %7824 = vst [vmem:[%s12871_s4 + $0x308] sm:$0xff] %v7523_v41  ;;  %v7527_v6 = vadd.f32 %v12280_v56, %v7526_v48 }
 0x9ec   :  { %7825 = vst [vmem:[%s12871_s4 + $0x310] sm:$0xff] %v7525_v52 }
 0x9ed   :  { %7826 = vst [vmem:[%s12871_s4 + $0x318] sm:$0xff] %v7527_v6 }
 0x9ef   :  { %v7530_v0 = vpop.f32.mrb[228].mxu1 }
 0x9f0   :  { %v7531_v4 = vadd.f32 %v12272_v54, %v7530_v0  ;;  %v7532_v34 = vpop.f32.mrb[229].mxu1 }
 0x9f1   :  { %v7533_v58 = vadd.f32 %v12280_v56, %v7532_v34  ;;  %v7534_v63 = vpop.f32.mrb[230].mxu1 }
 0x9f2   :  { %7827 = vst [vmem:[%s12871_s4 + $0x320] sm:$0xff] %v7531_v4  ;;  %v7535_v44 = vadd.f32 %v12272_v54, %v7534_v63  ;;  %v7536_v35 = vpop.f32.mrb[231].mxu1 }
 0x9f3   :  { %7828 = vst [vmem:[%s12871_s4 + $0x328] sm:$0xff] %v7533_v58  ;;  %v7537_v1 = vadd.f32 %v12280_v56, %v7536_v35 }
 0x9f4   :  { %7829 = vst [vmem:[%s12871_s4 + $0x330] sm:$0xff] %v7535_v44 }
 0x9f5   :  { %7830 = vst [vmem:[%s12871_s4 + $0x338] sm:$0xff] %v7537_v1 }
 0x9f7   :  { %v7540_v27 = vpop.f32.mrb[232].mxu1 }
 0x9f8   :  { %v7541_v21 = vadd.f32 %v12272_v54, %v7540_v27  ;;  %v7542_v2 = vpop.f32.mrb[233].mxu1 }
 0x9f9   :  { %v7543_v13 = vadd.f32 %v12280_v56, %v7542_v2  ;;  %v7544_v19 = vpop.f32.mrb[234].mxu1 }
 0x9fa   :  { %7831 = vst [vmem:[%s12871_s4 + $0x340] sm:$0xff] %v7541_v21  ;;  %v7545_v9 = vadd.f32 %v12272_v54, %v7544_v19  ;;  %v7546_v29 = vpop.f32.mrb[235].mxu1 }
 0x9fb   :  { %7832 = vst [vmem:[%s12871_s4 + $0x348] sm:$0xff] %v7543_v13  ;;  %v7547_v16 = vadd.f32 %v12280_v56, %v7546_v29 }
 0x9fc   :  { %7833 = vst [vmem:[%s12871_s4 + $0x350] sm:$0xff] %v7545_v9 }
 0x9fd   :  { %7834 = vst [vmem:[%s12871_s4 + $0x358] sm:$0xff] %v7547_v16 }
 0x9ff   :  { %v7550_v45 = vpop.f32.mrb[236].mxu1 }
 0xa00   :  { %v7551_v57 = vadd.f32 %v12272_v54, %v7550_v45  ;;  %v7552_v23 = vpop.f32.mrb[237].mxu1 }
 0xa01   :  { %v7553_v39 = vadd.f32 %v12280_v56, %v7552_v23  ;;  %v7554_v30 = vpop.f32.mrb[238].mxu1 }
 0xa02   :  { %7835 = vst [vmem:[%s12871_s4 + $0x360] sm:$0xff] %v7551_v57  ;;  %v7555_v42 = vadd.f32 %v12272_v54, %v7554_v30  ;;  %v7556_v11 = vpop.f32.mrb[239].mxu1 }
 0xa03   :  { %7836 = vst [vmem:[%s12871_s4 + $0x368] sm:$0xff] %v7553_v39  ;;  %v7557_v43 = vadd.f32 %v12280_v56, %v7556_v11 }
 0xa04   :  { %7837 = vst [vmem:[%s12871_s4 + $0x370] sm:$0xff] %v7555_v42 }
 0xa05   :  { %7838 = vst [vmem:[%s12871_s4 + $0x378] sm:$0xff] %v7557_v43 }
 0xa07   :  { %v7560_v5 = vpop.f32.mrb[240].mxu1 }
 0xa08   :  { %v7561_v38 = vadd.f32 %v12272_v54, %v7560_v5  ;;  %v7562_v49 = vpop.f32.mrb[241].mxu1 }
 0xa09   :  { %v7563_v28 = vadd.f32 %v12280_v56, %v7562_v49  ;;  %v7564_v8 = vpop.f32.mrb[242].mxu1 }
 0xa0a   :  { %7839 = vst [vmem:[%s12871_s4 + $0x380] sm:$0xff] %v7561_v38  ;;  %v7565_v37 = vadd.f32 %v12272_v54, %v7564_v8  ;;  %v7566_v18 = vpop.f32.mrb[243].mxu1 }
 0xa0b   :  { %7840 = vst [vmem:[%s12871_s4 + $0x388] sm:$0xff] %v7563_v28  ;;  %v7567_v17 = vadd.f32 %v12280_v56, %v7566_v18 }
 0xa0c   :  { %7841 = vst [vmem:[%s12871_s4 + $0x390] sm:$0xff] %v7565_v37 }
 0xa0d   :  { %7842 = vst [vmem:[%s12871_s4 + $0x398] sm:$0xff] %v7567_v17 }
 0xa0f   :  { %v7570_v61 = vpop.f32.mrb[244].mxu1 }
 0xa10   :  { %v7571_v14 = vadd.f32 %v12272_v54, %v7570_v61  ;;  %v7572_v36 = vpop.f32.mrb[245].mxu1 }
 0xa11   :  { %v7573_v32 = vadd.f32 %v12280_v56, %v7572_v36  ;;  %v7574_v51 = vpop.f32.mrb[246].mxu1 }
 0xa12   :  { %7843 = vst [vmem:[%s12871_s4 + $0x3a0] sm:$0xff] %v7571_v14  ;;  %v7575_v26 = vadd.f32 %v12272_v54, %v7574_v51  ;;  %v7576_v7 = vpop.f32.mrb[247].mxu1 }
 0xa13   :  { %7844 = vst [vmem:[%s12871_s4 + $0x3a8] sm:$0xff] %v7573_v32  ;;  %v7577_v31 = vadd.f32 %v12280_v56, %v7576_v7 }
 0xa14   :  { %7845 = vst [vmem:[%s12871_s4 + $0x3b0] sm:$0xff] %v7575_v26 }
 0xa15   :  { %7846 = vst [vmem:[%s12871_s4 + $0x3b8] sm:$0xff] %v7577_v31 }
 0xa17   :  { %v7580_v25 = vpop.f32.mrb[248].mxu1 }
 0xa18   :  { %v7581_v3 = vadd.f32 %v12272_v54, %v7580_v25  ;;  %v7582_v33 = vpop.f32.mrb[249].mxu1 }
 0xa19   :  { %v7583_v40 = vadd.f32 %v12280_v56, %v7582_v33  ;;  %v7584_v12 = vpop.f32.mrb[250].mxu1 }
 0xa1a   :  { %7847 = vst [vmem:[%s12871_s4 + $0x3c0] sm:$0xff] %v7581_v3  ;;  %v7585_v50 = vadd.f32 %v12272_v54, %v7584_v12  ;;  %v7586_v47 = vpop.f32.mrb[251].mxu1 }
 0xa1b   :  { %7848 = vst [vmem:[%s12871_s4 + $0x3c8] sm:$0xff] %v7583_v40  ;;  %v7587_v46 = vadd.f32 %v12280_v56, %v7586_v47 }
 0xa1c   :  { %7849 = vst [vmem:[%s12871_s4 + $0x3d0] sm:$0xff] %v7585_v50 }
 0xa1d   :  { %7850 = vst [vmem:[%s12871_s4 + $0x3d8] sm:$0xff] %v7587_v46 }
 0xa1f   :  { %v7590_v53 = vpop.f32.mrb[252].mxu1 }
 0xa20   :  { %v7591_v60 = vadd.f32 %v12272_v54, %v7590_v53  ;;  %v7592_v22 = vpop.f32.mrb[253].mxu1 }
 0xa21   :  { %v7593_v62 = vadd.f32 %v12280_v56, %v7592_v22  ;;  %v7594_v15 = vpop.f32.mrb[254].mxu1 }
 0xa22   :  { %7851 = vst [vmem:[%s12871_s4 + $0x3e0] sm:$0xff] %v7591_v60  ;;  %v7595_v10 = vadd.f32 %v12272_v54, %v7594_v15  ;;  %v7596_v20 = vpop.f32.mrb[255].mxu1 }
 0xa23   :  { %7852 = vst [vmem:[%s12871_s4 + $0x3e8] sm:$0xff] %v7593_v62  ;;  %v7597_v24 = vadd.f32 %v12280_v56, %v7596_v20 }
 0xa24   :  { %7853 = vst [vmem:[%s12871_s4 + $0x3f0] sm:$0xff] %v7595_v10 }
 0xa25   :  { %7854 = vst [vmem:[%s12871_s4 + $0x3f8] sm:$0xff] %v7597_v24 }

</bundles_post_ra>
